<compile_context>
chip_gen: v7x
topology: tpu7x:2x2x1
jax: 0.10.0
libtpu: 0.0.40
codegen_flags: <defaults>
</compile_context>

<pallas_src>
import jax
import jax.numpy as jnp
from jax import lax
from jax.experimental import pallas as pl
from jax.experimental.pallas import tpu as pltpu


# --------------------------------------------------------------------------------------
# Fused forward: PaddingChannels -> depth x CPL-conv -> AvgPool(4)+flatten ->
#                depth_linear x CPL-linear -> LinearNormalized, all in ONE pallas_call.
# --------------------------------------------------------------------------------------
def cpl_network_fused(x3, conv_params, pool_mat, lin_params, last_params, C, H, W):
    """x3: (B, cin0, H*W) f32 lane-dense input.  Returns (B, 1, NCLS_PAD) padded logits."""
    B, cin0, HW = x3.shape
    assert HW == H * W and HW % 128 == 0 and C >= cin0
    Ho, Wo = H // 4, W // 4
    Fdim = C * Ho * Wo
    qT, bl = last_params
    ncls_pad = qT.shape[1]
    depth = len(conv_params)
    depth_linear = len(lin_params)

    def kernel(*refs):
        i = 0
        x_ref = refs[i]; i += 1
        conv_refs = [(refs[i + 3 * l], refs[i + 3 * l + 1], refs[i + 3 * l + 2])
                     for l in range(depth)]
        i += 3 * depth
        pool_ref = refs[i]; i += 1
        lin_refs = [(refs[i + 3 * l], refs[i + 3 * l + 1], refs[i + 3 * l + 2])
                    for l in range(depth_linear)]
        i += 3 * depth_linear
        qT_ref, bl_ref = refs[i], refs[i + 1]; i += 2
        out_ref = refs[i]; i += 1
        xpad_ref, ps_ref, feat_ref = refs[i], refs[i + 1], refs[i + 2]

        # ---- boundary masks: built ONCE per image, reused by every patch build ----------
        pos = lax.broadcasted_iota(jnp.int32, (1, HW), 1)      # flattened pixel index
        colv = pos % W
        m_col_m = colv >= 1                                    # column w-1 exists
        m_col_p = colv < (W - 1)                               # column w+1 exists
        m_row_m = pos >= W                                     # row h-1 exists
        m_row_p = pos < (H - 1) * W                            # row h+1 exists

        def shifted(v, shift, mask):
            # out[:, p] = v[:, p + d] inside the image, 0 outside; shift = (-d) mod HW
            # (jnp.roll semantics).  Roll runs on the XLU, select on the VPU: no VMEM temps.
            return jnp.where(mask, pltpu.roll(v, shift, axis=1), 0.0)

        def conv3x3(v, w_ref, acc0):
            # 3x3 'same' conv of lane-dense v (cr, HW) with w_ref (3, co, 3*cr), grouped by
            # kernel row ky; inside a group columns are kx-major then channel.  Three
            # K=3*cr dots accumulated in vregs -- no im2col patch scratch.
            cr = v.shape[0]
            cols3 = jnp.concatenate(
                [shifted(v, 1, m_col_m),         # kx = 0  (reads column w-1)
                 v,                              # kx = 1
                 shifted(v, HW - 1, m_col_p)],   # kx = 2  (reads column w+1)
                axis=0)                          # (3*cr, HW)
            groups = (shifted(cols3, W, m_row_m),        # ky = 0  (reads row h-1)
                      cols3,                             # ky = 1
                      shifted(cols3, HW - W, m_row_p))   # ky = 2  (reads row h+1)
            acc = acc0
            for g in range(3):
                d = jnp.dot(w_ref[g], groups[g], preferred_element_type=jnp.float32)
                acc = d if acc is None else acc + d
            return acc

        # ---- PaddingChannels(mode='zero'): cin0 -> C (staged through a VMEM scratch) ----
        xpad_ref[0:cin0, :] = x_ref[...]
        if C > cin0:
            xpad_ref[cin0:C, :] = jnp.zeros((C - cin0, HW), jnp.float32)
        xact = xpad_ref[...]                                   # (C, HW)

        # ---- ConvexPotentialLayerConv: x <- x - h * convT3x3(relu(conv3x3(x) + b)) ------
        for wf_ref, wbh_ref, b_ref in conv_refs:
            y = jnp.maximum(conv3x3(xact, wf_ref, b_ref[...]), 0.0)   # (Cout, HW)
            xact = xact - conv3x3(y, wbh_ref, None)                   # h folded into wbh

        # ---- AvgPool2d(4, divisor_override=4) on the MXU + NCHW flatten -----------------
        ps_ref[...] = jnp.dot(xact, pool_ref[...], preferred_element_type=jnp.float32)
        for c in range(C):
            feat_ref[:, c * Ho * Wo:(c + 1) * Ho * Wo] = ps_ref[c:c + 1, :]
        f = feat_ref[...]                                      # (1, Fdim) lane-dense row

        # ---- ConvexPotentialLayerLinear: x <- x - relu(x W^T + b) (hW) ------------------
        for wT_ref, wh_ref, lb_ref in lin_refs:
            z = jnp.dot(f, wT_ref[...], preferred_element_type=jnp.float32) + lb_ref[...]
            f = f - jnp.dot(jnp.maximum(z, 0.0), wh_ref[...],
                            preferred_element_type=jnp.float32)

        # ---- LinearNormalized (row normalization folded into qT), lane-padded logits ----
        out_ref[...] = (jnp.dot(f, qT_ref[...], preferred_element_type=jnp.float32)
                        + bl_ref[...]).astype(out_ref.dtype)

    def resident(a):
        # full-array block, constant index map -> loaded once, resident across grid steps
        return pl.BlockSpec(a.shape, lambda n: (0,) * a.ndim)

    args = [x3]
    in_specs = [pl.BlockSpec((None, cin0, HW), lambda n: (n, 0, 0))]   # one image per step
    for p in conv_params:
        for a in p:
            args.append(a); in_specs.append(resident(a))
    args.append(pool_mat); in_specs.append(resident(pool_mat))
    for p in lin_params:
        for a in p:
            args.append(a); in_specs.append(resident(a))
    for a in (qT, bl):
        args.append(a); in_specs.append(resident(a))

    return pl.pallas_call(
        kernel,
        out_shape=jax.ShapeDtypeStruct((B, 1, ncls_pad), jnp.float32),
        grid=(B,),
        in_specs=in_specs,
        out_specs=pl.BlockSpec((None, 1, ncls_pad), lambda n: (n, 0, 0)),
        scratch_shapes=[
            pltpu.VMEM((C, HW), jnp.float32),        # zero-padded input image
            pltpu.VMEM((C, Ho * Wo), jnp.float32),   # pooled (C, 64)
            pltpu.VMEM((1, Fdim), jnp.float32),      # flattened feature row
        ],
        compiler_params=pltpu.CompilerParams(
            dimension_semantics=("parallel",)),      # v7x: both TensorCores take images
    )(*args)


# --------------------------------------------------------------------------------------
# Glue: spectral norms (setup-time power iteration), parameter init / preparation, forward
# --------------------------------------------------------------------------------------
def conv_spectral_norm(K, cin, H, W, key, n_iter=30):
    """Power iteration on the padded 3x3 conv operator (the reference's eval_sv_max)."""
    Kb = jnp.transpose(jnp.flip(K, axis=(2, 3)), (1, 0, 2, 3))
    dn = ("NCHW", "OIHW", "NCHW")
    pad = ((1, 1), (1, 1))
    A = lambda u: lax.conv_general_dilated(u, K, (1, 1), pad, dimension_numbers=dn)
    AT = lambda v: lax.conv_general_dilated(v, Kb, (1, 1), pad, dimension_numbers=dn)
    u = jax.random.normal(key, (1, cin, H, W), jnp.float32)
    for _ in range(n_iter):
        u = u / (jnp.linalg.norm(u) + 1e-12)
        u = AT(A(u))
    u = u / (jnp.linalg.norm(u) + 1e-12)
    return jnp.linalg.norm(A(u))


def linear_spectral_norm(Wm, key, n_iter=30):
    u = jax.random.normal(key, (Wm.shape[1],), jnp.float32)
    for _ in range(n_iter):
        u = u / (jnp.linalg.norm(u) + 1e-12)
        u = Wm.T @ (Wm @ u)
    u = u / (jnp.linalg.norm(u) + 1e-12)
    return jnp.linalg.norm(Wm @ u)


def make_pool_matrix(H, W, k=4):
    """(H*W, (H//k)*(W//k)) 0 / 1/k matrix: AvgPool2d(k, divisor_override=k) as a matmul."""
    Ho, Wo = H // k, W // k
    hw = jnp.arange(H * W)
    h, w = hw // W, hw % W
    out_idx = (h // k) * Wo + (w // k)
    return (out_idx[:, None] == jnp.arange(Ho * Wo)[None, :]).astype(jnp.float32) / k


def init_and_prepare_params(key, depth, depth_linear, num_channels, conv_size, n_features,
                            num_classes, H, W, epsilon=1e-4, ncls_pad=128):
    """Deterministic init (PyTorch-matching distributions) + kernel-ready weight prep."""
    HW = H * W
    Ho, Wo = H // 4, W // 4
    feat_dim = num_channels * Ho * Wo
    if depth_linear > 1:
        # ConvexPotentialLayerLinear preserves its input width (out = x - W^T relu(Wx+b)),
        # so stacked linear blocks are only shape-consistent when n_features == feat_dim.
        assert n_features == feat_dim, (
            "depth_linear > 1 requires n_features == num_channels * (H//4) * (W//4)")

    prep = {"conv": [], "lin": [], "num_channels": num_channels,
            "num_classes": num_classes}
    k = key
    for _ in range(depth):
        k, k1, k2, k3 = jax.random.split(k, 4)
        cin, cout = num_channels, conv_size
        fan_in, fan_out = cin * 9, cout * 9
        std = (2.0 / (fan_in + fan_out)) ** 0.5                    # xavier_normal_
        K = std * jax.random.normal(k1, (cout, cin, 3, 3), jnp.float32)
        bound = 1.0 / (fan_in ** 0.5)
        b = jax.random.uniform(k2, (cout,), jnp.float32, -bound, bound)
        sigma = conv_spectral_norm(K, cin, H, W, k3)
        h = 2.0 / (sigma ** 2 + epsilon)
        # forward taps: wf[co, (ky*3+kx)*cin + ci] = K[co, ci, ky, kx], then grouped by ky
        wf = jnp.transpose(K, (2, 3, 0, 1)).reshape(9, cout, cin)
        wf = jnp.transpose(wf, (1, 0, 2)).reshape(cout, 9 * cin)
        wf3 = wf.reshape(cout, 3, 3 * cin).transpose(1, 0, 2)        # (3, cout, 3*cin)
        # conv-transpose taps (flipped, channel-transposed), pre-scaled by h, grouped
        Kf = jnp.flip(K, axis=(2, 3))
        wb = jnp.transpose(Kf, (2, 3, 1, 0)).reshape(9, cin, cout)
        wb = jnp.transpose(wb, (1, 0, 2)).reshape(cin, 9 * cout)
        wb3 = (h * wb).reshape(cin, 3, 3 * cout).transpose(1, 0, 2)  # (3, cin, 3*cout)
        bfull = jnp.broadcast_to(b[:, None], (cout, HW))             # pre-broadcast bias
        prep["conv"].append((wf3, wb3, bfull))

    prep["pool"] = make_pool_matrix(H, W, 4)

    in_f = feat_dim
    for _ in range(depth_linear):
        k, k1, k2, k3 = jax.random.split(k, 4)
        std = (2.0 / (in_f + n_features)) ** 0.5                     # xavier_normal_
        Wl = std * jax.random.normal(k1, (n_features, in_f), jnp.float32)
        bound = 1.0 / (in_f ** 0.5)
        bl = jax.random.uniform(k2, (n_features,), jnp.float32, -bound, bound)
        sigma = linear_spectral_norm(Wl, k3)
        h = 2.0 / (sigma ** 2 + epsilon)
        prep["lin"].append((Wl.T, h * Wl, bl.reshape(1, n_features)))
        in_f = n_features                                            # as in the reference

    k, k1, k2 = jax.random.split(k, 3)
    bound = 1.0 / (in_f ** 0.5)
    Wlast = jax.random.uniform(k1, (num_classes, in_f), jnp.float32, -bound, bound)
    blast = jax.random.uniform(k2, (num_classes,), jnp.float32, -bound, bound)
    # LinearNormalized (use_lln=True): fold row normalization in; pad classes to 128 lanes.
    q = Wlast / jnp.maximum(jnp.linalg.norm(Wlast, axis=1, keepdims=True), 1e-12)
    qT = jnp.zeros((in_f, ncls_pad), jnp.float32).at[:, :num_classes].set(q.T)
    blp = jnp.zeros((1, ncls_pad), jnp.float32).at[0, :num_classes].set(blast)
    prep["last"] = (qT, blp)
    return prep


def forward(prep, x_nchw):
    B, cin0, H, W = x_nchw.shape
    x3 = x_nchw.reshape(B, cin0, H * W).astype(jnp.float32)      # metadata reshape only
    out = cpl_network_fused(x3, prep["conv"], prep["pool"], prep["lin"], prep["last"],
                            prep["num_channels"], H, W)
    return out[:, 0, :prep["num_classes"]]                       # drop lane padding


# --------------------------------------------------------------------------------------
if __name__ == "__main__":
    DEPTH = 2
    NUM_CLASSES = 10
    DEPTH_LINEAR = 2
    CONV_SIZE = 8
    NUM_CHANNELS = 8
    N_FEATURES = NUM_CHANNELS * 8 * 8         # 512; required for a shape-consistent network
    B, H, W = 2, 32, 32                       # module hardcodes 32x32 (C*8*8 features)

    root = jax.random.PRNGKey(0)
    prep = init_and_prepare_params(root, DEPTH, DEPTH_LINEAR, NUM_CHANNELS, CONV_SIZE,
                                   N_FEATURES, NUM_CLASSES, H, W)

    x = jax.random.normal(jax.random.fold_in(root, 12345), (B, 3, H, W), jnp.float32)

    fwd = jax.jit(lambda inp: forward(prep, inp))
    logits = jax.block_until_ready(fwd(x))
    assert logits.shape == (B, NUM_CLASSES), logits.shape
    assert bool(jnp.all(jnp.isfinite(logits)))
    print("KERNEL_OK")
</pallas_src>

<mosaic_0001>
module attributes {stable_mosaic.version = 11 : i64} {
  func.func @kernel(%arg0: i32, %arg1: memref<1x3x1024xf32, #tpu.memory_space<vmem>>, %arg2: memref<3x8x24xf32, #tpu.memory_space<vmem>>, %arg3: memref<3x8x24xf32, #tpu.memory_space<vmem>>, %arg4: memref<8x1024xf32, #tpu.memory_space<vmem>>, %arg5: memref<3x8x24xf32, #tpu.memory_space<vmem>>, %arg6: memref<3x8x24xf32, #tpu.memory_space<vmem>>, %arg7: memref<8x1024xf32, #tpu.memory_space<vmem>>, %arg8: memref<1024x64xf32, #tpu.memory_space<vmem>>, %arg9: memref<512x512xf32, #tpu.memory_space<vmem>>, %arg10: memref<512x512xf32, #tpu.memory_space<vmem>>, %arg11: memref<1x512xf32, #tpu.memory_space<vmem>>, %arg12: memref<512x512xf32, #tpu.memory_space<vmem>>, %arg13: memref<512x512xf32, #tpu.memory_space<vmem>>, %arg14: memref<1x512xf32, #tpu.memory_space<vmem>>, %arg15: memref<512x128xf32, #tpu.memory_space<vmem>>, %arg16: memref<1x128xf32, #tpu.memory_space<vmem>>, %arg17: memref<1x1x128xf32, #tpu.memory_space<vmem>>, %arg18: memref<8x1024xf32, #tpu.memory_space<vmem>>, %arg19: memref<8x64xf32, #tpu.memory_space<vmem>>, %arg20: memref<1x512xf32, #tpu.memory_space<vmem>>) attributes {dimension_semantics = [#tpu.dimension_semantics<parallel>], iteration_bounds = array<i64: 2>, scalar_prefetch = 0 : i64, scratch_operands = 3 : i64, tpu.core_type = #tpu.core_type<tc>, window_params = [{transform_indices = @transform_0, window_bounds = array<i64: 1, 3, 1024>}, {pipeline_mode = #tpu.pipeline_mode<synchronous>, transform_indices = @transform_1, window_bounds = array<i64: 3, 8, 24>}, {pipeline_mode = #tpu.pipeline_mode<synchronous>, transform_indices = @transform_2, window_bounds = array<i64: 3, 8, 24>}, {pipeline_mode = #tpu.pipeline_mode<synchronous>, transform_indices = @transform_3, window_bounds = array<i64: 8, 1024>}, {pipeline_mode = #tpu.pipeline_mode<synchronous>, transform_indices = @transform_4, window_bounds = array<i64: 3, 8, 24>}, {pipeline_mode = #tpu.pipeline_mode<synchronous>, transform_indices = @transform_5, window_bounds = array<i64: 3, 8, 24>}, {pipeline_mode = #tpu.pipeline_mode<synchronous>, transform_indices = @transform_6, window_bounds = array<i64: 8, 1024>}, {pipeline_mode = #tpu.pipeline_mode<synchronous>, transform_indices = @transform_7, window_bounds = array<i64: 1024, 64>}, {pipeline_mode = #tpu.pipeline_mode<synchronous>, transform_indices = @transform_8, window_bounds = array<i64: 512, 512>}, {pipeline_mode = #tpu.pipeline_mode<synchronous>, transform_indices = @transform_9, window_bounds = array<i64: 512, 512>}, {pipeline_mode = #tpu.pipeline_mode<synchronous>, transform_indices = @transform_10, window_bounds = array<i64: 1, 512>}, {pipeline_mode = #tpu.pipeline_mode<synchronous>, transform_indices = @transform_11, window_bounds = array<i64: 512, 512>}, {pipeline_mode = #tpu.pipeline_mode<synchronous>, transform_indices = @transform_12, window_bounds = array<i64: 512, 512>}, {pipeline_mode = #tpu.pipeline_mode<synchronous>, transform_indices = @transform_13, window_bounds = array<i64: 1, 512>}, {pipeline_mode = #tpu.pipeline_mode<synchronous>, transform_indices = @transform_14, window_bounds = array<i64: 512, 128>}, {pipeline_mode = #tpu.pipeline_mode<synchronous>, transform_indices = @transform_15, window_bounds = array<i64: 1, 128>}, {transform_indices = @transform_16, window_bounds = array<i64: 1, 1, 128>}]} {
    %0 = tpu.iota {dimensions = array<i32: 1>} : vector<1x1024xi32>
    %c32_i32 = arith.constant 32 : i32
    %c0_i32 = arith.constant 0 : i32
    %1 = arith.cmpi eq, %c32_i32, %c0_i32 : i32
    %c1_i32 = arith.constant 1 : i32
    %2 = arith.select %1, %c1_i32, %c32_i32 : i32
    %3 = vector.broadcast %2 : i32 to vector<1x1024xi32>
    %4 = arith.remsi %0, %3 : vector<1x1024xi32>
    %c0_i32_0 = arith.constant 0 : i32
    %5 = vector.broadcast %c0_i32_0 : i32 to vector<1x1024xi32>
    %6 = arith.cmpi ne, %4, %5 : vector<1x1024xi32>
    %c0_i32_1 = arith.constant 0 : i32
    %7 = vector.broadcast %c0_i32_1 : i32 to vector<1x1024xi32>
    %8 = arith.cmpi slt, %4, %7 : vector<1x1024xi32>
    %c0_i32_2 = arith.constant 0 : i32
    %9 = arith.cmpi slt, %2, %c0_i32_2 : i32
    %10 = vector.broadcast %9 : i1 to vector<1x1024xi1>
    %11 = vector.broadcast %10 : vector<1x1024xi1> to vector<1x1024xi1>
    %12 = arith.xori %8, %11 : vector<1x1024xi1>
    %13 = arith.andi %12, %6 : vector<1x1024xi1>
    %14 = vector.broadcast %2 : i32 to vector<1x1024xi32>
    %15 = arith.addi %4, %14 : vector<1x1024xi32>
    %16 = arith.select %13, %15, %4 : vector<1x1024xi1>, vector<1x1024xi32>
    %c1_i32_3 = arith.constant 1 : i32
    %17 = vector.broadcast %c1_i32_3 : i32 to vector<1x1024xi32>
    %18 = arith.cmpi sge, %16, %17 : vector<1x1024xi32>
    %c31_i32 = arith.constant 31 : i32
    %19 = vector.broadcast %c31_i32 : i32 to vector<1x1024xi32>
    %20 = arith.cmpi slt, %16, %19 : vector<1x1024xi32>
    %c32_i32_4 = arith.constant 32 : i32
    %21 = vector.broadcast %c32_i32_4 : i32 to vector<1x1024xi32>
    %22 = arith.cmpi sge, %0, %21 : vector<1x1024xi32>
    %c992_i32 = arith.constant 992 : i32
    %23 = vector.broadcast %c992_i32 : i32 to vector<1x1024xi32>
    %24 = arith.cmpi slt, %0, %23 : vector<1x1024xi32>
    %c0 = arith.constant 0 : index
    %c0_5 = arith.constant 0 : index
    %c0_6 = arith.constant 0 : index
    %25 = vector.load %arg1[%c0, %c0_5, %c0_6] : memref<1x3x1024xf32, #tpu.memory_space<vmem>>, vector<1x3x1024xf32>
    %26 = vector.shape_cast %25 : vector<1x3x1024xf32> to vector<3x1024xf32>
    %c0_7 = arith.constant 0 : index
    %c0_8 = arith.constant 0 : index
    %27 = vector.load %arg18[%c0_7, %c0_8] : memref<8x1024xf32, #tpu.memory_space<vmem>>, vector<3x1024xf32>
    tpu.vector_store %arg18[%c0_7, %c0_8], %26 {strides = array<i32>} : memref<8x1024xf32, #tpu.memory_space<vmem>>, vector<3x1024xf32>,
    %cst = arith.constant 0.000000e+00 : f32
    %28 = vector.broadcast %cst : f32 to vector<5x1024xf32>
    %c3 = arith.constant 3 : index
    %c0_9 = arith.constant 0 : index
    %29 = vector.load %arg18[%c3, %c0_9] : memref<8x1024xf32, #tpu.memory_space<vmem>>, vector<5x1024xf32>
    tpu.vector_store %arg18[%c3, %c0_9], %28 {strides = array<i32>} : memref<8x1024xf32, #tpu.memory_space<vmem>>, vector<5x1024xf32>,
    %c0_10 = arith.constant 0 : index
    %c0_11 = arith.constant 0 : index
    %30 = vector.load %arg18[%c0_10, %c0_11] : memref<8x1024xf32, #tpu.memory_space<vmem>>, vector<8x1024xf32>
    %c0_12 = arith.constant 0 : index
    %c0_13 = arith.constant 0 : index
    %31 = vector.load %arg4[%c0_12, %c0_13] : memref<8x1024xf32, #tpu.memory_space<vmem>>, vector<8x1024xf32>
    %c1_i32_14 = arith.constant 1 : i32
    %32 = tpu.dynamic_rotate %30 by %c1_i32_14 dim 1 : vector<8x1024xf32>, i32 -> vector<8x1024xf32>
    %cst_15 = arith.constant 0.000000e+00 : f32
    %33 = vector.shape_cast %18 : vector<1x1024xi1> to vector<1x1024xi1>
    %34 = vector.broadcast %33 : vector<1x1024xi1> to vector<8x1024xi1>
    %35 = vector.broadcast %cst_15 : f32 to vector<8x1024xf32>
    %36 = arith.select %34, %32, %35 : vector<8x1024xi1>, vector<8x1024xf32>
    %c1023_i32 = arith.constant 1023 : i32
    %37 = tpu.dynamic_rotate %30 by %c1023_i32 dim 1 : vector<8x1024xf32>, i32 -> vector<8x1024xf32>
    %cst_16 = arith.constant 0.000000e+00 : f32
    %38 = vector.shape_cast %20 : vector<1x1024xi1> to vector<1x1024xi1>
    %39 = vector.broadcast %38 : vector<1x1024xi1> to vector<8x1024xi1>
    %40 = vector.broadcast %cst_16 : f32 to vector<8x1024xf32>
    %41 = arith.select %39, %37, %40 : vector<8x1024xi1>, vector<8x1024xf32>
    %42 = tpu.concatenate %36, %30, %41 in 0 : vector<8x1024xf32>, vector<8x1024xf32>, vector<8x1024xf32> -> vector<24x1024xf32>
    %c32_i32_17 = arith.constant 32 : i32
    %43 = tpu.dynamic_rotate %42 by %c32_i32_17 dim 1 : vector<24x1024xf32>, i32 -> vector<24x1024xf32>
    %cst_18 = arith.constant 0.000000e+00 : f32
    %44 = vector.shape_cast %22 : vector<1x1024xi1> to vector<1x1024xi1>
    %45 = vector.broadcast %44 : vector<1x1024xi1> to vector<24x1024xi1>
    %46 = vector.broadcast %cst_18 : f32 to vector<24x1024xf32>
    %47 = arith.select %45, %43, %46 : vector<24x1024xi1>, vector<24x1024xf32>
    %c992_i32_19 = arith.constant 992 : i32
    %48 = tpu.dynamic_rotate %42 by %c992_i32_19 dim 1 : vector<24x1024xf32>, i32 -> vector<24x1024xf32>
    %cst_20 = arith.constant 0.000000e+00 : f32
    %49 = vector.shape_cast %24 : vector<1x1024xi1> to vector<1x1024xi1>
    %50 = vector.broadcast %49 : vector<1x1024xi1> to vector<24x1024xi1>
    %51 = vector.broadcast %cst_20 : f32 to vector<24x1024xf32>
    %52 = arith.select %50, %48, %51 : vector<24x1024xi1>, vector<24x1024xf32>
    %c0_21 = arith.constant 0 : index
    %c0_22 = arith.constant 0 : index
    %c0_23 = arith.constant 0 : index
    %53 = vector.load %arg2[%c0_21, %c0_22, %c0_23] : memref<3x8x24xf32, #tpu.memory_space<vmem>>, vector<1x8x24xf32>
    %54 = vector.shape_cast %53 : vector<1x8x24xf32> to vector<8x24xf32>
    %cst_24 = arith.constant dense<0.000000e+00> : vector<8x1024xf32>
    %55 = tpu.matmul %54, %47, %cst_24 {dimension_numbers = #tpu.dot_dimension_numbers<[1], [0], [0], [1], [0, 0, 1, 1], [], []>} : vector<8x24xf32>, vector<24x1024xf32>, vector<8x1024xf32> -> vector<8x1024xf32>
    %56 = arith.addf %31, %55 : vector<8x1024xf32>
    %c1 = arith.constant 1 : index
    %c0_25 = arith.constant 0 : index
    %c0_26 = arith.constant 0 : index
    %57 = vector.load %arg2[%c1, %c0_25, %c0_26] : memref<3x8x24xf32, #tpu.memory_space<vmem>>, vector<1x8x24xf32>
    %58 = vector.shape_cast %57 : vector<1x8x24xf32> to vector<8x24xf32>
    %cst_27 = arith.constant dense<0.000000e+00> : vector<8x1024xf32>
    %59 = tpu.matmul %58, %42, %cst_27 {dimension_numbers = #tpu.dot_dimension_numbers<[1], [0], [0], [1], [0, 0, 1, 1], [], []>} : vector<8x24xf32>, vector<24x1024xf32>, vector<8x1024xf32> -> vector<8x1024xf32>
    %60 = arith.addf %56, %59 : vector<8x1024xf32>
    %c2 = arith.constant 2 : index
    %c0_28 = arith.constant 0 : index
    %c0_29 = arith.constant 0 : index
    %61 = vector.load %arg2[%c2, %c0_28, %c0_29] : memref<3x8x24xf32, #tpu.memory_space<vmem>>, vector<1x8x24xf32>
    %62 = vector.shape_cast %61 : vector<1x8x24xf32> to vector<8x24xf32>
    %cst_30 = arith.constant dense<0.000000e+00> : vector<8x1024xf32>
    %63 = tpu.matmul %62, %52, %cst_30 {dimension_numbers = #tpu.dot_dimension_numbers<[1], [0], [0], [1], [0, 0, 1, 1], [], []>} : vector<8x24xf32>, vector<24x1024xf32>, vector<8x1024xf32> -> vector<8x1024xf32>
    %64 = arith.addf %60, %63 : vector<8x1024xf32>
    %cst_31 = arith.constant 0.000000e+00 : f32
    %65 = vector.broadcast %cst_31 : f32 to vector<8x1024xf32>
    %66 = arith.maximumf %64, %65 : vector<8x1024xf32>
    %c1_i32_32 = arith.constant 1 : i32
    %67 = tpu.dynamic_rotate %66 by %c1_i32_32 dim 1 : vector<8x1024xf32>, i32 -> vector<8x1024xf32>
    %cst_33 = arith.constant 0.000000e+00 : f32
    %68 = vector.shape_cast %18 : vector<1x1024xi1> to vector<1x1024xi1>
    %69 = vector.broadcast %68 : vector<1x1024xi1> to vector<8x1024xi1>
    %70 = vector.broadcast %cst_33 : f32 to vector<8x1024xf32>
    %71 = arith.select %69, %67, %70 : vector<8x1024xi1>, vector<8x1024xf32>
    %c1023_i32_34 = arith.constant 1023 : i32
    %72 = tpu.dynamic_rotate %66 by %c1023_i32_34 dim 1 : vector<8x1024xf32>, i32 -> vector<8x1024xf32>
    %cst_35 = arith.constant 0.000000e+00 : f32
    %73 = vector.shape_cast %20 : vector<1x1024xi1> to vector<1x1024xi1>
    %74 = vector.broadcast %73 : vector<1x1024xi1> to vector<8x1024xi1>
    %75 = vector.broadcast %cst_35 : f32 to vector<8x1024xf32>
    %76 = arith.select %74, %72, %75 : vector<8x1024xi1>, vector<8x1024xf32>
    %77 = tpu.concatenate %71, %66, %76 in 0 : vector<8x1024xf32>, vector<8x1024xf32>, vector<8x1024xf32> -> vector<24x1024xf32>
    %c32_i32_36 = arith.constant 32 : i32
    %78 = tpu.dynamic_rotate %77 by %c32_i32_36 dim 1 : vector<24x1024xf32>, i32 -> vector<24x1024xf32>
    %cst_37 = arith.constant 0.000000e+00 : f32
    %79 = vector.shape_cast %22 : vector<1x1024xi1> to vector<1x1024xi1>
    %80 = vector.broadcast %79 : vector<1x1024xi1> to vector<24x1024xi1>
    %81 = vector.broadcast %cst_37 : f32 to vector<24x1024xf32>
    %82 = arith.select %80, %78, %81 : vector<24x1024xi1>, vector<24x1024xf32>
    %c992_i32_38 = arith.constant 992 : i32
    %83 = tpu.dynamic_rotate %77 by %c992_i32_38 dim 1 : vector<24x1024xf32>, i32 -> vector<24x1024xf32>
    %cst_39 = arith.constant 0.000000e+00 : f32
    %84 = vector.shape_cast %24 : vector<1x1024xi1> to vector<1x1024xi1>
    %85 = vector.broadcast %84 : vector<1x1024xi1> to vector<24x1024xi1>
    %86 = vector.broadcast %cst_39 : f32 to vector<24x1024xf32>
    %87 = arith.select %85, %83, %86 : vector<24x1024xi1>, vector<24x1024xf32>
    %c0_40 = arith.constant 0 : index
    %c0_41 = arith.constant 0 : index
    %c0_42 = arith.constant 0 : index
    %88 = vector.load %arg3[%c0_40, %c0_41, %c0_42] : memref<3x8x24xf32, #tpu.memory_space<vmem>>, vector<1x8x24xf32>
    %89 = vector.shape_cast %88 : vector<1x8x24xf32> to vector<8x24xf32>
    %cst_43 = arith.constant dense<0.000000e+00> : vector<8x1024xf32>
    %90 = tpu.matmul %89, %82, %cst_43 {dimension_numbers = #tpu.dot_dimension_numbers<[1], [0], [0], [1], [0, 0, 1, 1], [], []>} : vector<8x24xf32>, vector<24x1024xf32>, vector<8x1024xf32> -> vector<8x1024xf32>
    %c1_44 = arith.constant 1 : index
    %c0_45 = arith.constant 0 : index
    %c0_46 = arith.constant 0 : index
    %91 = vector.load %arg3[%c1_44, %c0_45, %c0_46] : memref<3x8x24xf32, #tpu.memory_space<vmem>>, vector<1x8x24xf32>
    %92 = vector.shape_cast %91 : vector<1x8x24xf32> to vector<8x24xf32>
    %cst_47 = arith.constant dense<0.000000e+00> : vector<8x1024xf32>
    %93 = tpu.matmul %92, %77, %cst_47 {dimension_numbers = #tpu.dot_dimension_numbers<[1], [0], [0], [1], [0, 0, 1, 1], [], []>} : vector<8x24xf32>, vector<24x1024xf32>, vector<8x1024xf32> -> vector<8x1024xf32>
    %94 = arith.addf %90, %93 : vector<8x1024xf32>
    %c2_48 = arith.constant 2 : index
    %c0_49 = arith.constant 0 : index
    %c0_50 = arith.constant 0 : index
    %95 = vector.load %arg3[%c2_48, %c0_49, %c0_50] : memref<3x8x24xf32, #tpu.memory_space<vmem>>, vector<1x8x24xf32>
    %96 = vector.shape_cast %95 : vector<1x8x24xf32> to vector<8x24xf32>
    %cst_51 = arith.constant dense<0.000000e+00> : vector<8x1024xf32>
    %97 = tpu.matmul %96, %87, %cst_51 {dimension_numbers = #tpu.dot_dimension_numbers<[1], [0], [0], [1], [0, 0, 1, 1], [], []>} : vector<8x24xf32>, vector<24x1024xf32>, vector<8x1024xf32> -> vector<8x1024xf32>
    %98 = arith.addf %94, %97 : vector<8x1024xf32>
    %99 = arith.subf %30, %98 : vector<8x1024xf32>
    %c0_52 = arith.constant 0 : index
    %c0_53 = arith.constant 0 : index
    %100 = vector.load %arg7[%c0_52, %c0_53] : memref<8x1024xf32, #tpu.memory_space<vmem>>, vector<8x1024xf32>
    %c1_i32_54 = arith.constant 1 : i32
    %101 = tpu.dynamic_rotate %99 by %c1_i32_54 dim 1 : vector<8x1024xf32>, i32 -> vector<8x1024xf32>
    %cst_55 = arith.constant 0.000000e+00 : f32
    %102 = vector.shape_cast %18 : vector<1x1024xi1> to vector<1x1024xi1>
    %103 = vector.broadcast %102 : vector<1x1024xi1> to vector<8x1024xi1>
    %104 = vector.broadcast %cst_55 : f32 to vector<8x1024xf32>
    %105 = arith.select %103, %101, %104 : vector<8x1024xi1>, vector<8x1024xf32>
    %c1023_i32_56 = arith.constant 1023 : i32
    %106 = tpu.dynamic_rotate %99 by %c1023_i32_56 dim 1 : vector<8x1024xf32>, i32 -> vector<8x1024xf32>
    %cst_57 = arith.constant 0.000000e+00 : f32
    %107 = vector.shape_cast %20 : vector<1x1024xi1> to vector<1x1024xi1>
    %108 = vector.broadcast %107 : vector<1x1024xi1> to vector<8x1024xi1>
    %109 = vector.broadcast %cst_57 : f32 to vector<8x1024xf32>
    %110 = arith.select %108, %106, %109 : vector<8x1024xi1>, vector<8x1024xf32>
    %111 = tpu.concatenate %105, %99, %110 in 0 : vector<8x1024xf32>, vector<8x1024xf32>, vector<8x1024xf32> -> vector<24x1024xf32>
    %c32_i32_58 = arith.constant 32 : i32
    %112 = tpu.dynamic_rotate %111 by %c32_i32_58 dim 1 : vector<24x1024xf32>, i32 -> vector<24x1024xf32>
    %cst_59 = arith.constant 0.000000e+00 : f32
    %113 = vector.shape_cast %22 : vector<1x1024xi1> to vector<1x1024xi1>
    %114 = vector.broadcast %113 : vector<1x1024xi1> to vector<24x1024xi1>
    %115 = vector.broadcast %cst_59 : f32 to vector<24x1024xf32>
    %116 = arith.select %114, %112, %115 : vector<24x1024xi1>, vector<24x1024xf32>
    %c992_i32_60 = arith.constant 992 : i32
    %117 = tpu.dynamic_rotate %111 by %c992_i32_60 dim 1 : vector<24x1024xf32>, i32 -> vector<24x1024xf32>
    %cst_61 = arith.constant 0.000000e+00 : f32
    %118 = vector.shape_cast %24 : vector<1x1024xi1> to vector<1x1024xi1>
    %119 = vector.broadcast %118 : vector<1x1024xi1> to vector<24x1024xi1>
    %120 = vector.broadcast %cst_61 : f32 to vector<24x1024xf32>
    %121 = arith.select %119, %117, %120 : vector<24x1024xi1>, vector<24x1024xf32>
    %c0_62 = arith.constant 0 : index
    %c0_63 = arith.constant 0 : index
    %c0_64 = arith.constant 0 : index
    %122 = vector.load %arg5[%c0_62, %c0_63, %c0_64] : memref<3x8x24xf32, #tpu.memory_space<vmem>>, vector<1x8x24xf32>
    %123 = vector.shape_cast %122 : vector<1x8x24xf32> to vector<8x24xf32>
    %cst_65 = arith.constant dense<0.000000e+00> : vector<8x1024xf32>
    %124 = tpu.matmul %123, %116, %cst_65 {dimension_numbers = #tpu.dot_dimension_numbers<[1], [0], [0], [1], [0, 0, 1, 1], [], []>} : vector<8x24xf32>, vector<24x1024xf32>, vector<8x1024xf32> -> vector<8x1024xf32>
    %125 = arith.addf %100, %124 : vector<8x1024xf32>
    %c1_66 = arith.constant 1 : index
    %c0_67 = arith.constant 0 : index
    %c0_68 = arith.constant 0 : index
    %126 = vector.load %arg5[%c1_66, %c0_67, %c0_68] : memref<3x8x24xf32, #tpu.memory_space<vmem>>, vector<1x8x24xf32>
    %127 = vector.shape_cast %126 : vector<1x8x24xf32> to vector<8x24xf32>
    %cst_69 = arith.constant dense<0.000000e+00> : vector<8x1024xf32>
    %128 = tpu.matmul %127, %111, %cst_69 {dimension_numbers = #tpu.dot_dimension_numbers<[1], [0], [0], [1], [0, 0, 1, 1], [], []>} : vector<8x24xf32>, vector<24x1024xf32>, vector<8x1024xf32> -> vector<8x1024xf32>
    %129 = arith.addf %125, %128 : vector<8x1024xf32>
    %c2_70 = arith.constant 2 : index
    %c0_71 = arith.constant 0 : index
    %c0_72 = arith.constant 0 : index
    %130 = vector.load %arg5[%c2_70, %c0_71, %c0_72] : memref<3x8x24xf32, #tpu.memory_space<vmem>>, vector<1x8x24xf32>
    %131 = vector.shape_cast %130 : vector<1x8x24xf32> to vector<8x24xf32>
    %cst_73 = arith.constant dense<0.000000e+00> : vector<8x1024xf32>
    %132 = tpu.matmul %131, %121, %cst_73 {dimension_numbers = #tpu.dot_dimension_numbers<[1], [0], [0], [1], [0, 0, 1, 1], [], []>} : vector<8x24xf32>, vector<24x1024xf32>, vector<8x1024xf32> -> vector<8x1024xf32>
    %133 = arith.addf %129, %132 : vector<8x1024xf32>
    %cst_74 = arith.constant 0.000000e+00 : f32
    %134 = vector.broadcast %cst_74 : f32 to vector<8x1024xf32>
    %135 = arith.maximumf %133, %134 : vector<8x1024xf32>
    %c1_i32_75 = arith.constant 1 : i32
    %136 = tpu.dynamic_rotate %135 by %c1_i32_75 dim 1 : vector<8x1024xf32>, i32 -> vector<8x1024xf32>
    %cst_76 = arith.constant 0.000000e+00 : f32
    %137 = vector.shape_cast %18 : vector<1x1024xi1> to vector<1x1024xi1>
    %138 = vector.broadcast %137 : vector<1x1024xi1> to vector<8x1024xi1>
    %139 = vector.broadcast %cst_76 : f32 to vector<8x1024xf32>
    %140 = arith.select %138, %136, %139 : vector<8x1024xi1>, vector<8x1024xf32>
    %c1023_i32_77 = arith.constant 1023 : i32
    %141 = tpu.dynamic_rotate %135 by %c1023_i32_77 dim 1 : vector<8x1024xf32>, i32 -> vector<8x1024xf32>
    %cst_78 = arith.constant 0.000000e+00 : f32
    %142 = vector.shape_cast %20 : vector<1x1024xi1> to vector<1x1024xi1>
    %143 = vector.broadcast %142 : vector<1x1024xi1> to vector<8x1024xi1>
    %144 = vector.broadcast %cst_78 : f32 to vector<8x1024xf32>
    %145 = arith.select %143, %141, %144 : vector<8x1024xi1>, vector<8x1024xf32>
    %146 = tpu.concatenate %140, %135, %145 in 0 : vector<8x1024xf32>, vector<8x1024xf32>, vector<8x1024xf32> -> vector<24x1024xf32>
    %c32_i32_79 = arith.constant 32 : i32
    %147 = tpu.dynamic_rotate %146 by %c32_i32_79 dim 1 : vector<24x1024xf32>, i32 -> vector<24x1024xf32>
    %cst_80 = arith.constant 0.000000e+00 : f32
    %148 = vector.shape_cast %22 : vector<1x1024xi1> to vector<1x1024xi1>
    %149 = vector.broadcast %148 : vector<1x1024xi1> to vector<24x1024xi1>
    %150 = vector.broadcast %cst_80 : f32 to vector<24x1024xf32>
    %151 = arith.select %149, %147, %150 : vector<24x1024xi1>, vector<24x1024xf32>
    %c992_i32_81 = arith.constant 992 : i32
    %152 = tpu.dynamic_rotate %146 by %c992_i32_81 dim 1 : vector<24x1024xf32>, i32 -> vector<24x1024xf32>
    %cst_82 = arith.constant 0.000000e+00 : f32
    %153 = vector.shape_cast %24 : vector<1x1024xi1> to vector<1x1024xi1>
    %154 = vector.broadcast %153 : vector<1x1024xi1> to vector<24x1024xi1>
    %155 = vector.broadcast %cst_82 : f32 to vector<24x1024xf32>
    %156 = arith.select %154, %152, %155 : vector<24x1024xi1>, vector<24x1024xf32>
    %c0_83 = arith.constant 0 : index
    %c0_84 = arith.constant 0 : index
    %c0_85 = arith.constant 0 : index
    %157 = vector.load %arg6[%c0_83, %c0_84, %c0_85] : memref<3x8x24xf32, #tpu.memory_space<vmem>>, vector<1x8x24xf32>
    %158 = vector.shape_cast %157 : vector<1x8x24xf32> to vector<8x24xf32>
    %cst_86 = arith.constant dense<0.000000e+00> : vector<8x1024xf32>
    %159 = tpu.matmul %158, %151, %cst_86 {dimension_numbers = #tpu.dot_dimension_numbers<[1], [0], [0], [1], [0, 0, 1, 1], [], []>} : vector<8x24xf32>, vector<24x1024xf32>, vector<8x1024xf32> -> vector<8x1024xf32>
    %c1_87 = arith.constant 1 : index
    %c0_88 = arith.constant 0 : index
    %c0_89 = arith.constant 0 : index
    %160 = vector.load %arg6[%c1_87, %c0_88, %c0_89] : memref<3x8x24xf32, #tpu.memory_space<vmem>>, vector<1x8x24xf32>
    %161 = vector.shape_cast %160 : vector<1x8x24xf32> to vector<8x24xf32>
    %cst_90 = arith.constant dense<0.000000e+00> : vector<8x1024xf32>
    %162 = tpu.matmul %161, %146, %cst_90 {dimension_numbers = #tpu.dot_dimension_numbers<[1], [0], [0], [1], [0, 0, 1, 1], [], []>} : vector<8x24xf32>, vector<24x1024xf32>, vector<8x1024xf32> -> vector<8x1024xf32>
    %163 = arith.addf %159, %162 : vector<8x1024xf32>
    %c2_91 = arith.constant 2 : index
    %c0_92 = arith.constant 0 : index
    %c0_93 = arith.constant 0 : index
    %164 = vector.load %arg6[%c2_91, %c0_92, %c0_93] : memref<3x8x24xf32, #tpu.memory_space<vmem>>, vector<1x8x24xf32>
    %165 = vector.shape_cast %164 : vector<1x8x24xf32> to vector<8x24xf32>
    %cst_94 = arith.constant dense<0.000000e+00> : vector<8x1024xf32>
    %166 = tpu.matmul %165, %156, %cst_94 {dimension_numbers = #tpu.dot_dimension_numbers<[1], [0], [0], [1], [0, 0, 1, 1], [], []>} : vector<8x24xf32>, vector<24x1024xf32>, vector<8x1024xf32> -> vector<8x1024xf32>
    %167 = arith.addf %163, %166 : vector<8x1024xf32>
    %168 = arith.subf %99, %167 : vector<8x1024xf32>
    %c0_95 = arith.constant 0 : index
    %c0_96 = arith.constant 0 : index
    %169 = vector.load %arg8[%c0_95, %c0_96] : memref<1024x64xf32, #tpu.memory_space<vmem>>, vector<1024x64xf32>
    %cst_97 = arith.constant dense<0.000000e+00> : vector<8x64xf32>
    %170 = tpu.matmul %168, %169, %cst_97 {dimension_numbers = #tpu.dot_dimension_numbers<[1], [0], [0], [1], [0, 0, 1, 1], [], []>} : vector<8x1024xf32>, vector<1024x64xf32>, vector<8x64xf32> -> vector<8x64xf32>
    %c0_98 = arith.constant 0 : index
    %c0_99 = arith.constant 0 : index
    %171 = vector.load %arg19[%c0_98, %c0_99] : memref<8x64xf32, #tpu.memory_space<vmem>>, vector<8x64xf32>
    tpu.vector_store %arg19[%c0_98, %c0_99], %170 {strides = array<i32>} : memref<8x64xf32, #tpu.memory_space<vmem>>, vector<8x64xf32>,
    %c0_100 = arith.constant 0 : index
    %c0_101 = arith.constant 0 : index
    %172 = vector.load %arg19[%c0_100, %c0_101] : memref<8x64xf32, #tpu.memory_space<vmem>>, vector<1x64xf32>
    %c0_102 = arith.constant 0 : index
    %c0_103 = arith.constant 0 : index
    %173 = vector.load %arg20[%c0_102, %c0_103] : memref<1x512xf32, #tpu.memory_space<vmem>>, vector<1x64xf32>
    tpu.vector_store %arg20[%c0_102, %c0_103], %172 {strides = array<i32>} : memref<1x512xf32, #tpu.memory_space<vmem>>, vector<1x64xf32>,
    %c1_104 = arith.constant 1 : index
    %c0_105 = arith.constant 0 : index
    %174 = vector.load %arg19[%c1_104, %c0_105] : memref<8x64xf32, #tpu.memory_space<vmem>>, vector<1x64xf32>
    %c0_106 = arith.constant 0 : index
    %c64 = arith.constant 64 : index
    %175 = vector.load %arg20[%c0_106, %c64] : memref<1x512xf32, #tpu.memory_space<vmem>>, vector<1x64xf32>
    tpu.vector_store %arg20[%c0_106, %c64], %174 {strides = array<i32>} : memref<1x512xf32, #tpu.memory_space<vmem>>, vector<1x64xf32>,
    %c2_107 = arith.constant 2 : index
    %c0_108 = arith.constant 0 : index
    %176 = vector.load %arg19[%c2_107, %c0_108] : memref<8x64xf32, #tpu.memory_space<vmem>>, vector<1x64xf32>
    %c0_109 = arith.constant 0 : index
    %c128 = arith.constant 128 : index
    %177 = vector.load %arg20[%c0_109, %c128] : memref<1x512xf32, #tpu.memory_space<vmem>>, vector<1x64xf32>
    tpu.vector_store %arg20[%c0_109, %c128], %176 {strides = array<i32>} : memref<1x512xf32, #tpu.memory_space<vmem>>, vector<1x64xf32>,
    %c3_110 = arith.constant 3 : index
    %c0_111 = arith.constant 0 : index
    %178 = vector.load %arg19[%c3_110, %c0_111] : memref<8x64xf32, #tpu.memory_space<vmem>>, vector<1x64xf32>
    %c0_112 = arith.constant 0 : index
    %c192 = arith.constant 192 : index
    %179 = vector.load %arg20[%c0_112, %c192] : memref<1x512xf32, #tpu.memory_space<vmem>>, vector<1x64xf32>
    tpu.vector_store %arg20[%c0_112, %c192], %178 {strides = array<i32>} : memref<1x512xf32, #tpu.memory_space<vmem>>, vector<1x64xf32>,
    %c4 = arith.constant 4 : index
    %c0_113 = arith.constant 0 : index
    %180 = vector.load %arg19[%c4, %c0_113] : memref<8x64xf32, #tpu.memory_space<vmem>>, vector<1x64xf32>
    %c0_114 = arith.constant 0 : index
    %c256 = arith.constant 256 : index
    %181 = vector.load %arg20[%c0_114, %c256] : memref<1x512xf32, #tpu.memory_space<vmem>>, vector<1x64xf32>
    tpu.vector_store %arg20[%c0_114, %c256], %180 {strides = array<i32>} : memref<1x512xf32, #tpu.memory_space<vmem>>, vector<1x64xf32>,
    %c5 = arith.constant 5 : index
    %c0_115 = arith.constant 0 : index
    %182 = vector.load %arg19[%c5, %c0_115] : memref<8x64xf32, #tpu.memory_space<vmem>>, vector<1x64xf32>
    %c0_116 = arith.constant 0 : index
    %c320 = arith.constant 320 : index
    %183 = vector.load %arg20[%c0_116, %c320] : memref<1x512xf32, #tpu.memory_space<vmem>>, vector<1x64xf32>
    tpu.vector_store %arg20[%c0_116, %c320], %182 {strides = array<i32>} : memref<1x512xf32, #tpu.memory_space<vmem>>, vector<1x64xf32>,
    %c6 = arith.constant 6 : index
    %c0_117 = arith.constant 0 : index
    %184 = vector.load %arg19[%c6, %c0_117] : memref<8x64xf32, #tpu.memory_space<vmem>>, vector<1x64xf32>
    %c0_118 = arith.constant 0 : index
    %c384 = arith.constant 384 : index
    %185 = vector.load %arg20[%c0_118, %c384] : memref<1x512xf32, #tpu.memory_space<vmem>>, vector<1x64xf32>
    tpu.vector_store %arg20[%c0_118, %c384], %184 {strides = array<i32>} : memref<1x512xf32, #tpu.memory_space<vmem>>, vector<1x64xf32>,
    %c7 = arith.constant 7 : index
    %c0_119 = arith.constant 0 : index
    %186 = vector.load %arg19[%c7, %c0_119] : memref<8x64xf32, #tpu.memory_space<vmem>>, vector<1x64xf32>
    %c0_120 = arith.constant 0 : index
    %c448 = arith.constant 448 : index
    %187 = vector.load %arg20[%c0_120, %c448] : memref<1x512xf32, #tpu.memory_space<vmem>>, vector<1x64xf32>
    tpu.vector_store %arg20[%c0_120, %c448], %186 {strides = array<i32>} : memref<1x512xf32, #tpu.memory_space<vmem>>, vector<1x64xf32>,
    %c0_121 = arith.constant 0 : index
    %c0_122 = arith.constant 0 : index
    %188 = vector.load %arg20[%c0_121, %c0_122] : memref<1x512xf32, #tpu.memory_space<vmem>>, vector<1x512xf32>
    %c0_123 = arith.constant 0 : index
    %c0_124 = arith.constant 0 : index
    %189 = vector.load %arg9[%c0_123, %c0_124] : memref<512x512xf32, #tpu.memory_space<vmem>>, vector<512x512xf32>
    %cst_125 = arith.constant dense<0.000000e+00> : vector<1x512xf32>
    %190 = tpu.matmul %188, %189, %cst_125 {dimension_numbers = #tpu.dot_dimension_numbers<[1], [0], [0], [1], [0, 0, 1, 1], [], []>} : vector<1x512xf32>, vector<512x512xf32>, vector<1x512xf32> -> vector<1x512xf32>
    %c0_126 = arith.constant 0 : index
    %c0_127 = arith.constant 0 : index
    %191 = vector.load %arg11[%c0_126, %c0_127] : memref<1x512xf32, #tpu.memory_space<vmem>>, vector<1x512xf32>
    %192 = arith.addf %190, %191 : vector<1x512xf32>
    %cst_128 = arith.constant 0.000000e+00 : f32
    %193 = vector.broadcast %cst_128 : f32 to vector<1x512xf32>
    %194 = arith.maximumf %192, %193 : vector<1x512xf32>
    %c0_129 = arith.constant 0 : index
    %c0_130 = arith.constant 0 : index
    %195 = vector.load %arg10[%c0_129, %c0_130] : memref<512x512xf32, #tpu.memory_space<vmem>>, vector<512x512xf32>
    %cst_131 = arith.constant dense<0.000000e+00> : vector<1x512xf32>
    %196 = tpu.matmul %194, %195, %cst_131 {dimension_numbers = #tpu.dot_dimension_numbers<[1], [0], [0], [1], [0, 0, 1, 1], [], []>} : vector<1x512xf32>, vector<512x512xf32>, vector<1x512xf32> -> vector<1x512xf32>
    %197 = arith.subf %188, %196 : vector<1x512xf32>
    %c0_132 = arith.constant 0 : index
    %c0_133 = arith.constant 0 : index
    %198 = vector.load %arg12[%c0_132, %c0_133] : memref<512x512xf32, #tpu.memory_space<vmem>>, vector<512x512xf32>
    %cst_134 = arith.constant dense<0.000000e+00> : vector<1x512xf32>
    %199 = tpu.matmul %197, %198, %cst_134 {dimension_numbers = #tpu.dot_dimension_numbers<[1], [0], [0], [1], [0, 0, 1, 1], [], []>} : vector<1x512xf32>, vector<512x512xf32>, vector<1x512xf32> -> vector<1x512xf32>
    %c0_135 = arith.constant 0 : index
    %c0_136 = arith.constant 0 : index
    %200 = vector.load %arg14[%c0_135, %c0_136] : memref<1x512xf32, #tpu.memory_space<vmem>>, vector<1x512xf32>
    %201 = arith.addf %199, %200 : vector<1x512xf32>
    %cst_137 = arith.constant 0.000000e+00 : f32
    %202 = vector.broadcast %cst_137 : f32 to vector<1x512xf32>
    %203 = arith.maximumf %201, %202 : vector<1x512xf32>
    %c0_138 = arith.constant 0 : index
    %c0_139 = arith.constant 0 : index
    %204 = vector.load %arg13[%c0_138, %c0_139] : memref<512x512xf32, #tpu.memory_space<vmem>>, vector<512x512xf32>
    %cst_140 = arith.constant dense<0.000000e+00> : vector<1x512xf32>
    %205 = tpu.matmul %203, %204, %cst_140 {dimension_numbers = #tpu.dot_dimension_numbers<[1], [0], [0], [1], [0, 0, 1, 1], [], []>} : vector<1x512xf32>, vector<512x512xf32>, vector<1x512xf32> -> vector<1x512xf32>
    %206 = arith.subf %197, %205 : vector<1x512xf32>
    %c0_141 = arith.constant 0 : index
    %c0_142 = arith.constant 0 : index
    %207 = vector.load %arg15[%c0_141, %c0_142] : memref<512x128xf32, #tpu.memory_space<vmem>>, vector<512x128xf32>
    %cst_143 = arith.constant dense<0.000000e+00> : vector<1x128xf32>
    %208 = tpu.matmul %206, %207, %cst_143 {dimension_numbers = #tpu.dot_dimension_numbers<[1], [0], [0], [1], [0, 0, 1, 1], [], []>} : vector<1x512xf32>, vector<512x128xf32>, vector<1x128xf32> -> vector<1x128xf32>
    %c0_144 = arith.constant 0 : index
    %c0_145 = arith.constant 0 : index
    %209 = vector.load %arg16[%c0_144, %c0_145] : memref<1x128xf32, #tpu.memory_space<vmem>>, vector<1x128xf32>
    %210 = arith.addf %208, %209 : vector<1x128xf32>
    %c0_146 = arith.constant 0 : index
    %c0_147 = arith.constant 0 : index
    %c0_148 = arith.constant 0 : index
    %211 = vector.load %arg17[%c0_146, %c0_147, %c0_148] : memref<1x1x128xf32, #tpu.memory_space<vmem>>, vector<1x1x128xf32>
    %212 = vector.shape_cast %211 : vector<1x1x128xf32> to vector<1x128xf32>
    %213 = vector.shape_cast %210 : vector<1x128xf32> to vector<1x1x128xf32>
    tpu.vector_store %arg17[%c0_146, %c0_147, %c0_148], %213 {strides = array<i32>} : memref<1x1x128xf32, #tpu.memory_space<vmem>>, vector<1x1x128xf32>,
    return
  }
  func.func @transform_0(%arg0: i32) -> (i32, i32, i32) {
    %c0_i32 = arith.constant 0 : i32
    %c0_i32_0 = arith.constant 0 : i32
    %c0_i32_1 = arith.constant 0 : i32
    return %arg0, %c0_i32, %c0_i32_0 : i32, i32, i32
  }
  func.func @transform_1(%arg0: i32) -> (i32, i32, i32) {
    %c0_i32 = arith.constant 0 : i32
    %c0_i32_0 = arith.constant 0 : i32
    %c0_i32_1 = arith.constant 0 : i32
    %c0_i32_2 = arith.constant 0 : i32
    return %c0_i32, %c0_i32_0, %c0_i32_1 : i32, i32, i32
  }
  func.func @transform_2(%arg0: i32) -> (i32, i32, i32) {
    %c0_i32 = arith.constant 0 : i32
    %c0_i32_0 = arith.constant 0 : i32
    %c0_i32_1 = arith.constant 0 : i32
    %c0_i32_2 = arith.constant 0 : i32
    return %c0_i32, %c0_i32_0, %c0_i32_1 : i32, i32, i32
  }
  func.func @transform_3(%arg0: i32) -> (i32, i32) {
    %c0_i32 = arith.constant 0 : i32
    %c0_i32_0 = arith.constant 0 : i32
    %c0_i32_1 = arith.constant 0 : i32
    return %c0_i32, %c0_i32_0 : i32, i32
  }
  func.func @transform_4(%arg0: i32) -> (i32, i32, i32) {
    %c0_i32 = arith.constant 0 : i32
    %c0_i32_0 = arith.constant 0 : i32
    %c0_i32_1 = arith.constant 0 : i32
    %c0_i32_2 = arith.constant 0 : i32
    return %c0_i32, %c0_i32_0, %c0_i32_1 : i32, i32, i32
  }
  func.func @transform_5(%arg0: i32) -> (i32, i32, i32) {
    %c0_i32 = arith.constant 0 : i32
    %c0_i32_0 = arith.constant 0 : i32
    %c0_i32_1 = arith.constant 0 : i32
    %c0_i32_2 = arith.constant 0 : i32
    return %c0_i32, %c0_i32_0, %c0_i32_1 : i32, i32, i32
  }
  func.func @transform_6(%arg0: i32) -> (i32, i32) {
    %c0_i32 = arith.constant 0 : i32
    %c0_i32_0 = arith.constant 0 : i32
    %c0_i32_1 = arith.constant 0 : i32
    return %c0_i32, %c0_i32_0 : i32, i32
  }
  func.func @transform_7(%arg0: i32) -> (i32, i32) {
    %c0_i32 = arith.constant 0 : i32
    %c0_i32_0 = arith.constant 0 : i32
    %c0_i32_1 = arith.constant 0 : i32
    return %c0_i32, %c0_i32_0 : i32, i32
  }
  func.func @transform_8(%arg0: i32) -> (i32, i32) {
    %c0_i32 = arith.constant 0 : i32
    %c0_i32_0 = arith.constant 0 : i32
    %c0_i32_1 = arith.constant 0 : i32
    return %c0_i32, %c0_i32_0 : i32, i32
  }
  func.func @transform_9(%arg0: i32) -> (i32, i32) {
    %c0_i32 = arith.constant 0 : i32
    %c0_i32_0 = arith.constant 0 : i32
    %c0_i32_1 = arith.constant 0 : i32
    return %c0_i32, %c0_i32_0 : i32, i32
  }
  func.func @transform_10(%arg0: i32) -> (i32, i32) {
    %c0_i32 = arith.constant 0 : i32
    %c0_i32_0 = arith.constant 0 : i32
    %c0_i32_1 = arith.constant 0 : i32
    return %c0_i32, %c0_i32_0 : i32, i32
  }
  func.func @transform_11(%arg0: i32) -> (i32, i32) {
    %c0_i32 = arith.constant 0 : i32
    %c0_i32_0 = arith.constant 0 : i32
    %c0_i32_1 = arith.constant 0 : i32
    return %c0_i32, %c0_i32_0 : i32, i32
  }
  func.func @transform_12(%arg0: i32) -> (i32, i32) {
    %c0_i32 = arith.constant 0 : i32
    %c0_i32_0 = arith.constant 0 : i32
    %c0_i32_1 = arith.constant 0 : i32
    return %c0_i32, %c0_i32_0 : i32, i32
  }
  func.func @transform_13(%arg0: i32) -> (i32, i32) {
    %c0_i32 = arith.constant 0 : i32
    %c0_i32_0 = arith.constant 0 : i32
    %c0_i32_1 = arith.constant 0 : i32
    return %c0_i32, %c0_i32_0 : i32, i32
  }
  func.func @transform_14(%arg0: i32) -> (i32, i32) {
    %c0_i32 = arith.constant 0 : i32
    %c0_i32_0 = arith.constant 0 : i32
    %c0_i32_1 = arith.constant 0 : i32
    return %c0_i32, %c0_i32_0 : i32, i32
  }
  func.func @transform_15(%arg0: i32) -> (i32, i32) {
    %c0_i32 = arith.constant 0 : i32
    %c0_i32_0 = arith.constant 0 : i32
    %c0_i32_1 = arith.constant 0 : i32
    return %c0_i32, %c0_i32_0 : i32, i32
  }
  func.func @transform_16(%arg0: i32) -> (i32, i32, i32) {
    %c0_i32 = arith.constant 0 : i32
    %c0_i32_0 = arith.constant 0 : i32
    %c0_i32_1 = arith.constant 0 : i32
    return %arg0, %c0_i32, %c0_i32_0 : i32, i32, i32
  }
}

</mosaic_0001>

<bundles_post_ra>
// kernel: _lambda_.1
= control target key start
LH: loop header
LB: loop body
LE: loop exit
PB: predicated region body
PF: predicated region fallthrough
CT: control target
= control target key end

     0   :  { %s13737_s0 = inlined_call_operand.vmem [shape: f32[2,3,1024], index: 0, kind: input, shape index: {}]   ;;  %s13738_s1 = inlined_call_operand.vmem [shape: f32[3,8,24], index: 1, kind: input, shape index: {}]   ;;  %s13739_s2 = inlined_call_operand.vmem [shape: f32[3,8,24], index: 2, kind: input, shape index: {}]   ;;  %s13740_s3 = inlined_call_operand.vmem [shape: f32[8,1024], index: 3, kind: input, shape index: {}]   ;;  %s13741_s4 = inlined_call_operand.vmem [shape: f32[3,8,24], index: 4, kind: input, shape index: {}]   ;;  %s13742_s5 = inlined_call_operand.vmem [shape: f32[3,8,24], index: 5, kind: input, shape index: {}]   ;;  %s13743_s6 = inlined_call_operand.vmem [shape: f32[8,1024], index: 6, kind: input, shape index: {}]   ;;  %s13744_s7 = inlined_call_operand.hbm [shape: f32[1024,64], index: 7, kind: input, shape index: {}]   ;;  %s13745_s8 = inlined_call_operand.hbm [shape: f32[512,512], index: 8, kind: input, shape index: {}]   ;;  %s13746_s9 = inlined_call_operand.hbm [shape: f32[512,512], index: 9, kind: input, shape index: {}]   ;;  %s13747_s10 = inlined_call_operand.vmem [shape: f32[1,512], index: 10, kind: input, shape index: {}]   ;;  %s13748_s11 = inlined_call_operand.hbm [shape: f32[512,512], index: 11, kind: input, shape index: {}]   ;;  %s13749_s12 = inlined_call_operand.hbm [shape: f32[512,512], index: 12, kind: input, shape index: {}]   ;;  %s13750_s13 = inlined_call_operand.vmem [shape: f32[1,512], index: 13, kind: input, shape index: {}]   ;;  %s13751_s14 = inlined_call_operand.hbm [shape: f32[512,128], index: 14, kind: input, shape index: {}]   ;;  %s13752_s15 = inlined_call_operand.vmem [shape: f32[1,128], index: 15, kind: input, shape index: {}]   ;;  %s13753_s16 = inlined_call_operand.hbm [shape: f32[2,1,128], index: 16, kind: output, shape index: {}]  }
   0x1   :  { %13860 = sst [smem:[#allocation43_spill]] %s13737_s0 }
   0x2   :  { %13861 = sst [smem:[#allocation44_spill]] %s13745_s8 }
   0x3   :  { %13862 = sst [smem:[#allocation45_spill]] %s13748_s11 }
   0x4   :  { %13863 = sst [smem:[#allocation46_spill]] %s13750_s13 }
   0x5   :  { %13864 = sst [smem:[#allocation47_spill]] %s13752_s15 }
   0x6   :  { %13865 = sst [smem:[#allocation48_spill]] %s13753_s16 }
   0x7   :  { %21 = vsyncpa [#allocation6], 0 }
   0x8   :  { %22 = vsyncpa [#allocation9], 0 }
   0x9   :  { %23 = vsyncpa [#allocation12], 0 }
   0xa   :  { %24 = vsyncpa [#allocation15], 0 }
   0xb   :  { %25 = vsyncpa [#allocation7], 0 }
   0xc   :  { %27 = vsyncpa [#allocation7 + $0x1], 0  ;;  %s11437_s21 = smov 0   ;;  %s11439_s22 = smov 0  }
   0xd   :  { %s11441_s23 = smov 0   ;;  %s11443_s24 = smov 0  }
   0xe LB: > { %13866 = sst [smem:[#allocation22_spill]] %s11319_s21  ;;  %s11458_s25 = sadd.s32 4294967295, %s11331_s24   ;;  %s11331_s24 = sphi %s11443_s24, %s14284_s24   ;;  %s11327_s23 = sphi %s11441_s23, %s14287_s23   ;;  %s11323_s22 = sphi %s11439_s22, %s14286_s22   ;;  %s11319_s21 = sphi %s11437_s21, %s14285_s21  }
   0xf   : > { %13867 = sst [smem:[#allocation23_spill]] %s11323_s22  ;;  %s8628_s26 = sadd.s32 4294967294, %s11331_s24  }
  0x10   : > { %13868 = sst [smem:[#allocation24_spill]] %s11327_s23  ;;  %s11462_s27 = sadd.s32 1, %s11331_s24  }
  0x11   : > { %13869 = sst [smem:[#allocation25_spill]] %s11331_s24  ;;  %s381_s28 = sadd.s32 1, %s11327_s23 }
  0x12   : > { %13870 = sst [smem:[#allocation26_spill]] %s11462_s27  ;;  %s378_s29 = ssub.s32 %s11331_s24, %s11462_s27 }
  0x13   : > { %p391_p0 = scmp.ne.s32.totalorder %s11327_s23, %s11323_s22  ;;  %p379_p1 = scmp.eq.s32.totalorder %s378_s29, 0 }
  0x14   : > { %p392_p2 = scmp.eq.s32.totalorder %s11458_s25, 1  ;;  %p397_p3 = scmp.ne.s32.totalorder %s11323_s22, %s11319_s21 }
  0x15   : > { %p398_p4 = scmp.eq.s32.totalorder %s8628_s26, 1  ;;  %p8629_p7 = scmp.ge.s32.totalorder %s11331_s24, 1 }
  0x16   : > { %s11473_s30 = scalar_select %p379_p1, %s11327_s23, %s381_s28  }
  0x17   : > { %p11475_p5 = por %p392_p2, %p391_p0  ;;  %p11479_p6 = por %p398_p4, %p397_p3 }
  0x18   : > { %13871 = sst [smem:[#allocation27_spill]] %s11473_s30  ;;  %p405_p8 = scmp.lt.s32.totalorder %s11331_s24, 3 }
  0x19   : > { %s13872_s0 = scalar_select %p11475_p5, 1, 0 }
  0x1a   : > { %s13874_s17 = scalar_select %p11479_p6, 1, 0 }
  0x1b   : > { %13873 = sst [smem:[#allocation28_spill]] %s13872_s0  ;;  %p13761_p9 = scmp.eq.s32.totalorder %s11458_s25, 0 }
  0x1c   : > { %13875 = sst [smem:[#allocation29_spill]] %s13874_s17  ;;  %p11486_p10 = pnand %p8629_p7, %p405_p8 }
  0x1d   : > { %s11333_s19 = smov [#allocation8]   ;;  %s11334_s28 = smov [#allocation11]  }
  0x1e   : > { %s13876_s18 = scalar_select %p11486_p10, 1, 0 }
  0x1f   : > { %s448_s20 = sshll.u32 %s11333_s19, 4  ;;  %p10586_p11 = pneg %p11486_p10  ;;  %s11492_s20 = int_to_ptr.vmem [resolvable:$true] %s448_s20 }
  0x20   : > { %s477_s29 = sshll.u32 %s11334_s28, 4  ;;  %s11335_s30 = smov [#allocation5]   ;;  %s11500_s29 = int_to_ptr.vmem [resolvable:$true] %s477_s29 }
  0x21   : > { %p11496_p12 = pnand %p13761_p9, %p10586_p11  ;;  %s11502_s23 = sshll.u32 %s11335_s30, 4  ;;  %s436_s23 = int_to_ptr.vmem [resolvable:$true] %s11502_s23 }
  0x22   : > { %s13878_s8 = sld [smem:[#allocation44_spill]] }
  0x23   : > { %p11512_p0 = pneg %p11496_p12 }
  0x28   : > { %s11085_s19 = scalar_lea.hbm %s13878_s8, 32768 }
  0x29   : > { %p11086_p13 = scmp.ne.s32.totalorder %s13878_s8, %s11085_s19  ;;  %p11092_p3 = scmp.lt.u32.totalorder %s11085_s19, %s13878_s8 }
  0x2b   : > { %p11088_p1 = pnand %p11512_p0, %p11086_p13 }
  0x2d   : > { %p11089_p2 = pneg %p11088_p1 }
  0x2f   : > { %p11094_p4 = pnand %p11092_p3, %p11089_p2 }
  0x31   : > { %11097 = shalt.err (!%p11094_p4)
}
  0x32   : > { %s11098_s21 = scalar_lea.vmem %s11492_s20, 32768  ;;  %p11106_p9 = scmp.lt.s32.totalorder %s11492_s20, %s11492_s20 }
  0x33   : > { %p11099_p7 = scmp.ne.s32.totalorder %s11492_s20, %s11098_s21  ;;  %p11107_p6 = scmp.lt.s32.totalorder %s11098_s21, %s11098_s21 }
  0x35   : > { %p11101_p8 = pnand %p11099_p7, %p11512_p0  ;;  %p11108_p13 = por %p11107_p6, %p11106_p9 }
  0x37   : > { %p11102_p11 = pneg %p11101_p8 }
  0x39   : > { %p11109_p1 = pnand %p11108_p13, %p11102_p11 }
  0x3b   : > { %11112 = shalt.err (!%p11109_p1)
}
  0x3c   : > { %s13767_s24 = smov 512   ;;  %s13769_s27 = smov 32  }
  0x3d   : > { %10592 = dma.hbm_to_vmem [thread:$0]  (!%p11496_p12), %s13878_s8, 32768, %s11492_s20, [#allocation9], %s13767_s24, %s13767_s24, %s13769_s27  }
  0x3e   : > { %s13880_s11 = sld [smem:[#allocation45_spill]] }
  0x44   : > { %s11113_s21 = scalar_lea.hbm %s13880_s11, 32768 }
  0x45   : > { %p11114_p6 = scmp.ne.s32.totalorder %s13880_s11, %s11113_s21  ;;  %p11120_p3 = scmp.lt.u32.totalorder %s11113_s21, %s13880_s11 }
  0x47   : > { %p11116_p9 = pnand %p11114_p6, %p11512_p0 }
  0x49   : > { %p11117_p2 = pneg %p11116_p9 }
  0x4b   : > { %p11122_p4 = pnand %p11120_p3, %p11117_p2 }
  0x4d   : > { %11125 = shalt.err (!%p11122_p4)
}
  0x4e   : > { %s11126_s20 = scalar_lea.vmem %s11500_s29, 32768  ;;  %p11134_p13 = scmp.lt.s32.totalorder %s11500_s29, %s11500_s29 }
  0x4f   : > { %p11127_p7 = scmp.ne.s32.totalorder %s11500_s29, %s11126_s20  ;;  %p11135_p1 = scmp.lt.s32.totalorder %s11126_s20, %s11126_s20 }
  0x51   : > { %p11129_p8 = pnand %p11127_p7, %p11512_p0  ;;  %p11136_p6 = por %p11135_p1, %p11134_p13 }
  0x53   : > { %p11130_p11 = pneg %p11129_p8 }
  0x55   : > { %p11137_p9 = pnand %p11136_p6, %p11130_p11 }
  0x57   : > { %11140 = shalt.err (!%p11137_p9)
}
  0x58   : > { %10598 = dma.hbm_to_vmem [thread:$0]  (!%p11496_p12), %s13880_s11, 32768, %s11500_s29, [#allocation12], %s13767_s24, %s13767_s24, %s13769_s27  }
  0x59   : > { %s11141_s17 = scalar_lea.hbm %s13744_s7, 16384 }
  0x5a   : > { %p11142_p2 = scmp.ne.s32.totalorder %s13744_s7, %s11141_s17  ;;  %p11148_p7 = scmp.lt.u32.totalorder %s11141_s17, %s13744_s7 }
  0x5c   : > { %p11144_p3 = pnand %p11142_p2, %p11512_p0 }
  0x5e   : > { %p11145_p4 = pneg %p11144_p3 }
  0x60   : > { %p11150_p8 = pnand %p11148_p7, %p11145_p4 }
  0x62   : > { %11153 = shalt.err (!%p11150_p8)
}
  0x63   : > { %s11154_s20 = scalar_lea.vmem %s436_s23, 16384  ;;  %p11162_p6 = scmp.lt.s32.totalorder %s436_s23, %s436_s23 }
  0x64   : > { %p11155_p11 = scmp.ne.s32.totalorder %s436_s23, %s11154_s20  ;;  %p11163_p9 = scmp.lt.s32.totalorder %s11154_s20, %s11154_s20 }
  0x66   : > { %p11157_p13 = pnand %p11155_p11, %p11512_p0  ;;  %p11164_p5 = por %p11163_p9, %p11162_p6 }
  0x68   : > { %p11158_p1 = pneg %p11157_p13 }
  0x6a   : > { %p11165_p10 = pnand %p11164_p5, %p11158_p1 }
  0x6c   : > { %11168 = shalt.err (!%p11165_p10)
}
  0x6d   : > { %s11338_s29 = smov 128   ;;  %s11339_s13 = smov 8  }
  0x6e   : > { %10589 = dma.hbm_to_vmem [thread:$0]  (!%p11496_p12), %s13744_s7, 16384, %s436_s23, [#allocation6], %s11338_s29, %s11338_s29, %s11339_s13  }
  0x6f   : > { %s11340_s0 = smov [#allocation10]   ;;  %s11341_s19 = smov [#allocation13]  }
  0x70   : > { %s461_s17 = sshll.u32 %s11340_s0, 4  ;;  %s490_s28 = sshll.u32 %s11341_s19, 4  ;;  %s462_s17 = int_to_ptr.vmem [resolvable:$true] %s461_s17  ;;  %s491_s28 = int_to_ptr.vmem [resolvable:$true] %s490_s28 }
  0x71   : > { %s11169_s20 = scalar_lea.hbm %s13746_s9, 32768 }
  0x72   : > { %p11170_p5 = scmp.ne.s32.totalorder %s13746_s9, %s11169_s20  ;;  %p11176_p3 = scmp.lt.u32.totalorder %s11169_s20, %s13746_s9 }
  0x74   : > { %p11172_p10 = pnand %p11170_p5, %p11512_p0 }
  0x76   : > { %p11173_p2 = pneg %p11172_p10 }
  0x78   : > { %p11178_p4 = pnand %p11176_p3, %p11173_p2 }
  0x7a   : > { %11181 = shalt.err (!%p11178_p4)
}
  0x7b   : > { %s11182_s23 = scalar_lea.vmem %s462_s17, 32768  ;;  %p11190_p13 = scmp.lt.s32.totalorder %s462_s17, %s462_s17 }
  0x7c   : > { %p11183_p7 = scmp.ne.s32.totalorder %s462_s17, %s11182_s23  ;;  %p11191_p1 = scmp.lt.s32.totalorder %s11182_s23, %s11182_s23 }
  0x7e   : > { %p11185_p8 = pnand %p11183_p7, %p11512_p0  ;;  %p11192_p6 = por %p11191_p1, %p11190_p13 }
  0x80   : > { %p11186_p11 = pneg %p11185_p8 }
  0x82   : > { %p11193_p9 = pnand %p11192_p6, %p11186_p11 }
  0x84   : > { %11196 = shalt.err (!%p11193_p9)
}
  0x85   : > { %s13881_s24 = smov 32   ;;  %s13882_s27 = smov 512  }
  0x86   : > { %10595 = dma.hbm_to_vmem [thread:$0]  (!%p11496_p12), %s13746_s9, 32768, %s462_s17, [#allocation9], %s13882_s27, %s13882_s27, %s13881_s24  }
  0x87   : > { %s11197_s0 = scalar_lea.hbm %s13749_s12, 32768 }
  0x88   : > { %p11198_p5 = scmp.ne.s32.totalorder %s13749_s12, %s11197_s0  ;;  %p11204_p3 = scmp.lt.u32.totalorder %s11197_s0, %s13749_s12 }
  0x8a   : > { %p11200_p10 = pnand %p11198_p5, %p11512_p0 }
  0x8c   : > { %p11201_p2 = pneg %p11200_p10 }
  0x8e   : > { %p11206_p4 = pnand %p11204_p3, %p11201_p2 }
  0x90   : > { %11209 = shalt.err (!%p11206_p4)
}
  0x91   : > { %s11210_s23 = scalar_lea.vmem %s491_s28, 32768  ;;  %p11218_p13 = scmp.lt.s32.totalorder %s491_s28, %s491_s28 }
  0x92   : > { %p11211_p7 = scmp.ne.s32.totalorder %s491_s28, %s11210_s23  ;;  %p11219_p1 = scmp.lt.s32.totalorder %s11210_s23, %s11210_s23 }
  0x94   : > { %p11213_p8 = pnand %p11211_p7, %p11512_p0  ;;  %p11220_p6 = por %p11219_p1, %p11218_p13 }
  0x96   : > { %p11214_p11 = pneg %p11213_p8 }
  0x98   : > { %p11221_p9 = pnand %p11220_p6, %p11214_p11 }
  0x9a   : > { %11224 = shalt.err (!%p11221_p9)
}
  0x9b   : > { %10601 = dma.hbm_to_vmem [thread:$0]  (!%p11496_p12), %s13749_s12, 32768, %s491_s28, [#allocation12], %s13882_s27, %s13882_s27, %s13881_s24  }
  0x9c   : > { %s11342_s11 = smov [#allocation14]   ;;  %s11225_s19 = scalar_lea.hbm %s13751_s14, 8192 }
  0x9d   : > { %s506_s15 = sshll.u32 %s11342_s11, 4  ;;  %p11226_p5 = scmp.ne.s32.totalorder %s13751_s14, %s11225_s19  ;;  %s507_s15 = int_to_ptr.vmem [resolvable:$true] %s506_s15 }
  0x9e   : > { %p11232_p3 = scmp.lt.u32.totalorder %s11225_s19, %s13751_s14 }
  0x9f   : > { %p11228_p10 = pnand %p11226_p5, %p11512_p0 }
  0xa1   : > { %p11229_p2 = pneg %p11228_p10 }
  0xa3   : > { %p11234_p4 = pnand %p11232_p3, %p11229_p2 }
  0xa5   : > { %11237 = shalt.err (!%p11234_p4)
}
  0xa6   : > { %s11238_s28 = scalar_lea.vmem %s507_s15, 8192  ;;  %p11246_p13 = scmp.lt.s32.totalorder %s507_s15, %s507_s15 }
  0xa7   : > { %p11239_p7 = scmp.ne.s32.totalorder %s507_s15, %s11238_s28  ;;  %p11247_p1 = scmp.lt.s32.totalorder %s11238_s28, %s11238_s28 }
  0xa9   : > { %p11241_p8 = pnand %p11239_p7, %p11512_p0  ;;  %p11248_p6 = por %p11247_p1, %p11246_p13 }
  0xab   : > { %p11242_p11 = pneg %p11241_p8 }
  0xad   : > { %p11249_p9 = pnand %p11248_p6, %p11242_p11 }
  0xaf   : > { %11252 = shalt.err (!%p11249_p9)
}
  0xb0   : > { %10604 = dma.hbm_to_vmem [thread:$0]  (!%p11496_p12), %s13751_s14, 8192, %s507_s15, [#allocation15], %s11338_s29, %s11338_s29, %s11339_s13  }
  0xb1   : > { %p13883_p5 = scmp.ne.s32.totalorder %s13876_s18, 0 }
  0xb3   : > { %533 = sbr.rel (%p13883_p5) target bundleno = 4042 (0xfca), region = 84 }
  0xba   : > { %p13884_p0 = scmp.eq.s32.totalorder %s11458_s25, 0 }
  0xbc   : > { %11298 = dma.done.wait (%p13884_p0), [#allocation6], 16384   ;;  %p13885_p10 = pmov %p13884_p0 }
  0xbd   : > { %p13886_p2 = pmov %p13884_p0 }
  0xbe   : > { %11300 = vsyncadd (%p13885_p10), [#allocation6], 4294950912 }
  0xbf   : > { %11302 = dma.done.wait (%p13886_p2), [#allocation9], 65536   ;;  %p13887_p3 = pmov %p13884_p0 }
  0xc0   : > { %p13888_p4 = pmov %p13884_p0 }
  0xc1   : > { %11304 = vsyncadd (%p13887_p3), [#allocation9], 4294901760 }
  0xc2   : > { %11306 = dma.done.wait (%p13888_p4), [#allocation12], 65536   ;;  %p13889_p12 = pmov %p13884_p0 }
  0xc3   : > { %p13890_p7 = pmov %p13884_p0 }
  0xc4   : > { %11308 = vsyncadd (%p13889_p12), [#allocation12], 4294901760 }
  0xc5   : > { %11310 = dma.done.wait (%p13890_p7), [#allocation15], 8192   ;;  %p13891_p8 = pmov %p13884_p0 }
  0xc6   : > { %p602_p11 = scmp.lt.s32.totalorder %s11458_s25, 1  ;;  %v13784_v0 = vmov 0.0   ;;  %s13892_s13 = sld [smem:[#allocation43_spill]]  ;;  %v13775_v21 = vlaneseq  ;;  %v13893_v33 = vmov 0  ;;  %v13896_v42 = vmov 0 }
  0xc7   : > { %11312 = vsyncadd (%p13891_p8), [#allocation15], 4294959104  ;;  %770 = vst [vmem:[#allocation2 + $0x10] sm:$0xf8] %v13784_v0  ;;  %1256 = vmatprep.mubr.f32.mxu1 %v13784_v0  ;;  %1185 = vmatprep.mubr.f32.mxu0 %v13784_v0  ;;  %s11344_s8 = smov 127   ;;  %s11345_s11 = smov 1  }
  0xc8   : > { %768 = vst [vmem:[#allocation2] sm:$0xf8] %v13784_v0  ;;  %769 = vst [vmem:[#allocation2 + $0x8] sm:$0xf8] %v13784_v0  ;;  %s603_s16 = scalar_select %p602_p11, %s11458_s25, 1  ;;  %v11725_v22 = vand.u32 127, %v13775_v21 }
  0xc9   : > { %771 = vst [vmem:[#allocation2 + $0x18] sm:$0xf8] %v13784_v0  ;;  %772 = vst [vmem:[#allocation2 + $0x20] sm:$0xf8] %v13784_v0  ;;  %v13899_v46 = vmov 0  ;;  %v13902_v48 = vmov 0 }
  0xca   : > { %773 = vst [vmem:[#allocation2 + $0x28] sm:$0xf8] %v13784_v0  ;;  %774 = vst [vmem:[#allocation2 + $0x30] sm:$0xf8] %v13784_v0  ;;  %s8797_s18 = sshll.u32 %s603_s16, 5  ;;  %v610_v23 = vadd.s32 256, %v11725_v22 }
  0xcb   : > { %775 = vst [vmem:[#allocation2 + $0x38] sm:$0xf8] %v13784_v0  ;;  %v611_v25 = vadd.s32 384, %v11725_v22  ;;  %v11732_v27 = vadd.s32 128, %v11725_v22  ;;  %vm13771_vm0 = vcmp.lt.s32.totalorder %v11725_v22, 1  ;;  %v620_v35 = vand.u32 31, %v11725_v22 }
  0xcc   : > { %s606_s17 = scalar_lea.vmem %s13892_s13, %s8797_s18  ;;  %v634_v26 = vand.u32 31, %v610_v23  ;;  %v11744_v36 = vadd.s32 768, %v11725_v22  ;;  %v11780_v50 = vadd.s32 896, %v11725_v22  ;;  %s11346_s15 = smov 32   ;;  %vm13774_vm5 = vcmp.lt.s32.totalorder %v11725_v22, 127 }
  0xcd   : > { %v745_v1 = vld [vmem:[%s606_s17 + $0x8] sm:$0x77]  ;;  %v746_v2 = vld [vmem:[%s606_s17 + $0x10] sm:$0x77]  ;;  %v747_v3 = vld [vmem:[%s606_s17 + $0x18] sm:$0x77] }
  0xce   : > { %762 = vst [vmem:[#allocation2 + $0x10] sm:$0x7] %v745_v1  ;;  %v753_v4 = vcombine.high %v745_v1, %v745_v1  ;;  %v754_v5 = vcombine.high %v746_v2, %v746_v2  ;;  %v755_v6 = vcombine.high %v747_v3, %v747_v3  ;;  %766 = vst [vmem:[#allocation2 + $0x30] sm:$0x7] %v747_v3  ;;  %v744_v7 = vld [vmem:[%s606_s17] sm:$0x77] }
  0xcf   : > { %764 = vst [vmem:[#allocation2 + $0x20] sm:$0x7] %v746_v2  ;;  %v752_v8 = vcombine.high %v744_v7, %v744_v7  ;;  %760 = vst [vmem:[#allocation2] sm:$0x7] %v744_v7  ;;  %v641_v30 = vand.u32 31, %v611_v25  ;;  %vm11737_vm1 = vcmp.ge.s32.totalorder %v634_v26, 1 }
  0xd0   : > { %763 = vst [vmem:[#allocation2 + $0x18] sm:$0x7] %v753_v4  ;;  %765 = vst [vmem:[#allocation2 + $0x28] sm:$0x7] %v754_v5  ;;  %v13894_v33 = vsel %vm11737_vm1, 4294967295, %v13893_v33  ;;  %v627_v34 = vand.u32 31, %v11732_v27 }
  0xd1   : > { %767 = vst [vmem:[#allocation2 + $0x38] sm:$0x7] %v755_v6  ;;  %761 = vst [vmem:[#allocation2 + $0x8] sm:$0x7] %v752_v8  ;;  %vm11758_vm2 = vcmp.ge.s32.totalorder %v641_v30, 1  ;;  %vm11774_vm4 = vcmp.ge.s32.totalorder %v620_v35, 1 }
  0xd2   : > { %13895 = vst [vmem:[#allocation30_spill] sm:$0xff] %v13894_v33  ;;  %v13897_v42 = vsel %vm11758_vm2, 4294967295, %v13896_v42  ;;  %vm11767_vm3 = vcmp.ge.s32.totalorder %v627_v34, 1  ;;  %v13903_v48 = vsel %vm11774_vm4, 4294967295, %v13902_v48  ;;  %v662_v49 = vand.u32 31, %v11744_v36  ;;  %13905 = vst [vmem:[#allocation34_spill] sm:$0xff] %v11780_v50 }
  0xd3   : > { %13898 = vst [vmem:[#allocation31_spill] sm:$0xff] %v13897_v42  ;;  %v13900_v46 = vsel %vm11767_vm3, 4294967295, %v13899_v46  ;;  %13904 = vst [vmem:[#allocation33_spill] sm:$0xff] %v13903_v48  ;;  %vm11810_vm6 = vcmp.lt.s32.totalorder %v634_v26, 31  ;;  %v13906_v60 = vmov 0  ;;  %v669_v62 = vand.u32 31, %v11780_v50 }
  0xd4   : > { %13901 = vst [vmem:[#allocation32_spill] sm:$0xff] %v13900_v46  ;;  %v13907_v60 = vsel %vm11810_vm6, 4294967295, %v13906_v60  ;;  %vm11827_vm7 = vcmp.ge.s32.totalorder %v662_v49, 1  ;;  %v13908_v1 = vmov 0  ;;  %v613_v3 = vadd.s32 640, %v11725_v22  ;;  %s11347_s22 = smov 96  }
  0xd5   : > { %v11680_v9 = vld [vmem:[#allocation2 + $0x10] sm:$0xff]  ;;  %v13909_v1 = vsel %vm11827_vm7, 4294967295, %v13908_v1  ;;  %v612_v6 = vadd.s32 512, %v11725_v22  ;;  %vm11838_vm8 = vcmp.lt.s32.totalorder %v641_v30, 31  ;;  %v13911_v7 = vmov 0  ;;  %s11350_s24 = smov 64  }
  0xd6   : > { %v11682_v10 = vld [vmem:[#allocation2 + $0x30] sm:$0xff]  ;;  %845 = vrot.lane.b32.xlu0 %v11680_v9, %s11344_s8  ;;  %v11688_v12 = vld [vmem:[#allocation2 + $0x20] sm:$0xff]  ;;  %13910 = vst [vmem:[#allocation35_spill] sm:$0xff] %v13909_v1  ;;  %v13912_v7 = vsel %vm11838_vm8, 4294967295, %v13911_v7  ;;  %vm11850_vm9 = vcmp.ge.s32.totalorder %v669_v62, 1  ;;  %v655_v25 = vand.u32 31, %v613_v3 }
  0xd7   : > { %v11686_v11 = vld [vmem:[#allocation2 + $0x28] sm:$0xff]  ;;  %v11696_v16 = vld [vmem:[#allocation2] sm:$0xff]  ;;  %v11698_v17 = vld [vmem:[#allocation2 + $0x18] sm:$0xff]  ;;  %vm11873_vm10 = vcmp.lt.s32.totalorder %v627_v34, 31  ;;  %vm11901_vm12 = vcmp.lt.s32.totalorder %v620_v35, 31  ;;  %vm11919_vm14 = vcmp.lt.s32.totalorder %v662_v49, 31 }
  0xd8   : > { %v11690_v13 = vld [vmem:[#allocation2 + $0x38] sm:$0xff]  ;;  %v10682_v14 = vpack.i.bf16 %v11682_v10, %v11686_v11  ;;  %v11694_v15 = vld [vmem:[#allocation2 + $0x8] sm:$0xff]  ;;  %v10677_v20 = vpack.i.bf16 %v11696_v16, %v11698_v17  ;;  %vm11884_vm11 = vcmp.ge.s32.totalorder %v655_v25, 1  ;;  %vm11940_vm15 = vcmp.lt.s32.totalorder %v669_v62, 31  ;;  %s14273_s29 = sld [smem:[#allocation46_spill]]  ;;  %s14274_s13 = sld [smem:[#allocation23_spill]] }
  0xd9   : > { %v10672_v18 = vpack.i.bf16 %v11680_v9, %v11694_v15  ;;  %v10687_v19 = vpack.i.bf16 %v11688_v12, %v11690_v13  ;;  %s14275_s30 = sld [smem:[#allocation47_spill]]  ;;  %s8794_s20 = sshll.u32 %s11458_s25, 4 }
  0xda   : > { %10683 = vrot.lane.b32.xlu1 %v10682_v14, %s11345_s11  ;;  %s14276_s21 = sld [smem:[#allocation28_spill]]  ;;  %s14277_s23 = sld [smem:[#allocation48_spill]] }
  0xdb   : > { %10673 = vrot.lane.b32.xlu0 %v10672_v18, %s11345_s11  ;;  %v13913_v18 = vmov 0  ;;  %s11351_s25 = smov [#allocation16]  }
  0xdc   : > { %v13914_v18 = vsel %vm11850_vm9, 4294967295, %v13913_v18  ;;  %s11257_s18 = sshll.u32 %s11351_s25, 4  ;;  %s11258_s18 = int_to_ptr.vmem [resolvable:$false] %s11257_s18 }
  0xdd   : > { %13915 = vst [vmem:[#allocation36_spill] sm:$0xff] %v13914_v18  ;;  %s11259_s26 = scalar_lea.vmem %s11258_s18, 32 }
  0xde   : > { %10688 = vrot.lane.b32.xlu1 %v10687_v19, %s11345_s11  ;;  %s600_s17 = sand.u32 1, %s14274_s13  }
  0xdf   : > { %10678 = vrot.lane.b32.xlu0 %v10677_v20, %s11345_s11  ;;  %s8501_s27 = scalar_lea.sflag [#allocation7], %s600_s17 }
  0xe0   : > { %s14278_s28 = smov %s14277_s23  ;;  %p14279_p1 = scmp.ne.s32.totalorder %s14276_s21, 0 }
  0xe2   : > { %847 = vrot.lane.b32.xlu1 %v11698_v17, %s11344_s8 }
  0xe3   : > { %849 = vrot.lane.b32.xlu0 %v11688_v12, %s11344_s8 }
  0xe6   : > { %843 = vrot.lane.b32.xlu1 %v11694_v15, %s11344_s8 }
  0xe7   : > { %841 = vrot.lane.b32.xlu0 %v11696_v16, %s11344_s8 }
  0xea   : > { %853 = vrot.lane.b32.xlu1 %v11682_v10, %s11344_s8 }
  0xeb   : > { %855 = vrot.lane.b32.xlu0 %v11690_v13, %s11344_s8 }
  0xee   : > { %851 = vrot.lane.b32.xlu1 %v11686_v11, %s11344_s8 }
 0x148   : > { %v11728_v24 = vpop.permute.xlu0 %845 }
 0x14c   : > { %v11734_v28 = vpop.permute.xlu1 %10683 }
 0x14d   : > { %v10674_v29 = vpop.permute.xlu0 %10673  ;;  %v10686_v47 = vunpack.i.h.bf16 %v11734_v28  ;;  %v10685_v51 = vunpack.i.l.bf16 %v11734_v28 }
 0x14e   : > { %v10676_v31 = vunpack.i.h.bf16 %v10674_v29  ;;  %v10675_v32 = vunpack.i.l.bf16 %v10674_v29 }
 0x14f   : > { %v11833_v2 = vsel %vm13771_vm0, %v10685_v51, %v10686_v47 }
 0x150   : > { %v11746_v37 = vpop.permute.xlu1 %10688  ;;  %v11750_v38 = vsel %vm13771_vm0, %v10675_v32, %v10676_v31  ;;  %v839_v14 = vsel %vm11827_vm7, %v11833_v2, 0.0 }
 0x151   : > { %v10690_v39 = vunpack.i.l.bf16 %v11746_v37  ;;  %v11753_v40 = vpop.permute.xlu0 %10678  ;;  %v835_v41 = vsel %vm11737_vm1, %v11750_v38, 0.0  ;;  %v10691_v19 = vunpack.i.h.bf16 %v11746_v37  ;;  %v10712_v27 = vpack.i.bf16 %v11682_v10, %v839_v14 }
 0x152   : > { %v10681_v43 = vunpack.i.h.bf16 %v11753_v40  ;;  %v10680_v44 = vunpack.i.l.bf16 %v11753_v40  ;;  %v11765_v45 = vpack.i.bf16 %v11680_v9, %v835_v41  ;;  %v13918_v37 = vmov 0 }
 0x153   : > { %v11864_v23 = vsel %vm13771_vm0, %v10686_v47, %v10690_v39  ;;  %v13919_v37 = vsel %vm11884_vm11, 4294967295, %v13918_v37  ;;  %v13923_v47 = vmov 0 }
 0x154   : > { %10693 = vrot.lane.b32.xlu0 %v11765_v45, %s11346_s15  ;;  %v11787_v52 = vsel %vm13771_vm0, %v10676_v31, %v10680_v44  ;;  %v11791_v53 = vsel %vm13771_vm0, %v10681_v43, %v10675_v32  ;;  %v11795_v54 = vsel %vm13771_vm0, %v10690_v39, %v10681_v43  ;;  %v848_v55 = vpop.permute.xlu1 %847  ;;  %v840_v30 = vsel %vm11850_vm9, %v11864_v23, 0.0  ;;  %13920 = vst [vmem:[#allocation37_spill] sm:$0xff] %v13919_v37 }
 0x155   : > { %v836_v56 = vsel %vm11758_vm2, %v11787_v52, 0.0  ;;  %v834_v57 = vsel %vm11767_vm3, %v11791_v53, 0.0  ;;  %v833_v61 = vsel %vm11774_vm4, %v11795_v54, 0.0  ;;  %v11825_v63 = vsel %vm13774_vm5, %v11728_v24, %v848_v55  ;;  %v850_v4 = vpop.permute.xlu0 %849 }
 0x156   : > { %v11805_v58 = vpack.i.bf16 %v11698_v17, %v836_v56  ;;  %v11808_v59 = vpack.i.bf16 %v11694_v15, %v834_v57  ;;  %v10707_v5 = vpack.i.bf16 %v11696_v16, %v833_v61  ;;  %v11845_v8 = vsel %vm11810_vm6, %v11825_v63, 0.0 }
 0x157   : > { %v11860_v20 = vsel %vm13774_vm5, %v848_v55, %v850_v4  ;;  %v648_v31 = vand.u32 31, %v612_v6  ;;  %v11890_v39 = vsel %vm13771_vm0, %v10691_v19, %v10685_v51  ;;  %v10717_v34 = vpack.i.bf16 %v11690_v13, %v840_v30 }
 0x158   : > { %10698 = vrot.lane.b32.xlu1 %v11805_v58, %s11346_s15  ;;  %10703 = vrot.lane.b32.xlu0 %v11808_v59, %s11346_s15  ;;  %v844_v26 = vpop.permute.xlu1 %843  ;;  %v885_v28 = vsel %vm11838_vm8, %v11860_v20, 0.0  ;;  %v838_v41 = vsel %vm11884_vm11, %v11890_v39, 0.0  ;;  %v11917_v51 = vsel %vm13771_vm0, %v10680_v44, %v10691_v19  ;;  %v13926_v56 = vmov 0 }
 0x159   : > { %v842_v29 = vpop.permute.xlu0 %841  ;;  %v11882_v36 = vsel %vm13774_vm5, %v844_v26, %v11728_v24  ;;  %v13921_v24 = vmov 0  ;;  %vm11911_vm13 = vcmp.ge.s32.totalorder %v648_v31, 1  ;;  %v13927_v56 = vsel %vm11919_vm14, 4294967295, %v13926_v56 }
 0x15a   : > { %v883_v40 = vsel %vm11873_vm10, %v11882_v36, 0.0  ;;  %v13922_v24 = vsel %vm11901_vm12, 4294967295, %v13921_v24  ;;  %v11909_v43 = vsel %vm13774_vm5, %v842_v29, %v844_v26  ;;  %v13924_v47 = vsel %vm11911_vm13, 4294967295, %v13923_v47 }
 0x15b   : > { %13925 = vst [vmem:[#allocation38_spill] sm:$0xff] %v13924_v47  ;;  %v10722_v57 = vpack.i.bf16 %v11686_v11, %v838_v41  ;;  %v882_v3 = vsel %vm11901_vm12, %v11909_v43, 0.0  ;;  %v837_v44 = vsel %vm11911_vm13, %v11917_v51, 0.0  ;;  %v13928_v19 = vmov 0 }
 0x15c   : > { %10708 = vrot.lane.b32.xlu1 %v10707_v5, %s11346_s15  ;;  %906 = vrot.lane.b32.xlu0 %v11845_v8, %s11346_s15  ;;  %v854_v35 = vpop.permute.xlu1 %853  ;;  %v10727_v6 = vpack.i.bf16 %v11688_v12, %v837_v44  ;;  %v13929_v19 = vsel %vm11940_vm15, 4294967295, %v13928_v19  ;;  %vm11944_vm0 = vcmp.lt.s32.totalorder %v655_v25, 31  ;;  %v13930_v26 = vmov 0 }
 0x15d   : > { %v856_v55 = vpop.permute.xlu0 %855  ;;  %v13931_v26 = vsel %vm11944_vm0, 4294967295, %v13930_v26  ;;  %v13932_v44 = vmov 0 }
 0x15e   : > { %v11926_v61 = vsel %vm13774_vm5, %v854_v35, %v856_v55  ;;  %v11952_v30 = vsel %vm13774_vm5, %v856_v55, %v842_v29 }
 0x15f   : > { %v888_v49 = vsel %vm11919_vm14, %v11926_v61, 0.0  ;;  %v889_v62 = vsel %vm11940_vm15, %v11952_v30, 0.0  ;;  %vm11964_vm14 = vcmp.lt.s32.totalorder %v648_v31, 31 }
 0x160   : > { %912 = vrot.lane.b32.xlu1 %v885_v28, %s11346_s15  ;;  %10713 = vrot.lane.b32.xlu0 %v10712_v27, %s11346_s15  ;;  %v852_v14 = vpop.permute.xlu1 %851  ;;  %v13933_v44 = vsel %vm11964_vm14, 4294967295, %v13932_v44 }
 0x161   : > { %v11956_v41 = vsel %vm13774_vm5, %v852_v14, %v854_v35  ;;  %13934 = vst [vmem:[#allocation39_spill] sm:$0xff] %v13933_v44  ;;  %v11972_v29 = vsel %vm13774_vm5, %v850_v4, %v852_v14  ;;  %vm13790_vm5 = vcmp.lt.s32.totalorder %v11725_v22, 32 }
 0x162   : > { %v887_v25 = vsel %vm11944_vm0, %v11956_v41, 0.0  ;;  %v886_v35 = vsel %vm11964_vm14, %v11972_v29, 0.0  ;;  %vm13787_vm14 = vcmp.ge.s32.totalorder %v11725_v22, 32  ;;  %vm13786_vm0 = vcmask 195584  }
 0x163   : > { %vm12037_vm13 = vmpackc.low %vm13787_vm14, %vm13787_vm14 }
 0x164   : > { %10718 = vrot.lane.b32.xlu1 %v10717_v34, %s11346_s15  ;;  %900 = vrot.lane.b32.xlu0 %v883_v40, %s11346_s15 }
 0x168   : > { %10723 = vrot.lane.b32.xlu1 %v10722_v57, %s11346_s15  ;;  %894 = vrot.lane.b32.xlu0 %v882_v3, %s11346_s15 }
 0x16c   : > { %10728 = vrot.lane.b32.xlu1 %v10727_v6, %s11346_s15  ;;  %930 = vrot.lane.b32.xlu0 %v888_v49, %s11346_s15 }
 0x170   : > { %936 = vrot.lane.b32.xlu1 %v889_v62, %s11346_s15  ;;  %924 = vrot.lane.b32.xlu0 %v887_v25, %s11346_s15 }
 0x174   : > { %918 = vrot.lane.b32.xlu1 %v886_v35, %s11346_s15  ;;  %10733 = vrot.lane.b32.xlu0 %v11805_v58, %s11347_s22 }
 0x178   : > { %10738 = vrot.lane.b32.xlu1 %v10727_v6, %s11347_s22  ;;  %10743 = vrot.lane.b32.xlu0 %v11765_v45, %s11347_s22 }
 0x17c   : > { %10748 = vrot.lane.b32.xlu1 %v10707_v5, %s11347_s22  ;;  %10753 = vrot.lane.b32.xlu0 %v11808_v59, %s11347_s22 }
 0x180   : > { %1025 = vrot.lane.b32.xlu1 %v885_v28, %s11347_s22  ;;  %1031 = vrot.lane.b32.xlu0 %v886_v35, %s11347_s22 }
 0x184   : > { %10758 = vrot.lane.b32.xlu1 %v10717_v34, %s11347_s22  ;;  %1019 = vrot.lane.b32.xlu0 %v11845_v8, %s11347_s22 }
 0x188   : > { %10763 = vrot.lane.b32.xlu1 %v10712_v27, %s11347_s22  ;;  %1007 = vrot.lane.b32.xlu0 %v882_v3, %s11347_s22 }
 0x18c   : > { %1013 = vrot.lane.b32.xlu1 %v883_v40, %s11347_s22  ;;  %10768 = vrot.lane.b32.xlu0 %v10722_v57, %s11347_s22 }
 0x190   : > { %1049 = vrot.lane.b32.xlu1 %v889_v62, %s11347_s22  ;;  %1043 = vrot.lane.b32.xlu0 %v888_v49, %s11347_s22 }
 0x194   : > { %1037 = vrot.lane.b32.xlu1 %v887_v25, %s11347_s22 }
 0x1c6   : > { %v10694_v45 = vpop.permute.xlu0 %10693 }
 0x1c7   : > { %v10696_v58 = vunpack.i.h.bf16 %v10694_v45  ;;  %v10695_v59 = vunpack.i.l.bf16 %v10694_v45 }
 0x1ca   : > { %v11999_v4 = vpop.permute.xlu1 %10698  ;;  %v10704_v5 = vpop.permute.xlu0 %10703 }
 0x1cb   : > { %v13783_v8 = vunpack.i.h.bf16 %v11999_v4  ;;  %v10700_v27 = vunpack.i.l.bf16 %v11999_v4  ;;  %v10706_v28 = vunpack.i.h.bf16 %v10704_v5  ;;  %v10705_v31 = vunpack.i.l.bf16 %v10704_v5 }
 0x1cd   : > { %v951_v34 = vsel %vm13790_vm5, %v10695_v59, %v10700_v27  ;;  %v952_v40 = vsel %vm13790_vm5, %v10696_v58, %v13783_v8  ;;  %v954_v55 = vsel %vm13790_vm5, %v10705_v31, %v10695_v59  ;;  %v955_v57 = vsel %vm13790_vm5, %v10706_v28, %v10696_v58 }
 0x1ce   : > { %v10709_v3 = vpop.permute.xlu1 %10708  ;;  %v907_v49 = vpop.permute.xlu0 %906  ;;  %v9013_v6 = vpack.c.bf16 %v952_v40, %v951_v34  ;;  %v9015_v14 = vpack.c.bf16 %v955_v57, %v954_v55 }
 0x1cf   : > { %v10711_v62 = vunpack.i.h.bf16 %v10709_v3  ;;  %v10710_v25 = vunpack.i.l.bf16 %v10709_v3 }
 0x1d0   : > { %9014 = vmatprep.subr.bf16.mxu1 %v9013_v6 }
 0x1d1   : > { %9016 = vmatpush1.bf16.msra.mxu1 %v9015_v14  ;;  %v957_v35 = vsel %vm13790_vm5, %v10710_v25, %v10705_v31  ;;  %v958_v45 = vsel %vm13790_vm5, %v10711_v62, %v10706_v28  ;;  %v12026_v31 = vld [vmem:[%s13738_s1] sm:$0xff] }
 0x1d2   : > { %v12017_v5 = vpop.permute.xlu1 %912  ;;  %v10714_v59 = vpop.permute.xlu0 %10713  ;;  %v9008_v21 = vpack.c.bf16 %v958_v45, %v957_v35  ;;  %v13935_v35 = vmov 0 }
 0x1d3   : > { %v953_v58 = vsel %vm13790_vm5, %v907_v49, %v12017_v5  ;;  %v10716_v34 = vunpack.i.h.bf16 %v10714_v59  ;;  %v10715_v28 = vunpack.i.l.bf16 %v10714_v59  ;;  %v13936_v35 = vsel %vm12037_vm13, 4294967295, %v13935_v35 }
 0x1d4   : > { %9009 = vmatprep.subr.bf16.mxu0 %v9008_v21  ;;  %1196 = vmatprep.subr.mxu1 %v953_v58  ;;  %13937 = vst [vmem:[#allocation40_spill] sm:$0xff] %v13936_v35 }
 0x1d6   : > { %v10719_v40 = vpop.permute.xlu1 %10718  ;;  %v901_v55 = vpop.permute.xlu0 %900 }
 0x1d7   : > { %v10721_v57 = vunpack.i.h.bf16 %v10719_v40  ;;  %v10720_v3 = vunpack.i.l.bf16 %v10719_v40  ;;  %v956_v6 = vsel %vm13790_vm5, %v901_v55, %v907_v49 }
 0x1d8   : > { %1197 = vmatpush1.msra.mxu1 %v956_v6 }
 0x1d9   : > { %v960_v21 = vsel %vm13790_vm5, %v10720_v3, %v10710_v25  ;;  %v961_v14 = vsel %vm13790_vm5, %v10721_v57, %v10711_v62  ;;  %v939_v45 = vsel %vm13790_vm5, %v10715_v28, %v10720_v3  ;;  %v940_v49 = vsel %vm13790_vm5, %v10716_v34, %v10721_v57  ;;  %8650 = vmatmul.mubr.msk.f32.vlgmr.msra.gmra.mrb[0].mxu1 %vm13786_vm0, %v12026_v31 }
 0x1da   : > { %v10724_v25 = vpop.permute.xlu1 %10723  ;;  %v895_v59 = vpop.permute.xlu0 %894  ;;  %v9010_v58 = vpack.c.bf16 %v961_v14, %v960_v21  ;;  %v9021_v62 = vpack.c.bf16 %v940_v49, %v939_v45  ;;  %1398 = vmatprep.mubr.f32.mxu1 %v13784_v0  ;;  %vm13793_vm0 = vmmov 1  }
 0x1db   : > { %v10726_v40 = vunpack.i.h.bf16 %v10724_v25  ;;  %v10725_v6 = vunpack.i.l.bf16 %v10724_v25  ;;  %v959_v8 = vsel %vm13790_vm5, %v895_v59, %v901_v55  ;;  %vm12075_vm14 = vmpackc.low %vm13793_vm0, %vm11758_vm2  ;;  %vm13944_vm2 = vcmask 195584  }
 0x1dc   : > { %9012 = vmatpush1.bf16.msk.msra.mxu0 %vm12037_vm13, %v9010_v58  ;;  %9022 = vmatprep.subr.bf16.mxu1 %v9021_v62  ;;  %vm13941_vm13 = vcmp.ge.s32.totalorder %v11725_v22, 32 }
 0x1dd   : > { %v942_v57 = vsel %vm13790_vm5, %v10725_v6, %v10715_v28  ;;  %v943_v3 = vsel %vm13790_vm5, %v10726_v40, %v10716_v34  ;;  %1125 = vmatprep.subr.mxu0 %v959_v8  ;;  %v13938_v28 = vunpack.i.h.bf16 %v11999_v4  ;;  %v9031_v4 = vpack.c.bf16 %v11698_v17, %v11787_v52 }
 0x1de   : > { %v10729_v21 = vpop.permute.xlu1 %10728  ;;  %v931_v14 = vpop.permute.xlu0 %930  ;;  %v9023_v45 = vpack.c.bf16 %v943_v3, %v942_v57  ;;  %v9025_v52 = vpack.c.bf16 %v11694_v15, %v11791_v53 }
 0x1df   : > { %v10731_v49 = vunpack.i.h.bf16 %v10729_v21  ;;  %v10730_v0 = vunpack.i.l.bf16 %v10729_v21  ;;  %v9034_v21 = vpack.c.bf16 %v11680_v9, %v11750_v38  ;;  %v13947_v9 = vmov 0.0  }
 0x1e0   : > { %9024 = vmatpush1.bf16.msra.mxu1 %v9023_v45  ;;  %v13949_v38 = vmov 0 }
 0x1e1   : > { %v945_v55 = vsel %vm13790_vm5, %v10730_v0, %v10725_v6  ;;  %v946_v25 = vsel %vm13790_vm5, %v10731_v49, %v10726_v40  ;;  %v948_v58 = vsel %vm13790_vm5, %v10700_v27, %v10730_v0  ;;  %v949_v8 = vsel %vm13790_vm5, %v13938_v28, %v10731_v49  ;;  %v12142_v28 = vld [vmem:[%s13738_s1 + $0x8] sm:$0xff] }
 0x1e2   : > { %v937_v34 = vpop.permute.xlu1 %936  ;;  %v925_v62 = vpop.permute.xlu0 %924  ;;  %v9017_v57 = vpack.c.bf16 %v946_v25, %v945_v55  ;;  %v13939_v0 = vmov 0  ;;  %v9019_v27 = vpack.c.bf16 %v949_v8, %v948_v58  ;;  %v9043_v58 = vpack.c.bf16 %v11690_v13, %v11864_v23 }
 0x1e3   : > { %v962_v3 = vsel %vm13790_vm5, %v937_v34, %v895_v59  ;;  %v941_v6 = vsel %vm13790_vm5, %v931_v14, %v937_v34  ;;  %v944_v40 = vsel %vm13790_vm5, %v925_v62, %v931_v14  ;;  %v13940_v0 = vsel %vm12075_vm14, 4294967295, %v13939_v0  ;;  %vm12086_vm5 = vmpackc.low %vm13793_vm0, %vm11737_vm1 }
 0x1e4   : > { %8648 = vmatpush1.msk.msra.mxu0 %vm13941_vm13, %v962_v3  ;;  %1338 = vmatprep.subr.mxu1 %v941_v6  ;;  %v13942_v59 = vmov 0  ;;  %vm13945_vm13 = vmmov %vm13944_vm2  ;;  %vm13946_vm0 = vcmp.lt.s32.totalorder %v11725_v22, 32  ;;  %v9028_v13 = vpack.c.bf16 %v11696_v16, %v11795_v54  ;;  %v9046_v23 = vpack.c.bf16 %v11682_v10, %v11833_v2 }
 0x1e5   : > { %9018 = vmatprep.subr.bf16.mxu0 %v9017_v57  ;;  %1339 = vmatpush1.msra.mxu1 %v944_v40  ;;  %v13943_v59 = vsel %vm12086_vm5, 4294967295, %v13942_v59  ;;  %v13955_v8 = vmov 0  ;;  %v9037_v57 = vpack.c.bf16 %v11686_v11, %v11890_v39 }
 0x1e6   : > { %v919_v14 = vpop.permute.xlu1 %918  ;;  %v10734_v45 = vpop.permute.xlu0 %10733  ;;  %8649 = vmatmul.mubr.msk.f32.vlgmr.msra.gmra.mrb[0].mxu0 %vm13944_vm2, %v12026_v31  ;;  %9033 = vmatprep.subr.msk.bf16.mxu1 %vm12075_vm14, %v9031_v4  ;;  %vm13948_vm2 = vmmov 1  }
 0x1e7   : > { %9020 = vmatpush1.bf16.msra.mxu0 %v9019_v27  ;;  %8652 = vmatmul.mubr.msk.f32.vlgmr.msra.gmra.mrb[2].mxu1 %vm13945_vm13, %v12026_v31  ;;  %v947_v17 = vsel %vm13946_vm0, %v919_v14, %v925_v62  ;;  %vm12109_vm1 = vmpackc.low %vm13948_vm2, %vm11767_vm3  ;;  %v950_v25 = vsel %vm13946_vm0, %v12017_v5, %v919_v14  ;;  %v13953_v5 = vmov 0  ;;  %v10736_v34 = vunpack.i.h.bf16 %v10734_v45 }
 0x1e8   : > { %9036 = vmatpush1.bf16.msk.msra.mxu1 %vm12086_vm5, %v9034_v21  ;;  %1267 = vmatprep.subr.mxu0 %v947_v17  ;;  %v13950_v38 = vsel %vm12109_vm1, 4294967295, %v13949_v38  ;;  %vm12124_vm13 = vmpackc.low %vm13948_vm2, %vm11850_vm9  ;;  %v10735_v62 = vunpack.i.l.bf16 %v10734_v45  ;;  %vm13957_vm9 = vcmask 195584   ;;  %v13965_v21 = vmov 0 }
 0x1e9   : > { %8661 = vmatprep.subr.msk.mxu1 %vm11838_vm8, %v11860_v20  ;;  %1327 = vmatprep.mubr.f32.mxu0 %v13947_v9  ;;  %v13951_v20 = vmov 0  ;;  %vm12135_vm0 = vmpackc.low %vm13948_vm2, %vm11774_vm4  ;;  %v9040_v45 = vpack.c.bf16 %v11688_v12, %v11917_v51 }
 0x1ea   : > { %v12115_v49 = vpop.permute.xlu1 %10738  ;;  %v10744_v55 = vpop.permute.xlu0 %10743  ;;  %1553 = vmatprep.mubr.f32.mxu1 %v13947_v9  ;;  %v13952_v20 = vsel %vm12124_vm13, 4294967295, %v13951_v20  ;;  %v13954_v5 = vsel %vm12135_vm0, 4294967295, %v13953_v5  ;;  %vm12157_vm4 = vmpackc.low %vm13948_vm2, %vm11827_vm7 }
 0x1eb   : > { %v10741_v15 = vunpack.i.h.bf16 %v12115_v49  ;;  %v10740_v53 = vunpack.i.l.bf16 %v12115_v49  ;;  %1268 = vmatpush1.msra.mxu0 %v950_v25  ;;  %v13956_v8 = vsel %vm12157_vm4, 4294967295, %v13955_v8  ;;  %v10746_v16 = vunpack.i.h.bf16 %v10744_v55 }
 0x1ec   : > { %9027 = vmatprep.subr.msk.bf16.mxu0 %vm12109_vm1, %v9025_v52  ;;  %8662 = vmatpush1.msk.msra.mxu1 %vm11810_vm6, %v11825_v63  ;;  %v10745_v54 = vunpack.i.l.bf16 %v10744_v55  ;;  %vm13958_vm6 = vmmov %vm13957_vm9 }
 0x1ed   : > { %8651 = vmatmul.mubr.msk.f32.vlgmr.msra.gmra.mrb[2].mxu0 %vm13957_vm9, %v12026_v31  ;;  %9045 = vmatprep.subr.msk.bf16.mxu1 %vm12124_vm13, %v9043_v58  ;;  %vm13959_vm9 = vcmp.lt.s32.totalorder %v11725_v22, 96 }
 0x1ee   : > { %9030 = vmatpush1.bf16.msk.msra.mxu0 %vm12135_vm0, %v9028_v13  ;;  %8663 = vmatmul.mubr.msk.f32.vlgmr.msra.gmra.mrb[0].mxu1 %vm13958_vm6, %v12142_v28  ;;  %v10749_v10 = vpop.permute.xlu1 %10748  ;;  %v10754_v63 = vpop.permute.xlu0 %10753  ;;  %v1061_v2 = vsel %vm13959_vm9, %v10735_v62, %v10740_v53  ;;  %vm13960_vm7 = vmmov %vm13959_vm9 }
 0x1ef   : > { %8656 = vmatprep.subr.msk.mxu0 %vm11873_vm10, %v11882_v36  ;;  %9048 = vmatpush1.bf16.msk.msra.mxu1 %vm12157_vm4, %v9046_v23  ;;  %v1062_v31 = vsel %vm13960_vm7, %v10736_v34, %v10741_v15  ;;  %vm12191_vm6 = vmpackc.low %vm13948_vm2, %vm11884_vm11  ;;  %v13961_v36 = vmov 0  ;;  %v1065_v6 = vsel %vm13960_vm7, %v10746_v16, %v10736_v34  ;;  %v10756_v11 = vunpack.i.h.bf16 %v10754_v63 }
 0x1f0   : > { %8671 = vmatprep.subr.msk.mxu1 %vm11940_vm15, %v11952_v30  ;;  %1482 = vmatprep.mubr.f32.mxu0 %v13947_v9  ;;  %v13962_v36 = vsel %vm12191_vm6, 4294967295, %v13961_v36  ;;  %vm13963_vm9 = vmmov %vm13960_vm7  ;;  %v10755_v39 = vunpack.i.l.bf16 %v10754_v63  ;;  %v10751_v30 = vunpack.i.h.bf16 %v10749_v10  ;;  %v10750_v40 = vunpack.i.l.bf16 %v10749_v10 }
 0x1f1   : > { %v1064_v3 = vsel %vm13963_vm9, %v10745_v54, %v10735_v62  ;;  %1695 = vmatprep.mubr.f32.mxu1 %v13947_v9  ;;  %vm13964_vm11 = vnez %v13924_v47  ;;  %v9053_v14 = vpack.c.bf16 %v1062_v31, %v1061_v2  ;;  %vm13967_vm7 = vnez %v13927_v56 }
 0x1f2   : > { %8657 = vmatpush1.msk.msra.mxu0 %vm11901_vm12, %v11909_v43  ;;  %v1026_v4 = vpop.permute.xlu1 %1025  ;;  %v12203_v27 = vpop.permute.xlu0 %1031  ;;  %vm12208_vm9 = vmpackc.low %vm13948_vm2, %vm13964_vm11  ;;  %vm13968_vm15 = vcmask 195584   ;;  %v9055_v43 = vpack.c.bf16 %v1065_v6, %v1064_v3  ;;  %vm13969_vm2 = vcmp.lt.s32.totalorder %v11725_v22, 96  ;;  %v13979_v10 = vmov 0 }
 0x1f3   : > { %v13966_v21 = vsel %vm12208_vm9, 4294967295, %v13965_v21  ;;  %9039 = vmatprep.subr.msk.bf16.mxu0 %vm12191_vm6, %v9037_v57  ;;  %8672 = vmatpush1.msk.msra.mxu1 %vm13967_vm7, %v11926_v61  ;;  %v1063_v17 = vsel %vm13969_vm2, %v1026_v4, %v12203_v27  ;;  %vm13970_vm11 = vmmov %vm13968_vm15 }
 0x1f4   : > { %8658 = vmatmul.mubr.msk.f32.vlgmr.msra.gmra.mrb[0].mxu0 %vm13968_vm15, %v12142_v28  ;;  %9054 = vmatprep.subr.bf16.mxu1 %v9053_v14  ;;  %vm13971_vm4 = vmmov %vm13969_vm2 }
 0x1f5   : > { %9042 = vmatpush1.bf16.msk.msra.mxu0 %vm12208_vm9, %v9040_v45  ;;  %8673 = vmatmul.mubr.msk.f32.vlgmr.msra.gmra.mrb[2].mxu1 %vm13970_vm11, %v12142_v28  ;;  %v1067_v12 = vsel %vm13971_vm4, %v10755_v39, %v10745_v54  ;;  %vm13972_vm7 = vmmov %vm13969_vm2  ;;  %vm13813_vm11 = vcmp.lt.s32.totalorder %v11780_v50, 992  ;;  %v8674_v54 = vld [vmem:[%s13738_s1 + $0x10] sm:$0xff] }
 0x1f6   : > { %v1068_v51 = vsel %vm13972_vm7, %v10756_v11, %v10746_v16  ;;  %vm13973_vm15 = vmmov %vm13969_vm2  ;;  %9056 = vmatpush1.bf16.msra.mxu1 %v9055_v43  ;;  %v10759_v55 = vpop.permute.xlu1 %10758  ;;  %v1020_v25 = vpop.permute.xlu0 %1019  ;;  %1624 = vmatprep.mubr.f32.mxu0 %v13947_v9 }
 0x1f7   : > { %v1071_v61 = vsel %vm13973_vm15, %v10751_v30, %v10756_v11  ;;  %vm13974_vm13 = vmmov %vm13969_vm2  ;;  %vm13975_vm2 = vnez %v13931_v26  ;;  %1790 = vmatprep.subr.mxu1 %v1063_v17  ;;  %v10761_v58 = vunpack.i.h.bf16 %v10759_v55  ;;  %v10760_v13 = vunpack.i.l.bf16 %v10759_v55  ;;  %1850 = vmatprep.mubr.f32.mxu1 %v13947_v9 }
 0x1f8   : > { %v1070_v52 = vsel %vm13974_vm13, %v10750_v40, %v10755_v39  ;;  %8666 = vmatprep.subr.msk.mxu0 %vm13975_vm2, %v11956_v41  ;;  %v9049_v23 = vpack.c.bf16 %v1068_v51, %v1067_v12  ;;  %v1066_v34 = vsel %vm13971_vm4, %v1020_v25, %v1026_v4  ;;  %vm13976_vm13 = vmmov %vm13971_vm4  ;;  %vm13978_vm15 = vnez %v13933_v44 }
 0x1f9   : > { %v1073_v62 = vsel %vm13976_vm13, %v10760_v13, %v10750_v40  ;;  %vm13977_vm7 = vmmov %vm13971_vm4  ;;  %8667 = vmatpush1.msk.msra.mxu0 %vm13978_vm15, %v11972_v29  ;;  %v9051_v16 = vpack.c.bf16 %v1071_v61, %v1070_v52  ;;  %vm13982_vm13 = vcmask 195584  }
 0x1fa   : > { %v1074_v41 = vsel %vm13977_vm7, %v10761_v58, %v10751_v30  ;;  %vm12257_vm4 = vmpackc.low %vm13813_vm11, %vm13813_vm11  ;;  %9050 = vmatprep.subr.bf16.mxu0 %v9049_v23  ;;  %8668 = vmatmul.mubr.msk.f32.vlgmr.msra.gmra.mrb[2].mxu0 %vm13982_vm13, %v12142_v28  ;;  %v10764_v63 = vpop.permute.xlu1 %10763  ;;  %v1008_v2 = vpop.permute.xlu0 %1007  ;;  %vm13984_vm11 = vcmp.lt.s32.totalorder %v11725_v22, 96  ;;  %v787_v23 = vld [vmem:[%s13740_s3 + $0x18] sm:$0xff] }
 0x1fb   : > { %v13980_v10 = vsel %vm12257_vm4, 4294967295, %v13979_v10  ;;  %v9061_v31 = vpack.c.bf16 %v1074_v41, %v1073_v62  ;;  %9052 = vmatpush1.bf16.msra.mxu0 %v9051_v16  ;;  %1791 = vmatpush1.msra.mxu1 %v1066_v34  ;;  %v10766_v29 = vunpack.i.h.bf16 %v10764_v63  ;;  %v10765_v57 = vunpack.i.l.bf16 %v10764_v63  ;;  %vm13983_vm7 = vmmov %vm13982_vm13 }
 0x1fc   : > { %13981 = vst [vmem:[#allocation41_spill] sm:$0xff] %v13980_v10  ;;  %8676 = vmatmul.mubr.msk.f32.vlgmr.msra.gmra.mrb[0].mxu1 %vm13983_vm7, %v8674_v54  ;;  %vm13985_vm15 = vmmov %vm13984_vm11  ;;  %1779 = vmatprep.mubr.f32.mxu0 %v13947_v9 }
 0x1fd   : > { %9063 = vmatprep.subr.msk.bf16.mxu1 %vm12257_vm4, %v9061_v31  ;;  %v1052_v3 = vsel %vm13984_vm11, %v10765_v57, %v10760_v13  ;;  %v1053_v6 = vsel %vm13985_vm15, %v10766_v29, %v10761_v58  ;;  %1992 = vmatprep.mubr.f32.mxu1 %v13947_v9  ;;  %vm13986_vm13 = vmmov %vm13984_vm11  ;;  %v786_v13 = vld [vmem:[%s13740_s3 + $0x10] sm:$0xff] }
 0x1fe   : > { %v1014_v28 = vpop.permute.xlu1 %1013  ;;  %v10769_v11 = vpop.permute.xlu0 %10768  ;;  %v9064_v39 = vpack.c.bf16 %v1053_v6, %v1052_v3  ;;  %vm13987_vm7 = vmmov %vm13984_vm11 }
 0x1ff   : > { %v10771_v30 = vunpack.i.h.bf16 %v10769_v11  ;;  %v10770_v40 = vunpack.i.l.bf16 %v10769_v11  ;;  %v1069_v4 = vsel %vm13986_vm13, %v1014_v28, %v1020_v25  ;;  %v1072_v14 = vsel %vm13987_vm7, %v1008_v2, %v1014_v28  ;;  %vm13988_vm11 = vmmov %vm13987_vm7  ;;  %v790_v28 = vld [vmem:[%s13740_s3 + $0x30] sm:$0xff] }
 0x200   : > { %1719 = vmatprep.subr.mxu0 %v1069_v4  ;;  %9065 = vmatpush1.bf16.msra.mxu1 %v9064_v39  ;;  %vm13989_vm15 = vmmov %vm13987_vm7  ;;  %v791_v39 = vld [vmem:[%s13740_s3 + $0x38] sm:$0xff] }
 0x201   : > { %v1059_v45 = vsel %vm13988_vm11, %v10741_v15, %v10771_v30  ;;  %v1058_v43 = vsel %vm13989_vm15, %v10740_v53, %v10770_v40  ;;  %1720 = vmatpush1.msra.mxu0 %v1072_v14  ;;  %vm13990_vm4 = vmmov %vm13987_vm7  ;;  %vm13992_vm7 = vcmask 195584  }
 0x202   : > { %v1055_v17 = vsel %vm13990_vm4, %v10770_v40, %v10765_v57  ;;  %vm13991_vm13 = vmmov %vm13990_vm4  ;;  %v1050_v51 = vpop.permute.xlu1 %1049  ;;  %v1044_v61 = vpop.permute.xlu0 %1043  ;;  %8675 = vmatmul.mubr.msk.f32.vlgmr.msra.gmra.mrb[0].mxu0 %vm13992_vm7, %v8674_v54  ;;  %v9059_v55 = vpack.c.bf16 %v1059_v45, %v1058_v43  ;;  %v788_v43 = vld [vmem:[%s13740_s3 + $0x20] sm:$0xff] }
 0x203   : > { %v1056_v12 = vsel %vm13991_vm13, %v10771_v30, %v10766_v29  ;;  %vm13993_vm11 = vmmov %vm13990_vm4  ;;  %1921 = vmatprep.mubr.f32.mxu0 %v13947_v9 }
 0x204   : > { %v9057_v52 = vpack.c.bf16 %v1056_v12, %v1055_v17  ;;  %v1075_v15 = vsel %vm13993_vm11, %v1050_v51, %v1008_v2  ;;  %vm13994_vm2 = vmmov %vm13990_vm4  ;;  %vm13995_vm4 = vcmp.lt.s32.totalorder %v11780_v50, 992  ;;  %v785_v2 = vld [vmem:[%s13740_s3 + $0x8] sm:$0xff]  ;;  %vm14000_vm11 = vcmp.lt.s32.totalorder %v11725_v22, 1 }
 0x205   : > { %v1054_v49 = vsel %vm13994_vm2, %v1044_v61, %v1050_v51  ;;  %8680 = vmatprep.subr.msk.mxu1 %vm13995_vm4, %v1075_v15  ;;  %vm13996_vm15 = vmmov %vm13992_vm7  ;;  %v789_v51 = vld [vmem:[%s13740_s3 + $0x28] sm:$0xff] }
 0x206   : > { %9058 = vmatprep.subr.bf16.mxu0 %v9057_v52  ;;  %1933 = vmatpush1.msra.mxu1 %v1054_v49  ;;  %v1038_v53 = vpop.permute.xlu1 %1037  ;;  %vm13997_vm13 = vmmov %vm13994_vm2 }
 0x207   : > { %9060 = vmatpush1.bf16.msra.mxu0 %v9059_v55  ;;  %8681 = vmatmul.mubr.msk.f32.vlgmr.msra.gmra.mrb[2].mxu1 %vm13996_vm15, %v8674_v54  ;;  %v1057_v25 = vsel %vm13997_vm13, %v1038_v53, %v1044_v61  ;;  %vm13998_vm7 = vmmov %vm13994_vm2  ;;  %vm14003_vm13 = vnez %v13894_v33 }
 0x208   : > { %v1060_v58 = vsel %vm13998_vm7, %v12203_v27, %v1038_v53  ;;  %2412 = vmatprep.mubr.f32.mxu1 %v13947_v9  ;;  %1861 = vmatprep.subr.mxu0 %v1057_v25  ;;  %vm13999_vm2 = vmmov %vm13996_vm15  ;;  %vm14004_vm7 = vnez %v13897_v42 }
 0x209   : > { %vm14001_vm4 = vmmov %vm14000_vm11 }
 0x20a   : > { %vm14002_vm15 = vmmov %vm14001_vm4 }
 0x20b   : > { %1862 = vmatpush1.msra.mxu0 %v1060_v58 }
 0x20c   : > { %8677 = vmatmul.mubr.msk.f32.vlgmr.msra.gmra.mrb[2].mxu0 %vm13999_vm2, %v8674_v54  ;;  %v784_v54 = vld [vmem:[%s13740_s3] sm:$0xff]  ;;  %vm14005_vm2 = vmmov %vm14001_vm4 }
 0x20d   : > { %2341 = vmatprep.mubr.f32.mxu0 %v13947_v9 }
 0x2cf   : > { %v1852_v34 = vpop.f32.mrb[0].mxu1 }
 0x2d0   : > { %v10458_v62 = vadd.f32 %v1852_v34, %v786_v13  ;;  %v1854_v41 = vpop.f32.mrb[1].mxu1 }
 0x2d1   : > { %v10459_v27 = vadd.f32 %v1854_v41, %v787_v23 }
 0x2d2   : > { %v12311_v16 = vmax.f32 %v10458_v62, 0.0 }
 0x2d3   : > { %v12313_v63 = vmax.f32 %v10459_v27, 0.0 }
 0x2d5   : > { %v10777_v31 = vpack.i.bf16 %v12313_v63, %v12311_v16  ;;  %v1781_v29 = vpop.f32.mrb[0].mxu0 }
 0x2d6   : > { %v10456_v57 = vadd.f32 %v1781_v29, %v784_v54  ;;  %v1783_v3 = vpop.f32.mrb[1].mxu0 }
 0x2d7   : > { %10778 = vrot.lane.b32.xlu1 %v10777_v31, %s11345_s11  ;;  %v10457_v6 = vadd.f32 %v1783_v3, %v785_v2 }
 0x2d8   : > { %v12327_v11 = vmax.f32 %v10456_v57, 0.0 }
 0x2d9   : > { %v2008_v30 = vmax.f32 %v10457_v6, 0.0 }
 0x2da   : > { %v1994_v40 = vpop.f32.mrb[2].mxu1  ;;  %2047 = vrot.lane.b32.xlu0 %v12327_v11, %s11344_s8 }
 0x2db   : > { %v10462_v4 = vadd.f32 %v1994_v40, %v790_v28  ;;  %v1996_v14 = vpop.f32.mrb[3].mxu1  ;;  %2049 = vrot.lane.b32.xlu1 %v2008_v30, %s11344_s8  ;;  %v10772_v17 = vpack.i.bf16 %v2008_v30, %v12327_v11 }
 0x2dc   : > { %v10463_v45 = vadd.f32 %v1996_v14, %v791_v39 }
 0x2dd   : > { %v12339_v12 = vmax.f32 %v10462_v4, 0.0 }
 0x2de   : > { %v12344_v61 = vmax.f32 %v10463_v45, 0.0  ;;  %10773 = vrot.lane.b32.xlu0 %v10772_v17, %s11345_s11 }
 0x2df   : > { %v1923_v52 = vpop.f32.mrb[2].mxu0  ;;  %2053 = vrot.lane.b32.xlu1 %v12313_v63, %s11344_s8 }
 0x2e0   : > { %v10460_v55 = vadd.f32 %v1923_v52, %v788_v43  ;;  %v1925_v15 = vpop.f32.mrb[3].mxu0  ;;  %v10782_v53 = vpack.i.bf16 %v12339_v12, %v12344_v61 }
 0x2e1   : > { %v10461_v49 = vadd.f32 %v1925_v15, %v789_v51 }
 0x2e2   : > { %v12351_v25 = vmax.f32 %v10460_v55, 0.0  ;;  %10783 = vrot.lane.b32.xlu0 %v10782_v53, %s11345_s11 }
 0x2e3   : > { %v12353_v58 = vmax.f32 %v10461_v49, 0.0 }
 0x2e5   : > { %v10787_v13 = vpack.i.bf16 %v12353_v58, %v12351_v25 }
 0x2e6   : > { %2051 = vrot.lane.b32.xlu0 %v12311_v16, %s11344_s8 }
 0x2e7   : > { %10788 = vrot.lane.b32.xlu1 %v10787_v13, %s11345_s11 }
 0x2ea   : > { %2055 = vrot.lane.b32.xlu0 %v12351_v25, %s11344_s8 }
 0x2eb   : > { %2061 = vrot.lane.b32.xlu1 %v12344_v61, %s11344_s8 }
 0x2ee   : > { %2057 = vrot.lane.b32.xlu0 %v12353_v58, %s11344_s8 }
 0x2ef   : > { %2059 = vrot.lane.b32.xlu1 %v12339_v12, %s11344_s8 }
 0x349   : > { %v10779_v23 = vpop.permute.xlu1 %10778 }
 0x34a   : > { %v10781_v34 = vunpack.i.h.bf16 %v10779_v23  ;;  %v10780_v62 = vunpack.i.l.bf16 %v10779_v23 }
 0x34c   : > { %v2035_v41 = vsel %vm14000_vm11, %v10780_v62, %v10781_v34  ;;  %v12371_v27 = vpop.permute.xlu0 %2047  ;;  %vm14006_vm11 = vcmp.lt.s32.totalorder %v11725_v22, 127 }
 0x34d   : > { %v9072_v54 = vpack.c.bf16 %v12313_v63, %v2035_v41  ;;  %v2050_v2 = vpop.permute.xlu1 %2049  ;;  %v2042_v52 = vsel %vm14004_vm7, %v2035_v41, 0.0 }
 0x34e   : > { %v10802_v23 = vpack.i.bf16 %v12313_v63, %v2042_v52 }
 0x34f   : > { %9074 = vmatprep.subr.msk.bf16.mxu1 %vm12075_vm14, %v9072_v54  ;;  %vm14030_vm14 = vnez %v13909_v1 }
 0x350   : > { %v10774_v31 = vpop.permute.xlu0 %10773 }
 0x351   : > { %v10776_v29 = vunpack.i.h.bf16 %v10774_v31  ;;  %v10775_v57 = vunpack.i.l.bf16 %v10774_v31  ;;  %v2054_v28 = vpop.permute.xlu1 %2053 }
 0x353   : > { %v2036_v3 = vsel %vm14001_vm4, %v10776_v29, %v10780_v62  ;;  %v2037_v6 = vsel %vm14002_vm15, %v10775_v57, %v10776_v29  ;;  %vm14007_vm4 = vmmov %vm14006_vm11 }
 0x354   : > { %v9075_v39 = vpack.c.bf16 %v12311_v16, %v2036_v3  ;;  %v10784_v40 = vpop.permute.xlu0 %10783  ;;  %v9066_v4 = vpack.c.bf16 %v2008_v30, %v2037_v6  ;;  %v2040_v14 = vsel %vm11767_vm3, %v2037_v6, 0.0  ;;  %v2041_v45 = vsel %vm14003_vm13, %v2036_v3, 0.0  ;;  %vm14008_vm15 = vmmov %vm14005_vm2 }
 0x355   : > { %v10785_v43 = vunpack.i.l.bf16 %v10784_v40  ;;  %v10792_v17 = vpack.i.bf16 %v2008_v30, %v2040_v14  ;;  %v12386_v51 = vpack.i.bf16 %v12311_v16, %v2041_v45  ;;  %v10786_v16 = vunpack.i.h.bf16 %v10784_v40 }
 0x356   : > { %9068 = vmatprep.subr.msk.bf16.mxu0 %vm12109_vm1, %v9066_v4  ;;  %9077 = vmatpush1.bf16.msk.msra.mxu1 %vm12086_vm5, %v9075_v39  ;;  %v2069_v54 = vsel %vm14007_vm4, %v12371_v27, %v2050_v2  ;;  %vm14016_vm1 = vnez %v13956_v8  ;;  %vm14029_vm5 = vnez %v13919_v37 }
 0x357   : > { %v12396_v55 = vsel %vm14005_vm2, %v10785_v43, %v10775_v57  ;;  %10793 = vrot.lane.b32.xlu1 %v10792_v17, %s11346_s15  ;;  %10798 = vrot.lane.b32.xlu0 %v12386_v51, %s11346_s15  ;;  %v2031_v29 = vsel %vm14005_vm2, %v10786_v16, %v10785_v43  ;;  %v12435_v39 = vsel %vm11901_vm12, %v2069_v54, 0.0 }
 0x358   : > { %v9069_v30 = vpack.c.bf16 %v12327_v11, %v12396_v55  ;;  %v2052_v13 = vpop.permute.xlu0 %2051  ;;  %v9084_v45 = vpack.c.bf16 %v12344_v61, %v2031_v29 }
 0x359   : > { %v10789_v15 = vpop.permute.xlu1 %10788  ;;  %v2068_v62 = vsel %vm14006_vm11, %v2050_v2, %v2052_v13  ;;  %vm14009_vm11 = vmmov %vm14005_vm2 }
 0x35a   : > { %v10791_v49 = vunpack.i.h.bf16 %v10789_v15  ;;  %v10790_v53 = vunpack.i.l.bf16 %v10789_v15  ;;  %9071 = vmatpush1.bf16.msk.msra.mxu0 %vm12135_vm0, %v9069_v30  ;;  %v2072_v41 = vsel %vm11873_vm10, %v2068_v62, 0.0 }
 0x35b   : > { %10803 = vrot.lane.b32.xlu1 %v10802_v23, %s11346_s15  ;;  %2089 = vrot.lane.b32.xlu0 %v2072_v41, %s11346_s15 }
 0x35c   : > { %v12415_v31 = vsel %vm14008_vm15, %v10790_v53, %v10791_v49  ;;  %8685 = vmatprep.subr.msk.mxu0 %vm11873_vm10, %v2068_v62  ;;  %v2056_v57 = vpop.permute.xlu0 %2055  ;;  %v2034_v3 = vsel %vm14009_vm11, %v10781_v34, %v10790_v53  ;;  %vm14010_vm15 = vmmov %vm14005_vm2  ;;  %v8682_v34 = vld [vmem:[%s13739_s2 + $0x8] sm:$0xff]  ;;  %vm14012_vm11 = vnez %v13907_v60 }
 0x35d   : > { %v2062_v63 = vpop.permute.xlu1 %2061  ;;  %v2066_v2 = vsel %vm14007_vm4, %v2054_v28, %v2056_v57  ;;  %v2032_v6 = vsel %vm14010_vm15, %v10791_v49, %v10786_v16  ;;  %v9078_v40 = vpack.c.bf16 %v12353_v58, %v12415_v31  ;;  %vm14011_vm2 = vmmov %vm14007_vm4  ;;  %v9081_v43 = vpack.c.bf16 %v12351_v25, %v2034_v3 }
 0x35e   : > { %8686 = vmatpush1.msk.msra.mxu0 %vm11901_vm12, %v2069_v54  ;;  %8690 = vmatprep.subr.msk.mxu1 %vm11838_vm8, %v2066_v2  ;;  %v2067_v4 = vsel %vm14011_vm2, %v2052_v13, %v2054_v28  ;;  %v9087_v15 = vpack.c.bf16 %v12339_v12, %v2032_v6  ;;  %vm14013_vm4 = vcmask 195584   ;;  %vm14014_vm15 = vnez %v13952_v20 }
 0x35f   : > { %2083 = vrot.lane.b32.xlu1 %v12435_v39, %s11346_s15  ;;  %10808 = vrot.lane.b32.xlu0 %v10792_v17, %s11347_s22  ;;  %vm14015_vm0 = vmmov %vm14013_vm4  ;;  %v2073_v16 = vsel %vm14012_vm11, %v2067_v4, 0.0  ;;  %v2044_v54 = vsel %vm14029_vm5, %v12415_v31, 0.0 }
 0x360   : > { %8691 = vmatpush1.msk.msra.mxu1 %vm14012_vm11, %v2067_v4  ;;  %9080 = vmatprep.subr.msk.bf16.mxu0 %vm12191_vm6, %v9078_v40  ;;  %v2058_v52 = vpop.permute.xlu0 %2057  ;;  %vm14017_vm6 = vnez %v13931_v26 }
 0x361   : > { %v2060_v14 = vpop.permute.xlu1 %2059  ;;  %8687 = vmatmul.mubr.msk.f32.vlgmr.msra.gmra.mrb[4].mxu0 %vm14013_vm4, %v8682_v34  ;;  %9086 = vmatprep.subr.msk.bf16.mxu1 %vm14014_vm15, %v9084_v45  ;;  %vm14018_vm4 = vmmov %vm14011_vm2  ;;  %vm14019_vm15 = vnez %v13929_v19 }
 0x362   : > { %v2064_v28 = vsel %vm14011_vm2, %v2058_v52, %v2060_v14  ;;  %9083 = vmatpush1.bf16.msk.msra.mxu0 %vm12208_vm9, %v9081_v43  ;;  %8692 = vmatmul.mubr.msk.f32.vlgmr.msra.gmra.mrb[4].mxu1 %vm14015_vm0, %v8682_v34  ;;  %v2070_v17 = vsel %vm14018_vm4, %v2062_v63, %v12371_v27  ;;  %vm14020_vm0 = vmmov %vm14011_vm2  ;;  %vm14022_vm4 = vnez %v13933_v44  ;;  %vm14023_vm9 = vnez %v13927_v56 }
 0x363   : > { %9089 = vmatpush1.bf16.msk.msra.mxu1 %vm14016_vm1, %v9087_v15  ;;  %8695 = vmatprep.subr.msk.mxu0 %vm14017_vm6, %v2064_v28  ;;  %v2065_v30 = vsel %vm14020_vm0, %v2056_v57, %v2058_v52  ;;  %vm14021_vm2 = vmmov %vm14020_vm0  ;;  %vm14024_vm1 = vcmask 195584   ;;  %v2074_v27 = vsel %vm11838_vm8, %v2066_v2, 0.0  ;;  %v2076_v31 = vsel %vm14017_vm6, %v2064_v28, 0.0 }
 0x364   : > { %8700 = vmatprep.subr.msk.mxu1 %vm14019_vm15, %v2070_v17  ;;  %10818 = vrot.lane.b32.xlu0 %v10802_v23, %s11347_s22  ;;  %v2063_v49 = vsel %vm14021_vm2, %v2060_v14, %v2062_v63  ;;  %vm14025_vm0 = vmmov %vm14024_vm1  ;;  %vm14026_vm2 = vnez %v13903_v48 }
 0x365   : > { %2095 = vrot.lane.b32.xlu1 %v2073_v16, %s11346_s15  ;;  %2554 = vmatprep.mubr.f32.mxu1 %v13947_v9  ;;  %v2039_v53 = vsel %vm14026_vm2, %v12396_v55, 0.0 }
 0x366   : > { %8696 = vmatpush1.msk.msra.mxu0 %vm14022_vm4, %v2065_v30  ;;  %2483 = vmatprep.mubr.f32.mxu0 %v13947_v9 }
 0x367   : > { %8701 = vmatpush1.msk.msra.mxu1 %vm14023_vm9, %v2063_v49  ;;  %8697 = vmatmul.mubr.msk.f32.vlgmr.msra.gmra.mrb[6].mxu0 %vm14024_vm1, %v8682_v34  ;;  %vm14027_vm1 = vnez %v13924_v47 }
 0x368   : > { %2191 = vrot.lane.b32.xlu0 %v2073_v16, %s11347_s22  ;;  %8702 = vmatmul.mubr.msk.f32.vlgmr.msra.gmra.mrb[6].mxu1 %vm14025_vm0, %v8682_v34  ;;  %v2043_v13 = vsel %vm14027_vm1, %v2034_v3, 0.0  ;;  %vm14028_vm0 = vnez %v13914_v18 }
 0x369   : > { %10813 = vrot.lane.b32.xlu1 %v12386_v51, %s11347_s22  ;;  %2628 = vmatprep.mubr.f32.mxu0 %v13947_v9  ;;  %v10832_v51 = vpack.i.bf16 %v12327_v11, %v2039_v53  ;;  %v10822_v23 = vpack.i.bf16 %v12351_v25, %v2043_v13  ;;  %v2046_v62 = vsel %vm14028_vm0, %v2031_v29, 0.0  ;;  %v10842_v11 = vpack.i.bf16 %v12353_v58, %v2044_v54 }
 0x36a   : > { %2699 = vmatprep.mubr.f32.mxu1 %v13947_v9  ;;  %v10837_v55 = vpack.i.bf16 %v12344_v61, %v2046_v62  ;;  %v2045_v25 = vsel %vm14030_vm14, %v2032_v6, 0.0  ;;  %v2078_v61 = vsel %vm14019_vm15, %v2070_v17, 0.0  ;;  %v2075_v58 = vsel %vm14022_vm4, %v2065_v30, 0.0 }
 0x36b   : > { %vm14031_vm4 = vcmp.lt.s32.totalorder %v11725_v22, 32 }
 0x36c   : > { %2101 = vrot.lane.b32.xlu0 %v2074_v27, %s11346_s15  ;;  %vm14032_vm6 = vmmov %vm14031_vm4 }
 0x36d   : > { %2185 = vrot.lane.b32.xlu1 %v2072_v41, %s11347_s22  ;;  %v10847_v41 = vpack.i.bf16 %v12339_v12, %v2045_v25  ;;  %v2077_v12 = vsel %vm14023_vm9, %v2063_v49, 0.0  ;;  %vm14033_vm5 = vmmov %vm14031_vm4 }
 0x36e   : > { %vm14034_vm9 = vmmov %vm14031_vm4 }
 0x370   : > { %10833 = vrot.lane.b32.xlu0 %v10832_v51, %s11346_s15 }
 0x371   : > { %10823 = vrot.lane.b32.xlu1 %v10822_v23, %s11346_s15 }
 0x374   : > { %10838 = vrot.lane.b32.xlu0 %v10837_v55, %s11346_s15 }
 0x375   : > { %10828 = vrot.lane.b32.xlu1 %v10822_v23, %s11347_s22 }
 0x378   : > { %10843 = vrot.lane.b32.xlu0 %v10842_v11, %s11346_s15 }
 0x379   : > { %2197 = vrot.lane.b32.xlu1 %v2074_v27, %s11347_s22 }
 0x37c   : > { %2125 = vrot.lane.b32.xlu0 %v2078_v61, %s11346_s15 }
 0x37d   : > { %10848 = vrot.lane.b32.xlu1 %v10847_v41, %s11346_s15 }
 0x380   : > { %2113 = vrot.lane.b32.xlu0 %v2076_v31, %s11346_s15 }
 0x381   : > { %2107 = vrot.lane.b32.xlu1 %v2075_v58, %s11346_s15 }
 0x384   : > { %10853 = vrot.lane.b32.xlu0 %v10832_v51, %s11347_s22 }
 0x385   : > { %2119 = vrot.lane.b32.xlu1 %v2077_v12, %s11346_s15 }
 0x388   : > { %2203 = vrot.lane.b32.xlu0 %v2075_v58, %s11347_s22 }
 0x389   : > { %10858 = vrot.lane.b32.xlu1 %v10842_v11, %s11347_s22 }
 0x38c   : > { %10863 = vrot.lane.b32.xlu0 %v10847_v41, %s11347_s22 }
 0x38d   : > { %10868 = vrot.lane.b32.xlu1 %v10837_v55, %s11347_s22  ;;  %v12570_v55 = vld [vmem:[%s13739_s2] sm:$0xff] }
 0x390   : > { %2179 = vrot.lane.b32.xlu0 %v12435_v39, %s11347_s22 }
 0x391   : > { %2209 = vrot.lane.b32.xlu1 %v2076_v31, %s11347_s22 }
 0x394   : > { %2215 = vrot.lane.b32.xlu0 %v2077_v12, %s11347_s22 }
 0x395   : > { %2221 = vrot.lane.b32.xlu1 %v2078_v61, %s11347_s22 }
 0x3c9   : > { %v10794_v63 = vpop.permute.xlu1 %10793  ;;  %v10799_v29 = vpop.permute.xlu0 %10798 }
 0x3ca   : > { %v10796_v57 = vunpack.i.h.bf16 %v10794_v63  ;;  %v10795_v3 = vunpack.i.l.bf16 %v10794_v63  ;;  %v10801_v2 = vunpack.i.h.bf16 %v10799_v29  ;;  %v10800_v6 = vunpack.i.l.bf16 %v10799_v29 }
 0x3cc   : > { %v2143_v45 = vsel %vm14031_vm4, %v10796_v57, %v10801_v2  ;;  %v2142_v39 = vsel %vm14032_vm6, %v10795_v3, %v10800_v6  ;;  %vm14036_vm6 = vmmov %vm14031_vm4 }
 0x3cd   : > { %v10804_v40 = vpop.permute.xlu1 %10803  ;;  %v2090_v34 = vpop.permute.xlu0 %2089  ;;  %v9097_v16 = vpack.c.bf16 %v2143_v45, %v2142_v39 }
 0x3ce   : > { %v10806_v4 = vunpack.i.h.bf16 %v10804_v40  ;;  %v10805_v14 = vunpack.i.l.bf16 %v10804_v40 }
 0x3d0   : > { %v2139_v43 = vsel %vm14033_vm5, %v10800_v6, %v10805_v14  ;;  %v2140_v52 = vsel %vm14034_vm9, %v10801_v2, %v10806_v4  ;;  %vm14035_vm5 = vmmov %vm14031_vm4  ;;  %vm14037_vm9 = vcmask 195584  }
 0x3d1   : > { %v2084_v15 = vpop.permute.xlu1 %2083  ;;  %v12550_v28 = vpop.permute.xlu0 %10808  ;;  %v9095_v17 = vpack.c.bf16 %v2140_v52, %v2139_v43 }
 0x3d3   : > { %9096 = vmatprep.subr.bf16.mxu1 %v9095_v17 }
 0x3d4   : > { %9098 = vmatpush1.bf16.msra.mxu1 %v9097_v16 }
 0x3d6   : > { %v12552_v30 = vpop.permute.xlu0 %10818 }
 0x3d7   : > { %v2096_v49 = vpop.permute.xlu1 %2095 }
 0x3d8   : > { %v2144_v62 = vsel %vm14036_vm6, %v2090_v34, %v2096_v49  ;;  %vm14039_vm6 = vmmov %vm14031_vm4 }
 0x3da   : > { %v12554_v27 = vpop.permute.xlu0 %2191 }
 0x3db   : > { %v12556_v53 = vpop.permute.xlu1 %10813 }
 0x3dc   : > { %v10816_v16 = vunpack.i.h.bf16 %v12556_v53 }
 0x3de   : > { %v12558_v13 = vpop.permute.xlu0 %2101 }
 0x3df   : > { %v12560_v51 = vpop.permute.xlu1 %2185  ;;  %v2141_v23 = vsel %vm14035_vm5, %v2096_v49, %v12558_v13  ;;  %vm14038_vm5 = vmmov %vm14031_vm4  ;;  %v10815_v49 = vunpack.i.l.bf16 %v12556_v53 }
 0x3e0   : > { %2639 = vmatprep.subr.mxu1 %v2141_v23  ;;  %v2147_v23 = vsel %vm14038_vm5, %v2084_v15, %v2090_v34  ;;  %vm14044_vm14 = vmmov %vm14038_vm5 }
 0x3e1   : > { %2640 = vmatpush1.msra.mxu1 %v2144_v62  ;;  %vm14045_vm1 = vmmov %vm14038_vm5 }
 0x3e2   : > { %v10834_v54 = vpop.permute.xlu0 %10833  ;;  %8707 = vmatmul.mubr.msk.f32.vlgmr.msra.gmra.mrb[4].mxu1 %vm14037_vm9, %v12570_v55  ;;  %vm14040_vm9 = vmmov %vm14031_vm4 }
 0x3e3   : > { %v10824_v11 = vpop.permute.xlu1 %10823  ;;  %v10836_v25 = vunpack.i.h.bf16 %v10834_v54  ;;  %v10835_v41 = vunpack.i.l.bf16 %v10834_v54  ;;  %2841 = vmatprep.mubr.f32.mxu1 %v13947_v9 }
 0x3e4   : > { %v10826_v6 = vunpack.i.h.bf16 %v10824_v11  ;;  %v10825_v40 = vunpack.i.l.bf16 %v10824_v11 }
 0x3e5   : > { %v2145_v61 = vsel %vm14031_vm4, %v10835_v41, %v10795_v3  ;;  %v2146_v31 = vsel %vm14038_vm5, %v10836_v25, %v10796_v57  ;;  %vm14041_vm4 = vnez %v13936_v35 }
 0x3e6   : > { %v10839_v58 = vpop.permute.xlu0 %10838  ;;  %v9090_v12 = vpack.c.bf16 %v2146_v31, %v2145_v61  ;;  %v10811_v61 = vunpack.i.h.bf16 %v12550_v28  ;;  %v10810_v31 = vunpack.i.l.bf16 %v12550_v28 }
 0x3e7   : > { %v12579_v63 = vpop.permute.xlu1 %10828  ;;  %v10841_v29 = vunpack.i.h.bf16 %v10839_v58  ;;  %v10840_v2 = vunpack.i.l.bf16 %v10839_v58 }
 0x3e8   : > { %9091 = vmatprep.subr.bf16.mxu0 %v9090_v12 }
 0x3e9   : > { %v2149_v45 = vsel %vm14039_vm6, %v10841_v29, %v10836_v25  ;;  %v2148_v39 = vsel %vm14040_vm9, %v10840_v2, %v10835_v41  ;;  %vm14042_vm6 = vmmov %vm14038_vm5 }
 0x3ea   : > { %v9092_v43 = vpack.c.bf16 %v2149_v45, %v2148_v39  ;;  %v10844_v3 = vpop.permute.xlu0 %10843  ;;  %v2137_v62 = vsel %vm14042_vm6, %v10806_v4, %v10826_v6  ;;  %vm14043_vm9 = vmmov %vm14038_vm5  ;;  %vm14047_vm6 = vcmp.ge.s32.totalorder %v11725_v22, 32 }
 0x3eb   : > { %v12585_v52 = vpop.permute.xlu1 %2197  ;;  %v10846_v57 = vunpack.i.h.bf16 %v10844_v3  ;;  %v10845_v17 = vunpack.i.l.bf16 %v10844_v3  ;;  %v2136_v54 = vsel %vm14043_vm9, %v10805_v14, %v10825_v40  ;;  %vm14046_vm5 = vmmov %vm14045_vm1 }
 0x3ec   : > { %9094 = vmatpush1.bf16.msk.msra.mxu0 %vm14041_vm4, %v9092_v43  ;;  %v9101_v14 = vpack.c.bf16 %v2137_v62, %v2136_v54  ;;  %vm14052_vm4 = vmmov %vm14046_vm5 }
 0x3ed   : > { %2568 = vmatprep.subr.mxu0 %v2147_v23  ;;  %v2133_v11 = vsel %vm14044_vm14, %v10825_v40, %v10845_v17  ;;  %v2134_v25 = vsel %vm14045_vm1, %v10826_v6, %v10846_v57  ;;  %v10831_v40 = vunpack.i.h.bf16 %v12579_v63  ;;  %v10830_v6 = vunpack.i.l.bf16 %v12579_v63  ;;  %vm14053_vm8 = vmmov %vm14052_vm4 }
 0x3ee   : > { %v2126_v53 = vpop.permute.xlu0 %2125  ;;  %v9099_v41 = vpack.c.bf16 %v2134_v25, %v2133_v11  ;;  %vm14048_vm14 = vcmask 195584   ;;  %vm14049_vm1 = vcmp.lt.s32.totalorder %v11725_v22, 96  ;;  %v10821_v25 = vunpack.i.h.bf16 %v12552_v30 }
 0x3ef   : > { %v10849_v34 = vpop.permute.xlu1 %10848  ;;  %v2150_v4 = vsel %vm14046_vm5, %v2126_v53, %v2084_v15  ;;  %v2238_v28 = vsel %vm14049_vm1, %v10810_v31, %v10815_v49  ;;  %vm14050_vm9 = vmmov %vm14049_vm1 }
 0x3f0   : > { %v10851_v58 = vunpack.i.h.bf16 %v10849_v34  ;;  %v10850_v12 = vunpack.i.l.bf16 %v10849_v34  ;;  %8705 = vmatpush1.msk.msra.mxu0 %vm14047_vm6, %v2150_v4  ;;  %v2239_v15 = vsel %vm14050_vm9, %v10811_v61, %v10816_v16  ;;  %vm14051_vm6 = vmmov %vm14046_vm5 }
 0x3f1   : > { %9100 = vmatprep.subr.bf16.mxu0 %v9099_v41  ;;  %8706 = vmatmul.mubr.msk.f32.vlgmr.msra.gmra.mrb[4].mxu0 %vm14048_vm14, %v12570_v55  ;;  %vm14054_vm14 = vmmov %vm14052_vm4  ;;  %v9107_v41 = vpack.c.bf16 %v2239_v15, %v2238_v28 }
 0x3f2   : > { %v2130_v45 = vsel %vm14046_vm5, %v10845_v17, %v10850_v12  ;;  %v2131_v39 = vsel %vm14051_vm6, %v10846_v57, %v10851_v58  ;;  %v2114_v43 = vpop.permute.xlu0 %2113  ;;  %9102 = vmatpush1.bf16.msra.mxu0 %v9101_v14  ;;  %v2127_v3 = vsel %vm14052_vm4, %v10850_v12, %v10840_v2  ;;  %v2128_v23 = vsel %vm14053_vm8, %v10851_v58, %v10841_v29  ;;  %vm14055_vm8 = vmmov %vm14049_vm1 }
 0x3f3   : > { %v2108_v62 = vpop.permute.xlu1 %2107  ;;  %v9103_v54 = vpack.c.bf16 %v2128_v23, %v2127_v3  ;;  %v9105_v11 = vpack.c.bf16 %v2131_v39, %v2130_v45  ;;  %2770 = vmatprep.mubr.f32.mxu0 %v13947_v9  ;;  %v10820_v17 = vunpack.i.l.bf16 %v12552_v30  ;;  %v2233_v30 = vsel %vm14049_vm1, %v10821_v25, %v10831_v40  ;;  %vm14056_vm9 = vmmov %vm14049_vm1 }
 0x3f4   : > { %v2135_v57 = vsel %vm14054_vm14, %v2108_v62, %v2114_v43  ;;  %v2138_v2 = vsel %vm14052_vm4, %v12558_v13, %v2108_v62  ;;  %vm14057_vm5 = vmmov %vm14049_vm1  ;;  %vm14058_vm6 = vcmask 195584  }
 0x3f5   : > { %2710 = vmatprep.subr.mxu0 %v2135_v57  ;;  %9104 = vmatprep.subr.bf16.mxu1 %v9103_v54  ;;  %v2232_v34 = vsel %vm14055_vm8, %v10820_v17, %v10830_v6  ;;  %v2235_v4 = vsel %vm14056_vm9, %v10815_v49, %v10820_v17  ;;  %v2236_v13 = vsel %vm14057_vm5, %v10816_v16, %v10821_v25  ;;  %vm14059_vm14 = vmmov %vm14052_vm4 }
 0x3f6   : > { %9106 = vmatpush1.bf16.msra.mxu1 %v9105_v11  ;;  %v10854_v29 = vpop.permute.xlu0 %10853  ;;  %2711 = vmatpush1.msra.mxu0 %v2138_v2  ;;  %vm14060_vm8 = vmmov %vm14049_vm1  ;;  %v9111_v45 = vpack.c.bf16 %v2233_v30, %v2232_v34  ;;  %v9113_v3 = vpack.c.bf16 %v2236_v13, %v2235_v4 }
 0x3f7   : > { %v2120_v58 = vpop.permute.xlu1 %2119  ;;  %v10856_v12 = vunpack.i.h.bf16 %v10854_v29  ;;  %v10855_v14 = vunpack.i.l.bf16 %v10854_v29  ;;  %9108 = vmatprep.subr.bf16.mxu0 %v9107_v41  ;;  %8708 = vmatmul.mubr.msk.f32.vlgmr.msra.gmra.mrb[6].mxu0 %vm14058_vm6, %v12570_v55  ;;  %vm14061_vm9 = vmmov %vm14058_vm6 }
 0x3f8   : > { %v2129_v28 = vsel %vm14059_vm14, %v2120_v58, %v2126_v53  ;;  %v2132_v15 = vsel %vm14052_vm4, %v2114_v43, %v2120_v58  ;;  %2917 = vmatprep.mubr.f32.mxu0 %v13947_v9  ;;  %vm14062_vm5 = vmmov %vm14049_vm1 }
 0x3f9   : > { %v2242_v49 = vsel %vm14060_vm8, %v10856_v12, %v10811_v61  ;;  %v2241_v16 = vsel %vm14049_vm1, %v10855_v14, %v10810_v31  ;;  %2781 = vmatprep.subr.mxu1 %v2129_v28  ;;  %vm14063_vm6 = vmmov %vm14049_vm1 }
 0x3fa   : > { %2782 = vmatpush1.msra.mxu1 %v2132_v15  ;;  %v2204_v39 = vpop.permute.xlu0 %2203  ;;  %v9109_v23 = vpack.c.bf16 %v2242_v49, %v2241_v16  ;;  %v2240_v61 = vsel %vm14063_vm6, %v12560_v51, %v12554_v27  ;;  %vm14064_vm14 = vmmov %vm14049_vm1 }
 0x3fb   : > { %v10859_v62 = vpop.permute.xlu1 %10858  ;;  %9112 = vmatprep.subr.bf16.mxu1 %v9111_v45  ;;  %8709 = vmatmul.mubr.msk.f32.vlgmr.msra.gmra.mrb[6].mxu1 %vm14061_vm9, %v12570_v55  ;;  %v2234_v53 = vsel %vm14062_vm5, %v12585_v52, %v2204_v39  ;;  %v8710_v55 = vld [vmem:[%s13739_s2 + $0x10] sm:$0xff]  ;;  %v2237_v57 = vsel %vm14064_vm14, %v12554_v27, %v12585_v52  ;;  %vm14065_vm4 = vmmov %vm14049_vm1 }
 0x3fc   : > { %9114 = vmatpush1.bf16.msra.mxu1 %v9113_v3  ;;  %9110 = vmatpush1.bf16.msra.mxu0 %v9109_v23  ;;  %v10861_v31 = vunpack.i.h.bf16 %v10859_v62  ;;  %v10860_v43 = vunpack.i.l.bf16 %v10859_v62  ;;  %vm14066_vm8 = vmmov %vm14049_vm1 }
 0x3fd   : > { %2928 = vmatprep.subr.mxu1 %v2234_v53  ;;  %2857 = vmatprep.subr.mxu0 %v2240_v61  ;;  %vm14067_vm1 = vmmov %vm14061_vm9  ;;  %v11076_v53 = vld [vmem:[#allocation2 + $0x10] sm:$0xff] }
 0x3fe   : > { %v10864_v54 = vpop.permute.xlu0 %10863  ;;  %2988 = vmatprep.mubr.f32.mxu1 %v13947_v9  ;;  %v2230_v29 = vsel %vm14065_vm4, %v10831_v40, %v10861_v31  ;;  %v2229_v34 = vsel %vm14066_vm8, %v10830_v6, %v10860_v43  ;;  %vm14068_vm9 = vmmov %vm14065_vm4 }
 0x3ff   : > { %v10869_v11 = vpop.permute.xlu1 %10868  ;;  %v10866_v25 = vunpack.i.h.bf16 %v10864_v54  ;;  %v10865_v17 = vunpack.i.l.bf16 %v10864_v54  ;;  %vm14069_vm5 = vmmov %vm14065_vm4 }
 0x400   : > { %v10871_v2 = vunpack.i.h.bf16 %v10869_v11  ;;  %v10870_v41 = vunpack.i.l.bf16 %v10869_v11  ;;  %2929 = vmatpush1.msra.mxu1 %v2237_v57  ;;  %vm14070_vm6 = vmmov %vm14065_vm4 }
 0x401   : > { %8712 = vmatmul.mubr.msk.f32.vlgmr.msra.gmra.mrb[4].mxu1 %vm14067_vm1, %v8710_v55  ;;  %v2226_v30 = vsel %vm14068_vm9, %v10860_v43, %v10865_v17  ;;  %v2227_v27 = vsel %vm14069_vm5, %v10861_v31, %v10866_v25  ;;  %vm14071_vm14 = vmmov %vm14065_vm4  ;;  %vm14074_vm1 = vnez %v13980_v10  ;;  %vm14075_vm9 = vcmask 195584   ;;  %v11077_v43 = vld [vmem:[#allocation2 + $0x18] sm:$0xff] }
 0x402   : > { %v2244_v52 = vsel %vm14070_vm6, %v10870_v41, %v10855_v14  ;;  %v2245_v4 = vsel %vm14071_vm14, %v10871_v2, %v10856_v12  ;;  %v2224_v63 = vsel %vm14065_vm4, %v10866_v25, %v10871_v2  ;;  %vm14072_vm12 = vmmov %vm14065_vm4  ;;  %v2180_v6 = vpop.permute.xlu0 %2179  ;;  %3130 = vmatprep.mubr.f32.mxu1 %v13947_v9  ;;  %v9115_v14 = vpack.c.bf16 %v2227_v27, %v2226_v30  ;;  %v11080_v27 = vld [vmem:[#allocation2 + $0x20] sm:$0xff] }
 0x403   : > { %v2223_v40 = vsel %vm14072_vm12, %v10865_v17, %v10870_v41  ;;  %v9119_v13 = vpack.c.bf16 %v2245_v4, %v2244_v52  ;;  %v2210_v28 = vpop.permute.xlu1 %2209  ;;  %vm14073_vm8 = vmmov %vm14065_vm4  ;;  %v9117_v12 = vpack.c.bf16 %v2230_v29, %v2229_v34  ;;  %vm14079_vm14 = vcmp.lt.s32.totalorder %v11780_v50, 992  ;;  %v11079_v17 = vld [vmem:[#allocation2 + $0x8] sm:$0xff]  ;;  %v11081_v4 = vld [vmem:[#allocation2 + $0x38] sm:$0xff] }
 0x404   : > { %v9122_v58 = vpack.c.bf16 %v2224_v63, %v2223_v40  ;;  %v2243_v15 = vsel %vm14073_vm8, %v2180_v6, %v12560_v51  ;;  %vm14076_vm12 = vmmov %vm14065_vm4  ;;  %v2231_v23 = vsel %vm14065_vm4, %v2204_v39, %v2210_v28 }
 0x405   : > { %2858 = vmatpush1.msra.mxu0 %v2243_v15  ;;  %9121 = vmatprep.subr.msk.bf16.mxu1 %vm14074_vm1, %v9119_v13  ;;  %vm14077_vm5 = vmmov %vm14065_vm4 }
 0x406   : > { %8711 = vmatmul.mubr.msk.f32.vlgmr.msra.gmra.mrb[4].mxu0 %vm14075_vm9, %v8710_v55  ;;  %9116 = vmatprep.subr.bf16.mxu0 %v9115_v14  ;;  %v2216_v49 = vpop.permute.xlu0 %2215  ;;  %vm14078_vm6 = vmmov %vm14065_vm4 }
 0x407   : > { %9123 = vmatpush1.bf16.msra.mxu1 %v9122_v58  ;;  %v2222_v16 = vpop.permute.xlu1 %2221  ;;  %9118 = vmatpush1.bf16.msra.mxu0 %v9117_v12  ;;  %v2228_v45 = vsel %vm14076_vm12, %v2210_v28, %v2216_v49  ;;  %vm14080_vm8 = vmmov %vm14075_vm9  ;;  %v11083_v58 = vld [vmem:[#allocation2 + $0x30] sm:$0xff]  ;;  %vm14082_vm12 = vcmp.lt.s32.totalorder %v11725_v22, 127 }
 0x408   : > { %3059 = vmatprep.mubr.f32.mxu0 %v13947_v9  ;;  %v2246_v51 = vsel %vm14077_vm5, %v2222_v16, %v2180_v6  ;;  %v2225_v3 = vsel %vm14078_vm6, %v2216_v49, %v2222_v16  ;;  %2999 = vmatprep.subr.mxu0 %v2228_v45  ;;  %vm14081_vm9 = vmmov %vm14080_vm8  ;;  %v11082_v6 = vld [vmem:[#allocation2 + $0x28] sm:$0xff]  ;;  %vm14083_vm5 = vcmp.lt.s32.totalorder %v11725_v22, 1 }
 0x409   : > { %8716 = vmatprep.subr.msk.mxu1 %vm14079_vm14, %v2246_v51  ;;  %vm14084_vm6 = vmmov %vm14083_vm5 }
 0x40a   : > { %vm14085_vm14 = vmmov %vm14083_vm5 }
 0x40b   : > { %3071 = vmatpush1.msra.mxu1 %v2225_v3  ;;  %3000 = vmatpush1.msra.mxu0 %v2231_v23  ;;  %vm14086_vm4 = vmmov %vm14083_vm5 }
 0x40c   : > { %8717 = vmatmul.mubr.msk.f32.vlgmr.msra.gmra.mrb[6].mxu1 %vm14080_vm8, %v8710_v55  ;;  %8713 = vmatmul.mubr.msk.f32.vlgmr.msra.gmra.mrb[6].mxu0 %vm14081_vm9, %v8710_v55  ;;  %v11078_v55 = vld [vmem:[#allocation2] sm:$0xff]  ;;  %vm14087_vm8 = vmmov %vm14086_vm4 }
 0x40d   : > { %3556 = vmatprep.mubr.f32.mxu1 %v13947_v9  ;;  %3485 = vmatprep.mubr.f32.mxu0 %v13947_v9  ;;  %vm14088_vm9 = vmmov %vm14082_vm12 }
 0x4d4   : > { %v2990_v62 = vpop.f32.mrb[4].mxu1 }
 0x4d5   : > { %v12714_v61 = vsub.f32 %v11076_v53, %v2990_v62  ;;  %v2992_v31 = vpop.f32.mrb[5].mxu1 }
 0x4d6   : > { %v12716_v54 = vsub.f32 %v11077_v43, %v2992_v31 }
 0x4d7   : > { %3197 = vrot.lane.b32.xlu0 %v12714_v61, %s11344_s8 }
 0x4d8   : > { %3199 = vrot.lane.b32.xlu1 %v12716_v54, %s11344_s8 }
 0x4d9   : > { %v2919_v39 = vpop.f32.mrb[4].mxu0 }
 0x4da   : > { %v12722_v11 = vsub.f32 %v11078_v55, %v2919_v39  ;;  %v2921_v25 = vpop.f32.mrb[5].mxu0 }
 0x4db   : > { %v12724_v57 = vsub.f32 %v11079_v17, %v2921_v25 }
 0x4dc   : > { %v10872_v2 = vpack.i.bf16 %v12722_v11, %v12716_v54 }
 0x4dd   : > { %v10877_v41 = vpack.i.bf16 %v12714_v61, %v12724_v57 }
 0x4de   : > { %10873 = vrot.lane.b32.xlu1 %v10872_v2, %s11345_s11 }
 0x4df   : > { %v3132_v29 = vpop.f32.mrb[6].mxu1  ;;  %10878 = vrot.lane.b32.xlu0 %v10877_v41, %s11345_s11  ;;  %v3061_v34 = vpop.f32.mrb[6].mxu0 }
 0x4e0   : > { %v3134_v30 = vpop.f32.mrb[7].mxu1  ;;  %v12732_v52 = vsub.f32 %v11080_v27, %v3061_v34  ;;  %v3063_v40 = vpop.f32.mrb[7].mxu0  ;;  %v12740_v28 = vsub.f32 %v11083_v58, %v3132_v29 }
 0x4e1   : > { %v12734_v63 = vsub.f32 %v11081_v4, %v3134_v30  ;;  %v12736_v13 = vsub.f32 %v11082_v6, %v3063_v40 }
 0x4e2   : > { %3195 = vrot.lane.b32.xlu1 %v12724_v57, %s11344_s8 }
 0x4e3   : > { %3201 = vrot.lane.b32.xlu0 %v12732_v52, %s11344_s8  ;;  %v10882_v15 = vpack.i.bf16 %v12732_v52, %v12734_v63  ;;  %v10887_v14 = vpack.i.bf16 %v12740_v28, %v12736_v13 }
 0x4e6   : > { %10883 = vrot.lane.b32.xlu1 %v10882_v15, %s11345_s11 }
 0x4e7   : > { %10888 = vrot.lane.b32.xlu0 %v10887_v14, %s11345_s11 }
 0x4ea   : > { %3205 = vrot.lane.b32.xlu1 %v12740_v28, %s11344_s8 }
 0x4eb   : > { %3193 = vrot.lane.b32.xlu0 %v12722_v11, %s11344_s8 }
 0x4ee   : > { %3203 = vrot.lane.b32.xlu1 %v12736_v13, %s11344_s8 }
 0x4ef   : > { %3207 = vrot.lane.b32.xlu0 %v12734_v63, %s11344_s8 }
 0x549   : > { %v3198_v12 = vpop.permute.xlu0 %3197 }
 0x54a   : > { %v3200_v49 = vpop.permute.xlu1 %3199 }
 0x54b   : > { %v12760_v16 = vsel %vm14082_vm12, %v3198_v12, %v3200_v49  ;;  %vm14089_vm12 = vmmov %vm14088_vm9 }
 0x54c   : > { %v12765_v45 = vsel %vm14012_vm11, %v12760_v16, 0.0 }
 0x54d   : > { %3241 = vrot.lane.b32.xlu0 %v12765_v45, %s11346_s15 }
 0x550   : > { %v10874_v51 = vpop.permute.xlu1 %10873 }
 0x551   : > { %v10875_v3 = vunpack.i.l.bf16 %v10874_v51  ;;  %v10879_v23 = vpop.permute.xlu0 %10878  ;;  %v10876_v39 = vunpack.i.h.bf16 %v10874_v51 }
 0x552   : > { %v10881_v62 = vunpack.i.h.bf16 %v10879_v23  ;;  %v10880_v53 = vunpack.i.l.bf16 %v10879_v23 }
 0x554   : > { %v12771_v31 = vsel %vm14083_vm5, %v10881_v62, %v10875_v3  ;;  %v3196_v43 = vpop.permute.xlu1 %3195  ;;  %v12775_v55 = vsel %vm14084_vm6, %v10880_v53, %v10881_v62  ;;  %v12786_v34 = vsel %vm14085_vm14, %v10876_v39, %v10880_v53  ;;  %vm14090_vm5 = vmmov %vm14088_vm9 }
 0x555   : > { %v3188_v25 = vsel %vm14004_vm7, %v12771_v31, 0.0  ;;  %v3202_v17 = vpop.permute.xlu0 %3201  ;;  %v3187_v41 = vsel %vm14003_vm13, %v12775_v55, 0.0  ;;  %v3186_v58 = vsel %vm11767_vm3, %v12786_v34, 0.0  ;;  %vm14091_vm6 = vmmov %vm14090_vm5 }
 0x556   : > { %v10897_v2 = vpack.i.bf16 %v12716_v54, %v3188_v25  ;;  %v10902_v6 = vpack.i.bf16 %v12714_v61, %v3187_v41  ;;  %v10907_v53 = vpack.i.bf16 %v12724_v57, %v3186_v58  ;;  %vm14092_vm14 = vmmov %vm14086_vm4 }
 0x558   : > { %v10884_v29 = vpop.permute.xlu1 %10883  ;;  %10898 = vrot.lane.b32.xlu0 %v10897_v2, %s11347_s22  ;;  %10893 = vrot.lane.b32.xlu1 %v10897_v2, %s11346_s15 }
 0x559   : > { %v10885_v30 = vunpack.i.l.bf16 %v10884_v29  ;;  %v10889_v27 = vpop.permute.xlu0 %10888  ;;  %v10886_v41 = vunpack.i.h.bf16 %v10884_v29 }
 0x55a   : > { %v10891_v4 = vunpack.i.h.bf16 %v10889_v27 }
 0x55b   : > { %v12792_v40 = vsel %vm14086_vm4, %v10885_v30, %v10876_v39  ;;  %v12814_v39 = vsel %vm14088_vm9, %v3196_v43, %v3198_v12  ;;  %v12840_v18 = vsel %vm14092_vm14, %v10875_v3, %v10886_v41  ;;  %vm14093_vm4 = vnez %v13922_v24  ;;  %vm14094_vm9 = vmmov %vm14090_vm5 }
 0x55c   : > { %v3185_v15 = vsel %vm14026_vm2, %v12792_v40, 0.0  ;;  %v12803_v14 = vsel %vm14087_vm8, %v10891_v4, %v10885_v30  ;;  %10903 = vrot.lane.b32.xlu0 %v10902_v6, %s11346_s15  ;;  %v3218_v58 = vsel %vm11873_vm10, %v12814_v39, 0.0  ;;  %vm14098_vm14 = vnez %v13909_v1 }
 0x55d   : > { %v3194_v51 = vpop.permute.xlu0 %3193  ;;  %v10912_v23 = vpack.i.bf16 %v12722_v11, %v3185_v15  ;;  %v3192_v62 = vsel %vm14028_vm0, %v12803_v14, 0.0  ;;  %v10890_v15 = vunpack.i.l.bf16 %v10889_v27  ;;  %v3206_v27 = vpop.permute.xlu1 %3205 }
 0x55e   : > { %v10917_v2 = vpack.i.bf16 %v12734_v63, %v3192_v62  ;;  %v12828_v12 = vsel %vm14090_vm5, %v3194_v51, %v3196_v43  ;;  %v12836_v62 = vsel %vm14091_vm6, %v3200_v49, %v3202_v17  ;;  %vm14096_vm5 = vnez %v13924_v47  ;;  %vm14097_vm6 = vmmov %vm14087_vm8 }
 0x55f   : > { %10913 = vrot.lane.b32.xlu1 %v10912_v23, %s11346_s15  ;;  %v3217_v43 = vsel %vm14093_vm4, %v12828_v12, 0.0  ;;  %v3189_v3 = vsel %vm14096_vm5, %v12840_v18, 0.0  ;;  %v12863_v42 = vsel %vm14097_vm6, %v10886_v41, %v10890_v15  ;;  %vm14101_vm6 = vcmp.lt.s32.totalorder %v11725_v22, 127 }
 0x560   : > { %10908 = vrot.lane.b32.xlu0 %v10907_v53, %s11346_s15  ;;  %v10922_v33 = vpack.i.bf16 %v12732_v52, %v3189_v3 }
 0x561   : > { %v3208_v25 = vpop.permute.xlu0 %3207  ;;  %v3204_v1 = vpop.permute.xlu1 %3203 }
 0x562   : > { %v12820_v30 = vsel %vm14089_vm12, %v3208_v25, %v3194_v51  ;;  %v12848_v51 = vsel %vm14087_vm8, %v10890_v15, %v10891_v4  ;;  %v12852_v48 = vsel %vm14094_vm9, %v3206_v27, %v3208_v25  ;;  %vm14095_vm12 = vnez %v13912_v7 }
 0x563   : > { %10918 = vrot.lane.b32.xlu1 %v10917_v2, %s11346_s15  ;;  %v3224_v29 = vsel %vm14019_vm15, %v12820_v30, 0.0  ;;  %v3220_v49 = vsel %vm14095_vm12, %v12836_v62, 0.0  ;;  %v3191_v4 = vsel %vm14098_vm14, %v12848_v51, 0.0  ;;  %vm14099_vm8 = vnez %v13927_v56 }
 0x564   : > { %3235 = vrot.lane.b32.xlu0 %v3218_v58, %s11346_s15  ;;  %v3223_v25 = vsel %vm14099_vm8, %v12852_v48, 0.0  ;;  %vm14100_vm9 = vnez %v13919_v37  ;;  %v10927_v41 = vpack.i.bf16 %v12740_v28, %v3191_v4  ;;  %v12884_v46 = vsel %vm14101_vm6, %v3204_v1, %v3206_v27 }
 0x565   : > { %v3190_v47 = vsel %vm14100_vm9, %v12863_v42, 0.0  ;;  %vm14102_vm14 = vnez %v13931_v26  ;;  %vm14103_vm9 = vmmov %vm14101_vm6  ;;  %vm14105_vm6 = vnez %v13933_v44 }
 0x566   : > { %v10932_v15 = vpack.i.bf16 %v12736_v13, %v3190_v47  ;;  %v3222_v3 = vsel %vm14102_vm14, %v12884_v46, 0.0  ;;  %v12894_v47 = vsel %vm14103_vm9, %v3202_v17, %v3204_v1  ;;  %vm14106_vm9 = vcmp.lt.s32.totalorder %v11725_v22, 32 }
 0x567   : > { %3271 = vrot.lane.b32.xlu1 %v3224_v29, %s11346_s15  ;;  %14104 = vst [vmem:[#allocation42_spill] sm:$0xff] %v12894_v47  ;;  %vm14107_vm0 = vmmov %vm14106_vm9 }
 0x568   : > { %3229 = vrot.lane.b32.xlu0 %v3217_v43, %s11346_s15  ;;  %vm14108_vm2 = vmmov %vm14107_vm0 }
 0x569   : > { %vm14109_vm5 = vmmov %vm14107_vm0 }
 0x56a   : > { %vm14111_vm7 = vmmov %vm14107_vm0 }
 0x56b   : > { %3247 = vrot.lane.b32.xlu1 %v3220_v49, %s11346_s15  ;;  %vm14112_vm13 = vmmov %vm14107_vm0 }
 0x56c   : > { %3265 = vrot.lane.b32.xlu0 %v3223_v25, %s11346_s15 }
 0x56f   : > { %10923 = vrot.lane.b32.xlu1 %v10922_v33, %s11346_s15 }
 0x570   : > { %10928 = vrot.lane.b32.xlu0 %v10927_v41, %s11346_s15 }
 0x573   : > { %10933 = vrot.lane.b32.xlu1 %v10932_v15, %s11346_s15 }
 0x574   : > { %10943 = vrot.lane.b32.xlu0 %v10902_v6, %s11347_s22  ;;  %v3221_v6 = vsel %vm14105_vm6, %v12894_v47, 0.0 }
 0x577   : > { %10938 = vrot.lane.b32.xlu1 %v10922_v33, %s11347_s22 }
 0x578   : > { %3259 = vrot.lane.b32.xlu0 %v3222_v3, %s11346_s15 }
 0x57b   : > { %10948 = vrot.lane.b32.xlu1 %v10912_v23, %s11347_s22 }
 0x57c   : > { %10953 = vrot.lane.b32.xlu0 %v10907_v53, %s11347_s22 }
 0x57f   : > { %3253 = vrot.lane.b32.xlu1 %v3221_v6, %s11346_s15 }
 0x580   : > { %3337 = vrot.lane.b32.xlu0 %v12765_v45, %s11347_s22 }
 0x583   : > { %3343 = vrot.lane.b32.xlu1 %v3220_v49, %s11347_s22 }
 0x584   : > { %3325 = vrot.lane.b32.xlu0 %v3217_v43, %s11347_s22 }
 0x587   : > { %10958 = vrot.lane.b32.xlu1 %v10917_v2, %s11347_s22 }
 0x588   : > { %3349 = vrot.lane.b32.xlu0 %v3221_v6, %s11347_s22 }
 0x58b   : > { %10963 = vrot.lane.b32.xlu1 %v10927_v41, %s11347_s22 }
 0x58c   : > { %10968 = vrot.lane.b32.xlu0 %v10932_v15, %s11347_s22 }
 0x58f   : > { %3331 = vrot.lane.b32.xlu1 %v3218_v58, %s11347_s22 }
 0x590   : > { %3361 = vrot.lane.b32.xlu0 %v3223_v25, %s11347_s22 }
 0x593   : > { %3367 = vrot.lane.b32.xlu1 %v3224_v29, %s11347_s22 }
 0x597   : > { %3355 = vrot.lane.b32.xlu1 %v3222_v3, %s11347_s22 }
 0x5bf   : > { %v3242_v33 = vpop.permute.xlu0 %3241 }
 0x5ca   : > { %v12914_v1 = vpop.permute.xlu0 %10898  ;;  %v12916_v45 = vpop.permute.xlu1 %10893 }
 0x5cb   : > { %v10896_v23 = vunpack.i.h.bf16 %v12916_v45  ;;  %v13849_v53 = vunpack.i.l.bf16 %v12916_v45 }
 0x5ce   : > { %v10904_v17 = vpop.permute.xlu0 %10903 }
 0x5cf   : > { %v10906_v2 = vunpack.i.h.bf16 %v10904_v17  ;;  %v10905_v27 = vunpack.i.l.bf16 %v10904_v17 }
 0x5d1   : > { %v10914_v43 = vpop.permute.xlu1 %10913  ;;  %v3285_v58 = vsel %vm14106_vm9, %v10905_v27, %v13849_v53  ;;  %v3286_v29 = vsel %vm14107_vm0, %v10906_v2, %v10896_v23  ;;  %vm14110_vm9 = vmmov %vm14107_vm0 }
 0x5d2   : > { %v10916_v49 = vunpack.i.h.bf16 %v10914_v43  ;;  %v10915_v4 = vunpack.i.l.bf16 %v10914_v43  ;;  %v10909_v25 = vpop.permute.xlu0 %10908  ;;  %v9129_v41 = vpack.c.bf16 %v3286_v29, %v3285_v58 }
 0x5d3   : > { %v10911_v15 = vunpack.i.h.bf16 %v10909_v25  ;;  %v10910_v3 = vunpack.i.l.bf16 %v10909_v25 }
 0x5d4   : > { %9130 = vmatprep.subr.bf16.mxu1 %v9129_v41 }
 0x5d5   : > { %v10919_v6 = vpop.permute.xlu1 %10918  ;;  %v3288_v17 = vsel %vm14108_vm2, %v10910_v3, %v10905_v27  ;;  %v3289_v37 = vsel %vm14109_vm5, %v10911_v15, %v10906_v2  ;;  %v3291_v47 = vsel %vm14107_vm0, %v10915_v4, %v10910_v3  ;;  %v3292_v43 = vsel %vm14110_vm9, %v10916_v49, %v10911_v15  ;;  %vm14114_vm5 = vmmov %vm14107_vm0 }
 0x5d6   : > { %v10921_v50 = vunpack.i.h.bf16 %v10919_v6  ;;  %v10920_v10 = vunpack.i.l.bf16 %v10919_v6  ;;  %v9131_v53 = vpack.c.bf16 %v3289_v37, %v3288_v17  ;;  %v3236_v44 = vpop.permute.xlu0 %3235  ;;  %v9124_v27 = vpack.c.bf16 %v3292_v43, %v3291_v47 }
 0x5d7   : > { %vm14113_vm2 = vnez %v13936_v35  ;;  %vm14117_vm9 = vcmp.ge.s32.totalorder %v11725_v22, 32 }
 0x5d8   : > { %v3295_v58 = vsel %vm14111_vm7, %v10921_v50, %v10916_v49  ;;  %v3294_v29 = vsel %vm14112_vm13, %v10920_v10, %v10915_v4  ;;  %9132 = vmatpush1.bf16.msra.mxu1 %v9131_v53  ;;  %9125 = vmatprep.subr.bf16.mxu0 %v9124_v27  ;;  %v12945_v49 = vld [vmem:[%s13741_s4] sm:$0xff]  ;;  %vm14115_vm13 = vmmov %vm14107_vm0  ;;  %v3290_v4 = vsel %vm14107_vm0, %v3236_v44, %v3242_v33 }
 0x5d9   : > { %v9126_v25 = vpack.c.bf16 %v3295_v58, %v3294_v29  ;;  %v3272_v2 = vpop.permute.xlu1 %3271  ;;  %vm14116_vm7 = vmmov %vm14107_vm0 }
 0x5da   : > { %v3230_v41 = vpop.permute.xlu0 %3229 }
 0x5db   : > { %9128 = vmatpush1.bf16.msk.msra.mxu0 %vm14113_vm2, %v9126_v25  ;;  %v3293_v37 = vsel %vm14114_vm5, %v3230_v41, %v3236_v44  ;;  %v3296_v47 = vsel %vm14115_vm13, %v3272_v2, %v3230_v41  ;;  %vm14118_vm5 = vcmask 195584   ;;  %vm14120_vm13 = vmmov %vm14107_vm0 }
 0x5dc   : > { %3425 = vmatprep.subr.mxu0 %v3293_v37  ;;  %vm14119_vm2 = vmmov %vm14118_vm5 }
 0x5dd   : > { %v3248_v15 = vpop.permute.xlu1 %3247 }
 0x5de   : > { %v3287_v53 = vsel %vm14116_vm7, %v3242_v33, %v3248_v15  ;;  %v3266_v3 = vpop.permute.xlu0 %3265  ;;  %vm14121_vm7 = vmmov %vm14107_vm0 }
 0x5df   : > { %8720 = vmatpush1.msk.msra.mxu0 %vm14117_vm9, %v3296_v47  ;;  %3496 = vmatprep.subr.mxu1 %v3287_v53  ;;  %vm14123_vm9 = vmmov %vm14107_vm0 }
 0x5e0   : > { %3497 = vmatpush1.msra.mxu1 %v3290_v4  ;;  %8721 = vmatmul.mubr.msk.f32.vlgmr.msra.gmra.mrb[8].mxu0 %vm14118_vm5, %v12945_v49  ;;  %vm14125_vm5 = vmmov %vm14107_vm0 }
 0x5e1   : > { %v10924_v6 = vpop.permute.xlu1 %10923  ;;  %8722 = vmatmul.mubr.msk.f32.vlgmr.msra.gmra.mrb[8].mxu1 %vm14119_vm2, %v12945_v49  ;;  %3627 = vmatprep.mubr.f32.mxu0 %v13947_v9  ;;  %vm14122_vm2 = vmmov %vm14107_vm0 }
 0x5e2   : > { %3698 = vmatprep.mubr.f32.mxu1 %v13947_v9  ;;  %v10929_v17 = vpop.permute.xlu0 %10928  ;;  %v10926_v43 = vunpack.i.h.bf16 %v10924_v6  ;;  %v10925_v58 = vunpack.i.l.bf16 %v10924_v6 }
 0x5e3   : > { %v10931_v44 = vunpack.i.h.bf16 %v10929_v17  ;;  %v10930_v33 = vunpack.i.l.bf16 %v10929_v17  ;;  %v14124_v17 = vunpack.i.l.bf16 %v12916_v45 }
 0x5e4   : > { %v3283_v4 = vsel %vm14122_vm2, %v10896_v23, %v10926_v43  ;;  %vm14128_vm2 = vmmov %vm14107_vm0 }
 0x5e5   : > { %v10934_v29 = vpop.permute.xlu1 %10933  ;;  %v3273_v41 = vsel %vm14120_vm13, %v10930_v33, %v10920_v10  ;;  %v3274_v37 = vsel %vm14121_vm7, %v10931_v44, %v10921_v50  ;;  %v3282_v10 = vsel %vm14125_vm5, %v14124_v17, %v10925_v58  ;;  %vm14126_vm13 = vmmov %vm14107_vm0  ;;  %vm14130_vm5 = vcmask 195584  }
 0x5e6   : > { %v10936_v27 = vunpack.i.h.bf16 %v10934_v29  ;;  %v10935_v25 = vunpack.i.l.bf16 %v10934_v29  ;;  %v12965_v47 = vpop.permute.xlu0 %10943  ;;  %v9137_v53 = vpack.c.bf16 %v3274_v37, %v3273_v41  ;;  %vm14127_vm7 = vmmov %vm14107_vm0  ;;  %v9135_v45 = vpack.c.bf16 %v3283_v4, %v3282_v10 }
 0x5e8   : > { %v3277_v35 = vsel %vm14107_vm0, %v10936_v27, %v10931_v44  ;;  %v3276_v6 = vsel %vm14123_vm9, %v10935_v25, %v10930_v33  ;;  %9138 = vmatprep.subr.bf16.mxu1 %v9137_v53  ;;  %v3279_v41 = vsel %vm14126_vm13, %v10925_v58, %v10935_v25  ;;  %v3280_v23 = vsel %vm14127_vm7, %v10926_v43, %v10936_v27  ;;  %vm14132_vm7 = vmmov %vm14107_vm0 }
 0x5e9   : > { %v9139_v29 = vpack.c.bf16 %v3277_v35, %v3276_v6  ;;  %v12977_v50 = vpop.permute.xlu1 %10938  ;;  %v9133_v44 = vpack.c.bf16 %v3280_v23, %v3279_v41  ;;  %v3275_v33 = vsel %vm14128_vm2, %v3266_v3, %v3272_v2  ;;  %v9147_v35 = vpack.c.bf16 %v12716_v54, %v12771_v31  ;;  %vm14133_vm2 = vmmov %vm14107_vm0 }
 0x5ea   : > { %v3260_v37 = vpop.permute.xlu0 %3259  ;;  %v9150_v43 = vpack.c.bf16 %v12714_v61, %v12775_v55  ;;  %vm14129_vm9 = vnez %v13940_v0  ;;  %vm14131_vm13 = vnez %v13943_v59  ;;  %v9159_v53 = vpack.c.bf16 %v12734_v63, %v12803_v14 }
 0x5eb   : > { %9140 = vmatpush1.bf16.msra.mxu1 %v9139_v29  ;;  %9134 = vmatprep.subr.bf16.mxu0 %v9133_v44  ;;  %v3278_v58 = vsel %vm14107_vm0, %v3260_v37, %v3266_v3  ;;  %v9141_v3 = vpack.c.bf16 %v12724_v57, %v12786_v34  ;;  %v10941_v4 = vunpack.i.h.bf16 %v12977_v50  ;;  %v9144_v6 = vpack.c.bf16 %v12722_v11, %v12792_v40 }
 0x5ec   : > { %3638 = vmatprep.subr.mxu1 %v3275_v33  ;;  %9136 = vmatpush1.bf16.msra.mxu0 %v9135_v45  ;;  %v9162_v34 = vpack.c.bf16 %v12740_v28, %v12848_v51  ;;  %vm14134_vm0 = vnez %v13950_v38  ;;  %v10901_v14 = vunpack.i.h.bf16 %v12914_v1  ;;  %v10900_v29 = vunpack.i.l.bf16 %v12914_v1  ;;  %v14181_v38 = vld [vmem:[#allocation31_spill] sm:$0xff] }
 0x5ed   : > { %v12985_v17 = vpop.permute.xlu1 %10948  ;;  %v10946_v41 = vunpack.i.h.bf16 %v12965_v47  ;;  %v10945_v40 = vunpack.i.l.bf16 %v12965_v47  ;;  %v9153_v23 = vpack.c.bf16 %v12736_v13, %v12863_v42 }
 0x5ee   : > { %v12993_v27 = vpop.permute.xlu0 %10953  ;;  %v10951_v45 = vunpack.i.h.bf16 %v12985_v17 }
 0x5ef   : > { %3639 = vmatpush1.msra.mxu1 %v3278_v58  ;;  %v10955_v47 = vunpack.i.l.bf16 %v12993_v27  ;;  %v10956_v33 = vunpack.i.h.bf16 %v12993_v27  ;;  %v9156_v58 = vpack.c.bf16 %v12732_v52, %v12840_v18 }
 0x5f0   : > { %9149 = vmatprep.subr.msk.bf16.mxu1 %vm14129_vm9, %v9147_v35  ;;  %8724 = vmatmul.mubr.msk.f32.vlgmr.msra.gmra.mrb[10].mxu1 %vm14130_vm5, %v12945_v49 }
 0x5f1   : > { %v3254_v2 = vpop.permute.xlu1 %3253  ;;  %9152 = vmatpush1.bf16.msk.msra.mxu1 %vm14131_vm13, %v9150_v43  ;;  %3853 = vmatprep.mubr.f32.mxu1 %v13947_v9 }
 0x5f2   : > { %v3284_v31 = vsel %vm14132_vm7, %v3248_v15, %v3254_v2  ;;  %8733 = vmatprep.subr.msk.mxu1 %vm14095_vm12, %v12836_v62  ;;  %v3281_v55 = vsel %vm14133_vm2, %v3254_v2, %v3260_v37  ;;  %v13011_v25 = vpop.permute.xlu0 %3337  ;;  %v10940_v15 = vunpack.i.l.bf16 %v12977_v50  ;;  %v13020_v62 = vld [vmem:[%s13741_s4 + $0x8] sm:$0xff]  ;;  %vm14135_vm7 = vnez %v13952_v20 }
 0x5f3   : > { %3567 = vmatprep.subr.mxu0 %v3281_v55  ;;  %vm14136_vm2 = vnez %v13954_v5  ;;  %vm14138_vm12 = vnez %v13956_v8 }
 0x5f4   : > { %3568 = vmatpush1.msra.mxu0 %v3284_v31 }
 0x5f5   : > { %v13026_v10 = vpop.permute.xlu1 %3343  ;;  %9143 = vmatprep.subr.msk.bf16.mxu0 %vm14134_vm0, %v9141_v3  ;;  %8734 = vmatpush1.msk.msra.mxu1 %vm14012_vm11, %v12760_v16  ;;  %vm14137_vm11 = vmmov %vm14130_vm5 }
 0x5f6   : > { %8723 = vmatmul.mubr.msk.f32.vlgmr.msra.gmra.mrb[10].mxu0 %vm14130_vm5, %v12945_v49  ;;  %9161 = vmatprep.subr.msk.bf16.mxu1 %vm14135_vm7, %v9159_v53  ;;  %v13041_v51 = vpop.permute.xlu0 %3325  ;;  %vm14139_vm5 = vcmp.lt.s32.totalorder %v11725_v22, 96  ;;  %v10950_v49 = vunpack.i.l.bf16 %v12985_v17 }
 0x5f7   : > { %9146 = vmatpush1.bf16.msk.msra.mxu0 %vm14136_vm2, %v9144_v6  ;;  %8735 = vmatmul.mubr.msk.f32.vlgmr.msra.gmra.mrb[8].mxu1 %vm14137_vm11, %v13020_v62  ;;  %v3378_v16 = vsel %vm14139_vm5, %v10900_v29, %v10940_v15  ;;  %vm14140_vm7 = vmmov %vm14139_vm5  ;;  %v3381_v44 = vsel %vm14139_vm5, %v10945_v40, %v10900_v29 }
 0x5f8   : > { %8728 = vmatprep.subr.msk.mxu0 %vm11873_vm10, %v12814_v39  ;;  %9164 = vmatpush1.bf16.msk.msra.mxu1 %vm14138_vm12, %v9162_v34  ;;  %v3379_v1 = vsel %vm14140_vm7, %v10901_v14, %v10941_v4  ;;  %vm14141_vm11 = vmmov %vm14139_vm5  ;;  %vm14142_vm7 = vnez %v13962_v36 }
 0x5f9   : > { %8743 = vmatprep.subr.msk.mxu1 %vm14019_vm15, %v12820_v30  ;;  %v10959_v39 = vpop.permute.xlu1 %10958  ;;  %3782 = vmatprep.mubr.f32.mxu0 %v13947_v9  ;;  %v3382_v37 = vsel %vm14141_vm11, %v10946_v41, %v10901_v14  ;;  %v9169_v42 = vpack.c.bf16 %v3379_v1, %v3378_v16  ;;  %vm14143_vm11 = vmmov %vm14139_vm5  ;;  %vm14144_vm5 = vcmask 195584   ;;  %vm14145_vm15 = vnez %v13966_v21  ;;  %v8746_v1 = vld [vmem:[%s13741_s4 + $0x10] sm:$0xff] }
 0x5fa   : > { %3995 = vmatprep.mubr.f32.mxu1 %v13947_v9  ;;  %v10960_v35 = vunpack.i.l.bf16 %v10959_v39  ;;  %v13075_v30 = vpop.permute.xlu0 %3349  ;;  %v10961_v43 = vunpack.i.h.bf16 %v10959_v39  ;;  %v9171_v17 = vpack.c.bf16 %v3382_v37, %v3381_v44  ;;  %v3387_v27 = vsel %vm14143_vm11, %v10950_v49, %v10955_v47  ;;  %vm14146_vm12 = vmmov %vm14144_vm5  ;;  %v14155_v39 = vld [vmem:[#allocation42_spill] sm:$0xff] }
 0x5fb   : > { %8729 = vmatpush1.msk.msra.mxu0 %vm14093_vm4, %v12828_v12 }
 0x5fc   : > { %9155 = vmatprep.subr.msk.bf16.mxu0 %vm14142_vm7, %v9153_v23  ;;  %8744 = vmatpush1.msk.msra.mxu1 %vm14099_vm8, %v12852_v48  ;;  %vm14147_vm7 = vmmov %vm14143_vm11 }
 0x5fd   : > { %8730 = vmatmul.mubr.msk.f32.vlgmr.msra.gmra.mrb[8].mxu0 %vm14144_vm5, %v13020_v62  ;;  %9170 = vmatprep.subr.bf16.mxu1 %v9169_v42  ;;  %v10964_v12 = vpop.permute.xlu1 %10963  ;;  %v3384_v48 = vsel %vm14147_vm7, %v10955_v47, %v10945_v40  ;;  %vm14148_vm8 = vmmov %vm14147_vm7 }
 0x5fe   : > { %9158 = vmatpush1.bf16.msk.msra.mxu0 %vm14145_vm15, %v9156_v58  ;;  %v10966_v18 = vunpack.i.h.bf16 %v10964_v12  ;;  %v10965_v2 = vunpack.i.l.bf16 %v10964_v12  ;;  %8745 = vmatmul.mubr.msk.f32.vlgmr.msra.gmra.mrb[10].mxu1 %vm14146_vm12, %v13020_v62  ;;  %v3385_v31 = vsel %vm14148_vm8, %v10956_v33, %v10946_v41  ;;  %vm14149_vm11 = vmmov %vm14147_vm7  ;;  %v10969_v53 = vpop.permute.xlu0 %10968 }
 0x5ff   : > { %v3388_v55 = vsel %vm14149_vm11, %v10951_v45, %v10956_v33  ;;  %vm14150_vm5 = vmmov %vm14147_vm7  ;;  %8738 = vmatprep.subr.msk.mxu0 %vm14102_vm14, %v12884_v46  ;;  %9172 = vmatpush1.bf16.msra.mxu1 %v9171_v17  ;;  %v10971_v46 = vunpack.i.h.bf16 %v10969_v53  ;;  %v10970_v41 = vunpack.i.l.bf16 %v10969_v53  ;;  %v9165_v16 = vpack.c.bf16 %v3385_v31, %v3384_v48  ;;  %v14165_v17 = vld [vmem:[#allocation34_spill] sm:$0xff]  ;;  %v3153_v31 = vld [vmem:[%s13743_s6] sm:$0xff] }
 0x600   : > { %v3390_v3 = vsel %vm14150_vm5, %v10960_v35, %v10950_v49  ;;  %vm14151_vm12 = vmmov %vm14150_vm5  ;;  %3924 = vmatprep.mubr.f32.mxu0 %v13947_v9  ;;  %4150 = vmatprep.mubr.f32.mxu1 %v13947_v9  ;;  %v3383_v49 = vsel %vm14150_vm5, %v13011_v25, %v13026_v10  ;;  %v9167_v37 = vpack.c.bf16 %v3388_v55, %v3387_v27  ;;  %v3155_v55 = vld [vmem:[%s13743_s6 + $0x10] sm:$0xff] }
 0x601   : > { %v3380_v6 = vsel %vm14151_vm12, %v13026_v10, %v13075_v30  ;;  %vm14152_vm7 = vmmov %vm14150_vm5  ;;  %v3332_v40 = vpop.permute.xlu1 %3331  ;;  %v3373_v42 = vsel %vm14150_vm5, %v10971_v46, %v10966_v18 }
 0x602   : > { %v3391_v34 = vsel %vm14152_vm7, %v10961_v43, %v10951_v45  ;;  %vm14153_vm8 = vmmov %vm14150_vm5  ;;  %4090 = vmatprep.subr.mxu1 %v3380_v6  ;;  %8739 = vmatpush1.msk.msra.mxu0 %vm14105_vm6, %v14155_v39  ;;  %vm14158_vm7 = vcmask 195584   ;;  %v3159_v6 = vld [vmem:[%s13743_s6 + $0x30] sm:$0xff] }
 0x603   : > { %v3369_v14 = vsel %vm14153_vm8, %v10965_v2, %v10960_v35  ;;  %vm14154_vm11 = vmmov %vm14150_vm5  ;;  %v9177_v44 = vpack.c.bf16 %v3391_v34, %v3390_v3  ;;  %9166 = vmatprep.subr.bf16.mxu0 %v9165_v16  ;;  %4091 = vmatpush1.msra.mxu1 %v3383_v49  ;;  %v3156_v3 = vld [vmem:[%s13743_s6 + $0x18] sm:$0xff] }
 0x604   : > { %v3370_v29 = vsel %vm14154_vm11, %v10966_v18, %v10961_v43  ;;  %vm14157_vm12 = vmmov %vm14150_vm5  ;;  %8740 = vmatmul.mubr.msk.f32.vlgmr.msra.gmra.mrb[10].mxu0 %vm14158_vm7, %v13020_v62  ;;  %v3362_v43 = vpop.permute.xlu0 %3361 }
 0x605   : > { %v9180_v47 = vpack.c.bf16 %v3370_v29, %v3369_v14  ;;  %v3386_v33 = vsel %vm14157_vm12, %v3332_v40, %v13011_v25  ;;  %vm14159_vm8 = vmmov %vm14158_vm7  ;;  %9168 = vmatpush1.bf16.msra.mxu0 %v9167_v37  ;;  %9179 = vmatprep.subr.msk.bf16.mxu1 %vm14074_vm1, %v9177_v44  ;;  %v3368_v45 = vpop.permute.xlu1 %3367  ;;  %v3160_v29 = vld [vmem:[%s13743_s6 + $0x38] sm:$0xff]  ;;  %v3157_v44 = vld [vmem:[%s13743_s6 + $0x20] sm:$0xff] }
 0x606   : > { %8748 = vmatmul.mubr.msk.f32.vlgmr.msra.gmra.mrb[8].mxu1 %vm14159_vm8, %v8746_v1  ;;  %vm14161_vm11 = vmmov %vm14150_vm5  ;;  %4019 = vmatprep.subr.mxu0 %v3386_v33 }
 0x607   : > { %v3372_v35 = vsel %vm14161_vm11, %v10970_v41, %v10965_v2  ;;  %vm14162_vm12 = vmmov %vm14150_vm5  ;;  %9181 = vmatpush1.bf16.msra.mxu1 %v9180_v47  ;;  %4079 = vmatprep.mubr.f32.mxu0 %v13947_v9  ;;  %vm14166_vm11 = vcmp.lt.s32.totalorder %v14165_v17, 992 }
 0x608   : > { %v3375_v25 = vsel %vm14162_vm12, %v10940_v15, %v10970_v41  ;;  %vm14163_vm7 = vmmov %vm14150_vm5  ;;  %v3389_v15 = vsel %vm14150_vm5, %v13041_v51, %v3332_v40  ;;  %4292 = vmatprep.mubr.f32.mxu1 %v13947_v9 }
 0x609   : > { %v3376_v62 = vsel %vm14163_vm7, %v10941_v4, %v10971_v46  ;;  %vm14164_vm8 = vmmov %vm14150_vm5  ;;  %v9173_v4 = vpack.c.bf16 %v3373_v42, %v3372_v35  ;;  %4020 = vmatpush1.msra.mxu0 %v3389_v15  ;;  %v3356_v12 = vpop.permute.xlu1 %3355  ;;  %vm14168_vm7 = vcmask 195584  }
 0x60a   : > { %v3392_v58 = vsel %vm14164_vm8, %v3368_v45, %v13041_v51  ;;  %vm14167_vm12 = vmmov %vm14150_vm5  ;;  %v9175_v27 = vpack.c.bf16 %v3376_v62, %v3375_v25  ;;  %8747 = vmatmul.mubr.msk.f32.vlgmr.msra.gmra.mrb[8].mxu0 %vm14168_vm7, %v8746_v1 }
 0x60b   : > { %8752 = vmatprep.subr.msk.mxu1 %vm14166_vm11, %v3392_v58  ;;  %v3371_v50 = vsel %vm14167_vm12, %v3362_v43, %v3368_v45  ;;  %9174 = vmatprep.subr.bf16.mxu0 %v9173_v4  ;;  %vm14169_vm8 = vmmov %vm14150_vm5  ;;  %v3158_v45 = vld [vmem:[%s13743_s6 + $0x28] sm:$0xff] }
 0x60c   : > { %v3374_v18 = vsel %vm14169_vm8, %v3356_v12, %v3362_v43  ;;  %9176 = vmatpush1.bf16.msra.mxu0 %v9175_v27  ;;  %4233 = vmatpush1.msra.mxu1 %v3371_v50  ;;  %vm14170_vm11 = vmmov %vm14150_vm5 }
 0x60d   : > { %v3377_v51 = vsel %vm14170_vm11, %v13075_v30, %v3356_v12  ;;  %vm14171_vm5 = vmmov %vm14168_vm7  ;;  %4161 = vmatprep.subr.mxu0 %v3374_v18  ;;  %4221 = vmatprep.mubr.f32.mxu0 %v13947_v9  ;;  %v3154_v30 = vld [vmem:[%s13743_s6 + $0x8] sm:$0xff]  ;;  %vm14173_vm7 = vcmp.lt.s32.totalorder %v11725_v22, 1 }
 0x60e   : > { %8753 = vmatmul.mubr.msk.f32.vlgmr.msra.gmra.mrb[10].mxu1 %vm14171_vm5, %v8746_v1  ;;  %vm14172_vm12 = vmmov %vm14171_vm5 }
 0x60f   : > { %4712 = vmatprep.mubr.f32.mxu1 %v13947_v9  ;;  %vm14175_vm8 = vmmov %vm14173_vm7 }
 0x610   : > { %4162 = vmatpush1.msra.mxu0 %v3377_v51 }
 0x611   : > { %8749 = vmatmul.mubr.msk.f32.vlgmr.msra.gmra.mrb[10].mxu0 %vm14172_vm12, %v8746_v1 }
 0x612   : > { %4641 = vmatprep.mubr.f32.mxu0 %v13947_v9 }
 0x6d9   : > { %v4152_v2 = vpop.f32.mrb[8].mxu1 }
 0x6da   : > { %v4154_v48 = vpop.f32.mrb[9].mxu1  ;;  %v10466_v40 = vadd.f32 %v4152_v2, %v3155_v55 }
 0x6db   : > { %v10467_v16 = vadd.f32 %v4154_v48, %v3156_v3 }
 0x6dc   : > { %v4309_v62 = vmax.f32 %v10466_v40, 0.0 }
 0x6dd   : > { %v4081_v53 = vpop.f32.mrb[8].mxu0  ;;  %v4310_v58 = vmax.f32 %v10467_v16, 0.0 }
 0x6de   : > { %v10464_v34 = vadd.f32 %v4081_v53, %v3153_v31  ;;  %v4083_v14 = vpop.f32.mrb[9].mxu0 }
 0x6df   : > { %v10465_v46 = vadd.f32 %v4083_v14, %v3154_v30  ;;  %v10977_v18 = vpack.i.bf16 %v4310_v58, %v4309_v62 }
 0x6e0   : > { %v13189_v1 = vmax.f32 %v10464_v34, 0.0 }
 0x6e1   : > { %v4294_v41 = vpop.f32.mrb[10].mxu1  ;;  %v4308_v39 = vmax.f32 %v10465_v46, 0.0 }
 0x6e2   : > { %v10470_v49 = vadd.f32 %v4294_v41, %v3159_v6  ;;  %v4296_v47 = vpop.f32.mrb[11].mxu1  ;;  %4347 = vrot.lane.b32.xlu0 %v13189_v1, %s11344_s8 }
 0x6e3   : > { %v10471_v37 = vadd.f32 %v4296_v47, %v3160_v29  ;;  %4349 = vrot.lane.b32.xlu1 %v4308_v39, %s11344_s8  ;;  %v10972_v25 = vpack.i.bf16 %v4308_v39, %v13189_v1 }
 0x6e4   : > { %v13194_v33 = vmax.f32 %v10470_v49, 0.0  ;;  %v4223_v42 = vpop.f32.mrb[10].mxu0 }
 0x6e5   : > { %v13201_v35 = vmax.f32 %v10471_v37, 0.0  ;;  %v10468_v43 = vadd.f32 %v4223_v42, %v3157_v44  ;;  %v4225_v15 = vpop.f32.mrb[11].mxu0 }
 0x6e6   : > { %v10469_v50 = vadd.f32 %v4225_v15, %v3158_v45  ;;  %10973 = vrot.lane.b32.xlu0 %v10972_v25, %s11345_s11 }
 0x6e7   : > { %v10982_v4 = vpack.i.bf16 %v13194_v33, %v13201_v35  ;;  %v13207_v27 = vmax.f32 %v10468_v43, 0.0 }
 0x6e8   : > { %v13210_v12 = vmax.f32 %v10469_v50, 0.0  ;;  %v14179_v50 = vld [vmem:[#allocation30_spill] sm:$0xff] }
 0x6e9   : > { %10983 = vrot.lane.b32.xlu1 %v10982_v4, %s11345_s11  ;;  %vm14180_vm12 = vnez %v14179_v50 }
 0x6ea   : > { %v10987_v51 = vpack.i.bf16 %v13210_v12, %v13207_v27  ;;  %10978 = vrot.lane.b32.xlu0 %v10977_v18, %s11345_s11 }
 0x6ed   : > { %10988 = vrot.lane.b32.xlu1 %v10987_v51, %s11345_s11 }
 0x6ee   : > { %4351 = vrot.lane.b32.xlu0 %v4309_v62, %s11344_s8 }
 0x6f1   : > { %4361 = vrot.lane.b32.xlu1 %v13201_v35, %s11344_s8 }
 0x6f2   : > { %4353 = vrot.lane.b32.xlu0 %v4310_v58, %s11344_s8 }
 0x6f5   : > { %4355 = vrot.lane.b32.xlu1 %v13207_v27, %s11344_s8 }
 0x6f6   : > { %4357 = vrot.lane.b32.xlu0 %v13210_v12, %s11344_s8 }
 0x6f9   : > { %4359 = vrot.lane.b32.xlu1 %v13194_v33, %s11344_s8  ;;  %s601_s8 = scalar_lea.vmem [#allocation16], %s600_s17 }
 0x6fa   : > { %s8513_s11 = sshll.u32 %s601_s8, 4  ;;  %s13697_s11 = int_to_ptr.vmem [resolvable:$true] %s8513_s11 }
 0x6fb   : > { %s11253_s16 = scalar_lea.vmem %s13697_s11, 16  ;;  %p11260_p5 = scmp.lt.s32.totalorder %s13697_s11, %s11258_s18 }
 0x6fc   : > { %p11254_p13 = scmp.ne.s32.totalorder %s13697_s11, %s11253_s16  ;;  %p11261_p0 = scmp.lt.s32.totalorder %s11259_s26, %s11253_s16 }
 0x6fe   : > { %p11255_p6 = pnand %p11254_p13, %p14279_p1  ;;  %p11262_p10 = por %p11261_p0, %p11260_p5 }
 0x700   : > { %p11256_p9 = pneg %p11255_p6 }
 0x702   : > { %p11263_p2 = pnand %p11262_p10, %p11256_p9 }
 0x754   : > { %v13227_v2 = vpop.permute.xlu0 %4347 }
 0x755   : > { %v4350_v48 = vpop.permute.xlu1 %4349 }
 0x758   : > { %v10974_v31 = vpop.permute.xlu0 %10973 }
 0x759   : > { %v10976_v30 = vunpack.i.h.bf16 %v10974_v31  ;;  %v10975_v55 = vunpack.i.l.bf16 %v10974_v31 }
 0x75b   : > { %v10984_v3 = vpop.permute.xlu1 %10983  ;;  %v4337_v6 = vsel %vm14173_vm7, %v10975_v55, %v10976_v30 }
 0x75c   : > { %v10985_v53 = vunpack.i.l.bf16 %v10984_v3  ;;  %v4340_v14 = vsel %vm11767_vm3, %v4337_v6, 0.0  ;;  %v9182_v29 = vpack.c.bf16 %v4308_v39, %v4337_v6  ;;  %v10979_v41 = vpop.permute.xlu0 %10978  ;;  %vm14176_vm3 = vmmov %vm14173_vm7  ;;  %v10986_v31 = vunpack.i.h.bf16 %v10984_v3 }
 0x75d   : > { %v10981_v49 = vunpack.i.h.bf16 %v10979_v41  ;;  %v10980_v47 = vunpack.i.l.bf16 %v10979_v41  ;;  %v10992_v45 = vpack.i.bf16 %v4308_v39, %v4340_v14  ;;  %vm14177_vm11 = vmmov %vm14176_vm3  ;;  %vm14184_vm7 = vcmp.lt.s32.totalorder %v11725_v22, 127  ;;  %v8754_v41 = vld [vmem:[%s13742_s5 + $0x8] sm:$0xff] }
 0x75e   : > { %v13235_v46 = vsel %vm14175_vm8, %v10985_v53, %v10975_v55  ;;  %9184 = vmatprep.subr.msk.bf16.mxu0 %vm14134_vm0, %v9182_v29  ;;  %vm14178_vm5 = vmmov %vm14176_vm3  ;;  %vm14182_vm0 = vnez %v14181_v38 }
 0x75f   : > { %v9185_v40 = vpack.c.bf16 %v13189_v1, %v13235_v46  ;;  %v10989_v16 = vpop.permute.xlu1 %10988  ;;  %v4335_v42 = vsel %vm14176_vm3, %v10980_v47, %v10981_v49  ;;  %v4336_v25 = vsel %vm14177_vm11, %v10976_v30, %v10980_v47  ;;  %10993 = vrot.lane.b32.xlu1 %v10992_v45, %s11346_s15  ;;  %vm14185_vm8 = vmmov %vm14184_vm7  ;;  %vm14189_vm11 = vnez %v13962_v36 }
 0x760   : > { %v10991_v37 = vunpack.i.h.bf16 %v10989_v16  ;;  %v10990_v44 = vunpack.i.l.bf16 %v10989_v16  ;;  %v4352_v15 = vpop.permute.xlu0 %4351  ;;  %v4341_v4 = vsel %vm14180_vm12, %v4336_v25, 0.0  ;;  %v4342_v39 = vsel %vm14182_vm0, %v4335_v42, 0.0  ;;  %vm14191_vm12 = vmmov %vm14184_vm7 }
 0x761   : > { %9187 = vmatpush1.bf16.msk.msra.mxu0 %vm14136_vm2, %v9185_v40  ;;  %v9188_v18 = vpack.c.bf16 %v4310_v58, %v4335_v42  ;;  %v9191_v5 = vpack.c.bf16 %v4309_v62, %v4336_v25  ;;  %vm14183_vm2 = vmmov %vm14176_vm3  ;;  %v4368_v6 = vsel %vm14184_vm7, %v4350_v48, %v4352_v15  ;;  %v4369_v34 = vsel %vm14185_vm8, %v13227_v2, %v4350_v48 }
 0x762   : > { %v13249_v43 = vsel %vm14178_vm5, %v10990_v44, %v10991_v37  ;;  %v4334_v30 = vsel %vm14183_vm2, %v10981_v49, %v10990_v44  ;;  %8757 = vmatprep.subr.msk.mxu0 %vm11873_vm10, %v4368_v6  ;;  %v11002_v3 = vpack.i.bf16 %v4310_v58, %v4342_v39  ;;  %v10997_v14 = vpack.i.bf16 %v4309_v62, %v4341_v4  ;;  %vm14188_vm3 = vmmov %vm14183_vm2  ;;  %v14212_v39 = vld [vmem:[#allocation35_spill] sm:$0xff] }
 0x763   : > { %v4362_v51 = vpop.permute.xlu1 %4361  ;;  %v9194_v55 = vpack.c.bf16 %v13210_v12, %v13249_v43  ;;  %9190 = vmatprep.subr.msk.bf16.mxu1 %vm14129_vm9, %v9188_v18  ;;  %vm14186_vm9 = vmmov %vm14183_vm2  ;;  %v9197_v40 = vpack.c.bf16 %v13207_v27, %v4334_v30  ;;  %v4332_v62 = vsel %vm14188_vm3, %v10991_v37, %v10986_v31  ;;  %vm14190_vm5 = vcmask 195584  }
 0x764   : > { %9193 = vmatpush1.bf16.msk.msra.mxu1 %vm14131_vm13, %v9191_v5  ;;  %v4354_v29 = vpop.permute.xlu0 %4353  ;;  %v4331_v48 = vsel %vm14186_vm9, %v10986_v31, %v10985_v53  ;;  %11003 = vrot.lane.b32.xlu0 %v11002_v3, %s11346_s15  ;;  %vm14187_vm13 = vmmov %vm14184_vm7  ;;  %vm14192_vm0 = vnez %v13912_v7  ;;  %v4371_v16 = vsel %vm14093_vm4, %v4369_v34, 0.0  ;;  %v4372_v36 = vsel %vm11873_vm10, %v4368_v6, 0.0 }
 0x765   : > { %8758 = vmatpush1.msk.msra.mxu0 %vm14093_vm4, %v4369_v34  ;;  %10998 = vrot.lane.b32.xlu1 %v10997_v14, %s11346_s15  ;;  %v4367_v58 = vsel %vm14191_vm12, %v4352_v15, %v4354_v29  ;;  %v9200_v49 = vpack.c.bf16 %v13201_v35, %v4331_v48  ;;  %vm14193_vm2 = vnez %v13907_v60  ;;  %v9203_v21 = vpack.c.bf16 %v13194_v33, %v4332_v62  ;;  %vm14197_vm10 = vmmov %vm14185_vm8  ;;  %v14203_v60 = vld [vmem:[#allocation38_spill] sm:$0xff]  ;;  %v14208_v15 = vld [vmem:[#allocation36_spill] sm:$0xff] }
 0x766   : > { %9196 = vmatprep.subr.msk.bf16.mxu0 %vm14189_vm11, %v9194_v55  ;;  %8759 = vmatmul.mubr.msk.f32.vlgmr.msra.gmra.mrb[12].mxu0 %vm14190_vm5, %v8754_v41  ;;  %vm14195_vm4 = vnez %v13952_v20  ;;  %v4370_v32 = vsel %vm14197_vm10, %v4362_v51, %v13227_v2  ;;  %vm14198_vm9 = vnez %v13956_v8  ;;  %v4373_v44 = vsel %vm14193_vm2, %v4367_v58, 0.0  ;;  %vm14200_vm3 = vmmov %vm14185_vm8 }
 0x767   : > { %v4356_v0 = vpop.permute.xlu1 %4355  ;;  %9199 = vmatpush1.bf16.msk.msra.mxu0 %vm14145_vm15, %v9197_v40  ;;  %4783 = vmatprep.mubr.f32.mxu0 %v13947_v9  ;;  %vm14194_vm15 = vmmov %vm14184_vm7  ;;  %vm14204_vm12 = vnez %v14203_v60  ;;  %vm14213_vm10 = vnez %v14212_v39 }
 0x768   : > { %v4366_v59 = vsel %vm14187_vm13, %v4354_v29, %v4356_v0  ;;  %v4358_v53 = vpop.permute.xlu0 %4357  ;;  %4389 = vrot.lane.b32.xlu0 %v4372_v36, %s11346_s15  ;;  %vm14196_vm7 = vmmov %vm14190_vm5  ;;  %vm14199_vm13 = vnez %v13929_v19  ;;  %v4343_v8 = vsel %vm14204_vm12, %v4334_v30, 0.0  ;;  %v4345_v18 = vsel %vm14213_vm10, %v4332_v62, 0.0 }
 0x769   : > { %8762 = vmatprep.subr.msk.mxu1 %vm14192_vm0, %v4366_v59  ;;  %4383 = vrot.lane.b32.xlu1 %v4371_v16, %s11346_s15  ;;  %v4365_v37 = vsel %vm14185_vm8, %v4356_v0, %v4358_v53  ;;  %vm14201_vm11 = vmmov %vm14190_vm5  ;;  %vm14202_vm5 = vnez %v13927_v56  ;;  %v11027_v2 = vpack.i.bf16 %v13207_v27, %v4343_v8  ;;  %v14210_v27 = vld [vmem:[#allocation37_spill] sm:$0xff]  ;;  %v4378_v5 = vsel %vm14199_vm13, %v4370_v32, 0.0 }
 0x76a   : > { %8763 = vmatpush1.msk.msra.mxu1 %vm14193_vm2, %v4367_v58  ;;  %vm14205_vm2 = vmmov %vm14196_vm7  ;;  %v4375_v7 = vsel %vm14105_vm6, %v4365_v37, 0.0 }
 0x76b   : > { %v4360_v47 = vpop.permute.xlu1 %4359  ;;  %9202 = vmatprep.subr.msk.bf16.mxu1 %vm14195_vm4, %v9200_v49  ;;  %8764 = vmatmul.mubr.msk.f32.vlgmr.msra.gmra.mrb[12].mxu1 %vm14196_vm7, %v8754_v41  ;;  %vm14209_vm4 = vnez %v14208_v15  ;;  %vm14211_vm7 = vnez %v14210_v27 }
 0x76c   : > { %v4364_v24 = vsel %vm14194_vm15, %v4358_v53, %v4360_v47  ;;  %9205 = vmatpush1.bf16.msk.msra.mxu1 %vm14198_vm9, %v9203_v21  ;;  %4395 = vrot.lane.b32.xlu0 %v4373_v44, %s11346_s15  ;;  %v4363_v20 = vsel %vm14200_vm3, %v4360_v47, %v4362_v51  ;;  %v4346_v50 = vsel %vm14209_vm4, %v4331_v48, 0.0  ;;  %v4344_v38 = vsel %vm14211_vm7, %v13249_v43, 0.0 }
 0x76d   : > { %8767 = vmatprep.subr.msk.mxu0 %vm14102_vm14, %v4364_v24  ;;  %8772 = vmatprep.subr.msk.mxu1 %vm14199_vm13, %v4370_v32  ;;  %v11037_v4 = vpack.i.bf16 %v13201_v35, %v4346_v50  ;;  %v11047_v35 = vpack.i.bf16 %v13194_v33, %v4345_v18  ;;  %v4377_v19 = vsel %vm14202_vm5, %v4363_v20, 0.0 }
 0x76e   : > { %8768 = vmatpush1.msk.msra.mxu0 %vm14105_vm6, %v4365_v37  ;;  %11008 = vrot.lane.b32.xlu1 %v10992_v45, %s11347_s22  ;;  %v14206_v45 = vld [vmem:[#allocation33_spill] sm:$0xff] }
 0x76f   : > { %4854 = vmatprep.mubr.f32.mxu1 %v13947_v9  ;;  %8769 = vmatmul.mubr.msk.f32.vlgmr.msra.gmra.mrb[14].mxu0 %vm14201_vm11, %v8754_v41  ;;  %vm14207_vm15 = vnez %v14206_v45 }
 0x770   : > { %8773 = vmatpush1.msk.msra.mxu1 %vm14202_vm5, %v4363_v20  ;;  %4928 = vmatprep.mubr.f32.mxu0 %v13947_v9  ;;  %v4339_v42 = vsel %vm14207_vm15, %v13235_v46, 0.0  ;;  %v4374_v46 = vsel %vm14192_vm0, %v4366_v59, 0.0 }
 0x771   : > { %8774 = vmatmul.mubr.msk.f32.vlgmr.msra.gmra.mrb[14].mxu1 %vm14205_vm2, %v8754_v41  ;;  %11013 = vrot.lane.b32.xlu0 %v10997_v14, %s11347_s22  ;;  %v11032_v25 = vpack.i.bf16 %v13189_v1, %v4339_v42  ;;  %v11042_v1 = vpack.i.bf16 %v13210_v12, %v4344_v38  ;;  %v4376_v12 = vsel %vm14102_vm14, %v4364_v24, 0.0  ;;  %vm14214_vm14 = vcmp.lt.s32.totalorder %v11725_v22, 32 }
 0x772   : > { %11018 = vrot.lane.b32.xlu1 %v11002_v3, %s11347_s22  ;;  %4999 = vmatprep.mubr.f32.mxu1 %v13947_v9  ;;  %vm14215_vm6 = vmmov %vm14214_vm14 }
 0x773   : > { %vm14216_vm0 = vmmov %vm14215_vm6 }
 0x774   : > { %vm14217_vm8 = vmmov %vm14216_vm0 }
 0x775   : > { %11028 = vrot.lane.b32.xlu0 %v11027_v2, %s11347_s22  ;;  %vm14218_vm9 = vmmov %vm14216_vm0 }
 0x776   : > { %4485 = vrot.lane.b32.xlu1 %v4372_v36, %s11347_s22  ;;  %vm14219_vm13 = vmmov %vm14216_vm0 }
 0x777   : > { %vm14220_vm3 = vmmov %vm14216_vm0 }
 0x778   : > { %vm14221_vm11 = vmmov %vm14216_vm0 }
 0x779   : > { %11033 = vrot.lane.b32.xlu0 %v11032_v25, %s11346_s15  ;;  %vm14222_vm5 = vmmov %vm14216_vm0 }
 0x77a   : > { %11023 = vrot.lane.b32.xlu1 %v11027_v2, %s11346_s15  ;;  %vm14223_vm12 = vmmov %vm14216_vm0 }
 0x77b   : > { %vm14226_vm4 = vmmov %vm14216_vm0 }
 0x77c   : > { %vm14227_vm7 = vmmov %vm14216_vm0 }
 0x77d   : > { %11038 = vrot.lane.b32.xlu0 %v11037_v4, %s11346_s15  ;;  %vm14228_vm10 = vmmov %vm14216_vm0 }
 0x77e   : > { %4401 = vrot.lane.b32.xlu1 %v4374_v46, %s11346_s15 }
 0x781   : > { %11043 = vrot.lane.b32.xlu0 %v11042_v1, %s11346_s15 }
 0x782   : > { %4425 = vrot.lane.b32.xlu1 %v4378_v5, %s11346_s15 }
 0x785   : > { %11048 = vrot.lane.b32.xlu0 %v11047_v35, %s11346_s15 }
 0x786   : > { %4407 = vrot.lane.b32.xlu1 %v4375_v7, %s11346_s15 }
 0x789   : > { %4413 = vrot.lane.b32.xlu0 %v4376_v12, %s11346_s15 }
 0x78a   : > { %11053 = vrot.lane.b32.xlu1 %v11032_v25, %s11347_s22 }
 0x78d   : > { %4419 = vrot.lane.b32.xlu0 %v4377_v19, %s11346_s15 }
 0x78e   : > { %4479 = vrot.lane.b32.xlu1 %v4371_v16, %s11347_s22 }
 0x791   : > { %4491 = vrot.lane.b32.xlu0 %v4373_v44, %s11347_s22 }
 0x792   : > { %4503 = vrot.lane.b32.xlu1 %v4375_v7, %s11347_s22 }
 0x795   : > { %4497 = vrot.lane.b32.xlu0 %v4374_v46, %s11347_s22 }
 0x796   : > { %11063 = vrot.lane.b32.xlu1 %v11047_v35, %s11347_s22  ;;  %v14224_v35 = vld [vmem:[#allocation40_spill] sm:$0xff] }
 0x797   : > { %vm14225_vm15 = vnez %v14224_v35 }
 0x799   : > { %11058 = vrot.lane.b32.xlu0 %v11042_v1, %s11347_s22 }
 0x79a   : > { %4509 = vrot.lane.b32.xlu1 %v4376_v12, %s11347_s22 }
 0x79d   : > { %11068 = vrot.lane.b32.xlu0 %v11037_v4, %s11347_s22  ;;  %v13424_v4 = vld [vmem:[%s13742_s5] sm:$0xff] }
 0x79e   : > { %4521 = vrot.lane.b32.xlu1 %v4378_v5, %s11347_s22 }
 0x7a1   : > { %4515 = vrot.lane.b32.xlu0 %v4377_v19, %s11347_s22 }
 0x7d1   : > { %v10994_v56 = vpop.permute.xlu1 %10993 }
 0x7d2   : > { %v10996_v26 = vunpack.i.h.bf16 %v10994_v56  ;;  %v10995_v23 = vunpack.i.l.bf16 %v10994_v56 }
 0x7d6   : > { %v11004_v33 = vpop.permute.xlu0 %11003 }
 0x7d7   : > { %v10999_v43 = vpop.permute.xlu1 %10998  ;;  %v11006_v51 = vunpack.i.h.bf16 %v11004_v33  ;;  %v11005_v31 = vunpack.i.l.bf16 %v11004_v33 }
 0x7d8   : > { %v11001_v30 = vunpack.i.h.bf16 %v10999_v43  ;;  %v11000_v55 = vunpack.i.l.bf16 %v10999_v43 }
 0x7da   : > { %v4442_v6 = vsel %vm14214_vm14, %v10995_v23, %v11000_v55  ;;  %v4443_v34 = vsel %vm14215_vm6, %v10996_v26, %v11001_v30  ;;  %v4439_v3 = vsel %vm14216_vm0, %v11000_v55, %v11005_v31  ;;  %v4440_v14 = vsel %vm14217_vm8, %v11001_v30, %v11006_v51  ;;  %v4390_v41 = vpop.permute.xlu0 %4389  ;;  %vm14229_vm14 = vmmov %vm14216_vm0 }
 0x7db   : > { %v9213_v29 = vpack.c.bf16 %v4443_v34, %v4442_v6  ;;  %v4384_v0 = vpop.permute.xlu1 %4383  ;;  %v9211_v48 = vpack.c.bf16 %v4440_v14, %v4439_v3  ;;  %vm14230_vm6 = vmmov %vm14216_vm0  ;;  %vm14231_vm8 = vcmp.ge.s32.totalorder %v11725_v22, 32 }
 0x7dc   : > { %v4447_v7 = vsel %vm14226_vm4, %v4384_v0, %v4390_v41 }
 0x7dd   : > { %9212 = vmatprep.subr.bf16.mxu1 %v9211_v48 }
 0x7de   : > { %9214 = vmatpush1.bf16.msra.mxu1 %v9213_v29  ;;  %v4396_v40 = vpop.permute.xlu0 %4395 }
 0x7df   : > { %v4444_v45 = vsel %vm14221_vm11, %v4390_v41, %v4396_v40  ;;  %vm14235_vm11 = vmmov %vm14216_vm0 }
 0x7e0   : > { %v13396_v59 = vpop.permute.xlu1 %11008 }
 0x7e1   : > { %v11010_v33 = vunpack.i.l.bf16 %v13396_v59 }
 0x7e3   : > { %v13398_v62 = vpop.permute.xlu0 %11013 }
 0x7e4   : > { %v13400_v58 = vpop.permute.xlu1 %11018  ;;  %v11016_v18 = vunpack.i.h.bf16 %v13398_v62  ;;  %v11015_v5 = vunpack.i.l.bf16 %v13398_v62 }
 0x7e5   : > { %v11021_v34 = vunpack.i.h.bf16 %v13400_v58  ;;  %v11020_v41 = vunpack.i.l.bf16 %v13400_v58 }
 0x7e7   : > { %v13404_v16 = vpop.permute.xlu0 %11028 }
 0x7e8   : > { %v13402_v53 = vpop.permute.xlu1 %4485  ;;  %v11030_v62 = vunpack.i.l.bf16 %v13404_v16 }
 0x7eb   : > { %v11034_v36 = vpop.permute.xlu0 %11033 }
 0x7ec   : > { %v11024_v49 = vpop.permute.xlu1 %11023  ;;  %v11036_v47 = vunpack.i.h.bf16 %v11034_v36  ;;  %v11035_v21 = vunpack.i.l.bf16 %v11034_v36 }
 0x7ed   : > { %v11026_v42 = vunpack.i.h.bf16 %v11024_v49  ;;  %v11025_v25 = vunpack.i.l.bf16 %v11024_v49 }
 0x7ee   : > { %v4445_v24 = vsel %vm14218_vm9, %v11035_v21, %v10995_v23  ;;  %v4446_v32 = vsel %vm14219_vm13, %v11036_v47, %v10996_v26  ;;  %v11011_v23 = vunpack.i.h.bf16 %v13396_v59  ;;  %vm14232_vm9 = vcmp.lt.s32.totalorder %v11725_v22, 96 }
 0x7ef   : > { %v11039_v44 = vpop.permute.xlu0 %11038  ;;  %v9206_v20 = vpack.c.bf16 %v4446_v32, %v4445_v24  ;;  %v4437_v12 = vsel %vm14227_vm7, %v11006_v51, %v11026_v42  ;;  %v4436_v19 = vsel %vm14228_vm10, %v11005_v31, %v11025_v25  ;;  %v4538_v14 = vsel %vm14232_vm9, %v11010_v33, %v11015_v5  ;;  %vm14233_vm13 = vmmov %vm14232_vm9 }
 0x7f0   : > { %v13410_v37 = vpop.permute.xlu1 %4401  ;;  %v11041_v60 = vunpack.i.h.bf16 %v11039_v44  ;;  %v11040_v8 = vunpack.i.l.bf16 %v11039_v44  ;;  %v9217_v3 = vpack.c.bf16 %v4437_v12, %v4436_v19  ;;  %v4539_v29 = vsel %vm14233_vm13, %v11011_v23, %v11016_v18  ;;  %vm14240_vm4 = vmmov %vm14232_vm9 }
 0x7f1   : > { %v4441_v2 = vsel %vm14220_vm3, %v4396_v40, %v13410_v37  ;;  %9207 = vmatprep.subr.bf16.mxu0 %v9206_v20  ;;  %vm14234_vm3 = vmmov %vm14216_vm0  ;;  %v11031_v59 = vunpack.i.h.bf16 %v13404_v16  ;;  %v4536_v20 = vsel %vm14240_vm4, %v11016_v18, %v11021_v34 }
 0x7f2   : > { %4939 = vmatprep.subr.mxu1 %v4441_v2  ;;  %v4449_v15 = vsel %vm14222_vm5, %v11041_v60, %v11036_v47  ;;  %v4448_v50 = vsel %vm14223_vm12, %v11040_v8, %v11035_v21  ;;  %vm14236_vm5 = vmmov %vm14205_vm2 }
 0x7f3   : > { %4940 = vmatpush1.msra.mxu1 %v4444_v45  ;;  %v9208_v27 = vpack.c.bf16 %v4449_v15, %v4448_v50  ;;  %v11044_v46 = vpop.permute.xlu0 %11043  ;;  %vm14237_vm12 = vmmov %vm14216_vm0  ;;  %v9223_v45 = vpack.c.bf16 %v4539_v29, %v4538_v14 }
 0x7f4   : > { %v13426_v38 = vpop.permute.xlu1 %4425  ;;  %8779 = vmatmul.mubr.msk.f32.vlgmr.msra.gmra.mrb[12].mxu1 %vm14205_vm2, %v13424_v4  ;;  %v11046_v1 = vunpack.i.h.bf16 %v11044_v46  ;;  %v11045_v39 = vunpack.i.l.bf16 %v11044_v46  ;;  %vm14238_vm2 = vmmov %vm14216_vm0 }
 0x7f5   : > { %5141 = vmatprep.mubr.f32.mxu1 %v13947_v9  ;;  %9210 = vmatpush1.bf16.msk.msra.mxu0 %vm14225_vm15, %v9208_v27  ;;  %v4450_v51 = vsel %vm14216_vm0, %v13426_v38, %v4384_v0  ;;  %vm14239_vm15 = vmmov %vm14216_vm0 }
 0x7f6   : > { %4868 = vmatprep.subr.mxu0 %v4447_v7  ;;  %v4433_v56 = vsel %vm14229_vm14, %v11025_v25, %v11045_v39  ;;  %v4434_v26 = vsel %vm14230_vm6, %v11026_v42, %v11046_v1  ;;  %vm14241_vm7 = vmmov %vm14216_vm0 }
 0x7f7   : > { %v11049_v30 = vpop.permute.xlu0 %11048  ;;  %v9215_v55 = vpack.c.bf16 %v4434_v26, %v4433_v56  ;;  %vm14242_vm10 = vmmov %vm14240_vm4 }
 0x7f8   : > { %v4408_v43 = vpop.permute.xlu1 %4407  ;;  %v11051_v6 = vunpack.i.h.bf16 %v11049_v30  ;;  %v11050_v31 = vunpack.i.l.bf16 %v11049_v30  ;;  %vm14243_vm14 = vmmov %vm14240_vm4 }
 0x7f9   : > { %8777 = vmatpush1.msk.msra.mxu0 %vm14231_vm8, %v4450_v51  ;;  %vm14244_vm6 = vmmov %vm14240_vm4 }
 0x7fa   : > { %v4430_v48 = vsel %vm14234_vm3, %v11045_v39, %v11050_v31  ;;  %v4431_v0 = vsel %vm14235_vm11, %v11046_v1, %v11051_v6  ;;  %9216 = vmatprep.subr.bf16.mxu0 %v9215_v55  ;;  %8778 = vmatmul.mubr.msk.f32.vlgmr.msra.gmra.mrb[12].mxu0 %vm14236_vm5, %v13424_v4  ;;  %v4427_v40 = vsel %vm14237_vm12, %v11050_v31, %v11040_v8  ;;  %vm14245_vm0 = vmmov %vm14240_vm4 }
 0x7fb   : > { %v9221_v49 = vpack.c.bf16 %v4431_v0, %v4430_v48  ;;  %v4414_v58 = vpop.permute.xlu0 %4413  ;;  %9218 = vmatpush1.bf16.msra.mxu0 %v9217_v3  ;;  %v4428_v47 = vsel %vm14238_vm2, %v11051_v6, %v11041_v60  ;;  %5070 = vmatprep.mubr.f32.mxu0 %v13947_v9  ;;  %v4438_v8 = vsel %vm14241_vm7, %v13410_v37, %v4408_v43  ;;  %vm14246_vm8 = vmmov %vm14245_vm0  ;;  %v5469_v48 = vld [vmem:[#allocation5 + $0x80] sm:$0xff]  ;;  %v5470_v0 = vld [vmem:[#allocation5 + $0x88] sm:$0xff] }
 0x7fc   : > { %v13468_v36 = vpop.permute.xlu1 %11053  ;;  %v4435_v32 = vsel %vm14239_vm15, %v4408_v43, %v4414_v58  ;;  %v9219_v44 = vpack.c.bf16 %v4428_v47, %v4427_v40  ;;  %v4532_v37 = vsel %vm14244_vm6, %v11020_v41, %v11030_v62  ;;  %v4533_v50 = vsel %vm14245_vm0, %v11021_v34, %v11031_v59  ;;  %vm14247_vm9 = vmmov %vm14238_vm2 }
 0x7fd   : > { %v11056_v21 = vunpack.i.h.bf16 %v13468_v36  ;;  %v11055_v24 = vunpack.i.l.bf16 %v13468_v36  ;;  %5010 = vmatprep.subr.mxu0 %v4435_v32  ;;  %v4535_v27 = vsel %vm14246_vm8, %v11015_v5, %v11020_v41  ;;  %vm14248_vm13 = vmmov %vm14236_vm5  ;;  %v9227_v39 = vpack.c.bf16 %v4533_v50, %v4532_v37  ;;  %v5485_v37 = vld [vmem:[#allocation5 + $0x100] sm:$0xff]  ;;  %v5486_v50 = vld [vmem:[#allocation5 + $0x108] sm:$0xff] }
 0x7fe   : > { %9220 = vmatprep.subr.bf16.mxu1 %v9219_v44  ;;  %vm14249_vm3 = vmmov %vm14238_vm2  ;;  %v9229_v18 = vpack.c.bf16 %v4536_v20, %v4535_v27 }
 0x7ff   : > { %v4542_v60 = vsel %vm14242_vm10, %v11056_v21, %v11011_v23  ;;  %v4541_v2 = vsel %vm14243_vm14, %v11055_v24, %v11010_v33  ;;  %9222 = vmatpush1.bf16.msra.mxu1 %v9221_v49  ;;  %v4420_v15 = vpop.permute.xlu0 %4419  ;;  %5011 = vmatpush1.msra.mxu0 %v4438_v8  ;;  %vm14250_vm11 = vmmov %vm14236_vm5  ;;  %v5453_v49 = vld [vmem:[#allocation5] sm:$0xff]  ;;  %v5471_v8 = vld [vmem:[#allocation5 + $0x90] sm:$0xff] }
 0x800   : > { %v9225_v42 = vpack.c.bf16 %v4542_v60, %v4541_v2  ;;  %v13490_v25 = vpop.permute.xlu1 %4479  ;;  %v4432_v46 = vsel %vm14247_vm9, %v4414_v58, %v4420_v15  ;;  %9224 = vmatprep.subr.bf16.mxu0 %v9223_v45  ;;  %8780 = vmatmul.mubr.msk.f32.vlgmr.msra.gmra.mrb[14].mxu0 %vm14248_vm13, %v13424_v4  ;;  %v4429_v1 = vsel %vm14249_vm3, %v4420_v15, %v13426_v38  ;;  %vm14251_vm5 = vmmov %vm14245_vm0  ;;  %v13518_v38 = vld [vmem:[%s13742_s5 + $0x10] sm:$0xff]  ;;  %v5472_v60 = vld [vmem:[#allocation5 + $0x98] sm:$0xff] }
 0x801   : > { %5081 = vmatprep.subr.mxu1 %v4429_v1  ;;  %5217 = vmatprep.mubr.f32.mxu0 %v13947_v9  ;;  %vm14252_vm12 = vmmov %vm14245_vm0  ;;  %v5454_v58 = vld [vmem:[#allocation5 + $0x8] sm:$0xff]  ;;  %v9240_v2 = vpack.c.bf16 %v5470_v0, %v5469_v48  ;;  %v5501_v45 = vld [vmem:[#allocation5 + $0x180] sm:$0xff] }
 0x802   : > { %9226 = vmatpush1.bf16.msra.mxu0 %v9225_v42  ;;  %v4543_v12 = vsel %vm14252_vm12, %v13490_v25, %v13402_v53  ;;  %vm14253_vm2 = vmmov %vm14250_vm11  ;;  %v5502_v42 = vld [vmem:[#allocation5 + $0x188] sm:$0xff]  ;;  %v5455_v15 = vld [vmem:[#allocation5 + $0x10] sm:$0xff] }
 0x803   : > { %5082 = vmatpush1.msra.mxu1 %v4432_v46  ;;  %v4492_v5 = vpop.permute.xlu0 %4491  ;;  %vm14254_vm15 = vmmov %vm14245_vm0  ;;  %v9244_v46 = vpack.c.bf16 %v5472_v60, %v5471_v8  ;;  %v5456_v1 = vld [vmem:[#allocation5 + $0x18] sm:$0xff]  ;;  %v9272_v10 = vpack.c.bf16 %v5502_v42, %v5501_v45  ;;  %v5478_v48 = vld [vmem:[#allocation5 + $0xc8] sm:$0xff] }
 0x804   : > { %v4504_v35 = vpop.permute.xlu1 %4503  ;;  %9228 = vmatprep.subr.bf16.mxu1 %v9227_v39  ;;  %8781 = vmatmul.mubr.msk.f32.vlgmr.msra.gmra.mrb[14].mxu1 %vm14250_vm11, %v13424_v4  ;;  %v4540_v7 = vsel %vm14251_vm5, %v13402_v53, %v4492_v5  ;;  %vm14255_vm4 = vmmov %vm14245_vm0  ;;  %v5503_v39 = vld [vmem:[#allocation5 + $0x190] sm:$0xff]  ;;  %v5493_v45 = vld [vmem:[#allocation5 + $0x140] sm:$0xff] }
 0x805   : > { %9230 = vmatpush1.bf16.msra.mxu1 %v9229_v18  ;;  %5157 = vmatprep.subr.mxu0 %v4540_v7  ;;  %vm14256_vm7 = vmmov %vm14253_vm2  ;;  %v5504_v18 = vld [vmem:[#allocation5 + $0x198] sm:$0xff]  ;;  %v9274_v7 = vpack.c.bf16 %v5486_v50, %v5485_v37  ;;  %v5494_v42 = vld [vmem:[#allocation5 + $0x148] sm:$0xff] }
 0x806   : > { %5158 = vmatpush1.msra.mxu0 %v4543_v12  ;;  %5288 = vmatprep.mubr.f32.mxu1 %v13947_v9  ;;  %vm14257_vm10 = vmmov %vm14245_vm0  ;;  %v9246_v12 = vpack.c.bf16 %v5456_v1, %v5455_v15  ;;  %v5511_v15 = vld [vmem:[#allocation5 + $0x1d0] sm:$0xff]  ;;  %v5512_v37 = vld [vmem:[#allocation5 + $0x1d8] sm:$0xff] }
 0x807   : > { %v4498_v19 = vpop.permute.xlu0 %4497  ;;  %8783 = vmatmul.mubr.msk.f32.vlgmr.msra.gmra.mrb[12].mxu0 %vm14253_vm2, %v13518_v38  ;;  %vm14258_vm14 = vmmov %vm14245_vm0  ;;  %v5481_v50 = vld [vmem:[#allocation5 + $0xe0] sm:$0xff] }
 0x808   : > { %v11064_v4 = vpop.permute.xlu1 %11063  ;;  %v4537_v56 = vsel %vm14254_vm15, %v4492_v5, %v4498_v19  ;;  %v4534_v26 = vsel %vm14255_vm4, %v4498_v19, %v4504_v35  ;;  %5359 = vmatprep.mubr.f32.mxu0 %v13947_v9  ;;  %vm14259_vm6 = vmmov %vm14245_vm0  ;;  %vm14267_vm15 = vcmp.lt.s32.totalorder %v14165_v17, 992  ;;  %v5474_v5 = vld [vmem:[#allocation5 + $0xa8] sm:$0xff]  ;;  %v5457_v19 = vld [vmem:[#allocation5 + $0x20] sm:$0xff] }
 0x809   : > { %5228 = vmatprep.subr.mxu1 %v4534_v26  ;;  %v11066_v23 = vunpack.i.h.bf16 %v11064_v4  ;;  %v11065_v33 = vunpack.i.l.bf16 %v11064_v4  ;;  %vm14260_vm8 = vmmov %vm14245_vm0  ;;  %v9276_v4 = vpack.c.bf16 %v5504_v18, %v5503_v39  ;;  %v5488_v26 = vld [vmem:[#allocation5 + $0x118] sm:$0xff]  ;;  %v5505_v17 = vld [vmem:[#allocation5 + $0x1a0] sm:$0xff]  ;;  %v9292_v39 = vpack.c.bf16 %v5512_v37, %v5511_v15 }
 0x80a   : > { %5229 = vmatpush1.msra.mxu1 %v4537_v56  ;;  %vm14261_vm9 = vmmov %vm14245_vm0  ;;  %v5487_v56 = vld [vmem:[#allocation5 + $0x110] sm:$0xff]  ;;  %v5568_v15 = vld [vmem:[#allocation5 + $0x398] sm:$0xff] }
 0x80b   : > { %v11059_v53 = vpop.permute.xlu0 %11058  ;;  %8784 = vmatmul.mubr.msk.f32.vlgmr.msra.gmra.mrb[12].mxu1 %vm14256_vm7, %v13518_v38  ;;  %vm14262_vm13 = vmmov %vm14245_vm0  ;;  %v9278_v22 = vpack.c.bf16 %v5488_v26, %v5487_v56  ;;  %v5495_v18 = vld [vmem:[#allocation5 + $0x150] sm:$0xff]  ;;  %v5513_v56 = vld [vmem:[#allocation5 + $0x1e0] sm:$0xff]  ;;  %vm5861_vm7 = vcmask 523264  }
 0x80c   : > { %v11061_v43 = vunpack.i.h.bf16 %v11059_v53  ;;  %v11060_v30 = vunpack.i.l.bf16 %v11059_v53  ;;  %5430 = vmatprep.mubr.f32.mxu1 %v13947_v9  ;;  %v4510_v55 = vpop.permute.xlu1 %4509  ;;  %vm14263_vm3 = vmmov %vm14245_vm0 }
 0x80d   : > { %vm14264_vm11 = vmmov %vm14245_vm0 }
 0x80e   : > { %v4530_v51 = vsel %vm14257_vm10, %v11031_v59, %v11061_v43  ;;  %v4529_v6 = vsel %vm14258_vm14, %v11030_v62, %v11060_v30  ;;  %v4526_v31 = vsel %vm14259_vm6, %v11060_v30, %v11065_v33  ;;  %v4527_v34 = vsel %vm14245_vm0, %v11061_v43, %v11066_v23  ;;  %vm14265_vm5 = vmmov %vm14245_vm0  ;;  %v5475_v43 = vld [vmem:[#allocation5 + $0xb0] sm:$0xff]  ;;  %v5476_v30 = vld [vmem:[#allocation5 + $0xb8] sm:$0xff] }
 0x80f   : > { %v9233_v3 = vpack.c.bf16 %v4530_v51, %v4529_v6  ;;  %v11069_v14 = vpop.permute.xlu0 %11068  ;;  %v9231_v9 = vpack.c.bf16 %v4527_v34, %v4526_v31  ;;  %v4531_v36 = vsel %vm14265_vm5, %v4504_v35, %v4510_v55  ;;  %vm14266_vm12 = vmmov %vm14245_vm0  ;;  %v5473_v35 = vld [vmem:[#allocation5 + $0xa0] sm:$0xff]  ;;  %v5459_v6 = vld [vmem:[#allocation5 + $0x30] sm:$0xff] }
 0x810   : > { %v11071_v29 = vunpack.i.h.bf16 %v11069_v14  ;;  %v11070_v41 = vunpack.i.l.bf16 %v11069_v14  ;;  %v4522_v47 = vpop.permute.xlu1 %4521  ;;  %v9248_v53 = vpack.c.bf16 %v5474_v5, %v5473_v35  ;;  %vm14269_vm4 = vmmov %vm14253_vm2  ;;  %v5489_v31 = vld [vmem:[#allocation5 + $0x120] sm:$0xff]  ;;  %v5490_v34 = vld [vmem:[#allocation5 + $0x128] sm:$0xff] }
 0x811   : > { %9232 = vmatprep.subr.bf16.mxu0 %v9231_v9  ;;  %v4546_v27 = vsel %vm14266_vm12, %v4522_v47, %v13490_v25  ;;  %v5460_v14 = vld [vmem:[#allocation5 + $0x38] sm:$0xff]  ;;  %v5507_v9 = vld [vmem:[#allocation5 + $0x1b0] sm:$0xff]  ;;  %v5465_v5 = vld [vmem:[#allocation5 + $0x60] sm:$0xff] }
 0x812   : > { %v4524_v16 = vsel %vm14260_vm8, %v11066_v23, %v11071_v29  ;;  %v4545_v40 = vsel %vm14261_vm9, %v11071_v29, %v11056_v21  ;;  %v4523_v59 = vsel %vm14262_vm13, %v11065_v33, %v11070_v41  ;;  %v4544_v62 = vsel %vm14263_vm3, %v11070_v41, %v11055_v24  ;;  %9234 = vmatpush1.bf16.msra.mxu0 %v9233_v3  ;;  %v5458_v23 = vld [vmem:[#allocation5 + $0x28] sm:$0xff]  ;;  %v5508_v29 = vld [vmem:[#allocation5 + $0x1b8] sm:$0xff]  ;;  %v5477_v41 = vld [vmem:[#allocation5 + $0xc0] sm:$0xff] }
 0x813   : > { %v9235_v32 = vpack.c.bf16 %v4545_v40, %v4544_v62  ;;  %v9238_v44 = vpack.c.bf16 %v4524_v16, %v4523_v59  ;;  %v4516_v20 = vpop.permute.xlu0 %4515  ;;  %v9242_v24 = vpack.c.bf16 %v5454_v58, %v5453_v49  ;;  %v5506_v33 = vld [vmem:[#allocation5 + $0x1a8] sm:$0xff]  ;;  %v9252_v3 = vpack.c.bf16 %v5476_v30, %v5475_v43  ;;  %v5461_v40 = vld [vmem:[#allocation5 + $0x40] sm:$0xff]  ;;  %v5491_v59 = vld [vmem:[#allocation5 + $0x130] sm:$0xff] }
 0x814   : > { %v4528_v21 = vsel %vm14264_vm11, %v4510_v55, %v4516_v20  ;;  %v9250_v55 = vpack.c.bf16 %v5458_v23, %v5457_v19  ;;  %v9280_v51 = vpack.c.bf16 %v5506_v33, %v5505_v17  ;;  %v9254_v0 = vpack.c.bf16 %v5460_v14, %v5459_v6  ;;  %v5492_v62 = vld [vmem:[#allocation5 + $0x138] sm:$0xff]  ;;  %v5462_v58 = vld [vmem:[#allocation5 + $0x48] sm:$0xff]  ;;  %v5467_v23 = vld [vmem:[#allocation5 + $0x70] sm:$0xff] }
 0x815   : > { %5299 = vmatprep.subr.mxu0 %v4528_v21  ;;  %9237 = vmatprep.subr.msk.bf16.mxu1 %vm14074_vm1, %v9235_v32  ;;  %vm14268_vm1 = vmmov %vm14245_vm0  ;;  %v9284_v16 = vpack.c.bf16 %v5508_v29, %v5507_v9  ;;  %v9256_v49 = vpack.c.bf16 %v5478_v48, %v5477_v41  ;;  %v5510_v32 = vld [vmem:[#allocation5 + $0x1c8] sm:$0xff]  ;;  %v9286_v8 = vpack.c.bf16 %v5492_v62, %v5491_v59  ;;  %v5484_v19 = vld [vmem:[#allocation5 + $0xf8] sm:$0xff] }
 0x816   : > { %5300 = vmatpush1.msra.mxu0 %v4531_v36  ;;  %9239 = vmatpush1.bf16.msra.mxu1 %v9238_v44  ;;  %v4525_v25 = vsel %vm14268_vm1, %v4516_v20, %v4522_v47  ;;  %v5509_v47 = vld [vmem:[#allocation5 + $0x1c0] sm:$0xff]  ;;  %v5479_v44 = vld [vmem:[#allocation5 + $0xd0] sm:$0xff]  ;;  %v5480_v20 = vld [vmem:[#allocation5 + $0xd8] sm:$0xff]  ;;  %v9258_v60 = vpack.c.bf16 %v5462_v58, %v5461_v40 }
 0x817   : > { %8785 = vmatmul.mubr.msk.f32.vlgmr.msra.gmra.mrb[14].mxu0 %vm14253_vm2, %v13518_v38  ;;  %8788 = vmatprep.subr.msk.mxu1 %vm14267_vm15, %v4546_v27  ;;  %v9288_v21 = vpack.c.bf16 %v5510_v32, %v5509_v47  ;;  %v9260_v36 = vpack.c.bf16 %v5480_v20, %v5479_v44  ;;  %v5482_v27 = vld [vmem:[#allocation5 + $0xe8] sm:$0xff]  ;;  %v5468_v17 = vld [vmem:[#allocation5 + $0x78] sm:$0xff]  ;;  %v5497_v30 = vld [vmem:[#allocation5 + $0x160] sm:$0xff] }
 0x818   : > { %9241 = vmatprep.subr.bf16.mxu0 %v9240_v2  ;;  %v5463_v2 = vld [vmem:[#allocation5 + $0x50] sm:$0xff]  ;;  %v9264_v35 = vpack.c.bf16 %v5482_v27, %v5481_v50  ;;  %v9270_v43 = vpack.c.bf16 %v5468_v17, %v5467_v23  ;;  %v5516_v6 = vld [vmem:[#allocation5 + $0x1f8] sm:$0xff]  ;;  %v5565_v48 = vld [vmem:[#allocation5 + $0x380] sm:$0xff] }
 0x819   : > { %9243 = vmatpush3.bf16.msra.mxu0 %v9242_v24  ;;  %v5464_v24 = vld [vmem:[#allocation5 + $0x58] sm:$0xff]  ;;  %v5499_v14 = vld [vmem:[#allocation5 + $0x170] sm:$0xff]  ;;  %v5518_v40 = vld [vmem:[#allocation5 + $0x208] sm:$0xff] }
 0x81a   : > { %5371 = vmatpush1.msra.mxu1 %v4525_v25  ;;  %9245 = vmatprep.subr.bf16.mxu0 %v9244_v46  ;;  %v9290_v46 = vpack.c.bf16 %v5494_v42, %v5493_v45  ;;  %v9262_v1 = vpack.c.bf16 %v5464_v24, %v5463_v2  ;;  %v5500_v9 = vld [vmem:[#allocation5 + $0x178] sm:$0xff]  ;;  %v5535_v62 = vld [vmem:[#allocation5 + $0x290] sm:$0xff]  ;;  %v5550_v2 = vld [vmem:[#allocation5 + $0x308] sm:$0xff] }
 0x81b   : > { %8789 = vmatmul.mubr.msk.f32.vlgmr.msra.gmra.mrb[14].mxu1 %vm14269_vm4, %v13518_v38  ;;  %9273 = vmatprep.subr.bf16.mxu1 %v9272_v10  ;;  %v9282_v38 = vpack.c.bf16 %v5490_v34, %v5489_v31  ;;  %v5496_v10 = vld [vmem:[#allocation5 + $0x158] sm:$0xff]  ;;  %v5533_v31 = vld [vmem:[#allocation5 + $0x280] sm:$0xff]  ;;  %v9302_v41 = vpack.c.bf16 %v5500_v9, %v5499_v14  ;;  %v5519_v44 = vld [vmem:[#allocation5 + $0x210] sm:$0xff] }
 0x81c   : > { %9275 = vmatpush3.bf16.msra.mxu1 %v9274_v7  ;;  %v5466_v7 = vld [vmem:[#allocation5 + $0x68] sm:$0xff]  ;;  %v9294_v25 = vpack.c.bf16 %v5496_v10, %v5495_v18  ;;  %v5520_v20 = vld [vmem:[#allocation5 + $0x218] sm:$0xff]  ;;  %v5537_v45 = vld [vmem:[#allocation5 + $0x2a0] sm:$0xff] }
 0x81d   : > { %9247 = vmatpush3.bf16.msra.mxu0 %v9246_v12  ;;  %9277 = vmatprep.subr.bf16.mxu1 %v9276_v4  ;;  %v9266_v12 = vpack.c.bf16 %v5466_v7, %v5465_v5  ;;  %v5483_v4 = vld [vmem:[#allocation5 + $0xf0] sm:$0xff]  ;;  %v5540_v7 = vld [vmem:[#allocation5 + $0x2b8] sm:$0xff]  ;;  %v5554_v23 = vld [vmem:[#allocation5 + $0x328] sm:$0xff] }
 0x81e   : > { %9249 = vmatprep.subr.bf16.mxu0 %v9248_v53  ;;  %v9268_v26 = vpack.c.bf16 %v5484_v19, %v5483_v4  ;;  %v5514_v53 = vld [vmem:[#allocation5 + $0x1e8] sm:$0xff]  ;;  %v5567_v24 = vld [vmem:[#allocation5 + $0x390] sm:$0xff]  ;;  %v5541_v17 = vld [vmem:[#allocation5 + $0x2c0] sm:$0xff] }
 0x81f   : > { %v9296_v33 = vpack.c.bf16 %v5514_v53, %v5513_v56  ;;  %v9340_v18 = vpack.c.bf16 %v5568_v15, %v5567_v24  ;;  %v5551_v10 = vld [vmem:[#allocation5 + $0x310] sm:$0xff]  ;;  %v5524_v56 = vld [vmem:[#allocation5 + $0x238] sm:$0xff]  ;;  %v5553_v53 = vld [vmem:[#allocation5 + $0x320] sm:$0xff] }
 0x820   : > { %9279 = vmatpush3.bf16.msra.mxu1 %v9278_v22  ;;  %v5498_v22 = vld [vmem:[#allocation5 + $0x168] sm:$0xff]  ;;  %v5539_v5 = vld [vmem:[#allocation5 + $0x2b0] sm:$0xff]  ;;  %v5556_v14 = vld [vmem:[#allocation5 + $0x338] sm:$0xff] }
 0x821   : > { %9251 = vmatpush3.bf16.msra.mxu0 %v9250_v55  ;;  %9281 = vmatprep.subr.bf16.mxu1 %v9280_v51  ;;  %v9298_v55 = vpack.c.bf16 %v5498_v22, %v5497_v30  ;;  %v5515_v51 = vld [vmem:[#allocation5 + $0x1f0] sm:$0xff]  ;;  %v5572_v30 = vld [vmem:[#allocation5 + $0x3b8] sm:$0xff]  ;;  %v5529_v24 = vld [vmem:[#allocation5 + $0x260] sm:$0xff] }
 0x822   : > { %9253 = vmatprep.subr.bf16.mxu0 %v9252_v3  ;;  %v9300_v34 = vpack.c.bf16 %v5516_v6, %v5515_v51  ;;  %v5534_v3 = vld [vmem:[#allocation5 + $0x288] sm:$0xff]  ;;  %v5523_v19 = vld [vmem:[#allocation5 + $0x230] sm:$0xff]  ;;  %v5525_v51 = vld [vmem:[#allocation5 + $0x240] sm:$0xff] }
 0x823   : > { %v9304_v29 = vpack.c.bf16 %v5534_v3, %v5533_v31  ;;  %v9318_v22 = vpack.c.bf16 %v5524_v56, %v5523_v19  ;;  %v5526_v6 = vld [vmem:[#allocation5 + $0x248] sm:$0xff]  ;;  %v5555_v3 = vld [vmem:[#allocation5 + $0x330] sm:$0xff] }
 0x824   : > { %9283 = vmatpush3.bf16.msra.mxu1 %v9282_v38  ;;  %v5566_v38 = vld [vmem:[#allocation5 + $0x388] sm:$0xff]  ;;  %v5543_v9 = vld [vmem:[#allocation5 + $0x2d0] sm:$0xff] }
 0x825   : > { %9255 = vmatpush3.bf16.msra.mxu0 %v9254_v0  ;;  %9285 = vmatprep.subr.bf16.mxu1 %v9284_v16  ;;  %v9336_v0 = vpack.c.bf16 %v5566_v38, %v5565_v48  ;;  %v5517_v16 = vld [vmem:[#allocation5 + $0x200] sm:$0xff]  ;;  %v5574_v38 = vld [vmem:[#allocation5 + $0x3c8] sm:$0xff] }
 0x826   : > { %9257 = vmatprep.subr.bf16.mxu0 %v9256_v49  ;;  %v5536_v49 = vld [vmem:[#allocation5 + $0x298] sm:$0xff]  ;;  %v9306_v32 = vpack.c.bf16 %v5518_v40, %v5517_v16  ;;  %v5573_v48 = vld [vmem:[#allocation5 + $0x3c0] sm:$0xff]  ;;  %v9322_v40 = vpack.c.bf16 %v5526_v6, %v5525_v51  ;;  %v5530_v15 = vld [vmem:[#allocation5 + $0x268] sm:$0xff] }
 0x827   : > { %v5966_v51 = vld [vmem:[#allocation8 + $0x38] sm:$0xff]  ;;  %v5959_v6 = vld [vmem:[#allocation8] sm:$0xff] }
 0x828   : > { %9287 = vmatpush3.bf16.msra.mxu1 %v9286_v8 }
 0x829   : > { %9259 = vmatpush3.bf16.msra.mxu0 %v9258_v60  ;;  %9289 = vmatprep.subr.bf16.mxu1 %v9288_v21  ;;  %v9308_v60 = vpack.c.bf16 %v5536_v49, %v5535_v62  ;;  %v5549_v21 = vld [vmem:[#allocation5 + $0x300] sm:$0xff]  ;;  %v5527_v62 = vld [vmem:[#allocation5 + $0x250] sm:$0xff]  ;;  %v5528_v49 = vld [vmem:[#allocation5 + $0x258] sm:$0xff] }
 0x82a   : > { %9261 = vmatprep.subr.bf16.mxu0 %v9260_v36  ;;  %v5538_v36 = vld [vmem:[#allocation5 + $0x2a8] sm:$0xff]  ;;  %v9338_v27 = vpack.c.bf16 %v5550_v2, %v5549_v21  ;;  %v5575_v21 = vld [vmem:[#allocation5 + $0x3d0] sm:$0xff]  ;;  %v5576_v2 = vld [vmem:[#allocation5 + $0x3d8] sm:$0xff] }
 0x82c   : > { %9291 = vmatpush3.bf16.msra.mxu1 %v9290_v46  ;;  %v5521_v46 = vld [vmem:[#allocation5 + $0x220] sm:$0xff] }
 0x82d   : > { %9263 = vmatpush3.bf16.msra.mxu0 %v9262_v1  ;;  %9293 = vmatprep.subr.bf16.mxu1 %v9292_v39  ;;  %v5522_v1 = vld [vmem:[#allocation5 + $0x228] sm:$0xff]  ;;  %v9312_v39 = vpack.c.bf16 %v5538_v36, %v5537_v45 }
 0x82e   : > { %9265 = vmatprep.subr.bf16.mxu0 %v9264_v35  ;;  %v5552_v35 = vld [vmem:[#allocation5 + $0x318] sm:$0xff] }
 0x82f   : > { %v9342_v4 = vpack.c.bf16 %v5552_v35, %v5551_v10  ;;  %v5531_v10 = vld [vmem:[#allocation5 + $0x270] sm:$0xff] }
 0x830   : > { %9295 = vmatpush3.bf16.msra.mxu1 %v9294_v25  ;;  %v5569_v25 = vld [vmem:[#allocation5 + $0x3a0] sm:$0xff] }
 0x831   : > { %9267 = vmatpush3.bf16.msra.mxu0 %v9266_v12  ;;  %9297 = vmatprep.subr.bf16.mxu1 %v9296_v33  ;;  %v5570_v12 = vld [vmem:[#allocation5 + $0x3a8] sm:$0xff] }
 0x832   : > { %9269 = vmatprep.subr.bf16.mxu0 %v9268_v26  ;;  %v9344_v26 = vpack.c.bf16 %v5570_v12, %v5569_v25  ;;  %v5542_v33 = vld [vmem:[#allocation5 + $0x2c8] sm:$0xff]  ;;  %v5561_v25 = vld [vmem:[#allocation5 + $0x360] sm:$0xff] }
 0x833   : > { %v9320_v31 = vpack.c.bf16 %v5542_v33, %v5541_v17  ;;  %v5562_v12 = vld [vmem:[#allocation5 + $0x368] sm:$0xff] }
 0x834   : > { %9299 = vmatpush3.bf16.msra.mxu1 %v9298_v55  ;;  %v9346_v55 = vpack.c.bf16 %v5554_v23, %v5553_v53  ;;  %v9362_v56 = vpack.c.bf16 %v5562_v12, %v5561_v25  ;;  %v5564_v53 = vld [vmem:[#allocation5 + $0x378] sm:$0xff]  ;;  %v5991_v12 = vld [vmem:[#allocation8 + $0x100] sm:$0xff] }
 0x835   : > { %9271 = vmatpush3.bf16.msra.mxu0 %v9270_v43  ;;  %9301 = vmatprep.subr.bf16.mxu1 %v9300_v34  ;;  %v5571_v43 = vld [vmem:[#allocation5 + $0x3b0] sm:$0xff] }
 0x836   : > { %9305 = vmatprep.subr.bf16.mxu0 %v9304_v29  ;;  %v9348_v34 = vpack.c.bf16 %v5572_v30, %v5571_v43  ;;  %v5960_v43 = vld [vmem:[#allocation8 + $0x8] sm:$0xff] }
 0x837   : > { %v5964_v30 = vld [vmem:[#allocation8 + $0x28] sm:$0xff] }
 0x838   : > { %9303 = vmatpush3.bf16.msra.mxu1 %v9302_v41  ;;  %v5544_v41 = vld [vmem:[#allocation5 + $0x2d8] sm:$0xff] }
 0x839   : > { %9337 = vmatprep.subr.bf16.mxu1 %v9336_v0 }
 0x8da   : > { %v5219_v59 = vpop.f32.mrb[12].mxu0 }
 0x8db   : > { %v5221_v58 = vpop.f32.mrb[13].mxu0  ;;  %v5445_v8 = vsub.f32 %v12722_v11, %v5219_v59  ;;  %v9350_v59 = vpack.c.bf16 %v5556_v14, %v5555_v3  ;;  %v5961_v14 = vld [vmem:[#allocation8 + $0x10] sm:$0xff] }
 0x8dc   : > { %v5446_v47 = vsub.f32 %v12724_v57, %v5221_v58  ;;  %v9310_v57 = vpack.c.bf16 %v5520_v20, %v5519_v44  ;;  %v9324_v58 = vpack.c.bf16 %v5544_v41, %v5543_v9  ;;  %v5558_v44 = vld [vmem:[#allocation5 + $0x348] sm:$0xff]  ;;  %v5545_v20 = vld [vmem:[#allocation5 + $0x2e0] sm:$0xff]  ;;  %v5965_v9 = vld [vmem:[#allocation8 + $0x30] sm:$0xff] }
 0x8dd   : > { %v5968_v41 = vld [vmem:[#allocation8 + $0x48] sm:$0xff] }
 0x8de   : > { %v5290_v42 = vpop.f32.mrb[12].mxu1  ;;  %5645 = vmatprep.mubr.f32.mxu0 %v5446_v47  ;;  %v9352_v47 = vpack.c.bf16 %v5574_v38, %v5573_v48  ;;  %v5970_v48 = vld [vmem:[#allocation8 + $0x58] sm:$0xff] }
 0x8df   : > { %v5292_v37 = vpop.f32.mrb[13].mxu1  ;;  %5646 = vmatmul.mubr.f32.vlgmr.msra.gmra.mrb[16].mxu0 %v5445_v8  ;;  %v5447_v11 = vsub.f32 %v12714_v61, %v5290_v42  ;;  %v9316_v61 = vpack.c.bf16 %v5540_v7, %v5539_v5  ;;  %v9326_v42 = vpack.c.bf16 %v5528_v49, %v5527_v62  ;;  %v5532_v7 = vld [vmem:[#allocation5 + $0x278] sm:$0xff]  ;;  %v5973_v49 = vld [vmem:[#allocation8 + $0x70] sm:$0xff] }
 0x8e0   : > { %v5448_v50 = vsub.f32 %v12716_v54, %v5292_v37  ;;  %9307 = vmatpush3.bf16.msra.mxu0 %v9306_v32  ;;  %v9314_v54 = vpack.c.bf16 %v5522_v1, %v5521_v46  ;;  %v5557_v32 = vld [vmem:[#allocation5 + $0x340] sm:$0xff]  ;;  %v5547_v46 = vld [vmem:[#allocation5 + $0x2f0] sm:$0xff]  ;;  %v5548_v1 = vld [vmem:[#allocation5 + $0x2f8] sm:$0xff]  ;;  %v9334_v19 = vpack.c.bf16 %v5532_v7, %v5531_v10 }
 0x8e1   : > { %9309 = vmatprep.subr.bf16.mxu0 %v9308_v60  ;;  %v5546_v60 = vld [vmem:[#allocation5 + $0x2e8] sm:$0xff]  ;;  %v9354_v36 = vpack.c.bf16 %v5558_v44, %v5557_v32  ;;  %v9332_v35 = vpack.c.bf16 %v5548_v1, %v5547_v46  ;;  %v5974_v38 = vld [vmem:[#allocation8 + $0x78] sm:$0xff]  ;;  %v5987_v46 = vld [vmem:[#allocation8 + $0xe0] sm:$0xff] }
 0x8e2   : > { %5715 = vmatprep.mubr.f32.mxu1 %v5448_v50  ;;  %v9328_v37 = vpack.c.bf16 %v5546_v60, %v5545_v20  ;;  %v9356_v50 = vpack.c.bf16 %v5576_v2, %v5575_v21  ;;  %v5978_v20 = vld [vmem:[#allocation8 + $0x98] sm:$0xff]  ;;  %v5975_v60 = vld [vmem:[#allocation8 + $0x80] sm:$0xff] }
 0x8e3   : > { %5716 = vmatmul.mubr.f32.vlgmr.msra.gmra.mrb[16].mxu1 %v5447_v11  ;;  %v5577_v11 = vld [vmem:[#allocation5 + $0x3e0] sm:$0xff]  ;;  %v5994_v10 = vld [vmem:[#allocation8 + $0x118] sm:$0xff] }
 0x8e4   : > { %9311 = vmatpush3.bf16.msra.mxu0 %v9310_v57  ;;  %9339 = vmatpush3.bf16.msra.mxu1 %v9338_v27  ;;  %v5559_v57 = vld [vmem:[#allocation5 + $0x350] sm:$0xff]  ;;  %v5560_v27 = vld [vmem:[#allocation5 + $0x358] sm:$0xff]  ;;  %v5979_v2 = vld [vmem:[#allocation8 + $0xa0] sm:$0xff] }
 0x8e5   : > { %9313 = vmatprep.subr.bf16.mxu0 %v9312_v39  ;;  %9341 = vmatprep.subr.bf16.mxu1 %v9340_v18  ;;  %v5578_v39 = vld [vmem:[#allocation5 + $0x3e8] sm:$0xff]  ;;  %v9358_v18 = vpack.c.bf16 %v5560_v27, %v5559_v57  ;;  %v5990_v57 = vld [vmem:[#allocation8 + $0xf8] sm:$0xff]  ;;  %v5983_v27 = vld [vmem:[#allocation8 + $0xc0] sm:$0xff] }
 0x8e6   : > { %v9360_v5 = vpack.c.bf16 %v5578_v39, %v5577_v11  ;;  %v5985_v11 = vld [vmem:[#allocation8 + $0xd0] sm:$0xff] }
 0x8e7   : > { %v5989_v39 = vld [vmem:[#allocation8 + $0xf0] sm:$0xff] }
 0x8e8   : > { %9315 = vmatpush3.bf16.msra.mxu0 %v9314_v54  ;;  %9343 = vmatpush3.bf16.msra.mxu1 %v9342_v4  ;;  %v5579_v54 = vld [vmem:[#allocation5 + $0x3f0] sm:$0xff]  ;;  %v5580_v4 = vld [vmem:[#allocation5 + $0x3f8] sm:$0xff]  ;;  %v9510_v7 = vpack.c.bf16 %v5989_v39, %v5985_v11 }
 0x8e9   : > { %9317 = vmatprep.subr.bf16.mxu0 %v9316_v61  ;;  %9345 = vmatprep.subr.bf16.mxu1 %v9344_v26  ;;  %v9364_v61 = vpack.c.bf16 %v5580_v4, %v5579_v54  ;;  %v5563_v26 = vld [vmem:[#allocation5 + $0x370] sm:$0xff]  ;;  %v5995_v54 = vld [vmem:[#allocation8 + $0x120] sm:$0xff]  ;;  %v6034_v11 = vld [vmem:[#allocation8 + $0x258] sm:$0xff] }
 0x8ea   : > { %v13580_v29 = vpop.f32.mrb[14].mxu0  ;;  %v9366_v23 = vpack.c.bf16 %v5564_v53, %v5563_v26  ;;  %v5993_v4 = vld [vmem:[#allocation8 + $0x110] sm:$0xff]  ;;  %v6004_v26 = vld [vmem:[#allocation8 + $0x168] sm:$0xff]  ;;  %v6002_v53 = vld [vmem:[#allocation8 + $0x158] sm:$0xff] }
 0x8eb   : > { %v5363_v0 = vpop.f32.mrb[15].mxu0  ;;  %v5449_v17 = vsub.f32 %v12732_v52, %v13580_v29  ;;  %v9498_v52 = vpack.c.bf16 %v5965_v9, %v5961_v14  ;;  %v5972_v29 = vld [vmem:[#allocation8 + $0x68] sm:$0xff]  ;;  %v6014_v14 = vld [vmem:[#allocation8 + $0x1b8] sm:$0xff] }
 0x8ec   : > { %v5450_v16 = vsub.f32 %v12736_v13, %v5363_v0  ;;  %9319 = vmatpush3.bf16.msra.mxu0 %v9318_v22  ;;  %9347 = vmatpush3.bf16.msra.mxu1 %v9346_v55  ;;  %v5962_v22 = vld [vmem:[#allocation8 + $0x18] sm:$0xff]  ;;  %v9368_v55 = vpack.c.bf16 %v5964_v30, %v5960_v43  ;;  %v9500_v0 = vpack.c.bf16 %v5974_v38, %v5970_v48  ;;  %v5999_v30 = vld [vmem:[#allocation8 + $0x140] sm:$0xff]  ;;  %v6009_v38 = vld [vmem:[#allocation8 + $0x190] sm:$0xff] }
 0x8ed   : > { %9321 = vmatprep.subr.bf16.mxu0 %v9320_v31  ;;  %9349 = vmatprep.subr.bf16.mxu1 %v9348_v34  ;;  %v5963_v31 = vld [vmem:[#allocation8 + $0x20] sm:$0xff]  ;;  %v9496_v34 = vpack.c.bf16 %v5966_v51, %v5962_v22  ;;  %v6038_v39 = vld [vmem:[#allocation8 + $0x278] sm:$0xff] }
 0x8ee   : > { %v5432_v8 = vpop.f32.mrb[14].mxu1  ;;  %5785 = vmatprep.mubr.f32.mxu0 %v5450_v16  ;;  %v9370_v3 = vpack.c.bf16 %v5963_v31, %v5959_v6  ;;  %v5967_v16 = vld [vmem:[#allocation8 + $0x40] sm:$0xff]  ;;  %v6005_v6 = vld [vmem:[#allocation8 + $0x170] sm:$0xff]  ;;  %v6008_v31 = vld [vmem:[#allocation8 + $0x188] sm:$0xff] }
 0x8ef   : > { %v5434_v45 = vpop.f32.mrb[15].mxu1  ;;  %v5451_v33 = vsub.f32 %v12740_v28, %v5432_v8  ;;  %v9372_v28 = vpack.c.bf16 %v5972_v29, %v5968_v41  ;;  %v5982_v8 = vld [vmem:[#allocation8 + $0xb8] sm:$0xff]  ;;  %v6003_v22 = vld [vmem:[#allocation8 + $0x160] sm:$0xff] }
 0x8f0   : > { %v5452_v13 = vsub.f32 %v12734_v63, %v5434_v45  ;;  %9323 = vmatpush3.bf16.msra.mxu0 %v9322_v40  ;;  %9351 = vmatpush3.bf16.msra.mxu1 %v9350_v59  ;;  %v9330_v63 = vpack.c.bf16 %v5530_v15, %v5529_v24  ;;  %v5971_v40 = vld [vmem:[#allocation8 + $0x60] sm:$0xff]  ;;  %v5969_v59 = vld [vmem:[#allocation8 + $0x50] sm:$0xff]  ;;  %v9504_v21 = vpack.c.bf16 %v5982_v8, %v5978_v20  ;;  %v5988_v24 = vld [vmem:[#allocation8 + $0xe8] sm:$0xff] }
 0x8f1   : > { %9325 = vmatprep.subr.bf16.mxu0 %v9324_v58  ;;  %9353 = vmatprep.subr.bf16.mxu1 %v9352_v47  ;;  %v9374_v62 = vpack.c.bf16 %v5971_v40, %v5967_v16  ;;  %v5976_v58 = vld [vmem:[#allocation8 + $0x88] sm:$0xff]  ;;  %v9502_v32 = vpack.c.bf16 %v5973_v49, %v5969_v59  ;;  %v5977_v45 = vld [vmem:[#allocation8 + $0x90] sm:$0xff]  ;;  %v5986_v15 = vld [vmem:[#allocation8 + $0xd8] sm:$0xff]  ;;  %v9390_v9 = vpack.c.bf16 %v6003_v22, %v5999_v30 }
 0x8f2   : > { %5855 = vmatprep.mubr.f32.mxu1 %v5452_v13  ;;  %v5980_v47 = vld [vmem:[#allocation8 + $0xa8] sm:$0xff]  ;;  %v5981_v13 = vld [vmem:[#allocation8 + $0xb0] sm:$0xff]  ;;  %v9508_v1 = vpack.c.bf16 %v5990_v57, %v5986_v15  ;;  %v6007_v29 = vld [vmem:[#allocation8 + $0x180] sm:$0xff] }
 0x8f3   : > { %v9376_v44 = vpack.c.bf16 %v5980_v47, %v5976_v58  ;;  %v6011_v48 = vld [vmem:[#allocation8 + $0x1a0] sm:$0xff]  ;;  %v6016_v16 = vld [vmem:[#allocation8 + $0x1c8] sm:$0xff]  ;;  %v6018_v59 = vld [vmem:[#allocation8 + $0x1d8] sm:$0xff] }
 0x8f4   : > { %9327 = vmatpush3.bf16.msra.mxu0 %v9326_v42  ;;  %9355 = vmatpush3.bf16.msra.mxu1 %v9354_v36  ;;  %v9378_v42 = vpack.c.bf16 %v5979_v2, %v5975_v60  ;;  %v5984_v36 = vld [vmem:[#allocation8 + $0xc8] sm:$0xff]  ;;  %v9394_v49 = vpack.c.bf16 %v6011_v48, %v6007_v29  ;;  %v6017_v20 = vld [vmem:[#allocation8 + $0x1d0] sm:$0xff]  ;;  %v6023_v15 = vld [vmem:[#allocation8 + $0x200] sm:$0xff] }
 0x8f5   : > { %9329 = vmatprep.subr.bf16.mxu0 %v9328_v37  ;;  %9357 = vmatprep.subr.bf16.mxu1 %v9356_v50  ;;  %v9506_v37 = vpack.c.bf16 %v5981_v13, %v5977_v45  ;;  %v9380_v50 = vpack.c.bf16 %v5988_v24, %v5984_v36  ;;  %v6020_v40 = vld [vmem:[#allocation8 + $0x1e8] sm:$0xff]  ;;  %v6021_v60 = vld [vmem:[#allocation8 + $0x1f0] sm:$0xff]  ;;  %v6026_v45 = vld [vmem:[#allocation8 + $0x218] sm:$0xff] }
 0x8f6   : > { %v9396_v47 = vpack.c.bf16 %v6020_v40, %v6016_v16  ;;  %v6028_v2 = vld [vmem:[#allocation8 + $0x228] sm:$0xff]  ;;  %v6030_v13 = vld [vmem:[#allocation8 + $0x238] sm:$0xff]  ;;  %v9526_v36 = vpack.c.bf16 %v6021_v60, %v6017_v20  ;;  %v6045_v30 = vld [vmem:[#allocation8 + $0x2b0] sm:$0xff] }
 0x8f7   : > { %v9528_v57 = vpack.c.bf16 %v6030_v13, %v6026_v45  ;;  %v6048_v22 = vld [vmem:[#allocation8 + $0x2c8] sm:$0xff]  ;;  %v6053_v29 = vld [vmem:[#allocation8 + $0x2f0] sm:$0xff] }
 0x8f8   : > { %9331 = vmatpush3.bf16.msra.mxu0 %v9330_v63  ;;  %9359 = vmatpush3.bf16.msra.mxu1 %v9358_v18  ;;  %v5992_v63 = vld [vmem:[#allocation8 + $0x108] sm:$0xff] }
 0x8f9   : > { %9333 = vmatprep.subr.bf16.mxu0 %v9332_v35  ;;  %9361 = vmatprep.subr.bf16.mxu1 %v9360_v5  ;;  %v5996_v18 = vld [vmem:[#allocation8 + $0x128] sm:$0xff]  ;;  %v5998_v35 = vld [vmem:[#allocation8 + $0x138] sm:$0xff]  ;;  %v9382_v5 = vpack.c.bf16 %v5987_v46, %v5983_v27  ;;  %v6029_v27 = vld [vmem:[#allocation8 + $0x230] sm:$0xff] }
 0x8fa   : > { %v9384_v25 = vpack.c.bf16 %v5996_v18, %v5992_v63  ;;  %v6032_v46 = vld [vmem:[#allocation8 + $0x248] sm:$0xff] }
 0x8fb   : > { %v6056_v48 = vld [vmem:[#allocation8 + $0x308] sm:$0xff] }
 0x8fc   : > { %9335 = vmatpush3.bf16.msra.mxu0 %v9334_v19  ;;  %9363 = vmatpush3.bf16.msra.mxu1 %v9362_v56  ;;  %v9512_v19 = vpack.c.bf16 %v5998_v35, %v5994_v10  ;;  %v5997_v56 = vld [vmem:[#allocation8 + $0x130] sm:$0xff]  ;;  %v6031_v35 = vld [vmem:[#allocation8 + $0x240] sm:$0xff] }
 0x8fd   : > { %9365 = vmatprep.subr.bf16.mxu1 %v9364_v61  ;;  %9369 = vmatprep.subr.bf16.mxu0 %v9368_v55  ;;  %v6000_v61 = vld [vmem:[#allocation8 + $0x148] sm:$0xff]  ;;  %v6001_v55 = vld [vmem:[#allocation8 + $0x150] sm:$0xff] }
 0x8fe   : > { %v9388_v43 = vpack.c.bf16 %v6004_v26, %v6000_v61  ;;  %v9518_v41 = vpack.c.bf16 %v6005_v6, %v6001_v55  ;;  %v6052_v55 = vld [vmem:[#allocation8 + $0x2e8] sm:$0xff]  ;;  %v6054_v6 = vld [vmem:[#allocation8 + $0x2f8] sm:$0xff] }
 0x8ff   : > { %5786 = vmatmul.mubr.f32.vlgmr.msra.gmra.mrb[18].mxu0 %v5449_v17  ;;  %v9386_v17 = vpack.c.bf16 %v5995_v54, %v5991_v12  ;;  %v6037_v12 = vld [vmem:[#allocation8 + $0x270] sm:$0xff]  ;;  %v6040_v54 = vld [vmem:[#allocation8 + $0x288] sm:$0xff] }
 0x900   : > { %9367 = vmatpush3.bf16.msra.mxu1 %v9366_v23  ;;  %9371 = vmatpush1.bf16.msra.mxu0 %v9370_v3  ;;  %v6006_v23 = vld [vmem:[#allocation8 + $0x178] sm:$0xff] }
 0x901   : > { %9497 = vmatprep.subr.bf16.mxu1 %v9496_v34  ;;  %9373 = vmatprep.subr.bf16.mxu0 %v9372_v28  ;;  %v9516_v51 = vpack.c.bf16 %v6006_v23, %v6002_v53  ;;  %v6012_v34 = vld [vmem:[#allocation8 + $0x1a8] sm:$0xff]  ;;  %v6010_v3 = vld [vmem:[#allocation8 + $0x198] sm:$0xff]  ;;  %v6039_v23 = vld [vmem:[#allocation8 + $0x280] sm:$0xff] }
 0x902   : > { %v9520_v28 = vpack.c.bf16 %v6014_v14, %v6010_v3  ;;  %v9412_v3 = vpack.c.bf16 %v6052_v55, %v6048_v22  ;;  %v6047_v14 = vld [vmem:[#allocation8 + $0x2c0] sm:$0xff] }
 0x903   : > { %5856 = vmatmul.mubr.f32.vlgmr.msra.gmra.mrb[18].mxu1 %v5451_v33  ;;  %v9514_v33 = vpack.c.bf16 %v5997_v56, %v5993_v4  ;;  %v6044_v4 = vld [vmem:[#allocation8 + $0x2a8] sm:$0xff]  ;;  %v6046_v56 = vld [vmem:[#allocation8 + $0x2b8] sm:$0xff]  ;;  %v6075_v22 = vld [vmem:[#allocation8 + $0x3a0] sm:$0xff] }
 0x904   : > { %9499 = vmatpush1.bf16.msra.mxu1 %v9498_v52  ;;  %9375 = vmatpush1.bf16.msra.mxu0 %v9374_v62  ;;  %v9392_v52 = vpack.c.bf16 %v6012_v34, %v6008_v31  ;;  %v6022_v62 = vld [vmem:[#allocation8 + $0x1f8] sm:$0xff]  ;;  %v9408_v53 = vpack.c.bf16 %v6044_v4, %v6040_v54 }
 0x905   : > { %9501 = vmatprep.subr.bf16.mxu1 %v9500_v0  ;;  %9377 = vmatprep.subr.bf16.mxu0 %v9376_v44  ;;  %v6013_v0 = vld [vmem:[#allocation8 + $0x1b0] sm:$0xff]  ;;  %v6019_v44 = vld [vmem:[#allocation8 + $0x1e0] sm:$0xff]  ;;  %v9524_v8 = vpack.c.bf16 %v6022_v62, %v6018_v59 }
 0x906   : > { %v9522_v58 = vpack.c.bf16 %v6013_v0, %v6009_v38  ;;  %v6060_v38 = vld [vmem:[#allocation8 + $0x328] sm:$0xff]  ;;  %v6062_v0 = vld [vmem:[#allocation8 + $0x338] sm:$0xff]  ;;  %v6055_v62 = vld [vmem:[#allocation8 + $0x300] sm:$0xff] }
 0x907   : > { %v9416_v59 = vpack.c.bf16 %v6060_v38, %v6056_v48 }
 0x908   : > { %9503 = vmatpush1.bf16.msra.mxu1 %v9502_v32  ;;  %9379 = vmatpush1.bf16.msra.mxu0 %v9378_v42  ;;  %v6015_v32 = vld [vmem:[#allocation8 + $0x1c0] sm:$0xff] }
 0x909   : > { %9505 = vmatprep.subr.bf16.mxu1 %v9504_v21  ;;  %9381 = vmatprep.subr.bf16.mxu0 %v9380_v50  ;;  %v6024_v21 = vld [vmem:[#allocation8 + $0x208] sm:$0xff]  ;;  %v9398_v42 = vpack.c.bf16 %v6019_v44, %v6015_v32  ;;  %v6025_v50 = vld [vmem:[#allocation8 + $0x210] sm:$0xff] }
 0x90a   : > { %v9400_v24 = vpack.c.bf16 %v6028_v2, %v6024_v21  ;;  %v9530_v18 = vpack.c.bf16 %v6029_v27, %v6025_v50  ;;  %v6061_v32 = vld [vmem:[#allocation8 + $0x330] sm:$0xff] }
 0x90c   : > { %9507 = vmatpush1.bf16.msra.mxu1 %v9506_v37  ;;  %9383 = vmatpush1.bf16.msra.mxu0 %v9382_v5  ;;  %v6027_v37 = vld [vmem:[#allocation8 + $0x220] sm:$0xff] }
 0x90d   : > { %9509 = vmatprep.subr.bf16.mxu1 %v9508_v1  ;;  %9385 = vmatprep.subr.bf16.mxu0 %v9384_v25  ;;  %v6036_v1 = vld [vmem:[#allocation8 + $0x268] sm:$0xff]  ;;  %v9402_v63 = vpack.c.bf16 %v6027_v37, %v6023_v15  ;;  %v6035_v5 = vld [vmem:[#allocation8 + $0x260] sm:$0xff]  ;;  %v9532_v25 = vpack.c.bf16 %v6038_v39, %v6034_v11 }
 0x90e   : > { %v9404_v10 = vpack.c.bf16 %v6036_v1, %v6032_v46  ;;  %v9406_v61 = vpack.c.bf16 %v6035_v5, %v6031_v35  ;;  %v11349_v46 = vmov 1966171168   ;;  %v6064_v39 = vld [vmem:[#allocation8 + $0x348] sm:$0xff]  ;;  %v6070_v35 = vld [vmem:[#allocation8 + $0x378] sm:$0xff]  ;;  %v6063_v5 = vld [vmem:[#allocation8 + $0x340] sm:$0xff] }
 0x90f   : > { %v5879_v1 = vunpack.c.l.s4 %v11349_v46 }
 0x910   : > { %9511 = vmatpush1.bf16.msra.mxu1 %v9510_v7  ;;  %9387 = vmatpush1.bf16.msra.mxu0 %v9386_v17  ;;  %v6033_v7 = vld [vmem:[#allocation8 + $0x250] sm:$0xff]  ;;  %v6043_v17 = vld [vmem:[#allocation8 + $0x2a0] sm:$0xff] }
 0x911   : > { %9513 = vmatprep.subr.bf16.mxu1 %v9512_v19  ;;  %9389 = vmatprep.subr.bf16.mxu0 %v9388_v43  ;;  %v6042_v19 = vld [vmem:[#allocation8 + $0x298] sm:$0xff]  ;;  %v9534_v26 = vpack.c.bf16 %v6037_v12, %v6033_v7  ;;  %v9410_v31 = vpack.c.bf16 %v6043_v17, %v6039_v23  ;;  %v6067_v7 = vld [vmem:[#allocation8 + $0x360] sm:$0xff]  ;;  %v14270_v12 = vlaneseq  ;;  %v6076_v23 = vld [vmem:[#allocation8 + $0x3a8] sm:$0xff] }
 0x912   : > { %v9536_v43 = vpack.c.bf16 %v6046_v56, %v6042_v19  ;;  %v9422_v19 = vpack.c.bf16 %v6067_v7, %v6063_v5  ;;  %v6065_v56 = vld [vmem:[#allocation8 + $0x350] sm:$0xff]  ;;  %v6074_v17 = vld [vmem:[#allocation8 + $0x398] sm:$0xff]  ;;  %v6096_v5 = vld [vmem:[#allocation8 + $0x448] sm:$0xff] }
 0x913   : > { %v13588_v54 = vshrl.u32 %v14270_v12, 7  ;;  %vm13594_vm10 = vcmp.lt.s32.totalorder %v14270_v12, 64  ;;  %vm5888_vm14 = vcmp.ge.s32.totalorder %v14270_v12, 64  ;;  %vm5889_vm6 = vcmp.lt.s32.totalorder %v14270_v12, 128  ;;  %v6100_v7 = vld [vmem:[#allocation8 + $0x468] sm:$0xff] }
 0x914   : > { %9515 = vmatpush1.bf16.msra.mxu1 %v9514_v33  ;;  %9391 = vmatpush1.bf16.msra.mxu0 %v9390_v9  ;;  %v6041_v33 = vld [vmem:[#allocation8 + $0x290] sm:$0xff]  ;;  %v6051_v9 = vld [vmem:[#allocation8 + $0x2e0] sm:$0xff]  ;;  %vm5890_vm0 = vmand %vm5888_vm14, %vm5889_vm6 }
 0x915   : > { %9517 = vmatprep.subr.bf16.mxu1 %v9516_v51  ;;  %9393 = vmatprep.subr.bf16.mxu0 %v9392_v52  ;;  %v6050_v51 = vld [vmem:[#allocation8 + $0x2d8] sm:$0xff]  ;;  %v9538_v34 = vpack.c.bf16 %v6045_v30, %v6041_v33  ;;  %v9414_v16 = vpack.c.bf16 %v6051_v9, %v6047_v14  ;;  %v6071_v30 = vld [vmem:[#allocation8 + $0x380] sm:$0xff]  ;;  %v13621_v12 = vsub.s32 3, %v13588_v54 }
 0x916   : > { %v9540_v52 = vpack.c.bf16 %v6054_v6, %v6050_v51  ;;  %v9426_v6 = vpack.c.bf16 %v6075_v22, %v6071_v30  ;;  %v6104_v30 = vld [vmem:[#allocation8 + $0x488] sm:$0xff]  ;;  %v9436_v22 = vpack.c.bf16 %v6100_v7, %v6096_v5  ;;  %v6131_v5 = vld [vmem:[#allocation8 + $0x560] sm:$0xff] }
 0x918   : > { %9519 = vmatpush1.bf16.msra.mxu1 %v9518_v41  ;;  %9395 = vmatpush1.bf16.msra.mxu0 %v9394_v49  ;;  %v6049_v41 = vld [vmem:[#allocation8 + $0x2d0] sm:$0xff]  ;;  %v6059_v49 = vld [vmem:[#allocation8 + $0x320] sm:$0xff] }
 0x919   : > { %9521 = vmatprep.subr.bf16.mxu1 %v9520_v28  ;;  %9397 = vmatprep.subr.bf16.mxu0 %v9396_v47  ;;  %v6058_v28 = vld [vmem:[#allocation8 + $0x318] sm:$0xff]  ;;  %v9542_v40 = vpack.c.bf16 %v6053_v29, %v6049_v41  ;;  %v6057_v47 = vld [vmem:[#allocation8 + $0x310] sm:$0xff]  ;;  %v9418_v44 = vpack.c.bf16 %v6059_v49, %v6055_v62  ;;  %v6084_v41 = vld [vmem:[#allocation8 + $0x3e8] sm:$0xff] }
 0x91a   : > { %v9546_v20 = vpack.c.bf16 %v6061_v32, %v6057_v47  ;;  %v6086_v29 = vld [vmem:[#allocation8 + $0x3f8] sm:$0xff]  ;;  %v6081_v62 = vld [vmem:[#allocation8 + $0x3d0] sm:$0xff] }
 0x91c   : > { %9523 = vmatpush1.bf16.msra.mxu1 %v9522_v58  ;;  %9399 = vmatpush1.bf16.msra.mxu0 %v9398_v42  ;;  %v9544_v58 = vpack.c.bf16 %v6062_v0, %v6058_v28  ;;  %v6079_v28 = vld [vmem:[#allocation8 + $0x3c0] sm:$0xff] }
 0x91d   : > { %9525 = vmatprep.subr.bf16.mxu1 %v9524_v8  ;;  %9401 = vmatprep.subr.bf16.mxu0 %v9400_v24  ;;  %v6083_v0 = vld [vmem:[#allocation8 + $0x3e0] sm:$0xff] }
 0x920   : > { %9527 = vmatpush1.bf16.msra.mxu1 %v9526_v36  ;;  %9403 = vmatpush1.bf16.msra.mxu0 %v9402_v63  ;;  %v6068_v63 = vld [vmem:[#allocation8 + $0x368] sm:$0xff] }
 0x921   : > { %9529 = vmatprep.subr.bf16.mxu1 %v9528_v57  ;;  %9405 = vmatprep.subr.bf16.mxu0 %v9404_v10  ;;  %v9420_v10 = vpack.c.bf16 %v6068_v63, %v6064_v39  ;;  %v13616_v39 = vsub.s32 0, %v13588_v54  ;;  %v6087_v63 = vld [vmem:[#allocation8 + $0x400] sm:$0xff] }
 0x924   : > { %9531 = vmatpush1.bf16.msra.mxu1 %v9530_v18  ;;  %9407 = vmatpush1.bf16.msra.mxu0 %v9406_v61  ;;  %v6066_v18 = vld [vmem:[#allocation8 + $0x358] sm:$0xff]  ;;  %v6069_v61 = vld [vmem:[#allocation8 + $0x370] sm:$0xff] }
 0x925   : > { %9533 = vmatprep.subr.bf16.mxu1 %v9532_v25  ;;  %9409 = vmatprep.subr.bf16.mxu0 %v9408_v53  ;;  %v5880_v25 = vunpack.c.0.s8 %v5879_v1  ;;  %v9548_v4 = vpack.c.bf16 %v6070_v35, %v6066_v18  ;;  %v6072_v53 = vld [vmem:[#allocation8 + $0x388] sm:$0xff]  ;;  %v6091_v18 = vld [vmem:[#allocation8 + $0x420] sm:$0xff]  ;;  %v6093_v35 = vld [vmem:[#allocation8 + $0x430] sm:$0xff] }
 0x926   : > { %v9424_v33 = vpack.c.bf16 %v6076_v23, %v6072_v53  ;;  %v6095_v23 = vld [vmem:[#allocation8 + $0x440] sm:$0xff] }
 0x927   : > { %v13591_v55 = vsub.s32 %v5880_v25, %v13588_v54 }
 0x928   : > { %9535 = vmatpush1.bf16.msra.mxu1 %v9534_v26  ;;  %9411 = vmatpush1.bf16.msra.mxu0 %v9410_v31  ;;  %v9550_v26 = vpack.c.bf16 %v6069_v61, %v6065_v56  ;;  %v6073_v31 = vld [vmem:[#allocation8 + $0x390] sm:$0xff] }
 0x929   : > { %9537 = vmatprep.subr.bf16.mxu1 %v9536_v43  ;;  %9413 = vmatprep.subr.bf16.mxu0 %v9412_v3  ;;  %v6078_v43 = vld [vmem:[#allocation8 + $0x3b8] sm:$0xff]  ;;  %v6080_v3 = vld [vmem:[#allocation8 + $0x3c8] sm:$0xff] }
 0x92a   : > { %v9552_v51 = vpack.c.bf16 %v6078_v43, %v6074_v17  ;;  %v9428_v48 = vpack.c.bf16 %v6084_v41, %v6080_v3  ;;  %v6099_v17 = vld [vmem:[#allocation8 + $0x460] sm:$0xff]  ;;  %v6101_v43 = vld [vmem:[#allocation8 + $0x470] sm:$0xff] }
 0x92b   : > { %v9438_v14 = vpack.c.bf16 %v6099_v17, %v6095_v23  ;;  %v6103_v41 = vld [vmem:[#allocation8 + $0x480] sm:$0xff]  ;;  %v6142_v23 = vld [vmem:[#allocation8 + $0x5b8] sm:$0xff] }
 0x92c   : > { %9539 = vmatpush1.bf16.msra.mxu1 %v9538_v34  ;;  %9415 = vmatpush1.bf16.msra.mxu0 %v9414_v16  ;;  %v6077_v34 = vld [vmem:[#allocation8 + $0x3b0] sm:$0xff] }
 0x92d   : > { %9541 = vmatprep.subr.bf16.mxu1 %v9540_v52  ;;  %9417 = vmatprep.subr.bf16.mxu0 %v9416_v59  ;;  %v9554_v9 = vpack.c.bf16 %v6077_v34, %v6073_v31  ;;  %v6082_v52 = vld [vmem:[#allocation8 + $0x3d8] sm:$0xff]  ;;  %v9430_v59 = vpack.c.bf16 %v6083_v0, %v6079_v28  ;;  %v6109_v28 = vld [vmem:[#allocation8 + $0x4b0] sm:$0xff]  ;;  %v6112_v0 = vld [vmem:[#allocation8 + $0x4c8] sm:$0xff] }
 0x92e   : > { %v9556_v38 = vpack.c.bf16 %v6086_v29, %v6082_v52  ;;  %v6106_v31 = vld [vmem:[#allocation8 + $0x498] sm:$0xff]  ;;  %v6107_v52 = vld [vmem:[#allocation8 + $0x4a0] sm:$0xff] }
 0x92f   : > { %v6110_v34 = vld [vmem:[#allocation8 + $0x4b8] sm:$0xff] }
 0x930   : > { %9543 = vmatpush1.bf16.msra.mxu1 %v9542_v40  ;;  %9419 = vmatpush1.bf16.msra.mxu0 %v9418_v44 }
 0x931   : > { %9545 = vmatprep.subr.bf16.mxu1 %v9544_v58  ;;  %9421 = vmatprep.subr.bf16.mxu0 %v9420_v10  ;;  %v6089_v10 = vld [vmem:[#allocation8 + $0x410] sm:$0xff] }
 0x932   : > { %v9562_v53 = vpack.c.bf16 %v6093_v35, %v6089_v10  ;;  %v6127_v35 = vld [vmem:[#allocation8 + $0x540] sm:$0xff] }
 0x933   : > { %v9454_v17 = vpack.c.bf16 %v6131_v5, %v6127_v35 }
 0x934   : > { %9547 = vmatpush1.bf16.msra.mxu1 %v9546_v20  ;;  %9423 = vmatpush1.bf16.msra.mxu0 %v9422_v19  ;;  %v6102_v19 = vld [vmem:[#allocation8 + $0x478] sm:$0xff] }
 0x935   : > { %9549 = vmatprep.subr.bf16.mxu1 %v9548_v4  ;;  %9425 = vmatprep.subr.bf16.mxu0 %v9424_v33  ;;  %v6098_v4 = vld [vmem:[#allocation8 + $0x458] sm:$0xff]  ;;  %v6097_v33 = vld [vmem:[#allocation8 + $0x450] sm:$0xff] }
 0x938   : > { %9551 = vmatpush1.bf16.msra.mxu1 %v9550_v26  ;;  %9427 = vmatpush1.bf16.msra.mxu0 %v9426_v6  ;;  %v9434_v26 = vpack.c.bf16 %v6091_v18, %v6087_v63  ;;  %v6108_v6 = vld [vmem:[#allocation8 + $0x4a8] sm:$0xff]  ;;  %v6134_v63 = vld [vmem:[#allocation8 + $0x578] sm:$0xff] }
 0x939   : > { %9553 = vmatprep.subr.bf16.mxu1 %v9552_v51  ;;  %9429 = vmatprep.subr.bf16.mxu0 %v9428_v48  ;;  %v9564_v51 = vpack.c.bf16 %v6102_v19, %v6098_v4  ;;  %v9440_v29 = vpack.c.bf16 %v6108_v6, %v6104_v30  ;;  %v9568_v48 = vpack.c.bf16 %v6110_v34, %v6106_v31  ;;  %v6129_v19 = vld [vmem:[#allocation8 + $0x550] sm:$0xff]  ;;  %v6139_v30 = vld [vmem:[#allocation8 + $0x5a0] sm:$0xff]  ;;  %v6144_v34 = vld [vmem:[#allocation8 + $0x5c8] sm:$0xff] }
 0x93a   : > { %v6137_v6 = vld [vmem:[#allocation8 + $0x590] sm:$0xff] }
 0x93b   : > { %v6141_v31 = vld [vmem:[#allocation8 + $0x5b0] sm:$0xff] }
 0x93c   : > { %9555 = vmatpush1.bf16.msra.mxu1 %v9554_v9  ;;  %9431 = vmatpush1.bf16.msra.mxu0 %v9430_v59  ;;  %v9566_v9 = vpack.c.bf16 %v6101_v43, %v6097_v33  ;;  %v6118_v59 = vld [vmem:[#allocation8 + $0x4f8] sm:$0xff]  ;;  %v6135_v43 = vld [vmem:[#allocation8 + $0x580] sm:$0xff] }
 0x93d   : > { %9557 = vmatprep.subr.bf16.mxu1 %v9556_v38  ;;  %v6105_v38 = vld [vmem:[#allocation8 + $0x490] sm:$0xff] }
 0x9b2   : > { %v8830_v8 = vpop.f32.mrb[16].mxu0 }
 0x9b3   : > { %v8831_v60 = vpop.f32.mrb[17].mxu0 }
 0x9b4   : > { %v8832_v21 = vadd.f32 %v8831_v60, %v8830_v8 }
 0x9b6   : > { %v8865_v2 = vpop.f32.mrb[16].mxu1 }
 0x9b7   : > { %v8866_v45 = vpop.f32.mrb[17].mxu1 }
 0x9b8   : > { %v8867_v13 = vadd.f32 %v8866_v45, %v8865_v2 }
 0x9ba   : > { %v5718_v42 = vadd.f32 %v8867_v13, %v8832_v21  ;;  %v6085_v21 = vld [vmem:[#allocation8 + $0x3f0] sm:$0xff]  ;;  %v6088_v13 = vld [vmem:[#allocation8 + $0x408] sm:$0xff] }
 0x9bb   : > { %v9558_v45 = vpack.c.bf16 %v6085_v21, %v6081_v62  ;;  %v9442_v62 = vpack.c.bf16 %v6107_v52, %v6103_v41  ;;  %v6124_v21 = vld [vmem:[#allocation8 + $0x528] sm:$0xff]  ;;  %v9458_v41 = vpack.c.bf16 %v6139_v30, %v6135_v43  ;;  %v9586_v52 = vpack.c.bf16 %v6141_v31, %v6137_v6 }
 0x9bd   : > { %9559 = vmatpush1.bf16.msra.mxu1 %v9558_v45  ;;  %v6126_v45 = vld [vmem:[#allocation8 + $0x538] sm:$0xff] }
 0x9d2   : > { %v8900_v36 = vpop.f32.mrb[18].mxu0 }
 0x9d3   : > { %v8901_v24 = vpop.f32.mrb[19].mxu0 }
 0x9d4   : > { %v8902_v15 = vadd.f32 %v8901_v24, %v8900_v36  ;;  %v6090_v36 = vld [vmem:[#allocation8 + $0x418] sm:$0xff] }
 0x9d6   : > { %v5788_v37 = vadd.f32 %v8902_v15, %v5718_v42  ;;  %v8935_v50 = vpop.f32.mrb[18].mxu1  ;;  %v6092_v42 = vld [vmem:[#allocation8 + $0x428] sm:$0xff] }
 0x9d7   : > { %v8936_v57 = vpop.f32.mrb[19].mxu1  ;;  %v9432_v15 = vpack.c.bf16 %v6092_v42, %v6088_v13 }
 0x9d8   : > { %v8937_v27 = vadd.f32 %v8936_v57, %v8935_v50 }
 0x9d9   : > { %9433 = vmatprep.subr.bf16.mxu0 %v9432_v15 }
 0x9da   : > { %v5858_v11 = vadd.f32 %v8937_v27, %v5788_v37  ;;  %v6094_v37 = vld [vmem:[#allocation8 + $0x438] sm:$0xff] }
 0x9db   : > { %v9560_v50 = vpack.c.bf16 %v6094_v37, %v6090_v36  ;;  %v6119_v36 = vld [vmem:[#allocation8 + $0x500] sm:$0xff] }
 0x9dc   : > { %5862 = vst.msk [vmem:[#allocation3] sm:$0xff] %vm5861_vm7, %v5858_v11  ;;  %v13613_v11 = vsub.s32 1, %v13588_v54 }
 0x9dd   : > { %9561 = vmatprep.subr.bf16.mxu1 %v9560_v50  ;;  %v6121_v50 = vld [vmem:[#allocation8 + $0x510] sm:$0xff] }
 0x9e3   : > { %v8791_v16 = vld.sshfl [vmem:[#allocation3 + $0x3] sm:$0x1 pattern:$0x75316420]  ;;  %v5892_v40 = vld [vmem:[#allocation3 + $0x2] sm:$0x1] }
 0x9e4   : > { %v5909_v49 = vrot.slane %v8791_v16, %v13591_v55  ;;  %v8790_v58 = vld.sshfl [vmem:[#allocation3 + $0x1] sm:$0x1 pattern:$0x75316420]  ;;  %5893 = vst.msk [vmem:[#allocation4 + $0x1] sm:$0x1] %vm13594_vm10, %v5892_v40 }
 0x9e5   : > { %v5863_v47 = vld [vmem:[#allocation3] sm:$0x1]  ;;  %v5884_v32 = vrot.slane %v8790_v58, %v13591_v55  ;;  %v8793_v44 = vld.sshfl [vmem:[#allocation3 + $0x7] sm:$0x1 pattern:$0x75316420] }
 0x9e6   : > { %5868 = vst.msk [vmem:[#allocation4] sm:$0x1] %vm13594_vm10, %v5863_v47  ;;  %v5936_v20 = vld [vmem:[#allocation3 + $0x6] sm:$0x1]  ;;  %5910 = vrot.lane.b32.xlu1 %v5909_v49, %s11350_s24  ;;  %v5914_v60 = vld [vmem:[#allocation3 + $0x4] sm:$0x1]  ;;  %v5953_v2 = vrot.slane %v8793_v44, %v13591_v55  ;;  %v9570_v49 = vpack.c.bf16 %v6109_v28, %v6105_v38 }
 0x9e7   : > { %v8792_v8 = vld.sshfl [vmem:[#allocation3 + $0x5] sm:$0x1 pattern:$0x75316420]  ;;  %5937 = vst.msk [vmem:[#allocation4 + $0x3] sm:$0x1] %vm13594_vm10, %v5936_v20  ;;  %5885 = vrot.lane.b32.xlu0 %v5884_v32, %s11350_s24 }
 0x9e8   : > { %5915 = vst.msk [vmem:[#allocation4 + $0x2] sm:$0x1] %vm13594_vm10, %v5914_v60  ;;  %v5931_v24 = vrot.slane %v8792_v8, %v13591_v55  ;;  %v6116_v16 = vld [vmem:[#allocation8 + $0x4e8] sm:$0xff]  ;;  %v6114_v40 = vld [vmem:[#allocation8 + $0x4d8] sm:$0xff]  ;;  %v6111_v58 = vld [vmem:[#allocation8 + $0x4c0] sm:$0xff] }
 0x9e9   : > { %v6115_v47 = vld [vmem:[#allocation8 + $0x4e0] sm:$0xff]  ;;  %v9444_v32 = vpack.c.bf16 %v6116_v16, %v6112_v0  ;;  %v9572_v44 = vpack.c.bf16 %v6118_v59, %v6114_v40  ;;  %v6113_v20 = vld [vmem:[#allocation8 + $0x4d0] sm:$0xff]  ;;  %v6120_v60 = vld [vmem:[#allocation8 + $0x508] sm:$0xff] }
 0x9ea   : > { %5954 = vrot.lane.b32.xlu1 %v5953_v2, %s11350_s24  ;;  %v6117_v8 = vld [vmem:[#allocation8 + $0x4f0] sm:$0xff]  ;;  %v6122_v2 = vld [vmem:[#allocation8 + $0x518] sm:$0xff]  ;;  %v9446_v13 = vpack.c.bf16 %v6115_v47, %v6111_v58  ;;  %v9448_v15 = vpack.c.bf16 %v6124_v21, %v6120_v60  ;;  %v6152_v40 = vld [vmem:[#allocation8 + $0x608] sm:$0xff] }
 0x9eb   : > { %5932 = vrot.lane.b32.xlu0 %v5931_v24, %s11350_s24  ;;  %v9574_v42 = vpack.c.bf16 %v6117_v8, %v6113_v20  ;;  %v6123_v24 = vld [vmem:[#allocation8 + $0x520] sm:$0xff]  ;;  %v9576_v37 = vpack.c.bf16 %v6126_v45, %v6122_v2  ;;  %v6145_v0 = vld [vmem:[#allocation8 + $0x5d0] sm:$0xff]  ;;  %v6156_v59 = vld [vmem:[#allocation8 + $0x628] sm:$0xff]  ;;  %s13695_s24 = scalar_lea.hbm %s14277_s23, %s8794_s20 }
 0x9ec   : > { %v9450_v18 = vpack.c.bf16 %v6123_v24, %v6119_v36  ;;  %v6149_v16 = vld [vmem:[#allocation8 + $0x5f0] sm:$0xff]  ;;  %v9464_v20 = vpack.c.bf16 %v6156_v59, %v6152_v40  ;;  %v6160_v2 = vld [vmem:[#allocation8 + $0x648] sm:$0xff] }
 0x9ed   : > { %v9590_v47 = vpack.c.bf16 %v6149_v16, %v6145_v0  ;;  %v6153_v60 = vld [vmem:[#allocation8 + $0x610] sm:$0xff]  ;;  %v6164_v45 = vld [vmem:[#allocation8 + $0x668] sm:$0xff] }
 0x9ee   : > { %v6157_v21 = vld [vmem:[#allocation8 + $0x630] sm:$0xff] }
 0x9ef   : > { %v9594_v24 = vpack.c.bf16 %v6157_v21, %v6153_v60  ;;  %v6185_v40 = vld [vmem:[#allocation8 + $0x710] sm:$0xff] }
 0x9f0   : > { %v6189_v59 = vld [vmem:[#allocation8 + $0x730] sm:$0xff] }
 0xa58   : > { %v5911_v57 = vpop.permute.xlu1 %5910 }
 0xa59   : > { %5913 = vst.msk [vmem:[#allocation4 + $0x1] sm:$0x1] %vm5890_vm0, %v5911_v57  ;;  %v5886_v27 = vpop.permute.xlu0 %5885  ;;  %v6125_v57 = vld [vmem:[#allocation8 + $0x530] sm:$0xff] }
 0xa5a   : > { %5891 = vst.msk [vmem:[#allocation4] sm:$0x1] %vm5890_vm0, %v5886_v27  ;;  %v6128_v27 = vld [vmem:[#allocation8 + $0x548] sm:$0xff]  ;;  %v9578_v10 = vpack.c.bf16 %v6125_v57, %v6121_v50  ;;  %v9468_v50 = vpack.c.bf16 %v6164_v45, %v6160_v2  ;;  %v6193_v2 = vld [vmem:[#allocation8 + $0x750] sm:$0xff] }
 0xa5b   : > { %v6197_v45 = vld [vmem:[#allocation8 + $0x770] sm:$0xff] }
 0xa5c   : > { %v5955_v46 = vpop.permute.xlu1 %5954 }
 0xa5d   : > { %5957 = vst.msk [vmem:[#allocation4 + $0x3] sm:$0x1] %vm5890_vm0, %v5955_v46  ;;  %v5933_v1 = vpop.permute.xlu0 %5932  ;;  %v6132_v46 = vld [vmem:[#allocation8 + $0x568] sm:$0xff] }
 0xa5e   : > { %5935 = vst.msk [vmem:[#allocation4 + $0x2] sm:$0x1] %vm5890_vm0, %v5933_v1  ;;  %v6130_v1 = vld [vmem:[#allocation8 + $0x558] sm:$0xff]  ;;  %v9452_v7 = vpack.c.bf16 %v6132_v46, %v6128_v27  ;;  %v6161_v27 = vld [vmem:[#allocation8 + $0x650] sm:$0xff] }
 0xa5f   : > { %v9580_v4 = vpack.c.bf16 %v6134_v63, %v6130_v1  ;;  %v6165_v46 = vld [vmem:[#allocation8 + $0x670] sm:$0xff]  ;;  %v6168_v1 = vld [vmem:[#allocation8 + $0x688] sm:$0xff] }
 0xa60   : > { %v6172_v63 = vld [vmem:[#allocation8 + $0x6a8] sm:$0xff]  ;;  %v9598_v5 = vpack.c.bf16 %v6165_v46, %v6161_v27 }
 0xa65   : > { %v13618_v25 = vld [vmem:[#allocation4] sm:$0xf] }
 0xa66   : > { %v6224_v56 = vrot.slane %v13618_v25, %v13613_v11  ;;  %v6220_v61 = vrot.slane %v13618_v25, %v13616_v39  ;;  %v6232_v3 = vrot.slane %v13618_v25, %v13621_v12 }
 0xa68   : > { %6322 = vmatprep.mubr.f32.mxu0 %v6224_v56  ;;  %6464 = vmatprep.mubr.f32.mxu1 %v6224_v56  ;;  %v6133_v56 = vld [vmem:[#allocation8 + $0x570] sm:$0xff] }
 0xa69   : > { %6323 = vmatmul.mubr.f32.vlgmr.msra.gmra.mrb[20].mxu0 %v6220_v61  ;;  %6465 = vmatmul.mubr.f32.vlgmr.msra.gmra.mrb[20].mxu1 %v6220_v61  ;;  %v6136_v61 = vld [vmem:[#allocation8 + $0x588] sm:$0xff]  ;;  %v9582_v33 = vpack.c.bf16 %v6133_v56, %v6129_v19  ;;  %v9472_v19 = vpack.c.bf16 %v6172_v63, %v6168_v1  ;;  %v6201_v1 = vld [vmem:[#allocation8 + $0x790] sm:$0xff] }
 0xa6a   : > { %9435 = vmatpush1.bf16.msra.mxu0 %v9434_v26  ;;  %9563 = vmatpush1.bf16.msra.mxu1 %v9562_v53  ;;  %v6140_v26 = vld [vmem:[#allocation8 + $0x5a8] sm:$0xff]  ;;  %v6138_v53 = vld [vmem:[#allocation8 + $0x598] sm:$0xff]  ;;  %v6205_v63 = vld [vmem:[#allocation8 + $0x7b0] sm:$0xff] }
 0xa6b   : > { %6393 = vmatprep.mubr.f32.mxu0 %v6232_v3  ;;  %6535 = vmatprep.mubr.f32.mxu1 %v6232_v3  ;;  %v6148_v3 = vld [vmem:[#allocation8 + $0x5e8] sm:$0xff] }
 0xa6c   : > { %9437 = vmatprep.subr.bf16.mxu0 %v9436_v22  ;;  %9565 = vmatprep.subr.bf16.mxu1 %v9564_v51  ;;  %v9456_v22 = vpack.c.bf16 %v6140_v26, %v6136_v61  ;;  %v9584_v51 = vpack.c.bf16 %v6142_v23, %v6138_v53  ;;  %v9460_v38 = vpack.c.bf16 %v6148_v3, %v6144_v34  ;;  %v6169_v61 = vld [vmem:[#allocation8 + $0x690] sm:$0xff]  ;;  %v6176_v53 = vld [vmem:[#allocation8 + $0x6c8] sm:$0xff] }
 0xa6d   : > { %v6173_v26 = vld [vmem:[#allocation8 + $0x6b0] sm:$0xff]  ;;  %v6180_v23 = vld [vmem:[#allocation8 + $0x6e8] sm:$0xff] }
 0xa6e   : > { %9439 = vmatpush1.bf16.msra.mxu0 %v9438_v14  ;;  %9567 = vmatpush1.bf16.msra.mxu1 %v9566_v9  ;;  %v6146_v14 = vld [vmem:[#allocation8 + $0x5d8] sm:$0xff]  ;;  %v9602_v30 = vpack.c.bf16 %v6173_v26, %v6169_v61  ;;  %v9476_v6 = vpack.c.bf16 %v6180_v23, %v6176_v53  ;;  %v6177_v34 = vld [vmem:[#allocation8 + $0x6d0] sm:$0xff] }
 0xa6f   : > { %9441 = vmatprep.subr.bf16.mxu0 %v9440_v29  ;;  %9569 = vmatprep.subr.bf16.mxu1 %v9568_v48  ;;  %v6150_v9 = vld [vmem:[#allocation8 + $0x5f8] sm:$0xff]  ;;  %v6143_v29 = vld [vmem:[#allocation8 + $0x5c0] sm:$0xff]  ;;  %v6181_v3 = vld [vmem:[#allocation8 + $0x6f0] sm:$0xff] }
 0xa70   : > { %v6147_v48 = vld [vmem:[#allocation8 + $0x5e0] sm:$0xff]  ;;  %v9588_v28 = vpack.c.bf16 %v6150_v9, %v6146_v14  ;;  %v6184_v14 = vld [vmem:[#allocation8 + $0x708] sm:$0xff]  ;;  %v6209_v53 = vld [vmem:[#allocation8 + $0x7d0] sm:$0xff] }
 0xa71   : > { %v9462_v58 = vpack.c.bf16 %v6147_v48, %v6143_v29  ;;  %v6188_v9 = vld [vmem:[#allocation8 + $0x728] sm:$0xff]  ;;  %v9606_v48 = vpack.c.bf16 %v6181_v3, %v6177_v34  ;;  %v6213_v23 = vld [vmem:[#allocation8 + $0x7f0] sm:$0xff]  ;;  %v13630_v34 = vsub.s32 2, %v13588_v54 }
 0xa72   : > { %9443 = vmatpush1.bf16.msra.mxu0 %v9442_v62  ;;  %9571 = vmatpush1.bf16.msra.mxu1 %v9570_v49  ;;  %v6154_v62 = vld [vmem:[#allocation8 + $0x618] sm:$0xff]  ;;  %v9480_v0 = vpack.c.bf16 %v6188_v9, %v6184_v14  ;;  %v6548_v9 = vld [vmem:[#allocation10 + $0x10] sm:$0xff] }
 0xa73   : > { %9445 = vmatprep.subr.bf16.mxu0 %v9444_v32  ;;  %9573 = vmatprep.subr.bf16.mxu1 %v9572_v44  ;;  %v6158_v49 = vld [vmem:[#allocation8 + $0x638] sm:$0xff]  ;;  %v6151_v32 = vld [vmem:[#allocation8 + $0x600] sm:$0xff] }
 0xa74   : > { %v6155_v44 = vld [vmem:[#allocation8 + $0x620] sm:$0xff]  ;;  %v9592_v8 = vpack.c.bf16 %v6158_v49, %v6154_v62  ;;  %v6192_v62 = vld [vmem:[#allocation8 + $0x748] sm:$0xff] }
 0xa75   : > { %v9466_v36 = vpack.c.bf16 %v6155_v44, %v6151_v32  ;;  %v6196_v49 = vld [vmem:[#allocation8 + $0x768] sm:$0xff]  ;;  %v9610_v44 = vpack.c.bf16 %v6189_v59, %v6185_v40  ;;  %v6558_v40 = vld [vmem:[#allocation10 + $0x60] sm:$0xff]  ;;  %v6228_v59 = vrot.slane %v13618_v25, %v13630_v34 }
 0xa76   : > { %9447 = vmatpush1.bf16.msra.mxu0 %v9446_v13  ;;  %9575 = vmatpush1.bf16.msra.mxu1 %v9574_v42  ;;  %v6162_v13 = vld [vmem:[#allocation8 + $0x658] sm:$0xff]  ;;  %v9484_v60 = vpack.c.bf16 %v6196_v49, %v6192_v62  ;;  %v6556_v49 = vld [vmem:[#allocation10 + $0x50] sm:$0xff] }
 0xa77   : > { %9449 = vmatprep.subr.bf16.mxu0 %v9448_v15  ;;  %9577 = vmatprep.subr.bf16.mxu1 %v9576_v37  ;;  %v6166_v42 = vld [vmem:[#allocation8 + $0x678] sm:$0xff]  ;;  %v6159_v15 = vld [vmem:[#allocation8 + $0x640] sm:$0xff] }
 0xa78   : > { %v6163_v37 = vld [vmem:[#allocation8 + $0x660] sm:$0xff]  ;;  %v9596_v57 = vpack.c.bf16 %v6166_v42, %v6162_v13  ;;  %v6200_v13 = vld [vmem:[#allocation8 + $0x788] sm:$0xff] }
 0xa79   : > { %v9470_v35 = vpack.c.bf16 %v6163_v37, %v6159_v15  ;;  %v6204_v42 = vld [vmem:[#allocation8 + $0x7a8] sm:$0xff]  ;;  %v9614_v37 = vpack.c.bf16 %v6197_v45, %v6193_v2  ;;  %v6566_v2 = vld [vmem:[#allocation10 + $0xa0] sm:$0xff] }
 0xa7a   : > { %9451 = vmatpush1.bf16.msra.mxu0 %v9450_v18  ;;  %9579 = vmatpush1.bf16.msra.mxu1 %v9578_v10  ;;  %v6170_v18 = vld [vmem:[#allocation8 + $0x698] sm:$0xff]  ;;  %v9488_v27 = vpack.c.bf16 %v6204_v42, %v6200_v13  ;;  %v6564_v13 = vld [vmem:[#allocation10 + $0x90] sm:$0xff] }
 0xa7b   : > { %9453 = vmatprep.subr.bf16.mxu0 %v9452_v7  ;;  %9581 = vmatprep.subr.bf16.mxu1 %v9580_v4  ;;  %v6174_v10 = vld [vmem:[#allocation8 + $0x6b8] sm:$0xff]  ;;  %v6167_v7 = vld [vmem:[#allocation8 + $0x680] sm:$0xff]  ;;  %v6568_v42 = vld [vmem:[#allocation10 + $0xb0] sm:$0xff] }
 0xa7c   : > { %v6171_v4 = vld [vmem:[#allocation8 + $0x6a0] sm:$0xff]  ;;  %v9600_v56 = vpack.c.bf16 %v6174_v10, %v6170_v18  ;;  %v6208_v18 = vld [vmem:[#allocation8 + $0x7c8] sm:$0xff] }
 0xa7d   : > { %v9474_v43 = vpack.c.bf16 %v6171_v4, %v6167_v7  ;;  %v6212_v10 = vld [vmem:[#allocation8 + $0x7e8] sm:$0xff]  ;;  %v9618_v4 = vpack.c.bf16 %v6205_v63, %v6201_v1 }
 0xa7e   : > { %9455 = vmatpush1.bf16.msra.mxu0 %v9454_v17  ;;  %9583 = vmatpush1.bf16.msra.mxu1 %v9582_v33  ;;  %v6178_v17 = vld [vmem:[#allocation8 + $0x6d8] sm:$0xff]  ;;  %v9492_v61 = vpack.c.bf16 %v6212_v10, %v6208_v18  ;;  %v6572_v18 = vld [vmem:[#allocation10 + $0xd0] sm:$0xff] }
 0xa7f   : > { %9457 = vmatprep.subr.bf16.mxu0 %v9456_v22  ;;  %9585 = vmatprep.subr.bf16.mxu1 %v9584_v51  ;;  %v6182_v33 = vld [vmem:[#allocation8 + $0x6f8] sm:$0xff]  ;;  %v6175_v22 = vld [vmem:[#allocation8 + $0x6c0] sm:$0xff]  ;;  %v6576_v10 = vld [vmem:[#allocation10 + $0xf0] sm:$0xff] }
 0xa80   : > { %v6179_v51 = vld [vmem:[#allocation8 + $0x6e0] sm:$0xff]  ;;  %v9604_v31 = vpack.c.bf16 %v6182_v33, %v6178_v17  ;;  %v6547_v17 = vld [vmem:[#allocation10 + $0x8] sm:$0xff] }
 0xa81   : > { %v9478_v29 = vpack.c.bf16 %v6179_v51, %v6175_v22  ;;  %v6551_v33 = vld [vmem:[#allocation10 + $0x28] sm:$0xff]  ;;  %v9622_v51 = vpack.c.bf16 %v6213_v23, %v6209_v53 }
 0xa82   : > { %9459 = vmatpush1.bf16.msra.mxu0 %v9458_v41  ;;  %9587 = vmatpush1.bf16.msra.mxu1 %v9586_v52  ;;  %v6186_v41 = vld [vmem:[#allocation8 + $0x718] sm:$0xff]  ;;  %v9624_v3 = vpack.c.bf16 %v6551_v33, %v6547_v17  ;;  %v6580_v17 = vld [vmem:[#allocation10 + $0x110] sm:$0xff] }
 0xa83   : > { %9461 = vmatprep.subr.bf16.mxu0 %v9460_v38  ;;  %9589 = vmatprep.subr.bf16.mxu1 %v9588_v28  ;;  %v6190_v52 = vld [vmem:[#allocation8 + $0x738] sm:$0xff]  ;;  %v6183_v38 = vld [vmem:[#allocation8 + $0x700] sm:$0xff]  ;;  %v6584_v33 = vld [vmem:[#allocation10 + $0x130] sm:$0xff] }
 0xa84   : > { %v6187_v28 = vld [vmem:[#allocation8 + $0x720] sm:$0xff]  ;;  %v9608_v16 = vpack.c.bf16 %v6190_v52, %v6186_v41  ;;  %v6552_v41 = vld [vmem:[#allocation10 + $0x30] sm:$0xff]  ;;  %v6555_v52 = vld [vmem:[#allocation10 + $0x48] sm:$0xff] }
 0xa85   : > { %v9482_v32 = vpack.c.bf16 %v6187_v28, %v6183_v38  ;;  %v6561_v38 = vld [vmem:[#allocation10 + $0x78] sm:$0xff] }
 0xa86   : > { %9463 = vmatpush1.bf16.msra.mxu0 %v9462_v58  ;;  %9591 = vmatpush1.bf16.msra.mxu1 %v9590_v47  ;;  %v6194_v58 = vld [vmem:[#allocation8 + $0x758] sm:$0xff] }
 0xa87   : > { %9465 = vmatprep.subr.bf16.mxu0 %v9464_v20  ;;  %9593 = vmatprep.subr.bf16.mxu1 %v9592_v8  ;;  %v6198_v47 = vld [vmem:[#allocation8 + $0x778] sm:$0xff]  ;;  %v6191_v20 = vld [vmem:[#allocation8 + $0x740] sm:$0xff] }
 0xa88   : > { %v6195_v8 = vld [vmem:[#allocation8 + $0x760] sm:$0xff]  ;;  %v9612_v21 = vpack.c.bf16 %v6198_v47, %v6194_v58  ;;  %v6560_v58 = vld [vmem:[#allocation10 + $0x70] sm:$0xff]  ;;  %v6563_v47 = vld [vmem:[#allocation10 + $0x88] sm:$0xff] }
 0xa89   : > { %v9486_v15 = vpack.c.bf16 %v6195_v8, %v6191_v20  ;;  %v6569_v20 = vld [vmem:[#allocation10 + $0xb8] sm:$0xff] }
 0xa8a   : > { %9467 = vmatpush1.bf16.msra.mxu0 %v9466_v36  ;;  %9595 = vmatpush1.bf16.msra.mxu1 %v9594_v24  ;;  %v6202_v36 = vld [vmem:[#allocation8 + $0x798] sm:$0xff] }
 0xa8b   : > { %9469 = vmatprep.subr.bf16.mxu0 %v9468_v50  ;;  %9597 = vmatprep.subr.bf16.mxu1 %v9596_v57  ;;  %v6206_v24 = vld [vmem:[#allocation8 + $0x7b8] sm:$0xff]  ;;  %v6199_v50 = vld [vmem:[#allocation8 + $0x780] sm:$0xff] }
 0xa8c   : > { %v6203_v57 = vld [vmem:[#allocation8 + $0x7a0] sm:$0xff]  ;;  %v9616_v46 = vpack.c.bf16 %v6206_v24, %v6202_v36  ;;  %v6571_v36 = vld [vmem:[#allocation10 + $0xc8] sm:$0xff] }
 0xa8d   : > { %v9490_v7 = vpack.c.bf16 %v6203_v57, %v6199_v50  ;;  %v6575_v24 = vld [vmem:[#allocation10 + $0xe8] sm:$0xff]  ;;  %v9762_v57 = vpack.c.bf16 %v6568_v42, %v6564_v13  ;;  %v6604_v42 = vld [vmem:[#allocation10 + $0x1d0] sm:$0xff] }
 0xa8e   : > { %9471 = vmatpush1.bf16.msra.mxu0 %v9470_v35  ;;  %9599 = vmatpush1.bf16.msra.mxu1 %v9598_v5  ;;  %v6210_v35 = vld [vmem:[#allocation8 + $0x7d8] sm:$0xff]  ;;  %v9636_v1 = vpack.c.bf16 %v6575_v24, %v6571_v36  ;;  %v6608_v36 = vld [vmem:[#allocation10 + $0x1f0] sm:$0xff]  ;;  %v6611_v24 = vld [vmem:[#allocation10 + $0x208] sm:$0xff] }
 0xa8f   : > { %9473 = vmatprep.subr.bf16.mxu0 %v9472_v19  ;;  %9601 = vmatprep.subr.bf16.mxu1 %v9600_v56  ;;  %v6214_v5 = vld [vmem:[#allocation8 + $0x7f8] sm:$0xff]  ;;  %v6207_v19 = vld [vmem:[#allocation8 + $0x7c0] sm:$0xff] }
 0xa90   : > { %v6211_v56 = vld [vmem:[#allocation8 + $0x7e0] sm:$0xff]  ;;  %v9620_v26 = vpack.c.bf16 %v6214_v5, %v6210_v35  ;;  %v6579_v35 = vld [vmem:[#allocation10 + $0x108] sm:$0xff] }
 0xa91   : > { %v9494_v22 = vpack.c.bf16 %v6211_v56, %v6207_v19  ;;  %v6583_v5 = vld [vmem:[#allocation10 + $0x128] sm:$0xff]  ;;  %v9766_v56 = vpack.c.bf16 %v6576_v10, %v6572_v18  ;;  %v6612_v10 = vld [vmem:[#allocation10 + $0x210] sm:$0xff] }
 0xa92   : > { %9475 = vmatpush1.bf16.msra.mxu0 %v9474_v43  ;;  %9603 = vmatpush1.bf16.msra.mxu1 %v9602_v30  ;;  %v6549_v43 = vld [vmem:[#allocation10 + $0x18] sm:$0xff]  ;;  %v9640_v53 = vpack.c.bf16 %v6583_v5, %v6579_v35  ;;  %v6616_v35 = vld [vmem:[#allocation10 + $0x230] sm:$0xff]  ;;  %v6619_v5 = vld [vmem:[#allocation10 + $0x248] sm:$0xff] }
 0xa93   : > { %9477 = vmatprep.subr.bf16.mxu0 %v9476_v6  ;;  %9605 = vmatprep.subr.bf16.mxu1 %v9604_v31  ;;  %v6553_v30 = vld [vmem:[#allocation10 + $0x38] sm:$0xff]  ;;  %v6546_v6 = vld [vmem:[#allocation10] sm:$0xff] }
 0xa94   : > { %v6550_v31 = vld [vmem:[#allocation10 + $0x20] sm:$0xff]  ;;  %v9752_v14 = vpack.c.bf16 %v6553_v30, %v6549_v43  ;;  %v6587_v43 = vld [vmem:[#allocation10 + $0x148] sm:$0xff] }
 0xa95   : > { %v9626_v28 = vpack.c.bf16 %v6550_v31, %v6546_v6  ;;  %v6591_v30 = vld [vmem:[#allocation10 + $0x168] sm:$0xff]  ;;  %v9770_v31 = vpack.c.bf16 %v6584_v33, %v6580_v17  ;;  %v6620_v33 = vld [vmem:[#allocation10 + $0x250] sm:$0xff] }
 0xa96   : > { %9479 = vmatpush1.bf16.msra.mxu0 %v9478_v29  ;;  %9607 = vmatpush1.bf16.msra.mxu1 %v9606_v48  ;;  %v6559_v29 = vld [vmem:[#allocation10 + $0x68] sm:$0xff]  ;;  %v6557_v48 = vld [vmem:[#allocation10 + $0x58] sm:$0xff] }
 0xa97   : > { %9481 = vmatprep.subr.bf16.mxu0 %v9480_v0  ;;  %9609 = vmatprep.subr.bf16.mxu1 %v9608_v16  ;;  %v9754_v0 = vpack.c.bf16 %v6552_v41, %v6548_v9  ;;  %v6554_v16 = vld [vmem:[#allocation10 + $0x40] sm:$0xff]  ;;  %v9628_v54 = vpack.c.bf16 %v6559_v29, %v6555_v52  ;;  %v9756_v62 = vpack.c.bf16 %v6561_v38, %v6557_v48  ;;  %v6588_v52 = vld [vmem:[#allocation10 + $0x150] sm:$0xff]  ;;  %v6595_v48 = vld [vmem:[#allocation10 + $0x188] sm:$0xff] }
 0xa98   : > { %v9630_v8 = vpack.c.bf16 %v6558_v40, %v6554_v16  ;;  %v9644_v9 = vpack.c.bf16 %v6591_v30, %v6587_v43  ;;  %v6592_v29 = vld [vmem:[#allocation10 + $0x170] sm:$0xff]  ;;  %v6599_v38 = vld [vmem:[#allocation10 + $0x1a8] sm:$0xff] }
 0xa99   : > { %v9774_v40 = vpack.c.bf16 %v6592_v29, %v6588_v52  ;;  %v6624_v43 = vld [vmem:[#allocation10 + $0x270] sm:$0xff]  ;;  %v6627_v30 = vld [vmem:[#allocation10 + $0x288] sm:$0xff] }
 0xa9a   : > { %9483 = vmatpush1.bf16.msra.mxu0 %v9482_v32  ;;  %9611 = vmatpush1.bf16.msra.mxu1 %v9610_v44  ;;  %v6567_v32 = vld [vmem:[#allocation10 + $0xa8] sm:$0xff]  ;;  %v6565_v44 = vld [vmem:[#allocation10 + $0x98] sm:$0xff]  ;;  %v6628_v29 = vld [vmem:[#allocation10 + $0x290] sm:$0xff] }
 0xa9b   : > { %9485 = vmatprep.subr.bf16.mxu0 %v9484_v60  ;;  %9613 = vmatprep.subr.bf16.mxu1 %v9612_v21  ;;  %v9758_v60 = vpack.c.bf16 %v6560_v58, %v6556_v49  ;;  %v6562_v21 = vld [vmem:[#allocation10 + $0x80] sm:$0xff]  ;;  %v9632_v25 = vpack.c.bf16 %v6567_v32, %v6563_v47  ;;  %v9760_v45 = vpack.c.bf16 %v6569_v20, %v6565_v44  ;;  %v6596_v58 = vld [vmem:[#allocation10 + $0x190] sm:$0xff]  ;;  %v6603_v32 = vld [vmem:[#allocation10 + $0x1c8] sm:$0xff] }
 0xa9c   : > { %v9634_v50 = vpack.c.bf16 %v6566_v2, %v6562_v21  ;;  %v6600_v47 = vld [vmem:[#allocation10 + $0x1b0] sm:$0xff]  ;;  %v6607_v44 = vld [vmem:[#allocation10 + $0x1e8] sm:$0xff]  ;;  %v6605_v20 = vld [vmem:[#allocation10 + $0x1d8] sm:$0xff] }
 0xa9d   : > { %v9778_v21 = vpack.c.bf16 %v6600_v47, %v6596_v58  ;;  %v6602_v2 = vld [vmem:[#allocation10 + $0x1c0] sm:$0xff]  ;;  %v6636_v47 = vld [vmem:[#allocation10 + $0x2d0] sm:$0xff] }
 0xa9e   : > { %9487 = vmatpush1.bf16.msra.mxu0 %v9486_v15  ;;  %9615 = vmatpush1.bf16.msra.mxu1 %v9614_v37  ;;  %v6573_v15 = vld [vmem:[#allocation10 + $0xd8] sm:$0xff] }
 0xa9f   : > { %9489 = vmatprep.subr.bf16.mxu0 %v9488_v27  ;;  %9617 = vmatprep.subr.bf16.mxu1 %v9616_v46  ;;  %v6577_v37 = vld [vmem:[#allocation10 + $0xf8] sm:$0xff]  ;;  %v6570_v27 = vld [vmem:[#allocation10 + $0xc0] sm:$0xff] }
 0xaa0   : > { %v6574_v46 = vld [vmem:[#allocation10 + $0xe0] sm:$0xff]  ;;  %v9764_v63 = vpack.c.bf16 %v6577_v37, %v6573_v15  ;;  %v6615_v15 = vld [vmem:[#allocation10 + $0x228] sm:$0xff]  ;;  %v6613_v37 = vld [vmem:[#allocation10 + $0x218] sm:$0xff] }
 0xaa1   : > { %v9638_v19 = vpack.c.bf16 %v6574_v46, %v6570_v27  ;;  %v9782_v27 = vpack.c.bf16 %v6608_v36, %v6604_v42  ;;  %v6610_v46 = vld [vmem:[#allocation10 + $0x200] sm:$0xff]  ;;  %v6644_v36 = vld [vmem:[#allocation10 + $0x310] sm:$0xff] }
 0xaa2   : > { %9491 = vmatpush1.bf16.msra.mxu0 %v9490_v7  ;;  %9619 = vmatpush1.bf16.msra.mxu1 %v9618_v4  ;;  %v6581_v7 = vld [vmem:[#allocation10 + $0x118] sm:$0xff] }
 0xaa3   : > { %9493 = vmatprep.subr.bf16.mxu0 %v9492_v61  ;;  %9621 = vmatprep.subr.bf16.mxu1 %v9620_v26  ;;  %v6585_v4 = vld [vmem:[#allocation10 + $0x138] sm:$0xff]  ;;  %v6578_v61 = vld [vmem:[#allocation10 + $0x100] sm:$0xff] }
 0xaa4   : > { %v6582_v26 = vld [vmem:[#allocation10 + $0x120] sm:$0xff]  ;;  %v9768_v23 = vpack.c.bf16 %v6585_v4, %v6581_v7  ;;  %v6623_v7 = vld [vmem:[#allocation10 + $0x268] sm:$0xff]  ;;  %v6621_v4 = vld [vmem:[#allocation10 + $0x258] sm:$0xff] }
 0xaa5   : > { %v9642_v6 = vpack.c.bf16 %v6582_v26, %v6578_v61  ;;  %v9786_v61 = vpack.c.bf16 %v6616_v35, %v6612_v10  ;;  %v6618_v26 = vld [vmem:[#allocation10 + $0x240] sm:$0xff]  ;;  %v6652_v35 = vld [vmem:[#allocation10 + $0x350] sm:$0xff] }
 0xaa6   : > { %9495 = vmatpush1.bf16.msra.mxu0 %v9494_v22  ;;  %9623 = vmatpush1.bf16.msra.mxu1 %v9622_v51  ;;  %v6589_v22 = vld [vmem:[#allocation10 + $0x158] sm:$0xff] }
 0xaa7   : > { %9625 = vmatprep.subr.bf16.mxu0 %v9624_v3  ;;  %9753 = vmatprep.subr.bf16.mxu1 %v9752_v14  ;;  %v6593_v51 = vld [vmem:[#allocation10 + $0x178] sm:$0xff]  ;;  %v6586_v3 = vld [vmem:[#allocation10 + $0x140] sm:$0xff] }
 0xaa8   : > { %v6590_v14 = vld [vmem:[#allocation10 + $0x160] sm:$0xff]  ;;  %v9772_v41 = vpack.c.bf16 %v6593_v51, %v6589_v22  ;;  %v6631_v22 = vld [vmem:[#allocation10 + $0x2a8] sm:$0xff]  ;;  %v6629_v51 = vld [vmem:[#allocation10 + $0x298] sm:$0xff] }
 0xaa9   : > { %6394 = vmatmul.mubr.f32.vlgmr.msra.gmra.mrb[20].mxu0 %v6228_v59  ;;  %6536 = vmatmul.mubr.f32.vlgmr.msra.gmra.mrb[20].mxu1 %v6228_v59  ;;  %v9646_v16 = vpack.c.bf16 %v6590_v14, %v6586_v3  ;;  %v6594_v59 = vld [vmem:[#allocation10 + $0x180] sm:$0xff]  ;;  %v9790_v3 = vpack.c.bf16 %v6624_v43, %v6620_v33  ;;  %v6660_v43 = vld [vmem:[#allocation10 + $0x390] sm:$0xff] }
 0xaaa   : > { %9627 = vmatpush1.bf16.msra.mxu0 %v9626_v28  ;;  %9755 = vmatpush1.bf16.msra.mxu1 %v9754_v0  ;;  %v6597_v28 = vld [vmem:[#allocation10 + $0x198] sm:$0xff]  ;;  %v6626_v14 = vld [vmem:[#allocation10 + $0x280] sm:$0xff] }
 0xaab   : > { %9629 = vmatprep.subr.bf16.mxu0 %v9628_v54  ;;  %9757 = vmatprep.subr.bf16.mxu1 %v9756_v62  ;;  %v6601_v0 = vld [vmem:[#allocation10 + $0x1b8] sm:$0xff]  ;;  %v6598_v54 = vld [vmem:[#allocation10 + $0x1a0] sm:$0xff]  ;;  %v9648_v62 = vpack.c.bf16 %v6599_v38, %v6595_v48  ;;  %v6632_v48 = vld [vmem:[#allocation10 + $0x2b0] sm:$0xff] }
 0xaac   : > { %v9776_v49 = vpack.c.bf16 %v6601_v0, %v6597_v28  ;;  %v6635_v38 = vld [vmem:[#allocation10 + $0x2c8] sm:$0xff]  ;;  %v6637_v0 = vld [vmem:[#allocation10 + $0x2d8] sm:$0xff]  ;;  %v6662_v33 = vld [vmem:[#allocation10 + $0x3a0] sm:$0xff] }
 0xaad   : > { %v6639_v28 = vld [vmem:[#allocation10 + $0x2e8] sm:$0xff] }
 0xaae   : > { %9631 = vmatpush1.bf16.msra.mxu0 %v9630_v8  ;;  %9759 = vmatpush1.bf16.msra.mxu1 %v9758_v60  ;;  %v6609_v8 = vld [vmem:[#allocation10 + $0x1f8] sm:$0xff]  ;;  %v9650_v60 = vpack.c.bf16 %v6598_v54, %v6594_v59  ;;  %v9794_v59 = vpack.c.bf16 %v6632_v48, %v6628_v29  ;;  %v6634_v54 = vld [vmem:[#allocation10 + $0x2c0] sm:$0xff] }
 0xaaf   : > { %9633 = vmatprep.subr.bf16.mxu0 %v9632_v25  ;;  %9761 = vmatprep.subr.bf16.mxu1 %v9760_v45  ;;  %v6606_v25 = vld [vmem:[#allocation10 + $0x1e0] sm:$0xff]  ;;  %v9652_v45 = vpack.c.bf16 %v6607_v44, %v6603_v32  ;;  %v9780_v13 = vpack.c.bf16 %v6609_v8, %v6605_v20  ;;  %v6640_v32 = vld [vmem:[#allocation10 + $0x2f0] sm:$0xff]  ;;  %v6643_v44 = vld [vmem:[#allocation10 + $0x308] sm:$0xff] }
 0xab0   : > { %v6647_v20 = vld [vmem:[#allocation10 + $0x328] sm:$0xff]  ;;  %v6645_v8 = vld [vmem:[#allocation10 + $0x318] sm:$0xff] }
 0xab2   : > { %9635 = vmatpush1.bf16.msra.mxu0 %v9634_v50  ;;  %9763 = vmatpush1.bf16.msra.mxu1 %v9762_v57  ;;  %v6617_v50 = vld [vmem:[#allocation10 + $0x238] sm:$0xff]  ;;  %v9654_v57 = vpack.c.bf16 %v6606_v25, %v6602_v2  ;;  %v9798_v2 = vpack.c.bf16 %v6640_v32, %v6636_v47  ;;  %v6642_v25 = vld [vmem:[#allocation10 + $0x300] sm:$0xff] }
 0xab3   : > { %9637 = vmatprep.subr.bf16.mxu0 %v9636_v1  ;;  %9765 = vmatprep.subr.bf16.mxu1 %v9764_v63  ;;  %v6614_v1 = vld [vmem:[#allocation10 + $0x220] sm:$0xff]  ;;  %v9656_v63 = vpack.c.bf16 %v6615_v15, %v6611_v24  ;;  %v9784_v18 = vpack.c.bf16 %v6617_v50, %v6613_v37  ;;  %v6648_v24 = vld [vmem:[#allocation10 + $0x330] sm:$0xff]  ;;  %v6651_v15 = vld [vmem:[#allocation10 + $0x348] sm:$0xff] }
 0xab4   : > { %v6655_v37 = vld [vmem:[#allocation10 + $0x368] sm:$0xff]  ;;  %v6653_v50 = vld [vmem:[#allocation10 + $0x358] sm:$0xff] }
 0xab6   : > { %9639 = vmatpush1.bf16.msra.mxu0 %v9638_v19  ;;  %9767 = vmatpush1.bf16.msra.mxu1 %v9766_v56  ;;  %v6625_v19 = vld [vmem:[#allocation10 + $0x278] sm:$0xff]  ;;  %v9658_v56 = vpack.c.bf16 %v6614_v1, %v6610_v46  ;;  %v9802_v46 = vpack.c.bf16 %v6648_v24, %v6644_v36  ;;  %v6650_v1 = vld [vmem:[#allocation10 + $0x340] sm:$0xff]  ;;  %v6683_v24 = vld [vmem:[#allocation10 + $0x448] sm:$0xff] }
 0xab7   : > { %9641 = vmatprep.subr.bf16.mxu0 %v9640_v53  ;;  %9769 = vmatprep.subr.bf16.mxu1 %v9768_v23  ;;  %v6622_v53 = vld [vmem:[#allocation10 + $0x260] sm:$0xff]  ;;  %v9660_v23 = vpack.c.bf16 %v6623_v7, %v6619_v5  ;;  %v9788_v17 = vpack.c.bf16 %v6625_v19, %v6621_v4  ;;  %v6656_v5 = vld [vmem:[#allocation10 + $0x370] sm:$0xff]  ;;  %v6659_v7 = vld [vmem:[#allocation10 + $0x388] sm:$0xff] }
 0xab8   : > { %v6663_v4 = vld [vmem:[#allocation10 + $0x3a8] sm:$0xff]  ;;  %v6661_v19 = vld [vmem:[#allocation10 + $0x398] sm:$0xff] }
 0xaba   : > { %9643 = vmatpush1.bf16.msra.mxu0 %v9642_v6  ;;  %9771 = vmatpush1.bf16.msra.mxu1 %v9770_v31  ;;  %v6633_v6 = vld [vmem:[#allocation10 + $0x2b8] sm:$0xff]  ;;  %v9662_v31 = vpack.c.bf16 %v6622_v53, %v6618_v26  ;;  %v9806_v26 = vpack.c.bf16 %v6656_v5, %v6652_v35  ;;  %v6658_v53 = vld [vmem:[#allocation10 + $0x380] sm:$0xff]  ;;  %v6684_v35 = vld [vmem:[#allocation10 + $0x450] sm:$0xff] }
 0xabb   : > { %9645 = vmatprep.subr.bf16.mxu0 %v9644_v9  ;;  %9773 = vmatprep.subr.bf16.mxu1 %v9772_v41  ;;  %v6630_v9 = vld [vmem:[#allocation10 + $0x2a0] sm:$0xff]  ;;  %v9664_v41 = vpack.c.bf16 %v6631_v22, %v6627_v30  ;;  %v9792_v52 = vpack.c.bf16 %v6633_v6, %v6629_v51  ;;  %v6664_v30 = vld [vmem:[#allocation10 + $0x3b0] sm:$0xff]  ;;  %v9682_v22 = vpack.c.bf16 %v6662_v33, %v6658_v53  ;;  %v6667_v6 = vld [vmem:[#allocation10 + $0x3c8] sm:$0xff] }
 0xabc   : > { %v9810_v51 = vpack.c.bf16 %v6664_v30, %v6660_v43  ;;  %v6688_v5 = vld [vmem:[#allocation10 + $0x470] sm:$0xff]  ;;  %v6690_v33 = vld [vmem:[#allocation10 + $0x480] sm:$0xff] }
 0xabd   : > { %v6694_v43 = vld [vmem:[#allocation10 + $0x4a0] sm:$0xff] }
 0xabe   : > { %9647 = vmatpush1.bf16.msra.mxu0 %v9646_v16  ;;  %9775 = vmatpush1.bf16.msra.mxu1 %v9774_v40  ;;  %v6641_v16 = vld [vmem:[#allocation10 + $0x2f8] sm:$0xff]  ;;  %v9666_v40 = vpack.c.bf16 %v6630_v9, %v6626_v14 }
 0xabf   : > { %9649 = vmatprep.subr.bf16.mxu0 %v9648_v62  ;;  %9777 = vmatprep.subr.bf16.mxu1 %v9776_v49  ;;  %v6638_v62 = vld [vmem:[#allocation10 + $0x2e0] sm:$0xff]  ;;  %v9668_v49 = vpack.c.bf16 %v6639_v28, %v6635_v38  ;;  %v9796_v58 = vpack.c.bf16 %v6641_v16, %v6637_v0  ;;  %v6673_v9 = vld [vmem:[#allocation10 + $0x3f8] sm:$0xff]  ;;  %v6668_v38 = vld [vmem:[#allocation10 + $0x3d0] sm:$0xff] }
 0xac0   : > { %v6672_v28 = vld [vmem:[#allocation10 + $0x3f0] sm:$0xff]  ;;  %v6675_v16 = vld [vmem:[#allocation10 + $0x408] sm:$0xff] }
 0xac1   : > { %v9814_v0 = vpack.c.bf16 %v6672_v28, %v6668_v38 }
 0xac2   : > { %9651 = vmatpush1.bf16.msra.mxu0 %v9650_v60  ;;  %9779 = vmatpush1.bf16.msra.mxu1 %v9778_v21  ;;  %v6649_v60 = vld [vmem:[#allocation10 + $0x338] sm:$0xff]  ;;  %v9670_v21 = vpack.c.bf16 %v6638_v62, %v6634_v54 }
 0xac3   : > { %9653 = vmatprep.subr.bf16.mxu0 %v9652_v45  ;;  %9781 = vmatprep.subr.bf16.mxu1 %v9780_v13  ;;  %v6646_v45 = vld [vmem:[#allocation10 + $0x320] sm:$0xff]  ;;  %v9672_v13 = vpack.c.bf16 %v6647_v20, %v6643_v44  ;;  %v9800_v42 = vpack.c.bf16 %v6649_v60, %v6645_v8  ;;  %v6681_v62 = vld [vmem:[#allocation10 + $0x438] sm:$0xff] }
 0xac4   : > { %v6674_v60 = vld [vmem:[#allocation10 + $0x400] sm:$0xff] }
 0xac6   : > { %9655 = vmatpush1.bf16.msra.mxu0 %v9654_v57  ;;  %9783 = vmatpush1.bf16.msra.mxu1 %v9782_v27  ;;  %v6657_v57 = vld [vmem:[#allocation10 + $0x378] sm:$0xff]  ;;  %v9674_v27 = vpack.c.bf16 %v6646_v45, %v6642_v25  ;;  %v6678_v45 = vld [vmem:[#allocation10 + $0x420] sm:$0xff] }
 0xac7   : > { %9657 = vmatprep.subr.bf16.mxu0 %v9656_v63  ;;  %9785 = vmatprep.subr.bf16.mxu1 %v9784_v18  ;;  %v6654_v63 = vld [vmem:[#allocation10 + $0x360] sm:$0xff]  ;;  %v9676_v18 = vpack.c.bf16 %v6655_v37, %v6651_v15  ;;  %v9804_v10 = vpack.c.bf16 %v6657_v57, %v6653_v50  ;;  %v6687_v37 = vld [vmem:[#allocation10 + $0x468] sm:$0xff]  ;;  %v6685_v50 = vld [vmem:[#allocation10 + $0x458] sm:$0xff] }
 0xac8   : > { %v6689_v57 = vld [vmem:[#allocation10 + $0x478] sm:$0xff] }
 0xaca   : > { %9659 = vmatpush1.bf16.msra.mxu0 %v9658_v56  ;;  %9787 = vmatpush1.bf16.msra.mxu1 %v9786_v61  ;;  %v6665_v56 = vld [vmem:[#allocation10 + $0x3b8] sm:$0xff]  ;;  %v9678_v61 = vpack.c.bf16 %v6654_v63, %v6650_v1  ;;  %v6682_v63 = vld [vmem:[#allocation10 + $0x440] sm:$0xff] }
 0xacb   : > { %9661 = vmatprep.subr.bf16.mxu0 %v9660_v23  ;;  %9789 = vmatprep.subr.bf16.mxu1 %v9788_v17  ;;  %v9680_v23 = vpack.c.bf16 %v6663_v4, %v6659_v7  ;;  %v9808_v17 = vpack.c.bf16 %v6665_v56, %v6661_v19  ;;  %v6691_v7 = vld [vmem:[#allocation10 + $0x488] sm:$0xff]  ;;  %v9692_v4 = vpack.c.bf16 %v6687_v37, %v6683_v24  ;;  %v6718_v37 = vld [vmem:[#allocation10 + $0x560] sm:$0xff] }
 0xacc   : > { %v9820_v19 = vpack.c.bf16 %v6689_v57, %v6685_v50  ;;  %v6695_v56 = vld [vmem:[#allocation10 + $0x4a8] sm:$0xff] }
 0xacd   : > { %v9696_v30 = vpack.c.bf16 %v6695_v56, %v6691_v7  ;;  %v6722_v7 = vld [vmem:[#allocation10 + $0x580] sm:$0xff] }
 0xace   : > { %9663 = vmatpush1.bf16.msra.mxu0 %v9662_v31  ;;  %9791 = vmatpush1.bf16.msra.mxu1 %v9790_v3  ;;  %v6671_v31 = vld [vmem:[#allocation10 + $0x3e8] sm:$0xff]  ;;  %v6669_v3 = vld [vmem:[#allocation10 + $0x3d8] sm:$0xff] }
 0xacf   : > { %9665 = vmatprep.subr.bf16.mxu0 %v9664_v41  ;;  %9793 = vmatprep.subr.bf16.mxu1 %v9792_v52  ;;  %v9684_v14 = vpack.c.bf16 %v6671_v31, %v6667_v6  ;;  %v6666_v41 = vld [vmem:[#allocation10 + $0x3c0] sm:$0xff]  ;;  %v9812_v29 = vpack.c.bf16 %v6673_v9, %v6669_v3  ;;  %v6696_v6 = vld [vmem:[#allocation10 + $0x4b0] sm:$0xff]  ;;  %v6699_v31 = vld [vmem:[#allocation10 + $0x4c8] sm:$0xff] }
 0xad0   : > { %v6670_v52 = vld [vmem:[#allocation10 + $0x3e0] sm:$0xff]  ;;  %v6703_v3 = vld [vmem:[#allocation10 + $0x4e8] sm:$0xff]  ;;  %v6705_v9 = vld [vmem:[#allocation10 + $0x4f8] sm:$0xff] }
 0xad1   : > { %v9686_v48 = vpack.c.bf16 %v6670_v52, %v6666_v41  ;;  %v9698_v41 = vpack.c.bf16 %v6694_v43, %v6690_v33  ;;  %v9700_v38 = vpack.c.bf16 %v6703_v3, %v6699_v31  ;;  %v6737_v33 = vld [vmem:[#allocation10 + $0x5f8] sm:$0xff]  ;;  %v6732_v3 = vld [vmem:[#allocation10 + $0x5d0] sm:$0xff] }
 0xad2   : > { %9667 = vmatpush1.bf16.msra.mxu0 %v9666_v40  ;;  %9795 = vmatpush1.bf16.msra.mxu1 %v9794_v59  ;;  %v6679_v40 = vld [vmem:[#allocation10 + $0x428] sm:$0xff]  ;;  %v6677_v59 = vld [vmem:[#allocation10 + $0x418] sm:$0xff] }
 0xad3   : > { %9669 = vmatprep.subr.bf16.mxu0 %v9668_v49  ;;  %9797 = vmatprep.subr.bf16.mxu1 %v9796_v58  ;;  %v9688_v54 = vpack.c.bf16 %v6679_v40, %v6675_v16  ;;  %v9816_v49 = vpack.c.bf16 %v6681_v62, %v6677_v59  ;;  %v13637_v58 = vld [vmem:[%s13747_s10] sm:$0xf]  ;;  %v6707_v40 = vld [vmem:[#allocation10 + $0x508] sm:$0xff]  ;;  %v6713_v62 = vld [vmem:[#allocation10 + $0x538] sm:$0xff] }
 0xad4   : > { %v6241_v47 = vrot.slane %v13637_v58, %v13616_v39  ;;  %v6245_v32 = vrot.slane %v13637_v58, %v13613_v11  ;;  %v6253_v44 = vrot.slane %v13637_v58, %v13621_v12  ;;  %v6704_v16 = vld [vmem:[#allocation10 + $0x4f0] sm:$0xff]  ;;  %v6711_v59 = vld [vmem:[#allocation10 + $0x528] sm:$0xff] }
 0xad6   : > { %9671 = vmatpush1.bf16.msra.mxu0 %v9670_v21  ;;  %9799 = vmatpush1.bf16.msra.mxu1 %v9798_v2 }
 0xad7   : > { %9673 = vmatprep.subr.bf16.mxu0 %v9672_v13  ;;  %9801 = vmatprep.subr.bf16.mxu1 %v9800_v42  ;;  %v6676_v13 = vld [vmem:[#allocation10 + $0x410] sm:$0xff] }
 0xad8   : > { %v6680_v42 = vld [vmem:[#allocation10 + $0x430] sm:$0xff] }
 0xad9   : > { %v9818_v1 = vpack.c.bf16 %v6680_v42, %v6676_v13  ;;  %v6717_v13 = vld [vmem:[#allocation10 + $0x558] sm:$0xff] }
 0xada   : > { %9675 = vmatpush1.bf16.msra.mxu0 %v9674_v27  ;;  %9803 = vmatpush1.bf16.msra.mxu1 %v9802_v46  ;;  %v9690_v46 = vpack.c.bf16 %v6678_v45, %v6674_v60  ;;  %v6719_v45 = vld [vmem:[#allocation10 + $0x568] sm:$0xff]  ;;  %v6721_v42 = vld [vmem:[#allocation10 + $0x578] sm:$0xff] }
 0xadb   : > { %9677 = vmatprep.subr.bf16.mxu0 %v9676_v18  ;;  %9805 = vmatprep.subr.bf16.mxu1 %v9804_v10  ;;  %v6686_v18 = vld [vmem:[#allocation10 + $0x460] sm:$0xff]  ;;  %v9836_v57 = vpack.c.bf16 %v6721_v42, %v6717_v13  ;;  %v6752_v13 = vld [vmem:[#allocation10 + $0x670] sm:$0xff]  ;;  %v6755_v42 = vld [vmem:[#allocation10 + $0x688] sm:$0xff] }
 0xade   : > { %9679 = vmatpush1.bf16.msra.mxu0 %v9678_v61  ;;  %9807 = vmatpush1.bf16.msra.mxu1 %v9806_v26  ;;  %v6693_v61 = vld [vmem:[#allocation10 + $0x498] sm:$0xff] }
 0xadf   : > { %9681 = vmatprep.subr.bf16.mxu0 %v9680_v23  ;;  %9809 = vmatprep.subr.bf16.mxu1 %v9808_v17  ;;  %v6697_v26 = vld [vmem:[#allocation10 + $0x4b8] sm:$0xff]  ;;  %v9694_v23 = vpack.c.bf16 %v6686_v18, %v6682_v63  ;;  %v9822_v17 = vpack.c.bf16 %v6688_v5, %v6684_v35  ;;  %v6727_v63 = vld [vmem:[#allocation10 + $0x5a8] sm:$0xff] }
 0xae0   : > { %v6725_v18 = vld [vmem:[#allocation10 + $0x598] sm:$0xff] }
 0xae2   : > { %9683 = vmatpush1.bf16.msra.mxu0 %v9682_v22  ;;  %9811 = vmatpush1.bf16.msra.mxu1 %v9810_v51  ;;  %v9824_v22 = vpack.c.bf16 %v6697_v26, %v6693_v61  ;;  %v6692_v51 = vld [vmem:[#allocation10 + $0x490] sm:$0xff] }
 0xae3   : > { %9685 = vmatprep.subr.bf16.mxu0 %v9684_v14  ;;  %9813 = vmatprep.subr.bf16.mxu1 %v9812_v29  ;;  %v6701_v14 = vld [vmem:[#allocation10 + $0x4d8] sm:$0xff]  ;;  %v9826_v52 = vpack.c.bf16 %v6696_v6, %v6692_v51  ;;  %v6698_v29 = vld [vmem:[#allocation10 + $0x4c0] sm:$0xff]  ;;  %v6724_v61 = vld [vmem:[#allocation10 + $0x590] sm:$0xff] }
 0xae4   : > { %v9828_v28 = vpack.c.bf16 %v6705_v9, %v6701_v14  ;;  %v6728_v26 = vld [vmem:[#allocation10 + $0x5b0] sm:$0xff]  ;;  %v6734_v51 = vld [vmem:[#allocation10 + $0x5e0] sm:$0xff]  ;;  %v6739_v9 = vld [vmem:[#allocation10 + $0x608] sm:$0xff] }
 0xae5   : > { %v6736_v14 = vld [vmem:[#allocation10 + $0x5f0] sm:$0xff] }
 0xae6   : > { %9687 = vmatpush1.bf16.msra.mxu0 %v9686_v48  ;;  %9815 = vmatpush1.bf16.msra.mxu1 %v9814_v0  ;;  %v6702_v48 = vld [vmem:[#allocation10 + $0x4e0] sm:$0xff]  ;;  %v6700_v0 = vld [vmem:[#allocation10 + $0x4d0] sm:$0xff] }
 0xae7   : > { %9689 = vmatprep.subr.bf16.mxu0 %v9688_v54  ;;  %9817 = vmatprep.subr.bf16.mxu1 %v9816_v49  ;;  %v6709_v54 = vld [vmem:[#allocation10 + $0x518] sm:$0xff]  ;;  %v9702_v49 = vpack.c.bf16 %v6702_v48, %v6698_v29 }
 0xae8   : > { %v9832_v60 = vpack.c.bf16 %v6713_v62, %v6709_v54  ;;  %v6745_v29 = vld [vmem:[#allocation10 + $0x638] sm:$0xff]  ;;  %v6744_v54 = vld [vmem:[#allocation10 + $0x630] sm:$0xff]  ;;  %v6747_v62 = vld [vmem:[#allocation10 + $0x648] sm:$0xff] }
 0xb7c   : > { %v6395_v20 = vpop.f32.mrb[20].mxu0  ;;  %v13645_v8 = vpop.f32.mrb[20].mxu1 }
 0xb7d   : > { %v10472_v21 = vadd.f32 %v6395_v20, %v6241_v47  ;;  %v6397_v2 = vpop.f32.mrb[21].mxu0  ;;  %v6539_v25 = vpop.f32.mrb[21].mxu1  ;;  %v9830_v47 = vpack.c.bf16 %v6704_v16, %v6700_v0  ;;  %v9704_v20 = vpack.c.bf16 %v6711_v59, %v6707_v40  ;;  %v6742_v0 = vld [vmem:[#allocation10 + $0x620] sm:$0xff]  ;;  %v6740_v59 = vld [vmem:[#allocation10 + $0x610] sm:$0xff] }
 0xb7e   : > { %v10473_v36 = vadd.f32 %v6397_v2, %v6245_v32  ;;  %v10475_v15 = vadd.f32 %v6539_v25, %v6253_v44  ;;  %v6706_v32 = vld [vmem:[#allocation10 + $0x500] sm:$0xff]  ;;  %v6712_v2 = vld [vmem:[#allocation10 + $0x530] sm:$0xff]  ;;  %v6715_v25 = vld [vmem:[#allocation10 + $0x548] sm:$0xff] }
 0xb7f   : > { %v6542_v10 = vmax.f32 %v10472_v21, 0.0  ;;  %v6710_v44 = vld [vmem:[#allocation10 + $0x520] sm:$0xff]  ;;  %v6708_v21 = vld [vmem:[#allocation10 + $0x510] sm:$0xff]  ;;  %v9708_v50 = vpack.c.bf16 %v6719_v45, %v6715_v25 }
 0xb80   : > { %v6543_v27 = vmax.f32 %v10473_v36, 0.0  ;;  %v6545_v53 = vmax.f32 %v10475_v15, 0.0  ;;  %v9706_v36 = vpack.c.bf16 %v6710_v44, %v6706_v32  ;;  %v9834_v24 = vpack.c.bf16 %v6712_v2, %v6708_v21  ;;  %v6714_v15 = vld [vmem:[#allocation10 + $0x540] sm:$0xff]  ;;  %v6753_v32 = vld [vmem:[#allocation10 + $0x678] sm:$0xff]  ;;  %v6748_v45 = vld [vmem:[#allocation10 + $0x650] sm:$0xff] }
 0xb81   : > { %v9710_v35 = vpack.c.bf16 %v6718_v37, %v6714_v15  ;;  %v6750_v21 = vld [vmem:[#allocation10 + $0x660] sm:$0xff]  ;;  %v6761_v15 = vld [vmem:[#allocation10 + $0x6b8] sm:$0xff] }
 0xb82   : > { %6866 = vmatprep.mubr.f32.mxu0 %v6543_v27  ;;  %7008 = vmatprep.mubr.f32.mxu1 %v6543_v27  ;;  %v6716_v27 = vld [vmem:[#allocation10 + $0x550] sm:$0xff] }
 0xb83   : > { %6867 = vmatmul.mubr.f32.vlgmr.msra.gmra.mrb[22].mxu0 %v6542_v10  ;;  %7009 = vmatmul.mubr.f32.vlgmr.msra.gmra.mrb[22].mxu1 %v6542_v10  ;;  %v6729_v10 = vld [vmem:[#allocation10 + $0x5b8] sm:$0xff] }
 0xb84   : > { %9691 = vmatpush1.bf16.msra.mxu0 %v9690_v46  ;;  %9819 = vmatpush1.bf16.msra.mxu1 %v9818_v1  ;;  %v6720_v46 = vld [vmem:[#allocation10 + $0x570] sm:$0xff]  ;;  %v6723_v1 = vld [vmem:[#allocation10 + $0x588] sm:$0xff]  ;;  %v9840_v56 = vpack.c.bf16 %v6729_v10, %v6725_v18 }
 0xb85   : > { %6937 = vmatprep.mubr.f32.mxu0 %v6545_v53  ;;  %7079 = vmatprep.mubr.f32.mxu1 %v6545_v53  ;;  %v9838_v5 = vpack.c.bf16 %v6720_v46, %v6716_v27  ;;  %v6731_v53 = vld [vmem:[#allocation10 + $0x5c8] sm:$0xff]  ;;  %v6758_v27 = vld [vmem:[#allocation10 + $0x6a0] sm:$0xff]  ;;  %v6760_v18 = vld [vmem:[#allocation10 + $0x6b0] sm:$0xff] }
 0xb86   : > { %9693 = vmatprep.subr.bf16.mxu0 %v9692_v4  ;;  %9821 = vmatprep.subr.bf16.mxu1 %v9820_v19  ;;  %v6726_v4 = vld [vmem:[#allocation10 + $0x5a0] sm:$0xff]  ;;  %v9712_v19 = vpack.c.bf16 %v6727_v63, %v6723_v1  ;;  %v6756_v63 = vld [vmem:[#allocation10 + $0x690] sm:$0xff]  ;;  %v6763_v10 = vld [vmem:[#allocation10 + $0x6c8] sm:$0xff] }
 0xb87   : > { %v9714_v43 = vpack.c.bf16 %v6726_v4, %v6722_v7  ;;  %v6769_v7 = vld [vmem:[#allocation10 + $0x6f8] sm:$0xff] }
 0xb88   : > { %9695 = vmatpush1.bf16.msra.mxu0 %v9694_v23  ;;  %9823 = vmatpush1.bf16.msra.mxu1 %v9822_v17  ;;  %v6735_v23 = vld [vmem:[#allocation10 + $0x5e8] sm:$0xff]  ;;  %v6733_v17 = vld [vmem:[#allocation10 + $0x5d8] sm:$0xff] }
 0xb89   : > { %9697 = vmatprep.subr.bf16.mxu0 %v9696_v30  ;;  %9825 = vmatprep.subr.bf16.mxu1 %v9824_v22  ;;  %v9842_v30 = vpack.c.bf16 %v6728_v26, %v6724_v61  ;;  %v6730_v22 = vld [vmem:[#allocation10 + $0x5c0] sm:$0xff]  ;;  %v9716_v6 = vpack.c.bf16 %v6735_v23, %v6731_v53  ;;  %v9844_v31 = vpack.c.bf16 %v6737_v33, %v6733_v17  ;;  %v6764_v23 = vld [vmem:[#allocation10 + $0x6d0] sm:$0xff]  ;;  %v6771_v33 = vld [vmem:[#allocation10 + $0x708] sm:$0xff] }
 0xb8a   : > { %v9718_v48 = vpack.c.bf16 %v6734_v51, %v6730_v22  ;;  %v6766_v61 = vld [vmem:[#allocation10 + $0x6e0] sm:$0xff]  ;;  %v6768_v17 = vld [vmem:[#allocation10 + $0x6f0] sm:$0xff]  ;;  %v6777_v22 = vld [vmem:[#allocation10 + $0x738] sm:$0xff] }
 0xb8c   : > { %9699 = vmatpush1.bf16.msra.mxu0 %v9698_v41  ;;  %9827 = vmatpush1.bf16.msra.mxu1 %v9826_v52  ;;  %v6743_v41 = vld [vmem:[#allocation10 + $0x628] sm:$0xff]  ;;  %v6741_v52 = vld [vmem:[#allocation10 + $0x618] sm:$0xff] }
 0xb8d   : > { %9701 = vmatprep.subr.bf16.mxu0 %v9700_v38  ;;  %9829 = vmatprep.subr.bf16.mxu1 %v9828_v28  ;;  %v9846_v38 = vpack.c.bf16 %v6736_v14, %v6732_v3  ;;  %v6738_v28 = vld [vmem:[#allocation10 + $0x600] sm:$0xff]  ;;  %v9720_v16 = vpack.c.bf16 %v6743_v41, %v6739_v9  ;;  %v9848_v40 = vpack.c.bf16 %v6745_v29, %v6741_v52  ;;  %v6772_v41 = vld [vmem:[#allocation10 + $0x710] sm:$0xff]  ;;  %v6779_v29 = vld [vmem:[#allocation10 + $0x748] sm:$0xff] }
 0xb8e   : > { %v9722_v44 = vpack.c.bf16 %v6742_v0, %v6738_v28  ;;  %v6774_v3 = vld [vmem:[#allocation10 + $0x720] sm:$0xff]  ;;  %v6776_v52 = vld [vmem:[#allocation10 + $0x730] sm:$0xff]  ;;  %v6785_v28 = vld [vmem:[#allocation10 + $0x778] sm:$0xff] }
 0xb90   : > { %9703 = vmatpush1.bf16.msra.mxu0 %v9702_v49  ;;  %9831 = vmatpush1.bf16.msra.mxu1 %v9830_v47  ;;  %v6751_v49 = vld [vmem:[#allocation10 + $0x668] sm:$0xff]  ;;  %v6749_v47 = vld [vmem:[#allocation10 + $0x658] sm:$0xff] }
 0xb91   : > { %9705 = vmatprep.subr.bf16.mxu0 %v9704_v20  ;;  %9833 = vmatprep.subr.bf16.mxu1 %v9832_v60  ;;  %v9850_v20 = vpack.c.bf16 %v6744_v54, %v6740_v59  ;;  %v6746_v60 = vld [vmem:[#allocation10 + $0x640] sm:$0xff]  ;;  %v9724_v2 = vpack.c.bf16 %v6751_v49, %v6747_v62  ;;  %v9852_v25 = vpack.c.bf16 %v6753_v32, %v6749_v47  ;;  %v6780_v49 = vld [vmem:[#allocation10 + $0x750] sm:$0xff]  ;;  %v6787_v32 = vld [vmem:[#allocation10 + $0x788] sm:$0xff] }
 0xb92   : > { %v9726_v37 = vpack.c.bf16 %v6750_v21, %v6746_v60  ;;  %v6782_v59 = vld [vmem:[#allocation10 + $0x760] sm:$0xff]  ;;  %v6784_v47 = vld [vmem:[#allocation10 + $0x770] sm:$0xff]  ;;  %v6793_v60 = vld [vmem:[#allocation10 + $0x7b8] sm:$0xff] }
 0xb94   : > { %9707 = vmatpush1.bf16.msra.mxu0 %v9706_v36  ;;  %9835 = vmatpush1.bf16.msra.mxu1 %v9834_v24  ;;  %v6759_v36 = vld [vmem:[#allocation10 + $0x6a8] sm:$0xff]  ;;  %v6757_v24 = vld [vmem:[#allocation10 + $0x698] sm:$0xff] }
 0xb95   : > { %9709 = vmatprep.subr.bf16.mxu0 %v9708_v50  ;;  %9837 = vmatprep.subr.bf16.mxu1 %v9836_v57  ;;  %v9854_v50 = vpack.c.bf16 %v6752_v13, %v6748_v45  ;;  %v6754_v57 = vld [vmem:[#allocation10 + $0x680] sm:$0xff]  ;;  %v9728_v46 = vpack.c.bf16 %v6759_v36, %v6755_v42  ;;  %v9856_v1 = vpack.c.bf16 %v6761_v15, %v6757_v24  ;;  %v6788_v36 = vld [vmem:[#allocation10 + $0x790] sm:$0xff]  ;;  %v6795_v15 = vld [vmem:[#allocation10 + $0x7c8] sm:$0xff] }
 0xb96   : > { %v9730_v4 = vpack.c.bf16 %v6758_v27, %v6754_v57  ;;  %v6790_v45 = vld [vmem:[#allocation10 + $0x7a0] sm:$0xff]  ;;  %v6792_v24 = vld [vmem:[#allocation10 + $0x7b0] sm:$0xff]  ;;  %v6801_v57 = vld [vmem:[#allocation10 + $0x7f8] sm:$0xff] }
 0xb98   : > { %9711 = vmatpush1.bf16.msra.mxu0 %v9710_v35  ;;  %9839 = vmatpush1.bf16.msra.mxu1 %v9838_v5  ;;  %v6767_v35 = vld [vmem:[#allocation10 + $0x6e8] sm:$0xff]  ;;  %v6765_v5 = vld [vmem:[#allocation10 + $0x6d8] sm:$0xff] }
 0xb99   : > { %9713 = vmatprep.subr.bf16.mxu0 %v9712_v19  ;;  %9841 = vmatprep.subr.bf16.mxu1 %v9840_v56  ;;  %v9858_v19 = vpack.c.bf16 %v6760_v18, %v6756_v63  ;;  %v6762_v56 = vld [vmem:[#allocation10 + $0x6c0] sm:$0xff]  ;;  %v9732_v26 = vpack.c.bf16 %v6767_v35, %v6763_v10  ;;  %v9860_v53 = vpack.c.bf16 %v6769_v7, %v6765_v5  ;;  %v6796_v5 = vld [vmem:[#allocation10 + $0x7d0] sm:$0xff] }
 0xb9a   : > { %v9734_v51 = vpack.c.bf16 %v6766_v61, %v6762_v56  ;;  %v6798_v63 = vld [vmem:[#allocation10 + $0x7e0] sm:$0xff]  ;;  %v6249_v18 = vrot.slane %v13637_v58, %v13630_v34  ;;  %v6800_v7 = vld [vmem:[#allocation10 + $0x7f0] sm:$0xff]  ;;  %v7119_v56 = vld [vmem:[#allocation11 + $0x18] sm:$0xff] }
 0xb9b   : > { %v7123_v61 = vld [vmem:[#allocation11 + $0x38] sm:$0xff] }
 0xb9c   : > { %9715 = vmatpush1.bf16.msra.mxu0 %v9714_v43  ;;  %9843 = vmatpush1.bf16.msra.mxu1 %v9842_v30  ;;  %v6775_v43 = vld [vmem:[#allocation10 + $0x728] sm:$0xff]  ;;  %v6773_v30 = vld [vmem:[#allocation10 + $0x718] sm:$0xff] }
 0xb9d   : > { %9717 = vmatprep.subr.bf16.mxu0 %v9716_v6  ;;  %9845 = vmatprep.subr.bf16.mxu1 %v9844_v31  ;;  %v9862_v6 = vpack.c.bf16 %v6768_v17, %v6764_v23  ;;  %v6770_v31 = vld [vmem:[#allocation10 + $0x700] sm:$0xff]  ;;  %v9736_v14 = vpack.c.bf16 %v6775_v43, %v6771_v33  ;;  %v9864_v9 = vpack.c.bf16 %v6777_v22, %v6773_v30  ;;  %v7118_v30 = vld [vmem:[#allocation11 + $0x10] sm:$0xff] }
 0xb9e   : > { %v9738_v0 = vpack.c.bf16 %v6774_v3, %v6770_v31  ;;  %v7116_v23 = vld [vmem:[#allocation11] sm:$0xff]  ;;  %v10474_v33 = vadd.f32 %v13645_v8, %v6249_v18  ;;  %v10008_v43 = vpack.c.bf16 %v7123_v61, %v7119_v56  ;;  %v7122_v22 = vld [vmem:[#allocation11 + $0x30] sm:$0xff]  ;;  %v7127_v31 = vld [vmem:[#allocation11 + $0x58] sm:$0xff] }
 0xb9f   : > { %v7120_v17 = vld [vmem:[#allocation11 + $0x20] sm:$0xff]  ;;  %v7131_v3 = vld [vmem:[#allocation11 + $0x78] sm:$0xff]  ;;  %v7154_v56 = vld [vmem:[#allocation11 + $0x130] sm:$0xff] }
 0xba0   : > { %9719 = vmatpush1.bf16.msra.mxu0 %v9718_v48  ;;  %9847 = vmatpush1.bf16.msra.mxu1 %v9846_v38  ;;  %v6783_v48 = vld [vmem:[#allocation10 + $0x768] sm:$0xff]  ;;  %v6781_v38 = vld [vmem:[#allocation10 + $0x758] sm:$0xff] }
 0xba1   : > { %9721 = vmatprep.subr.bf16.mxu0 %v9720_v16  ;;  %9849 = vmatprep.subr.bf16.mxu1 %v9848_v40  ;;  %v9866_v16 = vpack.c.bf16 %v6776_v52, %v6772_v41  ;;  %v6778_v40 = vld [vmem:[#allocation10 + $0x740] sm:$0xff]  ;;  %v9740_v54 = vpack.c.bf16 %v6783_v48, %v6779_v29  ;;  %v9868_v62 = vpack.c.bf16 %v6785_v28, %v6781_v38  ;;  %v6544_v29 = vmax.f32 %v10474_v33, 0.0  ;;  %v7126_v38 = vld [vmem:[#allocation11 + $0x50] sm:$0xff]  ;;  %v7157_v61 = vld [vmem:[#allocation11 + $0x148] sm:$0xff] }
 0xba2   : > { %v9742_v21 = vpack.c.bf16 %v6782_v59, %v6778_v40  ;;  %v7124_v41 = vld [vmem:[#allocation11 + $0x40] sm:$0xff]  ;;  %v10012_v48 = vpack.c.bf16 %v7131_v3, %v7127_v31  ;;  %v7130_v28 = vld [vmem:[#allocation11 + $0x70] sm:$0xff]  ;;  %v7135_v40 = vld [vmem:[#allocation11 + $0x98] sm:$0xff] }
 0xba3   : > { %v7128_v52 = vld [vmem:[#allocation11 + $0x60] sm:$0xff]  ;;  %v7139_v59 = vld [vmem:[#allocation11 + $0xb8] sm:$0xff]  ;;  %v7165_v31 = vld [vmem:[#allocation11 + $0x188] sm:$0xff] }
 0xba4   : > { %9723 = vmatpush1.bf16.msra.mxu0 %v9722_v44  ;;  %9851 = vmatpush1.bf16.msra.mxu1 %v9850_v20  ;;  %v6791_v44 = vld [vmem:[#allocation10 + $0x7a8] sm:$0xff]  ;;  %v6789_v20 = vld [vmem:[#allocation10 + $0x798] sm:$0xff] }
 0xba5   : > { %9725 = vmatprep.subr.bf16.mxu0 %v9724_v2  ;;  %9853 = vmatprep.subr.bf16.mxu1 %v9852_v25  ;;  %v9870_v2 = vpack.c.bf16 %v6784_v47, %v6780_v49  ;;  %v6786_v25 = vld [vmem:[#allocation10 + $0x780] sm:$0xff]  ;;  %v9744_v13 = vpack.c.bf16 %v6791_v44, %v6787_v32  ;;  %v9872_v42 = vpack.c.bf16 %v6793_v60, %v6789_v20  ;;  %v7134_v20 = vld [vmem:[#allocation11 + $0x90] sm:$0xff]  ;;  %v7169_v3 = vld [vmem:[#allocation11 + $0x1a8] sm:$0xff] }
 0xba6   : > { %v9746_v27 = vpack.c.bf16 %v6790_v45, %v6786_v25  ;;  %v7132_v49 = vld [vmem:[#allocation11 + $0x80] sm:$0xff]  ;;  %v10016_v44 = vpack.c.bf16 %v7139_v59, %v7135_v40  ;;  %v7138_v60 = vld [vmem:[#allocation11 + $0xb0] sm:$0xff]  ;;  %v7143_v25 = vld [vmem:[#allocation11 + $0xd8] sm:$0xff] }
 0xba7   : > { %v7136_v47 = vld [vmem:[#allocation11 + $0xa0] sm:$0xff]  ;;  %v7147_v45 = vld [vmem:[#allocation11 + $0xf8] sm:$0xff]  ;;  %v7177_v40 = vld [vmem:[#allocation11 + $0x1e8] sm:$0xff] }
 0xba8   : > { %9727 = vmatpush1.bf16.msra.mxu0 %v9726_v37  ;;  %9855 = vmatpush1.bf16.msra.mxu1 %v9854_v50  ;;  %v6799_v37 = vld [vmem:[#allocation10 + $0x7e8] sm:$0xff]  ;;  %v6797_v50 = vld [vmem:[#allocation10 + $0x7d8] sm:$0xff] }
 0xba9   : > { %9729 = vmatprep.subr.bf16.mxu0 %v9728_v46  ;;  %9857 = vmatprep.subr.bf16.mxu1 %v9856_v1  ;;  %v9874_v46 = vpack.c.bf16 %v6792_v24, %v6788_v36  ;;  %v6794_v1 = vld [vmem:[#allocation10 + $0x7c0] sm:$0xff]  ;;  %v9748_v10 = vpack.c.bf16 %v6799_v37, %v6795_v15  ;;  %v9876_v35 = vpack.c.bf16 %v6801_v57, %v6797_v50  ;;  %v7142_v50 = vld [vmem:[#allocation11 + $0xd0] sm:$0xff]  ;;  %v7175_v59 = vld [vmem:[#allocation11 + $0x1d8] sm:$0xff] }
 0xbaa   : > { %v7140_v36 = vld [vmem:[#allocation11 + $0xc0] sm:$0xff]  ;;  %v10020_v37 = vpack.c.bf16 %v7147_v45, %v7143_v25  ;;  %v7146_v57 = vld [vmem:[#allocation11 + $0xf0] sm:$0xff]  ;;  %v7185_v25 = vld [vmem:[#allocation11 + $0x228] sm:$0xff] }
 0xbab   : > { %v7144_v24 = vld [vmem:[#allocation11 + $0xe0] sm:$0xff]  ;;  %v7183_v45 = vld [vmem:[#allocation11 + $0x218] sm:$0xff] }
 0xbac   : > { %9731 = vmatpush1.bf16.msra.mxu0 %v9730_v4  ;;  %9859 = vmatpush1.bf16.msra.mxu1 %v9858_v19  ;;  %v7117_v4 = vld [vmem:[#allocation11 + $0x8] sm:$0xff]  ;;  %v9894_v18 = vpack.c.bf16 %v7144_v24, %v7140_v36  ;;  %v7180_v24 = vld [vmem:[#allocation11 + $0x200] sm:$0xff] }
 0xbad   : > { %9733 = vmatprep.subr.bf16.mxu0 %v9732_v26  ;;  %9861 = vmatprep.subr.bf16.mxu1 %v9860_v53  ;;  %v7121_v19 = vld [vmem:[#allocation11 + $0x28] sm:$0xff]  ;;  %v9750_v26 = vpack.c.bf16 %v6798_v63, %v6794_v1  ;;  %v9878_v53 = vpack.c.bf16 %v6800_v7, %v6796_v5  ;;  %v7151_v1 = vld [vmem:[#allocation11 + $0x118] sm:$0xff]  ;;  %v7152_v5 = vld [vmem:[#allocation11 + $0x120] sm:$0xff] }
 0xbae   : > { %v9880_v58 = vpack.c.bf16 %v7121_v19, %v7117_v4  ;;  %v7155_v63 = vld [vmem:[#allocation11 + $0x138] sm:$0xff]  ;;  %v7150_v19 = vld [vmem:[#allocation11 + $0x110] sm:$0xff] }
 0xbaf   : > { %v10024_v4 = vpack.c.bf16 %v7155_v63, %v7151_v1  ;;  %v10026_v33 = vpack.c.bf16 %v7154_v56, %v7150_v19  ;;  %v7193_v1 = vld [vmem:[#allocation11 + $0x268] sm:$0xff]  ;;  %v7191_v63 = vld [vmem:[#allocation11 + $0x258] sm:$0xff]  ;;  %v7190_v56 = vld [vmem:[#allocation11 + $0x250] sm:$0xff] }
 0xbb0   : > { %9735 = vmatpush1.bf16.msra.mxu0 %v9734_v51  ;;  %9863 = vmatpush1.bf16.msra.mxu1 %v9862_v6  ;;  %v7125_v51 = vld [vmem:[#allocation11 + $0x48] sm:$0xff] }
 0xbb1   : > { %9737 = vmatprep.subr.bf16.mxu0 %v9736_v14  ;;  %9865 = vmatprep.subr.bf16.mxu1 %v9864_v9  ;;  %v7129_v6 = vld [vmem:[#allocation11 + $0x68] sm:$0xff]  ;;  %v9882_v14 = vpack.c.bf16 %v7120_v17, %v7116_v23  ;;  %v10010_v9 = vpack.c.bf16 %v7122_v22, %v7118_v30  ;;  %v7163_v23 = vld [vmem:[#allocation11 + $0x178] sm:$0xff] }
 0xbb2   : > { %v9884_v8 = vpack.c.bf16 %v7129_v6, %v7125_v51  ;;  %v7158_v51 = vld [vmem:[#allocation11 + $0x150] sm:$0xff] }
 0xbb3   : > { %v7162_v6 = vld [vmem:[#allocation11 + $0x170] sm:$0xff] }
 0xbb4   : > { %9739 = vmatpush1.bf16.msra.mxu0 %v9738_v0  ;;  %9867 = vmatpush1.bf16.msra.mxu1 %v9866_v16  ;;  %v7133_v0 = vld [vmem:[#allocation11 + $0x88] sm:$0xff] }
 0xbb5   : > { %9741 = vmatprep.subr.bf16.mxu0 %v9740_v54  ;;  %9869 = vmatprep.subr.bf16.mxu1 %v9868_v62  ;;  %v7137_v16 = vld [vmem:[#allocation11 + $0xa8] sm:$0xff]  ;;  %v9886_v54 = vpack.c.bf16 %v7128_v52, %v7124_v41  ;;  %v10014_v62 = vpack.c.bf16 %v7130_v28, %v7126_v38  ;;  %v10030_v52 = vpack.c.bf16 %v7162_v6, %v7158_v51  ;;  %v7166_v28 = vld [vmem:[#allocation11 + $0x190] sm:$0xff] }
 0xbb6   : > { %v9888_v32 = vpack.c.bf16 %v7137_v16, %v7133_v0  ;;  %v7170_v0 = vld [vmem:[#allocation11 + $0x1b0] sm:$0xff]  ;;  %v7173_v16 = vld [vmem:[#allocation11 + $0x1c8] sm:$0xff] }
 0xbb7   : > { %v7198_v6 = vld [vmem:[#allocation11 + $0x290] sm:$0xff] }
 0xbb8   : > { %9743 = vmatpush1.bf16.msra.mxu0 %v9742_v21  ;;  %9871 = vmatpush1.bf16.msra.mxu1 %v9870_v2  ;;  %v7141_v21 = vld [vmem:[#allocation11 + $0xc8] sm:$0xff] }
 0xbb9   : > { %9745 = vmatprep.subr.bf16.mxu0 %v9744_v13  ;;  %9873 = vmatprep.subr.bf16.mxu1 %v9872_v42  ;;  %v7145_v2 = vld [vmem:[#allocation11 + $0xe8] sm:$0xff]  ;;  %v9890_v13 = vpack.c.bf16 %v7136_v47, %v7132_v49  ;;  %v10018_v42 = vpack.c.bf16 %v7138_v60, %v7134_v20  ;;  %v10034_v49 = vpack.c.bf16 %v7170_v0, %v7166_v28  ;;  %v7172_v47 = vld [vmem:[#allocation11 + $0x1c0] sm:$0xff]  ;;  %v7174_v60 = vld [vmem:[#allocation11 + $0x1d0] sm:$0xff] }
 0xbba   : > { %v9892_v15 = vpack.c.bf16 %v7145_v2, %v7141_v21  ;;  %v7178_v21 = vld [vmem:[#allocation11 + $0x1f0] sm:$0xff]  ;;  %v7181_v2 = vld [vmem:[#allocation11 + $0x208] sm:$0xff] }
 0xbbb   : > { %v10038_v36 = vpack.c.bf16 %v7178_v21, %v7174_v60  ;;  %v7206_v0 = vld [vmem:[#allocation11 + $0x2d0] sm:$0xff]  ;;  %v7216_v60 = vld [vmem:[#allocation11 + $0x320] sm:$0xff] }
 0xbbc   : > { %9747 = vmatpush1.bf16.msra.mxu0 %v9746_v27  ;;  %9875 = vmatpush1.bf16.msra.mxu1 %v9874_v46  ;;  %v7149_v27 = vld [vmem:[#allocation11 + $0x108] sm:$0xff]  ;;  %v7214_v21 = vld [vmem:[#allocation11 + $0x310] sm:$0xff] }
 0xbbd   : > { %9749 = vmatprep.subr.bf16.mxu0 %v9748_v10  ;;  %9877 = vmatprep.subr.bf16.mxu1 %v9876_v35  ;;  %v7153_v46 = vld [vmem:[#allocation11 + $0x128] sm:$0xff]  ;;  %v10022_v10 = vpack.c.bf16 %v7146_v57, %v7142_v50  ;;  %v7148_v35 = vld [vmem:[#allocation11 + $0x100] sm:$0xff]  ;;  %v7182_v57 = vld [vmem:[#allocation11 + $0x210] sm:$0xff] }
 0xbbe   : > { %v9896_v7 = vpack.c.bf16 %v7153_v46, %v7149_v27  ;;  %v9898_v17 = vpack.c.bf16 %v7152_v5, %v7148_v35  ;;  %v7186_v27 = vld [vmem:[#allocation11 + $0x230] sm:$0xff]  ;;  %v7189_v46 = vld [vmem:[#allocation11 + $0x248] sm:$0xff]  ;;  %v7188_v5 = vld [vmem:[#allocation11 + $0x240] sm:$0xff] }
 0xbbf   : > { %v10042_v35 = vpack.c.bf16 %v7186_v27, %v7182_v57 }
 0xbc0   : > { %9751 = vmatpush1.bf16.msra.mxu0 %v9750_v26  ;;  %9879 = vmatpush1.bf16.msra.mxu1 %v9878_v53  ;;  %v7161_v26 = vld [vmem:[#allocation11 + $0x168] sm:$0xff]  ;;  %v7159_v53 = vld [vmem:[#allocation11 + $0x158] sm:$0xff] }
 0xbc1   : > { %9881 = vmatprep.subr.bf16.mxu0 %v9880_v58  ;;  %10009 = vmatprep.subr.bf16.mxu1 %v10008_v43  ;;  %v7156_v58 = vld [vmem:[#allocation11 + $0x140] sm:$0xff]  ;;  %v9900_v30 = vpack.c.bf16 %v7161_v26, %v7157_v61  ;;  %v10028_v22 = vpack.c.bf16 %v7163_v23, %v7159_v53  ;;  %v7194_v61 = vld [vmem:[#allocation11 + $0x270] sm:$0xff]  ;;  %v7197_v26 = vld [vmem:[#allocation11 + $0x288] sm:$0xff] }
 0xbc2   : > { %v7160_v43 = vld [vmem:[#allocation11 + $0x160] sm:$0xff]  ;;  %v7201_v53 = vld [vmem:[#allocation11 + $0x2a8] sm:$0xff]  ;;  %v7199_v23 = vld [vmem:[#allocation11 + $0x298] sm:$0xff] }
 0xbc3   : > { %6938 = vmatmul.mubr.f32.vlgmr.msra.gmra.mrb[22].mxu0 %v6544_v29  ;;  %7080 = vmatmul.mubr.f32.vlgmr.msra.gmra.mrb[22].mxu1 %v6544_v29  ;;  %v9902_v41 = vpack.c.bf16 %v7160_v43, %v7156_v58  ;;  %v7164_v29 = vld [vmem:[#allocation11 + $0x180] sm:$0xff]  ;;  %v10046_v58 = vpack.c.bf16 %v7194_v61, %v7190_v56 }
 0xbc4   : > { %9883 = vmatpush1.bf16.msra.mxu0 %v9882_v14  ;;  %10011 = vmatpush1.bf16.msra.mxu1 %v10010_v9  ;;  %v7167_v14 = vld [vmem:[#allocation11 + $0x198] sm:$0xff]  ;;  %v7196_v43 = vld [vmem:[#allocation11 + $0x280] sm:$0xff] }
 0xbc5   : > { %9885 = vmatprep.subr.bf16.mxu0 %v9884_v8  ;;  %10013 = vmatprep.subr.bf16.mxu1 %v10012_v48  ;;  %v7171_v9 = vld [vmem:[#allocation11 + $0x1b8] sm:$0xff]  ;;  %v7168_v8 = vld [vmem:[#allocation11 + $0x1a0] sm:$0xff]  ;;  %v9904_v48 = vpack.c.bf16 %v7169_v3, %v7165_v31  ;;  %v7202_v31 = vld [vmem:[#allocation11 + $0x2b0] sm:$0xff] }
 0xbc6   : > { %v10032_v38 = vpack.c.bf16 %v7171_v9, %v7167_v14  ;;  %v7205_v3 = vld [vmem:[#allocation11 + $0x2c8] sm:$0xff]  ;;  %v7207_v9 = vld [vmem:[#allocation11 + $0x2d8] sm:$0xff] }
 0xbc7   : > { %v7209_v14 = vld [vmem:[#allocation11 + $0x2e8] sm:$0xff] }
 0xbc8   : > { %9887 = vmatpush1.bf16.msra.mxu0 %v9886_v54  ;;  %10015 = vmatpush1.bf16.msra.mxu1 %v10014_v62  ;;  %v7179_v54 = vld [vmem:[#allocation11 + $0x1f8] sm:$0xff]  ;;  %v9906_v62 = vpack.c.bf16 %v7168_v8, %v7164_v29  ;;  %v10050_v29 = vpack.c.bf16 %v7202_v31, %v7198_v6  ;;  %v7204_v8 = vld [vmem:[#allocation11 + $0x2c0] sm:$0xff] }
 0xbc9   : > { %9889 = vmatprep.subr.bf16.mxu0 %v9888_v32  ;;  %10017 = vmatprep.subr.bf16.mxu1 %v10016_v44  ;;  %v7176_v32 = vld [vmem:[#allocation11 + $0x1e0] sm:$0xff]  ;;  %v9908_v44 = vpack.c.bf16 %v7177_v40, %v7173_v16  ;;  %v10036_v20 = vpack.c.bf16 %v7179_v54, %v7175_v59  ;;  %v7210_v16 = vld [vmem:[#allocation11 + $0x2f0] sm:$0xff]  ;;  %v7213_v40 = vld [vmem:[#allocation11 + $0x308] sm:$0xff] }
 0xbca   : > { %v7217_v59 = vld [vmem:[#allocation11 + $0x328] sm:$0xff]  ;;  %v7215_v54 = vld [vmem:[#allocation11 + $0x318] sm:$0xff] }
 0xbcc   : > { %9891 = vmatpush1.bf16.msra.mxu0 %v9890_v13  ;;  %10019 = vmatpush1.bf16.msra.mxu1 %v10018_v42  ;;  %v7187_v13 = vld [vmem:[#allocation11 + $0x238] sm:$0xff]  ;;  %v9910_v42 = vpack.c.bf16 %v7176_v32, %v7172_v47  ;;  %v10054_v47 = vpack.c.bf16 %v7210_v16, %v7206_v0  ;;  %v7212_v32 = vld [vmem:[#allocation11 + $0x300] sm:$0xff] }
 0xbcd   : > { %9893 = vmatprep.subr.bf16.mxu0 %v9892_v15  ;;  %10021 = vmatprep.subr.bf16.mxu1 %v10020_v37  ;;  %v7184_v15 = vld [vmem:[#allocation11 + $0x220] sm:$0xff]  ;;  %v9912_v37 = vpack.c.bf16 %v7185_v25, %v7181_v2  ;;  %v10040_v50 = vpack.c.bf16 %v7187_v13, %v7183_v45  ;;  %v7218_v2 = vld [vmem:[#allocation11 + $0x330] sm:$0xff]  ;;  %v9930_v25 = vpack.c.bf16 %v7216_v60, %v7212_v32  ;;  %v7221_v13 = vld [vmem:[#allocation11 + $0x348] sm:$0xff] }
 0xbce   : > { %v10058_v45 = vpack.c.bf16 %v7218_v2, %v7214_v21  ;;  %v7246_v60 = vld [vmem:[#allocation11 + $0x410] sm:$0xff]  ;;  %v11084_v2 = vld [vmem:[#allocation4] sm:$0xf] }
 0xbcf   : > { %v7250_v21 = vld [vmem:[#allocation11 + $0x430] sm:$0xff] }
 0xbd0   : > { %9895 = vmatpush1.bf16.msra.mxu0 %v9894_v18  ;;  %10023 = vmatpush1.bf16.msra.mxu1 %v10022_v10  ;;  %v7195_v18 = vld [vmem:[#allocation11 + $0x278] sm:$0xff]  ;;  %v9914_v10 = vpack.c.bf16 %v7184_v15, %v7180_v24 }
 0xbd1   : > { %9897 = vmatprep.subr.bf16.mxu0 %v9896_v7  ;;  %10025 = vmatprep.subr.bf16.mxu1 %v10024_v4  ;;  %v7192_v7 = vld [vmem:[#allocation11 + $0x260] sm:$0xff]  ;;  %v9916_v4 = vpack.c.bf16 %v7193_v1, %v7189_v46  ;;  %v10044_v19 = vpack.c.bf16 %v7195_v18, %v7191_v63  ;;  %v7227_v15 = vld [vmem:[#allocation11 + $0x378] sm:$0xff]  ;;  %v7222_v46 = vld [vmem:[#allocation11 + $0x350] sm:$0xff] }
 0xbd2   : > { %v7226_v1 = vld [vmem:[#allocation11 + $0x370] sm:$0xff]  ;;  %v7229_v18 = vld [vmem:[#allocation11 + $0x388] sm:$0xff] }
 0xbd3   : > { %v10062_v63 = vpack.c.bf16 %v7226_v1, %v7222_v46  ;;  %v7254_v46 = vld [vmem:[#allocation11 + $0x450] sm:$0xff] }
 0xbd4   : > { %9899 = vmatpush1.bf16.msra.mxu0 %v9898_v17  ;;  %10027 = vmatpush1.bf16.msra.mxu1 %v10026_v33  ;;  %v7203_v17 = vld [vmem:[#allocation11 + $0x2b8] sm:$0xff]  ;;  %v9918_v33 = vpack.c.bf16 %v7192_v7, %v7188_v5  ;;  %v7258_v1 = vld [vmem:[#allocation11 + $0x470] sm:$0xff] }
 0xbd5   : > { %9901 = vmatprep.subr.bf16.mxu0 %v9900_v30  ;;  %10029 = vmatprep.subr.bf16.mxu1 %v10028_v22  ;;  %v7200_v30 = vld [vmem:[#allocation11 + $0x2a0] sm:$0xff]  ;;  %v9920_v22 = vpack.c.bf16 %v7201_v53, %v7197_v26  ;;  %v10048_v51 = vpack.c.bf16 %v7203_v17, %v7199_v23  ;;  %v7235_v7 = vld [vmem:[#allocation11 + $0x3b8] sm:$0xff]  ;;  %v7230_v26 = vld [vmem:[#allocation11 + $0x390] sm:$0xff] }
 0xbd6   : > { %v7234_v53 = vld [vmem:[#allocation11 + $0x3b0] sm:$0xff]  ;;  %v7237_v17 = vld [vmem:[#allocation11 + $0x3c8] sm:$0xff] }
 0xbd7   : > { %v10066_v23 = vpack.c.bf16 %v7234_v53, %v7230_v26  ;;  %v7264_v26 = vld [vmem:[#allocation11 + $0x4a0] sm:$0xff] }
 0xbd8   : > { %9903 = vmatpush1.bf16.msra.mxu0 %v9902_v41  ;;  %10031 = vmatpush1.bf16.msra.mxu1 %v10030_v52  ;;  %v7211_v41 = vld [vmem:[#allocation11 + $0x2f8] sm:$0xff]  ;;  %v9922_v52 = vpack.c.bf16 %v7200_v30, %v7196_v43 }
 0xbd9   : > { %9905 = vmatprep.subr.bf16.mxu0 %v9904_v48  ;;  %10033 = vmatprep.subr.bf16.mxu1 %v10032_v38  ;;  %v7208_v48 = vld [vmem:[#allocation11 + $0x2e0] sm:$0xff]  ;;  %v9924_v38 = vpack.c.bf16 %v7209_v14, %v7205_v3  ;;  %v10052_v28 = vpack.c.bf16 %v7211_v41, %v7207_v9  ;;  %v7243_v30 = vld [vmem:[#allocation11 + $0x3f8] sm:$0xff]  ;;  %v7238_v3 = vld [vmem:[#allocation11 + $0x3d0] sm:$0xff] }
 0xbda   : > { %v7242_v14 = vld [vmem:[#allocation11 + $0x3f0] sm:$0xff]  ;;  %v7245_v41 = vld [vmem:[#allocation11 + $0x408] sm:$0xff] }
 0xbdb   : > { %v10070_v9 = vpack.c.bf16 %v7242_v14, %v7238_v3  ;;  %v7272_v3 = vld [vmem:[#allocation11 + $0x4e0] sm:$0xff] }
 0xbdc   : > { %9907 = vmatpush1.bf16.msra.mxu0 %v9906_v62  ;;  %10035 = vmatpush1.bf16.msra.mxu1 %v10034_v49  ;;  %v7219_v62 = vld [vmem:[#allocation11 + $0x338] sm:$0xff]  ;;  %v9926_v49 = vpack.c.bf16 %v7208_v48, %v7204_v8 }
 0xbdd   : > { %9909 = vmatprep.subr.bf16.mxu0 %v9908_v44  ;;  %10037 = vmatprep.subr.bf16.mxu1 %v10036_v20  ;;  %v9928_v44 = vpack.c.bf16 %v7217_v59, %v7213_v40  ;;  %v10056_v20 = vpack.c.bf16 %v7219_v62, %v7215_v54  ;;  %v7251_v48 = vld [vmem:[#allocation11 + $0x438] sm:$0xff] }
 0xbe0   : > { %9911 = vmatpush1.bf16.msra.mxu0 %v9910_v42  ;;  %10039 = vmatpush1.bf16.msra.mxu1 %v10038_v36  ;;  %v7225_v42 = vld [vmem:[#allocation11 + $0x368] sm:$0xff]  ;;  %v7223_v36 = vld [vmem:[#allocation11 + $0x358] sm:$0xff] }
 0xbe1   : > { %9913 = vmatprep.subr.bf16.mxu0 %v9912_v37  ;;  %10041 = vmatprep.subr.bf16.mxu1 %v10040_v50  ;;  %v9932_v24 = vpack.c.bf16 %v7225_v42, %v7221_v13  ;;  %v7220_v37 = vld [vmem:[#allocation11 + $0x340] sm:$0xff]  ;;  %v10060_v57 = vpack.c.bf16 %v7227_v15, %v7223_v36  ;;  %v7257_v13 = vld [vmem:[#allocation11 + $0x468] sm:$0xff]  ;;  %v7255_v42 = vld [vmem:[#allocation11 + $0x458] sm:$0xff] }
 0xbe2   : > { %v7224_v50 = vld [vmem:[#allocation11 + $0x360] sm:$0xff]  ;;  %v7259_v36 = vld [vmem:[#allocation11 + $0x478] sm:$0xff] }
 0xbe3   : > { %v9934_v27 = vpack.c.bf16 %v7224_v50, %v7220_v37  ;;  %v10074_v50 = vpack.c.bf16 %v7250_v21, %v7246_v60 }
 0xbe4   : > { %9915 = vmatpush1.bf16.msra.mxu0 %v9914_v10  ;;  %10043 = vmatpush1.bf16.msra.mxu1 %v10042_v35  ;;  %v7233_v10 = vld [vmem:[#allocation11 + $0x3a8] sm:$0xff]  ;;  %v7231_v35 = vld [vmem:[#allocation11 + $0x398] sm:$0xff] }
 0xbe5   : > { %9917 = vmatprep.subr.bf16.mxu0 %v9916_v4  ;;  %10045 = vmatprep.subr.bf16.mxu1 %v10044_v19  ;;  %v9936_v5 = vpack.c.bf16 %v7233_v10, %v7229_v18  ;;  %v7228_v4 = vld [vmem:[#allocation11 + $0x380] sm:$0xff]  ;;  %v10064_v56 = vpack.c.bf16 %v7235_v7, %v7231_v35  ;;  %v10076_v10 = vpack.c.bf16 %v7259_v36, %v7255_v42  ;;  %v7265_v35 = vld [vmem:[#allocation11 + $0x4a8] sm:$0xff]  ;;  %v7267_v7 = vld [vmem:[#allocation11 + $0x4b8] sm:$0xff] }
 0xbe6   : > { %v7232_v19 = vld [vmem:[#allocation11 + $0x3a0] sm:$0xff]  ;;  %v7286_v36 = vld [vmem:[#allocation11 + $0x550] sm:$0xff] }
 0xbe7   : > { %v9938_v61 = vpack.c.bf16 %v7232_v19, %v7228_v4 }
 0xbe8   : > { %9919 = vmatpush1.bf16.msra.mxu0 %v9918_v33  ;;  %10047 = vmatpush1.bf16.msra.mxu1 %v10046_v58  ;;  %v7241_v33 = vld [vmem:[#allocation11 + $0x3e8] sm:$0xff]  ;;  %v7239_v58 = vld [vmem:[#allocation11 + $0x3d8] sm:$0xff] }
 0xbe9   : > { %9921 = vmatprep.subr.bf16.mxu0 %v9920_v22  ;;  %10049 = vmatprep.subr.bf16.mxu1 %v10048_v51  ;;  %v9940_v43 = vpack.c.bf16 %v7241_v33, %v7237_v17  ;;  %v7236_v22 = vld [vmem:[#allocation11 + $0x3c0] sm:$0xff]  ;;  %v10068_v6 = vpack.c.bf16 %v7243_v30, %v7239_v58  ;;  %v7262_v17 = vld [vmem:[#allocation11 + $0x490] sm:$0xff]  ;;  %v7269_v58 = vld [vmem:[#allocation11 + $0x4c8] sm:$0xff] }
 0xbea   : > { %v7240_v51 = vld [vmem:[#allocation11 + $0x3e0] sm:$0xff]  ;;  %v7266_v33 = vld [vmem:[#allocation11 + $0x4b0] sm:$0xff]  ;;  %v7271_v30 = vld [vmem:[#allocation11 + $0x4d8] sm:$0xff] }
 0xbeb   : > { %v9942_v31 = vpack.c.bf16 %v7240_v51, %v7236_v22  ;;  %v7275_v22 = vld [vmem:[#allocation11 + $0x4f8] sm:$0xff] }
 0xbec   : > { %9923 = vmatpush1.bf16.msra.mxu0 %v9922_v52  ;;  %10051 = vmatpush1.bf16.msra.mxu1 %v10050_v29  ;;  %v7249_v52 = vld [vmem:[#allocation11 + $0x428] sm:$0xff]  ;;  %v7247_v29 = vld [vmem:[#allocation11 + $0x418] sm:$0xff] }
 0xbed   : > { %9925 = vmatprep.subr.bf16.mxu0 %v9924_v38  ;;  %10053 = vmatprep.subr.bf16.mxu1 %v10052_v28  ;;  %v9944_v8 = vpack.c.bf16 %v7249_v52, %v7245_v41  ;;  %v10072_v38 = vpack.c.bf16 %v7251_v48, %v7247_v29  ;;  %v7270_v41 = vld [vmem:[#allocation11 + $0x4d0] sm:$0xff]  ;;  %v7277_v29 = vld [vmem:[#allocation11 + $0x508] sm:$0xff]  ;;  %v7279_v48 = vld [vmem:[#allocation11 + $0x518] sm:$0xff] }
 0xbee   : > { %v7274_v52 = vld [vmem:[#allocation11 + $0x4f0] sm:$0xff] }
 0xbf0   : > { %9927 = vmatpush1.bf16.msra.mxu0 %v9926_v49  ;;  %10055 = vmatpush1.bf16.msra.mxu1 %v10054_v47 }
 0xbf1   : > { %9929 = vmatprep.subr.bf16.mxu0 %v9928_v44  ;;  %10057 = vmatprep.subr.bf16.mxu1 %v10056_v20  ;;  %v7244_v44 = vld [vmem:[#allocation11 + $0x400] sm:$0xff] }
 0xbf2   : > { %v7248_v20 = vld [vmem:[#allocation11 + $0x420] sm:$0xff] }
 0xbf3   : > { %v9946_v37 = vpack.c.bf16 %v7248_v20, %v7244_v44  ;;  %v7287_v44 = vld [vmem:[#allocation11 + $0x558] sm:$0xff] }
 0xbf4   : > { %9931 = vmatpush1.bf16.msra.mxu0 %v9930_v25  ;;  %10059 = vmatpush1.bf16.msra.mxu1 %v10058_v45  ;;  %v7253_v45 = vld [vmem:[#allocation11 + $0x448] sm:$0xff]  ;;  %v7291_v20 = vld [vmem:[#allocation11 + $0x578] sm:$0xff] }
 0xbf5   : > { %9933 = vmatprep.subr.bf16.mxu0 %v9932_v24  ;;  %10061 = vmatprep.subr.bf16.mxu1 %v10060_v57  ;;  %v7252_v57 = vld [vmem:[#allocation11 + $0x440] sm:$0xff]  ;;  %v9948_v18 = vpack.c.bf16 %v7257_v13, %v7253_v45  ;;  %v10092_v42 = vpack.c.bf16 %v7291_v20, %v7287_v44  ;;  %v7325_v44 = vld [vmem:[#allocation11 + $0x688] sm:$0xff] }
 0xbf6   : > { %v7288_v45 = vld [vmem:[#allocation11 + $0x560] sm:$0xff]  ;;  %v7329_v20 = vld [vmem:[#allocation11 + $0x6a8] sm:$0xff] }
 0xbf8   : > { %9935 = vmatpush1.bf16.msra.mxu0 %v9934_v27  ;;  %10063 = vmatpush1.bf16.msra.mxu1 %v10062_v63  ;;  %v7256_v27 = vld [vmem:[#allocation11 + $0x460] sm:$0xff]  ;;  %v7261_v63 = vld [vmem:[#allocation11 + $0x488] sm:$0xff] }
 0xbf9   : > { %9937 = vmatprep.subr.bf16.mxu0 %v9936_v5  ;;  %10065 = vmatprep.subr.bf16.mxu1 %v10064_v56  ;;  %v7263_v5 = vld [vmem:[#allocation11 + $0x498] sm:$0xff]  ;;  %v9950_v19 = vpack.c.bf16 %v7256_v27, %v7252_v57  ;;  %v10078_v56 = vpack.c.bf16 %v7258_v1, %v7254_v46  ;;  %v9952_v53 = vpack.c.bf16 %v7265_v35, %v7261_v63  ;;  %v7292_v1 = vld [vmem:[#allocation11 + $0x580] sm:$0xff]  ;;  %v7294_v35 = vld [vmem:[#allocation11 + $0x590] sm:$0xff] }
 0xbfa   : > { %v7299_v57 = vld [vmem:[#allocation11 + $0x5b8] sm:$0xff]  ;;  %v7296_v63 = vld [vmem:[#allocation11 + $0x5a0] sm:$0xff] }
 0xbfc   : > { %9939 = vmatpush1.bf16.msra.mxu0 %v9938_v61  ;;  %10067 = vmatpush1.bf16.msra.mxu1 %v10066_v23  ;;  %v7260_v61 = vld [vmem:[#allocation11 + $0x480] sm:$0xff]  ;;  %v10080_v23 = vpack.c.bf16 %v7267_v7, %v7263_v5  ;;  %v7298_v5 = vld [vmem:[#allocation11 + $0x5b0] sm:$0xff]  ;;  %v7301_v7 = vld [vmem:[#allocation11 + $0x5c8] sm:$0xff] }
 0xbfd   : > { %9941 = vmatprep.subr.bf16.mxu0 %v9940_v43  ;;  %10069 = vmatprep.subr.bf16.mxu1 %v10068_v6  ;;  %v7273_v43 = vld [vmem:[#allocation11 + $0x4e8] sm:$0xff]  ;;  %v9954_v51 = vpack.c.bf16 %v7264_v26, %v7260_v61  ;;  %v10082_v6 = vpack.c.bf16 %v7266_v33, %v7262_v17  ;;  %v9970_v61 = vpack.c.bf16 %v7296_v63, %v7292_v1 }
 0xbfe   : > { %v9956_v14 = vpack.c.bf16 %v7273_v43, %v7269_v58  ;;  %v10098_v26 = vpack.c.bf16 %v7298_v5, %v7294_v35  ;;  %v7302_v58 = vld [vmem:[#allocation11 + $0x5d0] sm:$0xff] }
 0xbff   : > { %v7306_v43 = vld [vmem:[#allocation11 + $0x5f0] sm:$0xff] }
 0xc00   : > { %9943 = vmatpush1.bf16.msra.mxu0 %v9942_v31  ;;  %10071 = vmatpush1.bf16.msra.mxu1 %v10070_v9  ;;  %v7268_v31 = vld [vmem:[#allocation11 + $0x4c0] sm:$0xff]  ;;  %v10084_v9 = vpack.c.bf16 %v7275_v22, %v7271_v30  ;;  %v7309_v30 = vld [vmem:[#allocation11 + $0x608] sm:$0xff] }
 0xc01   : > { %9945 = vmatprep.subr.bf16.mxu0 %v9944_v8  ;;  %10073 = vmatprep.subr.bf16.mxu1 %v10072_v38  ;;  %v7281_v8 = vld [vmem:[#allocation11 + $0x528] sm:$0xff]  ;;  %v7283_v38 = vld [vmem:[#allocation11 + $0x538] sm:$0xff] }
 0xc02   : > { %v7313_v22 = vld [vmem:[#allocation11 + $0x628] sm:$0xff] }
 0xc96   : > { %v6939_v28 = vpop.f32.mrb[22].mxu0  ;;  %v7081_v0 = vpop.f32.mrb[22].mxu1 }
 0xc97   : > { %v6941_v16 = vpop.f32.mrb[23].mxu0  ;;  %v7083_v40 = vpop.f32.mrb[23].mxu1 }
 0xc98   : > { %v7090_v59 = vcombine.low %v6939_v28, %v6941_v16  ;;  %v7091_v54 = vcombine.low %v7081_v0, %v7083_v40  ;;  %v9958_v28 = vpack.c.bf16 %v7272_v3, %v7268_v31  ;;  %v10086_v0 = vpack.c.bf16 %v7274_v52, %v7270_v41  ;;  %v7276_v16 = vld [vmem:[#allocation11 + $0x500] sm:$0xff] }
 0xc99   : > { %v7280_v40 = vld [vmem:[#allocation11 + $0x520] sm:$0xff]  ;;  %v10102_v3 = vpack.c.bf16 %v7306_v43, %v7302_v58  ;;  %v9976_v41 = vpack.c.bf16 %v7313_v22, %v7309_v30  ;;  %v7342_v30 = vld [vmem:[#allocation11 + $0x710] sm:$0xff] }
 0xc9a   : > { %v7098_v62 = vrot.slane %v7090_v59, %v13591_v55  ;;  %v7105_v49 = vrot.slane %v7091_v54, %v13591_v55  ;;  %v9960_v59 = vpack.c.bf16 %v7281_v8, %v7277_v29  ;;  %v10088_v54 = vpack.c.bf16 %v7283_v38, %v7279_v48  ;;  %v7310_v29 = vld [vmem:[#allocation11 + $0x610] sm:$0xff]  ;;  %v7317_v48 = vld [vmem:[#allocation11 + $0x648] sm:$0xff] }
 0xc9b   : > { %v9962_v60 = vpack.c.bf16 %v7280_v40, %v7276_v16  ;;  %v7314_v8 = vld [vmem:[#allocation11 + $0x630] sm:$0xff]  ;;  %v7321_v38 = vld [vmem:[#allocation11 + $0x668] sm:$0xff] }
 0xc9c   : > { %v7106_v47 = vcombine.low %v7098_v62, %v7105_v49  ;;  %v7278_v62 = vld [vmem:[#allocation11 + $0x510] sm:$0xff]  ;;  %v10106_v40 = vpack.c.bf16 %v7314_v8, %v7310_v29 }
 0xc9d   : > { %v7282_v49 = vld [vmem:[#allocation11 + $0x530] sm:$0xff] }
 0xc9e   : > { %v7113_v32 = vrot.slane %v7106_v47, %v13591_v55  ;;  %v7285_v47 = vld [vmem:[#allocation11 + $0x548] sm:$0xff]  ;;  %v10090_v21 = vpack.c.bf16 %v7282_v49, %v7278_v62  ;;  %v9980_v62 = vpack.c.bf16 %v7321_v38, %v7317_v48  ;;  %v7346_v22 = vld [vmem:[#allocation11 + $0x730] sm:$0xff] }
 0xc9f   : > { %v7350_v48 = vld [vmem:[#allocation11 + $0x750] sm:$0xff] }
 0xca0   : > { %v13653_v25 = vsub.f32 %v11084_v2, %v7113_v32  ;;  %v7289_v32 = vld [vmem:[#allocation11 + $0x568] sm:$0xff]  ;;  %v7284_v2 = vld [vmem:[#allocation11 + $0x540] sm:$0xff]  ;;  %v7354_v38 = vld [vmem:[#allocation11 + $0x770] sm:$0xff] }
 0xca1   : > { %v9964_v13 = vpack.c.bf16 %v7289_v32, %v7285_v47  ;;  %v9966_v27 = vpack.c.bf16 %v7288_v45, %v7284_v2  ;;  %v7318_v47 = vld [vmem:[#allocation11 + $0x650] sm:$0xff] }
 0xca2   : > { %v7381_v24 = vrot.slane %v13653_v25, %v13613_v11  ;;  %v7377_v15 = vrot.slane %v13653_v25, %v13616_v39  ;;  %v7389_v4 = vrot.slane %v13653_v25, %v13621_v12  ;;  %v7322_v32 = vld [vmem:[#allocation11 + $0x670] sm:$0xff] }
 0xca3   : > { %v10110_v45 = vpack.c.bf16 %v7322_v32, %v7318_v47 }
 0xca4   : > { %7479 = vmatprep.mubr.f32.mxu0 %v7381_v24  ;;  %7621 = vmatprep.mubr.f32.mxu1 %v7381_v24  ;;  %v7290_v24 = vld [vmem:[#allocation11 + $0x570] sm:$0xff] }
 0xca5   : > { %7480 = vmatmul.mubr.f32.vlgmr.msra.gmra.mrb[24].mxu0 %v7377_v15  ;;  %7622 = vmatmul.mubr.f32.vlgmr.msra.gmra.mrb[24].mxu1 %v7377_v15  ;;  %v7293_v15 = vld [vmem:[#allocation11 + $0x588] sm:$0xff]  ;;  %v10094_v46 = vpack.c.bf16 %v7290_v24, %v7286_v36  ;;  %v9984_v36 = vpack.c.bf16 %v7329_v20, %v7325_v44  ;;  %v7358_v44 = vld [vmem:[#allocation11 + $0x790] sm:$0xff] }
 0xca6   : > { %9947 = vmatpush1.bf16.msra.mxu0 %v9946_v37  ;;  %10075 = vmatpush1.bf16.msra.mxu1 %v10074_v50  ;;  %v7297_v37 = vld [vmem:[#allocation11 + $0x5a8] sm:$0xff]  ;;  %v7295_v50 = vld [vmem:[#allocation11 + $0x598] sm:$0xff]  ;;  %v7362_v20 = vld [vmem:[#allocation11 + $0x7b0] sm:$0xff] }
 0xca7   : > { %7550 = vmatprep.mubr.f32.mxu0 %v7389_v4  ;;  %7692 = vmatprep.mubr.f32.mxu1 %v7389_v4  ;;  %v7305_v4 = vld [vmem:[#allocation11 + $0x5e8] sm:$0xff] }
 0xca8   : > { %9949 = vmatprep.subr.bf16.mxu0 %v9948_v18  ;;  %10077 = vmatprep.subr.bf16.mxu1 %v10076_v10  ;;  %v9968_v18 = vpack.c.bf16 %v7297_v37, %v7293_v15  ;;  %v10096_v10 = vpack.c.bf16 %v7299_v57, %v7295_v50  ;;  %v9972_v17 = vpack.c.bf16 %v7305_v4, %v7301_v7  ;;  %v7326_v15 = vld [vmem:[#allocation11 + $0x690] sm:$0xff]  ;;  %v7333_v50 = vld [vmem:[#allocation11 + $0x6c8] sm:$0xff] }
 0xca9   : > { %v7330_v37 = vld [vmem:[#allocation11 + $0x6b0] sm:$0xff]  ;;  %v7337_v57 = vld [vmem:[#allocation11 + $0x6e8] sm:$0xff] }
 0xcaa   : > { %9951 = vmatpush1.bf16.msra.mxu0 %v9950_v19  ;;  %10079 = vmatpush1.bf16.msra.mxu1 %v10078_v56  ;;  %v7303_v19 = vld [vmem:[#allocation11 + $0x5d8] sm:$0xff]  ;;  %v10114_v63 = vpack.c.bf16 %v7330_v37, %v7326_v15  ;;  %v9988_v35 = vpack.c.bf16 %v7337_v57, %v7333_v50  ;;  %v7334_v7 = vld [vmem:[#allocation11 + $0x6d0] sm:$0xff] }
 0xcab   : > { %9953 = vmatprep.subr.bf16.mxu0 %v9952_v53  ;;  %10081 = vmatprep.subr.bf16.mxu1 %v10080_v23  ;;  %v7307_v56 = vld [vmem:[#allocation11 + $0x5f8] sm:$0xff]  ;;  %v7300_v53 = vld [vmem:[#allocation11 + $0x5c0] sm:$0xff]  ;;  %v7338_v4 = vld [vmem:[#allocation11 + $0x6f0] sm:$0xff] }
 0xcac   : > { %v7304_v23 = vld [vmem:[#allocation11 + $0x5e0] sm:$0xff]  ;;  %v10100_v33 = vpack.c.bf16 %v7307_v56, %v7303_v19  ;;  %v7341_v19 = vld [vmem:[#allocation11 + $0x708] sm:$0xff]  ;;  %v7366_v50 = vld [vmem:[#allocation11 + $0x7d0] sm:$0xff] }
 0xcad   : > { %v9974_v31 = vpack.c.bf16 %v7304_v23, %v7300_v53  ;;  %v7345_v56 = vld [vmem:[#allocation11 + $0x728] sm:$0xff]  ;;  %v10118_v23 = vpack.c.bf16 %v7338_v4, %v7334_v7  ;;  %v7370_v57 = vld [vmem:[#allocation11 + $0x7f0] sm:$0xff] }
 0xcae   : > { %9955 = vmatpush1.bf16.msra.mxu0 %v9954_v51  ;;  %10083 = vmatpush1.bf16.msra.mxu1 %v10082_v6  ;;  %v7311_v51 = vld [vmem:[#allocation11 + $0x618] sm:$0xff]  ;;  %v9992_v58 = vpack.c.bf16 %v7345_v56, %v7341_v19  ;;  %v7705_v19 = vld [vmem:[#allocation13 + $0x10] sm:$0xff] }
 0xcaf   : > { %9957 = vmatprep.subr.bf16.mxu0 %v9956_v14  ;;  %10085 = vmatprep.subr.bf16.mxu1 %v10084_v9  ;;  %v7315_v6 = vld [vmem:[#allocation11 + $0x638] sm:$0xff]  ;;  %v7308_v14 = vld [vmem:[#allocation11 + $0x600] sm:$0xff]  ;;  %v7709_v56 = vld [vmem:[#allocation13 + $0x30] sm:$0xff] }
 0xcb0   : > { %v7312_v9 = vld [vmem:[#allocation11 + $0x620] sm:$0xff]  ;;  %v10104_v52 = vpack.c.bf16 %v7315_v6, %v7311_v51  ;;  %v7349_v51 = vld [vmem:[#allocation11 + $0x748] sm:$0xff] }
 0xcb1   : > { %v9978_v16 = vpack.c.bf16 %v7312_v9, %v7308_v14  ;;  %v7353_v6 = vld [vmem:[#allocation11 + $0x768] sm:$0xff]  ;;  %v10122_v9 = vpack.c.bf16 %v7346_v22, %v7342_v30  ;;  %v7385_v30 = vrot.slane %v13653_v25, %v13630_v34 }
 0xcb2   : > { %9959 = vmatpush1.bf16.msra.mxu0 %v9958_v28  ;;  %10087 = vmatpush1.bf16.msra.mxu1 %v10086_v0  ;;  %v7319_v28 = vld [vmem:[#allocation11 + $0x658] sm:$0xff]  ;;  %v9996_v29 = vpack.c.bf16 %v7353_v6, %v7349_v51  ;;  %v7713_v6 = vld [vmem:[#allocation13 + $0x50] sm:$0xff] }
 0xcb3   : > { %9961 = vmatprep.subr.bf16.mxu0 %v9960_v59  ;;  %10089 = vmatprep.subr.bf16.mxu1 %v10088_v54  ;;  %v7323_v0 = vld [vmem:[#allocation11 + $0x678] sm:$0xff]  ;;  %v7316_v59 = vld [vmem:[#allocation11 + $0x640] sm:$0xff] }
 0xcb4   : > { %v7320_v54 = vld [vmem:[#allocation11 + $0x660] sm:$0xff]  ;;  %v10108_v49 = vpack.c.bf16 %v7323_v0, %v7319_v28  ;;  %v7357_v28 = vld [vmem:[#allocation11 + $0x788] sm:$0xff] }
 0xcb5   : > { %v9982_v2 = vpack.c.bf16 %v7320_v54, %v7316_v59  ;;  %v7361_v0 = vld [vmem:[#allocation11 + $0x7a8] sm:$0xff]  ;;  %v10126_v54 = vpack.c.bf16 %v7354_v38, %v7350_v48  ;;  %v7723_v48 = vld [vmem:[#allocation13 + $0xa0] sm:$0xff] }
 0xcb6   : > { %9963 = vmatpush1.bf16.msra.mxu0 %v9962_v60  ;;  %10091 = vmatpush1.bf16.msra.mxu1 %v10090_v21  ;;  %v7327_v60 = vld [vmem:[#allocation11 + $0x698] sm:$0xff]  ;;  %v10000_v47 = vpack.c.bf16 %v7361_v0, %v7357_v28  ;;  %v7721_v0 = vld [vmem:[#allocation13 + $0x90] sm:$0xff] }
 0xcb7   : > { %9965 = vmatprep.subr.bf16.mxu0 %v9964_v13  ;;  %10093 = vmatprep.subr.bf16.mxu1 %v10092_v42  ;;  %v7331_v21 = vld [vmem:[#allocation11 + $0x6b8] sm:$0xff]  ;;  %v7324_v13 = vld [vmem:[#allocation11 + $0x680] sm:$0xff] }
 0xcb8   : > { %v7328_v42 = vld [vmem:[#allocation11 + $0x6a0] sm:$0xff]  ;;  %v10112_v24 = vpack.c.bf16 %v7331_v21, %v7327_v60  ;;  %v7365_v60 = vld [vmem:[#allocation11 + $0x7c8] sm:$0xff] }
 0xcb9   : > { %v9986_v1 = vpack.c.bf16 %v7328_v42, %v7324_v13  ;;  %v7369_v21 = vld [vmem:[#allocation11 + $0x7e8] sm:$0xff]  ;;  %v10130_v42 = vpack.c.bf16 %v7362_v20, %v7358_v44  ;;  %v7731_v44 = vld [vmem:[#allocation13 + $0xe0] sm:$0xff] }
 0xcba   : > { %9967 = vmatpush1.bf16.msra.mxu0 %v9966_v27  ;;  %10095 = vmatpush1.bf16.msra.mxu1 %v10094_v46  ;;  %v7335_v27 = vld [vmem:[#allocation11 + $0x6d8] sm:$0xff]  ;;  %v10004_v15 = vpack.c.bf16 %v7369_v21, %v7365_v60  ;;  %v7729_v21 = vld [vmem:[#allocation13 + $0xd0] sm:$0xff] }
 0xcbb   : > { %9969 = vmatprep.subr.bf16.mxu0 %v9968_v18  ;;  %10097 = vmatprep.subr.bf16.mxu1 %v10096_v10  ;;  %v7339_v46 = vld [vmem:[#allocation11 + $0x6f8] sm:$0xff]  ;;  %v7332_v18 = vld [vmem:[#allocation11 + $0x6c0] sm:$0xff] }
 0xcbc   : > { %v7336_v10 = vld [vmem:[#allocation11 + $0x6e0] sm:$0xff]  ;;  %v10116_v5 = vpack.c.bf16 %v7339_v46, %v7335_v27  ;;  %v7704_v27 = vld [vmem:[#allocation13 + $0x8] sm:$0xff] }
 0xcbd   : > { %v9990_v53 = vpack.c.bf16 %v7336_v10, %v7332_v18  ;;  %v7708_v46 = vld [vmem:[#allocation13 + $0x28] sm:$0xff]  ;;  %v10134_v10 = vpack.c.bf16 %v7370_v57, %v7366_v50  ;;  %v7739_v50 = vld [vmem:[#allocation13 + $0x120] sm:$0xff] }
 0xcbe   : > { %9971 = vmatpush1.bf16.msra.mxu0 %v9970_v61  ;;  %10099 = vmatpush1.bf16.msra.mxu1 %v10098_v26  ;;  %v7343_v61 = vld [vmem:[#allocation11 + $0x718] sm:$0xff]  ;;  %v10136_v7 = vpack.c.bf16 %v7708_v46, %v7704_v27  ;;  %v7737_v46 = vld [vmem:[#allocation13 + $0x110] sm:$0xff] }
 0xcbf   : > { %9973 = vmatprep.subr.bf16.mxu0 %v9972_v17  ;;  %10101 = vmatprep.subr.bf16.mxu1 %v10100_v33  ;;  %v7347_v26 = vld [vmem:[#allocation11 + $0x738] sm:$0xff]  ;;  %v7340_v17 = vld [vmem:[#allocation11 + $0x700] sm:$0xff] }
 0xcc0   : > { %v7344_v33 = vld [vmem:[#allocation11 + $0x720] sm:$0xff]  ;;  %v10120_v43 = vpack.c.bf16 %v7347_v26, %v7343_v61  ;;  %v7712_v61 = vld [vmem:[#allocation13 + $0x48] sm:$0xff] }
 0xcc1   : > { %v9994_v14 = vpack.c.bf16 %v7344_v33, %v7340_v17  ;;  %v7716_v26 = vld [vmem:[#allocation13 + $0x68] sm:$0xff]  ;;  %v10266_v33 = vpack.c.bf16 %v7709_v56, %v7705_v19  ;;  %v7747_v19 = vld [vmem:[#allocation13 + $0x160] sm:$0xff] }
 0xcc2   : > { %9975 = vmatpush1.bf16.msra.mxu0 %v9974_v31  ;;  %10103 = vmatpush1.bf16.msra.mxu1 %v10102_v3  ;;  %v7351_v31 = vld [vmem:[#allocation11 + $0x758] sm:$0xff]  ;;  %v10140_v22 = vpack.c.bf16 %v7716_v26, %v7712_v61  ;;  %v7745_v26 = vld [vmem:[#allocation13 + $0x150] sm:$0xff] }
 0xcc3   : > { %9977 = vmatprep.subr.bf16.mxu0 %v9976_v41  ;;  %10105 = vmatprep.subr.bf16.mxu1 %v10104_v52  ;;  %v7355_v3 = vld [vmem:[#allocation11 + $0x778] sm:$0xff]  ;;  %v7348_v41 = vld [vmem:[#allocation11 + $0x740] sm:$0xff] }
 0xcc4   : > { %v7352_v52 = vld [vmem:[#allocation11 + $0x760] sm:$0xff]  ;;  %v10124_v8 = vpack.c.bf16 %v7355_v3, %v7351_v31  ;;  %v7717_v31 = vld [vmem:[#allocation13 + $0x70] sm:$0xff]  ;;  %v7720_v3 = vld [vmem:[#allocation13 + $0x88] sm:$0xff] }
 0xcc5   : > { %v9998_v59 = vpack.c.bf16 %v7352_v52, %v7348_v41  ;;  %v7726_v41 = vld [vmem:[#allocation13 + $0xb8] sm:$0xff] }
 0xcc6   : > { %9979 = vmatpush1.bf16.msra.mxu0 %v9978_v16  ;;  %10107 = vmatpush1.bf16.msra.mxu1 %v10106_v40  ;;  %v7359_v16 = vld [vmem:[#allocation11 + $0x798] sm:$0xff] }
 0xcc7   : > { %9981 = vmatprep.subr.bf16.mxu0 %v9980_v62  ;;  %10109 = vmatprep.subr.bf16.mxu1 %v10108_v49  ;;  %v7363_v40 = vld [vmem:[#allocation11 + $0x7b8] sm:$0xff]  ;;  %v7356_v62 = vld [vmem:[#allocation11 + $0x780] sm:$0xff] }
 0xcc8   : > { %v7360_v49 = vld [vmem:[#allocation11 + $0x7a0] sm:$0xff]  ;;  %v10128_v32 = vpack.c.bf16 %v7363_v40, %v7359_v16  ;;  %v7725_v16 = vld [vmem:[#allocation13 + $0xb0] sm:$0xff]  ;;  %v7728_v40 = vld [vmem:[#allocation13 + $0xc8] sm:$0xff] }
 0xcc9   : > { %v10002_v13 = vpack.c.bf16 %v7360_v49, %v7356_v62  ;;  %v7734_v62 = vld [vmem:[#allocation13 + $0xf8] sm:$0xff] }
 0xcca   : > { %9983 = vmatpush1.bf16.msra.mxu0 %v9982_v2  ;;  %10111 = vmatpush1.bf16.msra.mxu1 %v10110_v45  ;;  %v7367_v2 = vld [vmem:[#allocation11 + $0x7d8] sm:$0xff] }
 0xccb   : > { %9985 = vmatprep.subr.bf16.mxu0 %v9984_v36  ;;  %10113 = vmatprep.subr.bf16.mxu1 %v10112_v24  ;;  %v7371_v45 = vld [vmem:[#allocation11 + $0x7f8] sm:$0xff]  ;;  %v7364_v36 = vld [vmem:[#allocation11 + $0x7c0] sm:$0xff] }
 0xccc   : > { %v7368_v24 = vld [vmem:[#allocation11 + $0x7e0] sm:$0xff]  ;;  %v10132_v37 = vpack.c.bf16 %v7371_v45, %v7367_v2  ;;  %v7733_v2 = vld [vmem:[#allocation13 + $0xf0] sm:$0xff]  ;;  %v7736_v45 = vld [vmem:[#allocation13 + $0x108] sm:$0xff] }
 0xccd   : > { %v10006_v18 = vpack.c.bf16 %v7368_v24, %v7364_v36  ;;  %v7742_v36 = vld [vmem:[#allocation13 + $0x138] sm:$0xff] }
 0xcce   : > { %9987 = vmatpush1.bf16.msra.mxu0 %v9986_v1  ;;  %10115 = vmatpush1.bf16.msra.mxu1 %v10114_v63  ;;  %v7706_v1 = vld [vmem:[#allocation13 + $0x18] sm:$0xff] }
 0xccf   : > { %9989 = vmatprep.subr.bf16.mxu0 %v9988_v35  ;;  %10117 = vmatprep.subr.bf16.mxu1 %v10116_v5  ;;  %v7710_v63 = vld [vmem:[#allocation13 + $0x38] sm:$0xff]  ;;  %v7703_v35 = vld [vmem:[#allocation13] sm:$0xff] }
 0xcd0   : > { %v7707_v5 = vld [vmem:[#allocation13 + $0x20] sm:$0xff]  ;;  %v10264_v4 = vpack.c.bf16 %v7710_v63, %v7706_v1  ;;  %v7741_v1 = vld [vmem:[#allocation13 + $0x130] sm:$0xff]  ;;  %v7744_v63 = vld [vmem:[#allocation13 + $0x148] sm:$0xff] }
 0xcd1   : > { %v10138_v17 = vpack.c.bf16 %v7707_v5, %v7703_v35  ;;  %v7750_v35 = vld [vmem:[#allocation13 + $0x178] sm:$0xff] }
 0xcd2   : > { %9991 = vmatpush1.bf16.msra.mxu0 %v9990_v53  ;;  %10119 = vmatpush1.bf16.msra.mxu1 %v10118_v23  ;;  %v7714_v53 = vld [vmem:[#allocation13 + $0x58] sm:$0xff] }
 0xcd3   : > { %9993 = vmatprep.subr.bf16.mxu0 %v9992_v58  ;;  %10121 = vmatprep.subr.bf16.mxu1 %v10120_v43  ;;  %v7718_v23 = vld [vmem:[#allocation13 + $0x78] sm:$0xff]  ;;  %v7711_v58 = vld [vmem:[#allocation13 + $0x40] sm:$0xff] }
 0xcd4   : > { %v7715_v43 = vld [vmem:[#allocation13 + $0x60] sm:$0xff]  ;;  %v10268_v51 = vpack.c.bf16 %v7718_v23, %v7714_v53  ;;  %v7749_v53 = vld [vmem:[#allocation13 + $0x170] sm:$0xff]  ;;  %v7752_v23 = vld [vmem:[#allocation13 + $0x188] sm:$0xff] }
 0xcd5   : > { %v10142_v52 = vpack.c.bf16 %v7715_v43, %v7711_v58  ;;  %v7758_v58 = vld [vmem:[#allocation13 + $0x1b8] sm:$0xff] }
 0xcd6   : > { %9995 = vmatpush1.bf16.msra.mxu0 %v9994_v14  ;;  %10123 = vmatpush1.bf16.msra.mxu1 %v10122_v9  ;;  %v7724_v14 = vld [vmem:[#allocation13 + $0xa8] sm:$0xff]  ;;  %v7722_v9 = vld [vmem:[#allocation13 + $0x98] sm:$0xff] }
 0xcd7   : > { %9997 = vmatprep.subr.bf16.mxu0 %v9996_v29  ;;  %10125 = vmatprep.subr.bf16.mxu1 %v10124_v8  ;;  %v10270_v29 = vpack.c.bf16 %v7717_v31, %v7713_v6  ;;  %v7719_v8 = vld [vmem:[#allocation13 + $0x80] sm:$0xff]  ;;  %v10144_v38 = vpack.c.bf16 %v7724_v14, %v7720_v3  ;;  %v10272_v28 = vpack.c.bf16 %v7726_v41, %v7722_v9  ;;  %v7753_v3 = vld [vmem:[#allocation13 + $0x190] sm:$0xff]  ;;  %v7760_v9 = vld [vmem:[#allocation13 + $0x1c8] sm:$0xff] }
 0xcd8   : > { %v10146_v49 = vpack.c.bf16 %v7723_v48, %v7719_v8  ;;  %v7757_v14 = vld [vmem:[#allocation13 + $0x1b0] sm:$0xff]  ;;  %v7764_v41 = vld [vmem:[#allocation13 + $0x1e8] sm:$0xff] }
 0xcd9   : > { %v10290_v48 = vpack.c.bf16 %v7757_v14, %v7753_v3 }
 0xcda   : > { %9999 = vmatpush1.bf16.msra.mxu0 %v9998_v59  ;;  %10127 = vmatpush1.bf16.msra.mxu1 %v10126_v54  ;;  %v7732_v59 = vld [vmem:[#allocation13 + $0xe8] sm:$0xff]  ;;  %v7730_v54 = vld [vmem:[#allocation13 + $0xd8] sm:$0xff] }
 0xcdb   : > { %10001 = vmatprep.subr.bf16.mxu0 %v10000_v47  ;;  %10129 = vmatprep.subr.bf16.mxu1 %v10128_v32  ;;  %v10274_v47 = vpack.c.bf16 %v7725_v16, %v7721_v0  ;;  %v7727_v32 = vld [vmem:[#allocation13 + $0xc0] sm:$0xff]  ;;  %v10148_v20 = vpack.c.bf16 %v7732_v59, %v7728_v40  ;;  %v10276_v60 = vpack.c.bf16 %v7734_v62, %v7730_v54  ;;  %v7761_v40 = vld [vmem:[#allocation13 + $0x1d0] sm:$0xff]  ;;  %v7768_v54 = vld [vmem:[#allocation13 + $0x208] sm:$0xff] }
 0xcdc   : > { %v10150_v24 = vpack.c.bf16 %v7731_v44, %v7727_v32  ;;  %v10164_v0 = vpack.c.bf16 %v7764_v41, %v7760_v9  ;;  %v7765_v59 = vld [vmem:[#allocation13 + $0x1f0] sm:$0xff]  ;;  %v7772_v62 = vld [vmem:[#allocation13 + $0x228] sm:$0xff] }
 0xcdd   : > { %v10294_v44 = vpack.c.bf16 %v7765_v59, %v7761_v40  ;;  %v7793_v9 = vld [vmem:[#allocation13 + $0x2d0] sm:$0xff] }
 0xcde   : > { %10003 = vmatpush1.bf16.msra.mxu0 %v10002_v13  ;;  %10131 = vmatpush1.bf16.msra.mxu1 %v10130_v42  ;;  %v7740_v13 = vld [vmem:[#allocation13 + $0x128] sm:$0xff]  ;;  %v7738_v42 = vld [vmem:[#allocation13 + $0x118] sm:$0xff]  ;;  %v7797_v41 = vld [vmem:[#allocation13 + $0x2f0] sm:$0xff] }
 0xcdf   : > { %10005 = vmatprep.subr.bf16.mxu0 %v10004_v15  ;;  %10133 = vmatprep.subr.bf16.mxu1 %v10132_v37  ;;  %v10278_v15 = vpack.c.bf16 %v7733_v2, %v7729_v21  ;;  %v7735_v37 = vld [vmem:[#allocation13 + $0x100] sm:$0xff]  ;;  %v10152_v57 = vpack.c.bf16 %v7740_v13, %v7736_v45  ;;  %v10280_v27 = vpack.c.bf16 %v7742_v36, %v7738_v42  ;;  %v7769_v45 = vld [vmem:[#allocation13 + $0x210] sm:$0xff]  ;;  %v7776_v42 = vld [vmem:[#allocation13 + $0x248] sm:$0xff] }
 0xce0   : > { %v10154_v5 = vpack.c.bf16 %v7739_v50, %v7735_v37  ;;  %v10168_v21 = vpack.c.bf16 %v7772_v62, %v7768_v54  ;;  %v7773_v13 = vld [vmem:[#allocation13 + $0x230] sm:$0xff]  ;;  %v7780_v36 = vld [vmem:[#allocation13 + $0x268] sm:$0xff] }
 0xce1   : > { %v10298_v50 = vpack.c.bf16 %v7773_v13, %v7769_v45  ;;  %v7801_v54 = vld [vmem:[#allocation13 + $0x310] sm:$0xff] }
 0xce2   : > { %10007 = vmatpush1.bf16.msra.mxu0 %v10006_v18  ;;  %10135 = vmatpush1.bf16.msra.mxu1 %v10134_v10  ;;  %v7748_v18 = vld [vmem:[#allocation13 + $0x168] sm:$0xff]  ;;  %v7746_v10 = vld [vmem:[#allocation13 + $0x158] sm:$0xff]  ;;  %v7805_v62 = vld [vmem:[#allocation13 + $0x330] sm:$0xff] }
 0xce3   : > { %10137 = vmatprep.subr.bf16.mxu0 %v10136_v7  ;;  %10265 = vmatprep.subr.bf16.mxu1 %v10264_v4  ;;  %v10282_v7 = vpack.c.bf16 %v7741_v1, %v7737_v46  ;;  %v7743_v4 = vld [vmem:[#allocation13 + $0x140] sm:$0xff]  ;;  %v10156_v56 = vpack.c.bf16 %v7748_v18, %v7744_v63  ;;  %v10284_v61 = vpack.c.bf16 %v7750_v35, %v7746_v10  ;;  %v7777_v63 = vld [vmem:[#allocation13 + $0x250] sm:$0xff]  ;;  %v7784_v10 = vld [vmem:[#allocation13 + $0x288] sm:$0xff] }
 0xce4   : > { %v10158_v43 = vpack.c.bf16 %v7747_v19, %v7743_v4  ;;  %v10172_v46 = vpack.c.bf16 %v7780_v36, %v7776_v42  ;;  %v7781_v18 = vld [vmem:[#allocation13 + $0x270] sm:$0xff]  ;;  %v7788_v35 = vld [vmem:[#allocation13 + $0x2a8] sm:$0xff] }
 0xce5   : > { %7551 = vmatmul.mubr.f32.vlgmr.msra.gmra.mrb[24].mxu0 %v7385_v30  ;;  %7693 = vmatmul.mubr.f32.vlgmr.msra.gmra.mrb[24].mxu1 %v7385_v30  ;;  %v10286_v30 = vpack.c.bf16 %v7749_v53, %v7745_v26  ;;  %v10302_v19 = vpack.c.bf16 %v7781_v18, %v7777_v63  ;;  %v10176_v26 = vpack.c.bf16 %v7788_v35, %v7784_v10  ;;  %v7809_v42 = vld [vmem:[#allocation13 + $0x350] sm:$0xff]  ;;  %v7819_v18 = vld [vmem:[#allocation13 + $0x3a0] sm:$0xff] }
 0xce6   : > { %10139 = vmatpush1.bf16.msra.mxu0 %v10138_v17  ;;  %10267 = vmatpush1.bf16.msra.mxu1 %v10266_v33  ;;  %v7756_v17 = vld [vmem:[#allocation13 + $0x1a8] sm:$0xff]  ;;  %v7754_v33 = vld [vmem:[#allocation13 + $0x198] sm:$0xff]  ;;  %v7813_v36 = vld [vmem:[#allocation13 + $0x370] sm:$0xff] }
 0xce7   : > { %10141 = vmatprep.subr.bf16.mxu0 %v10140_v22  ;;  %10269 = vmatprep.subr.bf16.mxu1 %v10268_v51  ;;  %v7751_v22 = vld [vmem:[#allocation13 + $0x180] sm:$0xff]  ;;  %v10160_v6 = vpack.c.bf16 %v7756_v17, %v7752_v23  ;;  %v10288_v31 = vpack.c.bf16 %v7758_v58, %v7754_v33  ;;  %v7785_v23 = vld [vmem:[#allocation13 + $0x290] sm:$0xff]  ;;  %v7792_v33 = vld [vmem:[#allocation13 + $0x2c8] sm:$0xff] }
 0xce8   : > { %v7755_v51 = vld [vmem:[#allocation13 + $0x1a0] sm:$0xff]  ;;  %v7789_v17 = vld [vmem:[#allocation13 + $0x2b0] sm:$0xff]  ;;  %v7796_v58 = vld [vmem:[#allocation13 + $0x2e8] sm:$0xff] }
 0xce9   : > { %v10162_v8 = vpack.c.bf16 %v7755_v51, %v7751_v22  ;;  %v10306_v51 = vpack.c.bf16 %v7789_v17, %v7785_v23  ;;  %v10180_v3 = vpack.c.bf16 %v7796_v58, %v7792_v33  ;;  %v7817_v10 = vld [vmem:[#allocation13 + $0x390] sm:$0xff]  ;;  %v7827_v23 = vld [vmem:[#allocation13 + $0x3e0] sm:$0xff] }
 0xcea   : > { %10143 = vmatpush1.bf16.msra.mxu0 %v10142_v52  ;;  %10271 = vmatpush1.bf16.msra.mxu1 %v10270_v29  ;;  %v7762_v52 = vld [vmem:[#allocation13 + $0x1d8] sm:$0xff]  ;;  %v7821_v35 = vld [vmem:[#allocation13 + $0x3b0] sm:$0xff] }
 0xceb   : > { %10145 = vmatprep.subr.bf16.mxu0 %v10144_v38  ;;  %10273 = vmatprep.subr.bf16.mxu1 %v10272_v28  ;;  %v7766_v29 = vld [vmem:[#allocation13 + $0x1f8] sm:$0xff]  ;;  %v7759_v38 = vld [vmem:[#allocation13 + $0x1c0] sm:$0xff]  ;;  %v7825_v58 = vld [vmem:[#allocation13 + $0x3d0] sm:$0xff] }
 0xcec   : > { %v7763_v28 = vld [vmem:[#allocation13 + $0x1e0] sm:$0xff]  ;;  %v10292_v16 = vpack.c.bf16 %v7766_v29, %v7762_v52  ;;  %v7800_v52 = vld [vmem:[#allocation13 + $0x308] sm:$0xff] }
 0xced   : > { %v10166_v32 = vpack.c.bf16 %v7763_v28, %v7759_v38  ;;  %v7804_v29 = vld [vmem:[#allocation13 + $0x328] sm:$0xff]  ;;  %v10310_v28 = vpack.c.bf16 %v7797_v41, %v7793_v9  ;;  %v13666_v9 = vld [vmem:[%s14273_s29] sm:$0xf] }
 0xcee   : > { %10147 = vmatpush1.bf16.msra.mxu0 %v10146_v49  ;;  %10275 = vmatpush1.bf16.msra.mxu1 %v10274_v47  ;;  %v7770_v49 = vld [vmem:[#allocation13 + $0x218] sm:$0xff]  ;;  %v10184_v40 = vpack.c.bf16 %v7804_v29, %v7800_v52  ;;  %v7398_v41 = vrot.slane %v13666_v9, %v13616_v39  ;;  %v7402_v52 = vrot.slane %v13666_v9, %v13613_v11 }
 0xcef   : > { %10149 = vmatprep.subr.bf16.mxu0 %v10148_v20  ;;  %10277 = vmatprep.subr.bf16.mxu1 %v10276_v60  ;;  %v7774_v47 = vld [vmem:[#allocation13 + $0x238] sm:$0xff]  ;;  %v7767_v20 = vld [vmem:[#allocation13 + $0x200] sm:$0xff]  ;;  %v7410_v29 = vrot.slane %v13666_v9, %v13621_v12 }
 0xcf0   : > { %v7771_v60 = vld [vmem:[#allocation13 + $0x220] sm:$0xff]  ;;  %v10296_v2 = vpack.c.bf16 %v7774_v47, %v7770_v49  ;;  %v7808_v49 = vld [vmem:[#allocation13 + $0x348] sm:$0xff] }
 0xcf1   : > { %v10170_v37 = vpack.c.bf16 %v7771_v60, %v7767_v20  ;;  %v7812_v47 = vld [vmem:[#allocation13 + $0x368] sm:$0xff]  ;;  %v10314_v60 = vpack.c.bf16 %v7805_v62, %v7801_v54  ;;  %v7837_v54 = vld [vmem:[#allocation13 + $0x430] sm:$0xff] }
 0xcf2   : > { %10151 = vmatpush1.bf16.msra.mxu0 %v10150_v24  ;;  %10279 = vmatpush1.bf16.msra.mxu1 %v10278_v15  ;;  %v7778_v24 = vld [vmem:[#allocation13 + $0x258] sm:$0xff]  ;;  %v10188_v45 = vpack.c.bf16 %v7812_v47, %v7808_v49  ;;  %v7840_v49 = vld [vmem:[#allocation13 + $0x448] sm:$0xff] }
 0xcf3   : > { %10153 = vmatprep.subr.bf16.mxu0 %v10152_v57  ;;  %10281 = vmatprep.subr.bf16.mxu1 %v10280_v27  ;;  %v7782_v15 = vld [vmem:[#allocation13 + $0x278] sm:$0xff]  ;;  %v7775_v57 = vld [vmem:[#allocation13 + $0x240] sm:$0xff] }
 0xcf4   : > { %v7779_v27 = vld [vmem:[#allocation13 + $0x260] sm:$0xff]  ;;  %v10300_v1 = vpack.c.bf16 %v7782_v15, %v7778_v24  ;;  %v7816_v24 = vld [vmem:[#allocation13 + $0x388] sm:$0xff] }
 0xcf5   : > { %v10174_v4 = vpack.c.bf16 %v7779_v27, %v7775_v57  ;;  %v7820_v15 = vld [vmem:[#allocation13 + $0x3a8] sm:$0xff]  ;;  %v10318_v27 = vpack.c.bf16 %v7813_v36, %v7809_v42  ;;  %v7841_v36 = vld [vmem:[#allocation13 + $0x450] sm:$0xff] }
 0xcf6   : > { %10155 = vmatpush1.bf16.msra.mxu0 %v10154_v5  ;;  %10283 = vmatpush1.bf16.msra.mxu1 %v10282_v7  ;;  %v7786_v5 = vld [vmem:[#allocation13 + $0x298] sm:$0xff] }
 0xcf7   : > { %10157 = vmatprep.subr.bf16.mxu0 %v10156_v56  ;;  %10285 = vmatprep.subr.bf16.mxu1 %v10284_v61  ;;  %v7790_v7 = vld [vmem:[#allocation13 + $0x2b8] sm:$0xff]  ;;  %v7783_v56 = vld [vmem:[#allocation13 + $0x280] sm:$0xff] }
 0xcf8   : > { %v7787_v61 = vld [vmem:[#allocation13 + $0x2a0] sm:$0xff]  ;;  %v10304_v53 = vpack.c.bf16 %v7790_v7, %v7786_v5  ;;  %v10322_v7 = vpack.c.bf16 %v7821_v35, %v7817_v10 }
 0xcf9   : > { %v10178_v22 = vpack.c.bf16 %v7787_v61, %v7783_v56  ;;  %v7826_v56 = vld [vmem:[#allocation13 + $0x3d8] sm:$0xff]  ;;  %v7847_v10 = vld [vmem:[#allocation13 + $0x480] sm:$0xff] }
 0xcfa   : > { %10159 = vmatpush1.bf16.msra.mxu0 %v10158_v43  ;;  %10287 = vmatpush1.bf16.msra.mxu1 %v10286_v30  ;;  %v7794_v43 = vld [vmem:[#allocation13 + $0x2d8] sm:$0xff]  ;;  %v7851_v35 = vld [vmem:[#allocation13 + $0x4a0] sm:$0xff] }
 0xcfb   : > { %10161 = vmatprep.subr.bf16.mxu0 %v10160_v6  ;;  %10289 = vmatprep.subr.bf16.mxu1 %v10288_v31  ;;  %v7798_v30 = vld [vmem:[#allocation13 + $0x2f8] sm:$0xff]  ;;  %v7791_v6 = vld [vmem:[#allocation13 + $0x2c0] sm:$0xff] }
 0xcfc   : > { %v7795_v31 = vld [vmem:[#allocation13 + $0x2e0] sm:$0xff]  ;;  %v10308_v14 = vpack.c.bf16 %v7798_v30, %v7794_v43  ;;  %v7829_v43 = vld [vmem:[#allocation13 + $0x3f0] sm:$0xff] }
 0xcfd   : > { %v10182_v38 = vpack.c.bf16 %v7795_v31, %v7791_v6  ;;  %v10326_v30 = vpack.c.bf16 %v7829_v43, %v7825_v58  ;;  %v7834_v6 = vld [vmem:[#allocation13 + $0x418] sm:$0xff]  ;;  %v7859_v58 = vld [vmem:[#allocation13 + $0x4e0] sm:$0xff] }
 0xcfe   : > { %10163 = vmatpush1.bf16.msra.mxu0 %v10162_v8  ;;  %10291 = vmatpush1.bf16.msra.mxu1 %v10290_v48  ;;  %v7802_v8 = vld [vmem:[#allocation13 + $0x318] sm:$0xff] }
 0xcff   : > { %10165 = vmatprep.subr.bf16.mxu0 %v10164_v0  ;;  %10293 = vmatprep.subr.bf16.mxu1 %v10292_v16  ;;  %v7806_v48 = vld [vmem:[#allocation13 + $0x338] sm:$0xff]  ;;  %v7799_v0 = vld [vmem:[#allocation13 + $0x300] sm:$0xff] }
 0xd00   : > { %v7803_v16 = vld [vmem:[#allocation13 + $0x320] sm:$0xff]  ;;  %v10312_v59 = vpack.c.bf16 %v7806_v48, %v7802_v8 }
 0xd01   : > { %v10186_v20 = vpack.c.bf16 %v7803_v16, %v7799_v0 }
 0xd02   : > { %10167 = vmatpush1.bf16.msra.mxu0 %v10166_v32  ;;  %10295 = vmatpush1.bf16.msra.mxu1 %v10294_v44  ;;  %v7810_v32 = vld [vmem:[#allocation13 + $0x358] sm:$0xff] }
 0xd03   : > { %10169 = vmatprep.subr.bf16.mxu0 %v10168_v21  ;;  %10297 = vmatprep.subr.bf16.mxu1 %v10296_v2  ;;  %v7814_v44 = vld [vmem:[#allocation13 + $0x378] sm:$0xff]  ;;  %v7807_v21 = vld [vmem:[#allocation13 + $0x340] sm:$0xff] }
 0xd04   : > { %v7811_v2 = vld [vmem:[#allocation13 + $0x360] sm:$0xff]  ;;  %v10316_v13 = vpack.c.bf16 %v7814_v44, %v7810_v32  ;;  %v7844_v32 = vld [vmem:[#allocation13 + $0x468] sm:$0xff]  ;;  %v7842_v44 = vld [vmem:[#allocation13 + $0x458] sm:$0xff] }
 0xd05   : > { %v10190_v57 = vpack.c.bf16 %v7811_v2, %v7807_v21 }
 0xd06   : > { %10171 = vmatpush1.bf16.msra.mxu0 %v10170_v37  ;;  %10299 = vmatpush1.bf16.msra.mxu1 %v10298_v50  ;;  %v7818_v37 = vld [vmem:[#allocation13 + $0x398] sm:$0xff] }
 0xd07   : > { %10173 = vmatprep.subr.bf16.mxu0 %v10172_v46  ;;  %10301 = vmatprep.subr.bf16.mxu1 %v10300_v1  ;;  %v7822_v50 = vld [vmem:[#allocation13 + $0x3b8] sm:$0xff]  ;;  %v7815_v46 = vld [vmem:[#allocation13 + $0x380] sm:$0xff]  ;;  %v10192_v1 = vpack.c.bf16 %v7820_v15, %v7816_v24  ;;  %v7845_v24 = vld [vmem:[#allocation13 + $0x470] sm:$0xff] }
 0xd08   : > { %v10320_v63 = vpack.c.bf16 %v7822_v50, %v7818_v37  ;;  %v10194_v5 = vpack.c.bf16 %v7819_v18, %v7815_v46  ;;  %v7848_v15 = vld [vmem:[#allocation13 + $0x488] sm:$0xff]  ;;  %v10204_v37 = vpack.c.bf16 %v7844_v32, %v7840_v49  ;;  %v7854_v46 = vld [vmem:[#allocation13 + $0x4b8] sm:$0xff]  ;;  %v10334_v18 = vpack.c.bf16 %v7845_v24, %v7841_v36  ;;  %v7871_v32 = vld [vmem:[#allocation13 + $0x540] sm:$0xff] }
 0xd09   : > { %v7886_v36 = vld [vmem:[#allocation13 + $0x5b8] sm:$0xff] }
 0xd0a   : > { %10175 = vmatpush1.bf16.msra.mxu0 %v10174_v4  ;;  %10303 = vmatpush1.bf16.msra.mxu1 %v10302_v19  ;;  %v7824_v4 = vld [vmem:[#allocation13 + $0x3c8] sm:$0xff] }
 0xd0b   : > { %10177 = vmatprep.subr.bf16.mxu0 %v10176_v26  ;;  %10305 = vmatprep.subr.bf16.mxu1 %v10304_v53  ;;  %v7828_v19 = vld [vmem:[#allocation13 + $0x3e8] sm:$0xff]  ;;  %v7830_v26 = vld [vmem:[#allocation13 + $0x3f8] sm:$0xff]  ;;  %v7823_v53 = vld [vmem:[#allocation13 + $0x3c0] sm:$0xff] }
 0xd0c   : > { %v10196_v61 = vpack.c.bf16 %v7828_v19, %v7824_v4  ;;  %v10324_v17 = vpack.c.bf16 %v7830_v26, %v7826_v56  ;;  %v10198_v33 = vpack.c.bf16 %v7827_v23, %v7823_v53  ;;  %v7849_v4 = vld [vmem:[#allocation13 + $0x490] sm:$0xff]  ;;  %v7856_v56 = vld [vmem:[#allocation13 + $0x4c8] sm:$0xff]  ;;  %v7858_v26 = vld [vmem:[#allocation13 + $0x4d8] sm:$0xff]  ;;  %v10210_v23 = vpack.c.bf16 %v7851_v35, %v7847_v10 }
 0xd0d   : > { %v7853_v19 = vld [vmem:[#allocation13 + $0x4b0] sm:$0xff]  ;;  %v7862_v53 = vld [vmem:[#allocation13 + $0x4f8] sm:$0xff] }
 0xd0e   : > { %10179 = vmatpush1.bf16.msra.mxu0 %v10178_v22  ;;  %10307 = vmatpush1.bf16.msra.mxu1 %v10306_v51  ;;  %v7832_v22 = vld [vmem:[#allocation13 + $0x408] sm:$0xff]  ;;  %v7890_v10 = vld [vmem:[#allocation13 + $0x5d8] sm:$0xff] }
 0xd0f   : > { %10181 = vmatprep.subr.bf16.mxu0 %v10180_v3  ;;  %10309 = vmatprep.subr.bf16.mxu1 %v10308_v14  ;;  %v7836_v51 = vld [vmem:[#allocation13 + $0x428] sm:$0xff]  ;;  %v7838_v3 = vld [vmem:[#allocation13 + $0x438] sm:$0xff] }
 0xd10   : > { %v10200_v31 = vpack.c.bf16 %v7836_v51, %v7832_v22  ;;  %v10328_v14 = vpack.c.bf16 %v7838_v3, %v7834_v6  ;;  %v7857_v22 = vld [vmem:[#allocation13 + $0x4d0] sm:$0xff]  ;;  %v7864_v6 = vld [vmem:[#allocation13 + $0x508] sm:$0xff]  ;;  %v7866_v3 = vld [vmem:[#allocation13 + $0x518] sm:$0xff] }
 0xd11   : > { %v7861_v51 = vld [vmem:[#allocation13 + $0x4f0] sm:$0xff]  ;;  %v7894_v35 = vld [vmem:[#allocation13 + $0x5f8] sm:$0xff] }
 0xd12   : > { %10183 = vmatpush1.bf16.msra.mxu0 %v10182_v38  ;;  %10311 = vmatpush1.bf16.msra.mxu1 %v10310_v28  ;;  %v7831_v38 = vld [vmem:[#allocation13 + $0x400] sm:$0xff] }
 0xd13   : > { %10185 = vmatprep.subr.bf16.mxu0 %v10184_v40  ;;  %10313 = vmatprep.subr.bf16.mxu1 %v10312_v59  ;;  %v7835_v40 = vld [vmem:[#allocation13 + $0x420] sm:$0xff]  ;;  %v7833_v59 = vld [vmem:[#allocation13 + $0x410] sm:$0xff] }
 0xd14   : > { %v10202_v21 = vpack.c.bf16 %v7835_v40, %v7831_v38  ;;  %v10330_v2 = vpack.c.bf16 %v7837_v54, %v7833_v59  ;;  %v7872_v40 = vld [vmem:[#allocation13 + $0x548] sm:$0xff]  ;;  %v7874_v54 = vld [vmem:[#allocation13 + $0x558] sm:$0xff] }
 0xd15   : > { %v7876_v59 = vld [vmem:[#allocation13 + $0x568] sm:$0xff] }
 0xd16   : > { %10187 = vmatpush1.bf16.msra.mxu0 %v10186_v20  ;;  %10315 = vmatpush1.bf16.msra.mxu1 %v10314_v60  ;;  %v7846_v20 = vld [vmem:[#allocation13 + $0x478] sm:$0xff] }
 0xd17   : > { %10189 = vmatprep.subr.bf16.mxu0 %v10188_v45  ;;  %10317 = vmatprep.subr.bf16.mxu1 %v10316_v13  ;;  %v7839_v45 = vld [vmem:[#allocation13 + $0x440] sm:$0xff]  ;;  %v10332_v50 = vpack.c.bf16 %v7846_v20, %v7842_v44  ;;  %v10220_v20 = vpack.c.bf16 %v7876_v59, %v7872_v40 }
 0xd18   : > { %v7843_v13 = vld [vmem:[#allocation13 + $0x460] sm:$0xff] }
 0xd19   : > { %v7875_v44 = vld [vmem:[#allocation13 + $0x560] sm:$0xff] }
 0xd1a   : > { %10191 = vmatpush1.bf16.msra.mxu0 %v10190_v57  ;;  %10319 = vmatpush1.bf16.msra.mxu1 %v10318_v27  ;;  %v7852_v57 = vld [vmem:[#allocation13 + $0x4a8] sm:$0xff]  ;;  %v7850_v27 = vld [vmem:[#allocation13 + $0x498] sm:$0xff]  ;;  %v10222_v24 = vpack.c.bf16 %v7875_v44, %v7871_v32 }
 0xd1b   : > { %10193 = vmatprep.subr.bf16.mxu0 %v10192_v1  ;;  %10321 = vmatprep.subr.bf16.mxu1 %v10320_v63  ;;  %v10206_v63 = vpack.c.bf16 %v7843_v13, %v7839_v45  ;;  %v7880_v45 = vld [vmem:[#allocation13 + $0x588] sm:$0xff]  ;;  %v7914_v32 = vld [vmem:[#allocation13 + $0x698] sm:$0xff] }
 0xd1c   : > { %v7884_v13 = vld [vmem:[#allocation13 + $0x5a8] sm:$0xff]  ;;  %v7918_v44 = vld [vmem:[#allocation13 + $0x6b8] sm:$0xff] }
 0xd1e   : > { %10195 = vmatpush1.bf16.msra.mxu0 %v10194_v5  ;;  %10323 = vmatpush1.bf16.msra.mxu1 %v10322_v7  ;;  %v10208_v5 = vpack.c.bf16 %v7852_v57, %v7848_v15  ;;  %v10336_v7 = vpack.c.bf16 %v7854_v46, %v7850_v27  ;;  %v10224_v57 = vpack.c.bf16 %v7884_v13, %v7880_v45  ;;  %v7881_v46 = vld [vmem:[#allocation13 + $0x590] sm:$0xff] }
 0xd1f   : > { %10197 = vmatprep.subr.bf16.mxu0 %v10196_v61  ;;  %10325 = vmatprep.subr.bf16.mxu1 %v10324_v17  ;;  %v7860_v61 = vld [vmem:[#allocation13 + $0x4e8] sm:$0xff]  ;;  %v10338_v17 = vpack.c.bf16 %v7853_v19, %v7849_v4  ;;  %v7887_v4 = vld [vmem:[#allocation13 + $0x5c0] sm:$0xff]  ;;  %v10368_v13 = vpack.c.bf16 %v7918_v44, %v7914_v32  ;;  %v7945_v32 = vld [vmem:[#allocation13 + $0x790] sm:$0xff] }
 0xd20   : > { %v10212_v43 = vpack.c.bf16 %v7860_v61, %v7856_v56  ;;  %v7891_v19 = vld [vmem:[#allocation13 + $0x5e0] sm:$0xff]  ;;  %v10356_v61 = vpack.c.bf16 %v7894_v35, %v7890_v10  ;;  %v7921_v10 = vld [vmem:[#allocation13 + $0x6d0] sm:$0xff] }
 0xd21   : > { %v7925_v35 = vld [vmem:[#allocation13 + $0x6f0] sm:$0xff] }
 0xd22   : > { %10199 = vmatpush1.bf16.msra.mxu0 %v10198_v33  ;;  %10327 = vmatpush1.bf16.msra.mxu1 %v10326_v30  ;;  %v7855_v33 = vld [vmem:[#allocation13 + $0x4c0] sm:$0xff]  ;;  %v10340_v30 = vpack.c.bf16 %v7862_v53, %v7858_v26  ;;  %v7889_v26 = vld [vmem:[#allocation13 + $0x5d0] sm:$0xff] }
 0xd23   : > { %10201 = vmatprep.subr.bf16.mxu0 %v10200_v31  ;;  %10329 = vmatprep.subr.bf16.mxu1 %v10328_v14  ;;  %v7868_v31 = vld [vmem:[#allocation13 + $0x528] sm:$0xff]  ;;  %v7870_v14 = vld [vmem:[#allocation13 + $0x538] sm:$0xff]  ;;  %v7893_v53 = vld [vmem:[#allocation13 + $0x5f0] sm:$0xff] }
 0xd24   : > { %v10216_v38 = vpack.c.bf16 %v7868_v31, %v7864_v6  ;;  %v7949_v44 = vld [vmem:[#allocation13 + $0x7b0] sm:$0xff] }
 0xdb8   : > { %v7552_v8 = vpop.f32.mrb[24].mxu0  ;;  %v13674_v48 = vpop.f32.mrb[24].mxu1 }
 0xdb9   : > { %v10476_v28 = vadd.f32 %v7552_v8, %v7398_v41  ;;  %v7554_v0 = vpop.f32.mrb[25].mxu0  ;;  %v7696_v16 = vpop.f32.mrb[25].mxu1  ;;  %v10214_v41 = vpack.c.bf16 %v7859_v58, %v7855_v33  ;;  %v7867_v8 = vld [vmem:[#allocation13 + $0x520] sm:$0xff]  ;;  %v7898_v33 = vld [vmem:[#allocation13 + $0x618] sm:$0xff] }
 0xdba   : > { %v10477_v62 = vadd.f32 %v7554_v0, %v7402_v52  ;;  %v10479_v47 = vadd.f32 %v7696_v16, %v7410_v29  ;;  %v10342_v52 = vpack.c.bf16 %v7861_v51, %v7857_v22  ;;  %v7863_v29 = vld [vmem:[#allocation13 + $0x500] sm:$0xff]  ;;  %v7865_v0 = vld [vmem:[#allocation13 + $0x510] sm:$0xff]  ;;  %v7902_v58 = vld [vmem:[#allocation13 + $0x638] sm:$0xff] }
 0xdbb   : > { %v7699_v42 = vmax.f32 %v10476_v28, 0.0  ;;  %v10344_v28 = vpack.c.bf16 %v7870_v14, %v7866_v3  ;;  %v7869_v16 = vld [vmem:[#allocation13 + $0x530] sm:$0xff]  ;;  %v10218_v49 = vpack.c.bf16 %v7867_v8, %v7863_v29  ;;  %v7895_v22 = vld [vmem:[#allocation13 + $0x600] sm:$0xff]  ;;  %v10360_v31 = vpack.c.bf16 %v7902_v58, %v7898_v33  ;;  %v7906_v29 = vld [vmem:[#allocation13 + $0x658] sm:$0xff] }
 0xdbc   : > { %v7700_v60 = vmax.f32 %v10477_v62, 0.0  ;;  %v7702_v1 = vmax.f32 %v10479_v47, 0.0  ;;  %v7878_v62 = vld [vmem:[#allocation13 + $0x578] sm:$0xff]  ;;  %v10346_v47 = vpack.c.bf16 %v7869_v16, %v7865_v0  ;;  %v7899_v51 = vld [vmem:[#allocation13 + $0x620] sm:$0xff]  ;;  %v7897_v3 = vld [vmem:[#allocation13 + $0x610] sm:$0xff] }
 0xdbd   : > { %v7901_v14 = vld [vmem:[#allocation13 + $0x630] sm:$0xff]  ;;  %v7910_v8 = vld [vmem:[#allocation13 + $0x678] sm:$0xff]  ;;  %v7903_v0 = vld [vmem:[#allocation13 + $0x640] sm:$0xff] }
 0xdbe   : > { %8023 = vmatprep.mubr.f32.mxu0 %v7700_v60  ;;  %8165 = vmatprep.mubr.f32.mxu1 %v7700_v60  ;;  %v10348_v60 = vpack.c.bf16 %v7878_v62, %v7874_v54  ;;  %v7907_v16 = vld [vmem:[#allocation13 + $0x660] sm:$0xff]  ;;  %v10364_v59 = vpack.c.bf16 %v7910_v8, %v7906_v29  ;;  %v7905_v54 = vld [vmem:[#allocation13 + $0x650] sm:$0xff] }
 0xdbf   : > { %8024 = vmatmul.mubr.f32.vlgmr.msra.gmra.mrb[26].mxu0 %v7699_v42  ;;  %8166 = vmatmul.mubr.f32.vlgmr.msra.gmra.mrb[26].mxu1 %v7699_v42  ;;  %v7882_v42 = vld [vmem:[#allocation13 + $0x598] sm:$0xff]  ;;  %v7909_v62 = vld [vmem:[#allocation13 + $0x670] sm:$0xff] }
 0xdc0   : > { %10203 = vmatpush1.bf16.msra.mxu0 %v10202_v21  ;;  %10331 = vmatpush1.bf16.msra.mxu1 %v10330_v2  ;;  %v7873_v21 = vld [vmem:[#allocation13 + $0x550] sm:$0xff]  ;;  %v10352_v27 = vpack.c.bf16 %v7886_v36, %v7882_v42 }
 0xdc1   : > { %8094 = vmatprep.mubr.f32.mxu0 %v7702_v1  ;;  %8236 = vmatprep.mubr.f32.mxu1 %v7702_v1  ;;  %v7877_v2 = vld [vmem:[#allocation13 + $0x570] sm:$0xff] }
 0xdc2   : > { %10205 = vmatprep.subr.bf16.mxu0 %v10204_v37  ;;  %10333 = vmatprep.subr.bf16.mxu1 %v10332_v50  ;;  %v10350_v15 = vpack.c.bf16 %v7877_v2, %v7873_v21  ;;  %v7879_v37 = vld [vmem:[#allocation13 + $0x580] sm:$0xff]  ;;  %v7885_v1 = vld [vmem:[#allocation13 + $0x5b0] sm:$0xff] }
 0xdc3   : > { %v7883_v50 = vld [vmem:[#allocation13 + $0x5a0] sm:$0xff]  ;;  %v7913_v42 = vld [vmem:[#allocation13 + $0x690] sm:$0xff] }
 0xdc4   : > { %10207 = vmatpush1.bf16.msra.mxu0 %v10206_v63  ;;  %10335 = vmatpush1.bf16.msra.mxu1 %v10334_v18  ;;  %v7888_v63 = vld [vmem:[#allocation13 + $0x5c8] sm:$0xff]  ;;  %v7911_v21 = vld [vmem:[#allocation13 + $0x680] sm:$0xff]  ;;  %v7917_v36 = vld [vmem:[#allocation13 + $0x6b0] sm:$0xff] }
 0xdc5   : > { %10209 = vmatprep.subr.bf16.mxu0 %v10208_v5  ;;  %10337 = vmatprep.subr.bf16.mxu1 %v10336_v7  ;;  %v7892_v18 = vld [vmem:[#allocation13 + $0x5e8] sm:$0xff]  ;;  %v10226_v5 = vpack.c.bf16 %v7883_v50, %v7879_v37  ;;  %v10354_v7 = vpack.c.bf16 %v7885_v1, %v7881_v46  ;;  %v7915_v2 = vld [vmem:[#allocation13 + $0x6a0] sm:$0xff]  ;;  %v7922_v37 = vld [vmem:[#allocation13 + $0x6d8] sm:$0xff] }
 0xdc6   : > { %v10228_v56 = vpack.c.bf16 %v7892_v18, %v7888_v63  ;;  %v7926_v50 = vld [vmem:[#allocation13 + $0x6f8] sm:$0xff]  ;;  %v7919_v46 = vld [vmem:[#allocation13 + $0x6c0] sm:$0xff]  ;;  %v7929_v33 = vld [vmem:[#allocation13 + $0x710] sm:$0xff] }
 0xdc7   : > { %v7923_v1 = vld [vmem:[#allocation13 + $0x6e0] sm:$0xff]  ;;  %v10372_v18 = vpack.c.bf16 %v7926_v50, %v7922_v37  ;;  %v7933_v58 = vld [vmem:[#allocation13 + $0x730] sm:$0xff] }
 0xdc8   : > { %10211 = vmatpush1.bf16.msra.mxu0 %v10210_v23  ;;  %10339 = vmatpush1.bf16.msra.mxu1 %v10338_v17  ;;  %v7896_v23 = vld [vmem:[#allocation13 + $0x608] sm:$0xff]  ;;  %v7937_v29 = vld [vmem:[#allocation13 + $0x750] sm:$0xff] }
 0xdc9   : > { %10213 = vmatprep.subr.bf16.mxu0 %v10212_v43  ;;  %10341 = vmatprep.subr.bf16.mxu1 %v10340_v30  ;;  %v7900_v17 = vld [vmem:[#allocation13 + $0x628] sm:$0xff]  ;;  %v10230_v43 = vpack.c.bf16 %v7891_v19, %v7887_v4  ;;  %v10358_v30 = vpack.c.bf16 %v7893_v53, %v7889_v26  ;;  %v7930_v4 = vld [vmem:[#allocation13 + $0x718] sm:$0xff]  ;;  %v7927_v26 = vld [vmem:[#allocation13 + $0x700] sm:$0xff] }
 0xdca   : > { %v10232_v6 = vpack.c.bf16 %v7900_v17, %v7896_v23  ;;  %v7934_v19 = vld [vmem:[#allocation13 + $0x738] sm:$0xff]  ;;  %v7931_v53 = vld [vmem:[#allocation13 + $0x720] sm:$0xff]  ;;  %v7941_v8 = vld [vmem:[#allocation13 + $0x770] sm:$0xff] }
 0xdcb   : > { %v10376_v17 = vpack.c.bf16 %v7934_v19, %v7930_v4  ;;  %v7953_v50 = vld [vmem:[#allocation13 + $0x7d0] sm:$0xff]  ;;  %v8305_v19 = vld [vmem:[#allocation14 + $0x100] sm:$0xff] }
 0xdcc   : > { %10215 = vmatpush1.bf16.msra.mxu0 %v10214_v41  ;;  %10343 = vmatpush1.bf16.msra.mxu1 %v10342_v52  ;;  %v7904_v41 = vld [vmem:[#allocation13 + $0x648] sm:$0xff] }
 0xdcd   : > { %10217 = vmatprep.subr.bf16.mxu0 %v10216_v38  ;;  %10345 = vmatprep.subr.bf16.mxu1 %v10344_v28  ;;  %v7908_v52 = vld [vmem:[#allocation13 + $0x668] sm:$0xff]  ;;  %v10234_v38 = vpack.c.bf16 %v7899_v51, %v7895_v22  ;;  %v10362_v28 = vpack.c.bf16 %v7901_v14, %v7897_v3  ;;  %v7938_v22 = vld [vmem:[#allocation13 + $0x758] sm:$0xff]  ;;  %v7935_v3 = vld [vmem:[#allocation13 + $0x740] sm:$0xff] }
 0xdce   : > { %v10236_v40 = vpack.c.bf16 %v7908_v52, %v7904_v41  ;;  %v7942_v51 = vld [vmem:[#allocation13 + $0x778] sm:$0xff]  ;;  %v7939_v14 = vld [vmem:[#allocation13 + $0x760] sm:$0xff] }
 0xdcf   : > { %v10380_v52 = vpack.c.bf16 %v7942_v51, %v7938_v22  ;;  %v8307_v51 = vld [vmem:[#allocation14 + $0x110] sm:$0xff] }
 0xdd0   : > { %10219 = vmatpush1.bf16.msra.mxu0 %v10218_v49  ;;  %10347 = vmatpush1.bf16.msra.mxu1 %v10346_v47  ;;  %v7912_v49 = vld [vmem:[#allocation13 + $0x688] sm:$0xff] }
 0xdd1   : > { %10221 = vmatprep.subr.bf16.mxu0 %v10220_v20  ;;  %10349 = vmatprep.subr.bf16.mxu1 %v10348_v60  ;;  %v7916_v47 = vld [vmem:[#allocation13 + $0x6a8] sm:$0xff]  ;;  %v10238_v20 = vpack.c.bf16 %v7907_v16, %v7903_v0  ;;  %v10366_v60 = vpack.c.bf16 %v7909_v62, %v7905_v54  ;;  %v7946_v0 = vld [vmem:[#allocation13 + $0x798] sm:$0xff]  ;;  %v7943_v54 = vld [vmem:[#allocation13 + $0x780] sm:$0xff] }
 0xdd2   : > { %v10240_v45 = vpack.c.bf16 %v7916_v47, %v7912_v49  ;;  %v7950_v16 = vld [vmem:[#allocation13 + $0x7b8] sm:$0xff]  ;;  %v7947_v62 = vld [vmem:[#allocation13 + $0x7a0] sm:$0xff] }
 0xdd3   : > { %v10384_v47 = vpack.c.bf16 %v7950_v16, %v7946_v0  ;;  %v8309_v16 = vld [vmem:[#allocation14 + $0x120] sm:$0xff] }
 0xdd4   : > { %10223 = vmatpush1.bf16.msra.mxu0 %v10222_v24  ;;  %10351 = vmatpush1.bf16.msra.mxu1 %v10350_v15  ;;  %v7920_v24 = vld [vmem:[#allocation13 + $0x6c8] sm:$0xff] }
 0xdd5   : > { %10225 = vmatprep.subr.bf16.mxu0 %v10224_v57  ;;  %10353 = vmatprep.subr.bf16.mxu1 %v10352_v27  ;;  %v7924_v15 = vld [vmem:[#allocation13 + $0x6e8] sm:$0xff]  ;;  %v10242_v57 = vpack.c.bf16 %v7915_v2, %v7911_v21  ;;  %v10370_v27 = vpack.c.bf16 %v7917_v36, %v7913_v42  ;;  %v7954_v21 = vld [vmem:[#allocation13 + $0x7d8] sm:$0xff]  ;;  %v7951_v42 = vld [vmem:[#allocation13 + $0x7c0] sm:$0xff] }
 0xdd6   : > { %v10244_v63 = vpack.c.bf16 %v7924_v15, %v7920_v24  ;;  %v7958_v2 = vld [vmem:[#allocation13 + $0x7f8] sm:$0xff]  ;;  %v7955_v36 = vld [vmem:[#allocation13 + $0x7e0] sm:$0xff]  ;;  %v7406_v24 = vrot.slane %v13666_v9, %v13630_v34 }
 0xdd7   : > { %v10388_v37 = vpack.c.bf16 %v7958_v2, %v7954_v21  ;;  %v8311_v2 = vld [vmem:[#allocation14 + $0x130] sm:$0xff] }
 0xdd8   : > { %10227 = vmatpush1.bf16.msra.mxu0 %v10226_v5  ;;  %10355 = vmatpush1.bf16.msra.mxu1 %v10354_v7  ;;  %v7928_v5 = vld [vmem:[#allocation13 + $0x708] sm:$0xff] }
 0xdd9   : > { %10229 = vmatprep.subr.bf16.mxu0 %v10228_v56  ;;  %10357 = vmatprep.subr.bf16.mxu1 %v10356_v61  ;;  %v7932_v7 = vld [vmem:[#allocation13 + $0x728] sm:$0xff]  ;;  %v10246_v56 = vpack.c.bf16 %v7923_v1, %v7919_v46  ;;  %v10374_v61 = vpack.c.bf16 %v7925_v35, %v7921_v10  ;;  %v8321_v1 = vld [vmem:[#allocation14 + $0x180] sm:$0xff] }
 0xdda   : > { %v10248_v23 = vpack.c.bf16 %v7932_v7, %v7928_v5  ;;  %v8290_v46 = vld [vmem:[#allocation14 + $0x88] sm:$0xff]  ;;  %v8273_v35 = vld [vmem:[#allocation14] sm:$0xff]  ;;  %v10478_v7 = vadd.f32 %v13674_v48, %v7406_v24 }
 0xddb   : > { %v8274_v5 = vld [vmem:[#allocation14 + $0x8] sm:$0xff] }
 0xddc   : > { %10231 = vmatpush1.bf16.msra.mxu0 %v10230_v43  ;;  %10359 = vmatpush1.bf16.msra.mxu1 %v10358_v30  ;;  %v7936_v43 = vld [vmem:[#allocation13 + $0x748] sm:$0xff] }
 0xddd   : > { %10233 = vmatprep.subr.bf16.mxu0 %v10232_v6  ;;  %10361 = vmatprep.subr.bf16.mxu1 %v10360_v31  ;;  %v7940_v30 = vld [vmem:[#allocation13 + $0x768] sm:$0xff]  ;;  %v10250_v6 = vpack.c.bf16 %v7931_v53, %v7927_v26  ;;  %v10378_v31 = vpack.c.bf16 %v7933_v58, %v7929_v33  ;;  %v8292_v26 = vld [vmem:[#allocation14 + $0x98] sm:$0xff]  ;;  %v8323_v53 = vld [vmem:[#allocation14 + $0x190] sm:$0xff] }
 0xdde   : > { %v10252_v41 = vpack.c.bf16 %v7940_v30, %v7936_v43  ;;  %v8275_v58 = vld [vmem:[#allocation14 + $0x10] sm:$0xff]  ;;  %v8276_v43 = vld [vmem:[#allocation14 + $0x18] sm:$0xff]  ;;  %v7701_v30 = vmax.f32 %v10478_v7, 0.0  ;;  %v8330_v24 = vld [vmem:[#allocation14 + $0x1c8] sm:$0xff] }
 0xddf   : > { %v8331_v7 = vld [vmem:[#allocation14 + $0x1d0] sm:$0xff] }
 0xde0   : > { %10235 = vmatpush1.bf16.msra.mxu0 %v10234_v38  ;;  %10363 = vmatpush1.bf16.msra.mxu1 %v10362_v28  ;;  %v7944_v38 = vld [vmem:[#allocation13 + $0x788] sm:$0xff] }
 0xde1   : > { %10237 = vmatprep.subr.bf16.mxu0 %v10236_v40  ;;  %10365 = vmatprep.subr.bf16.mxu1 %v10364_v59  ;;  %v7948_v28 = vld [vmem:[#allocation13 + $0x7a8] sm:$0xff]  ;;  %v10254_v40 = vpack.c.bf16 %v7939_v14, %v7935_v3  ;;  %v10382_v59 = vpack.c.bf16 %v7941_v8, %v7937_v29  ;;  %v8325_v14 = vld [vmem:[#allocation14 + $0x1a0] sm:$0xff] }
 0xde2   : > { %v10256_v49 = vpack.c.bf16 %v7948_v28, %v7944_v38  ;;  %v8294_v3 = vld [vmem:[#allocation14 + $0xa8] sm:$0xff]  ;;  %v8277_v8 = vld [vmem:[#allocation14 + $0x20] sm:$0xff] }
 0xde3   : > { %v8278_v38 = vld [vmem:[#allocation14 + $0x28] sm:$0xff] }
 0xde4   : > { %10239 = vmatpush1.bf16.msra.mxu0 %v10238_v20  ;;  %10367 = vmatpush1.bf16.msra.mxu1 %v10366_v60  ;;  %v7952_v20 = vld [vmem:[#allocation13 + $0x7c8] sm:$0xff] }
 0xde5   : > { %10241 = vmatprep.subr.bf16.mxu0 %v10240_v45  ;;  %10369 = vmatprep.subr.bf16.mxu1 %v10368_v13  ;;  %v7956_v60 = vld [vmem:[#allocation13 + $0x7e8] sm:$0xff]  ;;  %v10258_v45 = vpack.c.bf16 %v7947_v62, %v7943_v54  ;;  %v10386_v13 = vpack.c.bf16 %v7949_v44, %v7945_v32  ;;  %v8296_v54 = vld [vmem:[#allocation14 + $0xb8] sm:$0xff]  ;;  %v8327_v62 = vld [vmem:[#allocation14 + $0x1b0] sm:$0xff] }
 0xde6   : > { %v10260_v15 = vpack.c.bf16 %v7956_v60, %v7952_v20  ;;  %v8279_v44 = vld [vmem:[#allocation14 + $0x30] sm:$0xff]  ;;  %v8280_v20 = vld [vmem:[#allocation14 + $0x38] sm:$0xff] }
 0xde8   : > { %10243 = vmatpush1.bf16.msra.mxu0 %v10242_v57  ;;  %10371 = vmatpush1.bf16.msra.mxu1 %v10370_v27  ;;  %v7957_v57 = vld [vmem:[#allocation13 + $0x7f0] sm:$0xff]  ;;  %v8289_v27 = vld [vmem:[#allocation14 + $0x80] sm:$0xff] }
 0xde9   : > { %10245 = vmatprep.subr.bf16.mxu0 %v10244_v63  ;;  %10373 = vmatprep.subr.bf16.mxu1 %v10372_v18  ;;  %v8322_v63 = vld [vmem:[#allocation14 + $0x188] sm:$0xff]  ;;  %v10262_v18 = vpack.c.bf16 %v7955_v36, %v7951_v42  ;;  %v10390_v10 = vpack.c.bf16 %v7957_v57, %v7953_v50  ;;  %v10392_v9 = vpack.c.bf16 %v8290_v46, %v8289_v27  ;;  %v8329_v36 = vld [vmem:[#allocation14 + $0x1c0] sm:$0xff] }
 0xdea   : > { %v10424_v4 = vpack.c.bf16 %v8322_v63, %v8321_v1  ;;  %v8298_v42 = vld [vmem:[#allocation14 + $0xc8] sm:$0xff]  ;;  %v10440_v57 = vpack.c.bf16 %v8330_v24, %v8329_v36  ;;  %v8281_v27 = vld [vmem:[#allocation14 + $0x40] sm:$0xff] }
 0xdeb   : > { %v8282_v46 = vld [vmem:[#allocation14 + $0x48] sm:$0xff]  ;;  %v8313_v1 = vld [vmem:[#allocation14 + $0x140] sm:$0xff] }
 0xdec   : > { %10247 = vmatpush1.bf16.msra.mxu0 %v10246_v56  ;;  %10375 = vmatpush1.bf16.msra.mxu1 %v10374_v61  ;;  %v8306_v56 = vld [vmem:[#allocation14 + $0x108] sm:$0xff]  ;;  %v8291_v61 = vld [vmem:[#allocation14 + $0x90] sm:$0xff]  ;;  %v10410_v63 = vpack.c.bf16 %v8282_v46, %v8281_v27 }
 0xded   : > { %10249 = vmatprep.subr.bf16.mxu0 %v10248_v23  ;;  %10377 = vmatprep.subr.bf16.mxu1 %v10376_v17  ;;  %v8324_v23 = vld [vmem:[#allocation14 + $0x198] sm:$0xff]  ;;  %v10394_v17 = vpack.c.bf16 %v8274_v5, %v8273_v35  ;;  %v10426_v33 = vpack.c.bf16 %v8306_v56, %v8305_v19  ;;  %v10396_v48 = vpack.c.bf16 %v8292_v26, %v8291_v61  ;;  %v8299_v35 = vld [vmem:[#allocation14 + $0xd0] sm:$0xff] }
 0xdee   : > { %v10428_v22 = vpack.c.bf16 %v8324_v23, %v8323_v53  ;;  %v8300_v5 = vld [vmem:[#allocation14 + $0xd8] sm:$0xff]  ;;  %v8283_v19 = vld [vmem:[#allocation14 + $0x50] sm:$0xff] }
 0xdef   : > { %v8284_v56 = vld [vmem:[#allocation14 + $0x58] sm:$0xff]  ;;  %v8315_v53 = vld [vmem:[#allocation14 + $0x150] sm:$0xff] }
 0xdf0   : > { %10251 = vmatpush1.bf16.msra.mxu0 %v10250_v6  ;;  %10379 = vmatpush1.bf16.msra.mxu1 %v10378_v31  ;;  %v8308_v6 = vld [vmem:[#allocation14 + $0x118] sm:$0xff]  ;;  %v8293_v31 = vld [vmem:[#allocation14 + $0xa0] sm:$0xff]  ;;  %v10414_v26 = vpack.c.bf16 %v8284_v56, %v8283_v19 }
 0xdf1   : > { %10253 = vmatprep.subr.bf16.mxu0 %v10252_v41  ;;  %10381 = vmatprep.subr.bf16.mxu1 %v10380_v52  ;;  %v8326_v41 = vld [vmem:[#allocation14 + $0x1a8] sm:$0xff]  ;;  %v10398_v52 = vpack.c.bf16 %v8276_v43, %v8275_v58  ;;  %v10430_v29 = vpack.c.bf16 %v8308_v6, %v8307_v51  ;;  %v10400_v28 = vpack.c.bf16 %v8294_v3, %v8293_v31  ;;  %v8316_v23 = vld [vmem:[#allocation14 + $0x158] sm:$0xff]  ;;  %v8333_v43 = vld [vmem:[#allocation14 + $0x1e0] sm:$0xff] }
 0xdf2   : > { %v10432_v0 = vpack.c.bf16 %v8326_v41, %v8325_v14  ;;  %v8302_v58 = vld [vmem:[#allocation14 + $0xe8] sm:$0xff]  ;;  %v8317_v3 = vld [vmem:[#allocation14 + $0x160] sm:$0xff] }
 0xdf3   : > { %v8286_v51 = vld [vmem:[#allocation14 + $0x68] sm:$0xff] }
 0xdf4   : > { %10255 = vmatpush1.bf16.msra.mxu0 %v10254_v40  ;;  %10383 = vmatpush1.bf16.msra.mxu1 %v10382_v59  ;;  %v8310_v40 = vld [vmem:[#allocation14 + $0x128] sm:$0xff]  ;;  %v8295_v59 = vld [vmem:[#allocation14 + $0xb0] sm:$0xff] }
 0xdf5   : > { %10257 = vmatprep.subr.bf16.mxu0 %v10256_v49  ;;  %10385 = vmatprep.subr.bf16.mxu1 %v10384_v47  ;;  %v8328_v49 = vld [vmem:[#allocation14 + $0x1b8] sm:$0xff]  ;;  %v10402_v47 = vpack.c.bf16 %v8278_v38, %v8277_v8  ;;  %v10434_v32 = vpack.c.bf16 %v8310_v40, %v8309_v16  ;;  %v10404_v60 = vpack.c.bf16 %v8296_v54, %v8295_v59  ;;  %v8318_v14 = vld [vmem:[#allocation14 + $0x168] sm:$0xff]  ;;  %v8335_v8 = vld [vmem:[#allocation14 + $0x1f0] sm:$0xff] }
 0xdf6   : > { %v10436_v21 = vpack.c.bf16 %v8328_v49, %v8327_v62  ;;  %v10450_v41 = vpack.c.bf16 %v8318_v14, %v8317_v3  ;;  %v8288_v16 = vld [vmem:[#allocation14 + $0x78] sm:$0xff]  ;;  %v8319_v54 = vld [vmem:[#allocation14 + $0x170] sm:$0xff] }
 0xdf7   : > { %v8320_v62 = vld [vmem:[#allocation14 + $0x178] sm:$0xff] }
 0xdf8   : > { %10259 = vmatpush1.bf16.msra.mxu0 %v10258_v45  ;;  %10387 = vmatpush1.bf16.msra.mxu1 %v10386_v13  ;;  %v8312_v45 = vld [vmem:[#allocation14 + $0x138] sm:$0xff]  ;;  %v8297_v13 = vld [vmem:[#allocation14 + $0xc0] sm:$0xff]  ;;  %v10454_v49 = vpack.c.bf16 %v8320_v62, %v8319_v54 }
 0xdf9   : > { %10261 = vmatprep.subr.bf16.mxu0 %v10260_v15  ;;  %10389 = vmatprep.subr.bf16.mxu1 %v10388_v37  ;;  %v10406_v15 = vpack.c.bf16 %v8280_v20, %v8279_v44  ;;  %v10438_v37 = vpack.c.bf16 %v8312_v45, %v8311_v2  ;;  %v10408_v50 = vpack.c.bf16 %v8298_v42, %v8297_v13 }
 0xdfc   : > { %10263 = vmatpush1.bf16.msra.mxu0 %v10262_v18  ;;  %10391 = vmatpush1.bf16.msra.mxu1 %v10390_v10  ;;  %v8314_v18 = vld [vmem:[#allocation14 + $0x148] sm:$0xff] }
 0xdfd   : > { %10393 = vmatprep.subr.bf16.mxu0 %v10392_v9  ;;  %10425 = vmatprep.subr.bf16.mxu1 %v10424_v4  ;;  %v10442_v10 = vpack.c.bf16 %v8314_v18, %v8313_v1  ;;  %v10412_v9 = vpack.c.bf16 %v8300_v5, %v8299_v35  ;;  %v8332_v4 = vld [vmem:[#allocation14 + $0x1d8] sm:$0xff] }
 0xdfe   : > { %v10444_v61 = vpack.c.bf16 %v8332_v4, %v8331_v7 }
 0xdff   : > { %8095 = vmatmul.mubr.f32.vlgmr.msra.gmra.mrb[26].mxu0 %v7701_v30  ;;  %8237 = vmatmul.mubr.f32.vlgmr.msra.gmra.mrb[26].mxu1 %v7701_v30 }
 0xe00   : > { %10395 = vmatpush3.bf16.msra.mxu0 %v10394_v17  ;;  %10427 = vmatpush3.bf16.msra.mxu1 %v10426_v33  ;;  %v10446_v17 = vpack.c.bf16 %v8316_v23, %v8315_v53  ;;  %v8301_v33 = vld [vmem:[#allocation14 + $0xe0] sm:$0xff] }
 0xe01   : > { %10397 = vmatprep.subr.bf16.mxu0 %v10396_v48  ;;  %10429 = vmatprep.subr.bf16.mxu1 %v10428_v22  ;;  %v10416_v30 = vpack.c.bf16 %v8302_v58, %v8301_v33  ;;  %v8334_v48 = vld [vmem:[#allocation14 + $0x1e8] sm:$0xff]  ;;  %v8285_v22 = vld [vmem:[#allocation14 + $0x60] sm:$0xff] }
 0xe02   : > { %v10448_v6 = vpack.c.bf16 %v8334_v48, %v8333_v43  ;;  %v10418_v31 = vpack.c.bf16 %v8286_v51, %v8285_v22 }
 0xe04   : > { %10399 = vmatpush3.bf16.msra.mxu0 %v10398_v52  ;;  %10431 = vmatpush3.bf16.msra.mxu1 %v10430_v29  ;;  %v8303_v52 = vld [vmem:[#allocation14 + $0xf0] sm:$0xff]  ;;  %v8304_v29 = vld [vmem:[#allocation14 + $0xf8] sm:$0xff] }
 0xe05   : > { %10401 = vmatprep.subr.bf16.mxu0 %v10400_v28  ;;  %10433 = vmatprep.subr.bf16.mxu1 %v10432_v0  ;;  %v10420_v38 = vpack.c.bf16 %v8304_v29, %v8303_v52  ;;  %v8336_v28 = vld [vmem:[#allocation14 + $0x1f8] sm:$0xff]  ;;  %v8287_v0 = vld [vmem:[#allocation14 + $0x70] sm:$0xff] }
 0xe06   : > { %v10452_v40 = vpack.c.bf16 %v8336_v28, %v8335_v8  ;;  %v10422_v59 = vpack.c.bf16 %v8288_v16, %v8287_v0 }
 0xe08   : > { %10403 = vmatpush3.bf16.msra.mxu0 %v10402_v47  ;;  %10435 = vmatpush3.bf16.msra.mxu1 %v10434_v32 }
 0xe09   : > { %10405 = vmatprep.subr.bf16.mxu0 %v10404_v60  ;;  %10437 = vmatprep.subr.bf16.mxu1 %v10436_v21 }
 0xe0c   : > { %10407 = vmatpush3.bf16.msra.mxu0 %v10406_v15  ;;  %10439 = vmatpush3.bf16.msra.mxu1 %v10438_v37 }
 0xe0d   : > { %10409 = vmatprep.subr.bf16.mxu0 %v10408_v50  ;;  %10441 = vmatprep.subr.bf16.mxu1 %v10440_v57 }
 0xe10   : > { %10411 = vmatpush3.bf16.msra.mxu0 %v10410_v63  ;;  %10443 = vmatpush3.bf16.msra.mxu1 %v10442_v10 }
 0xe11   : > { %10413 = vmatprep.subr.bf16.mxu0 %v10412_v9  ;;  %10445 = vmatprep.subr.bf16.mxu1 %v10444_v61 }
 0xe14   : > { %10415 = vmatpush3.bf16.msra.mxu0 %v10414_v26  ;;  %10447 = vmatpush3.bf16.msra.mxu1 %v10446_v17 }
 0xe15   : > { %10417 = vmatprep.subr.bf16.mxu0 %v10416_v30  ;;  %10449 = vmatprep.subr.bf16.mxu1 %v10448_v6 }
 0xe18   : > { %10419 = vmatpush3.bf16.msra.mxu0 %v10418_v31  ;;  %10451 = vmatpush3.bf16.msra.mxu1 %v10450_v41 }
 0xe19   : > { %10421 = vmatprep.subr.bf16.mxu0 %v10420_v38  ;;  %10453 = vmatprep.subr.bf16.mxu1 %v10452_v40 }
 0xe1c   : > { %10423 = vmatpush3.bf16.msra.mxu0 %v10422_v59  ;;  %10455 = vmatpush3.bf16.msra.mxu1 %v10454_v49 }
 0xed2   : > { %v8096_v47 = vpop.f32.mrb[26].mxu0  ;;  %v8238_v32 = vpop.f32.mrb[26].mxu1 }
 0xed3   : > { %v8098_v44 = vpop.f32.mrb[27].mxu0  ;;  %v8240_v20 = vpop.f32.mrb[27].mxu1 }
 0xed4   : > { %v8247_v60 = vcombine.low %v8096_v47, %v8098_v44  ;;  %v8248_v21 = vcombine.low %v8238_v32, %v8240_v20 }
 0xed6   : > { %v8255_v2 = vrot.slane %v8247_v60, %v13591_v55  ;;  %v8262_v45 = vrot.slane %v8248_v21, %v13591_v55 }
 0xed8   : > { %v8263_v13 = vcombine.low %v8255_v2, %v8262_v45 }
 0xeda   : > { %v8270_v42 = vrot.slane %v8263_v13, %v13591_v55  ;;  %v8337_v55 = vld [vmem:[%s14275_s30] sm:$0x1] }
 0xedc   : > { %v8272_v36 = vsub.f32 %v13653_v25, %v8270_v42 }
 0xede   : > { %v8346_v24 = vrot.slane %v8272_v36, %v13613_v11  ;;  %v8354_v15 = vrot.slane %v8272_v36, %v13621_v12  ;;  %v8342_v37 = vrot.slane %v8272_v36, %v13616_v39  ;;  %v8350_v50 = vrot.slane %v8272_v36, %v13630_v34 }
 0xee0   : > { %8423 = vmatprep.mubr.f32.mxu0 %v8346_v24  ;;  %8493 = vmatprep.mubr.f32.mxu1 %v8354_v15 }
 0xee1   : > { %8424 = vmatmul.mubr.f32.vlgmr.msra.gmra.mrb[28].mxu0 %v8342_v37  ;;  %8494 = vmatmul.mubr.f32.vlgmr.msra.gmra.mrb[28].mxu1 %v8350_v50 }
 0xfb4   : > { %v8970_v57 = vpop.f32.mrb[28].mxu0  ;;  %v9005_v27 = vpop.f32.mrb[28].mxu1 }
 0xfb5   : > { %v8971_v11 = vpop.f32.mrb[29].mxu0  ;;  %v9006_v25 = vpop.f32.mrb[29].mxu1 }
 0xfb6   : > { %v8972_v46 = vadd.f32 %v8971_v11, %v8970_v57  ;;  %v9007_v12 = vadd.f32 %v9006_v25, %v9005_v27 }
 0xfb8   : > { %v8426_v39 = vadd.f32 %v8972_v46, %v8337_v55 }
 0xfba   : > { %v8496_v34 = vadd.f32 %v9007_v12, %v8426_v39 }
 0xfbc   : > { %8499 = vst [vmem:[%s601_s8] sm:$0x1] %v8496_v34 }
 0xfbd   : > { %11266 = shalt.err (!%p11263_p2)
}
 0xfbe   : > { %s11267_s29 = scalar_lea.hbm %s13695_s24, 16  ;;  %s11271_s0 = scalar_lea.hbm %s14278_s28, 32 }
 0xfbf   : > { %p11268_p3 = scmp.ne.s32.totalorder %s13695_s24, %s11267_s29  ;;  %p11272_p7 = scmp.lt.u32.totalorder %s13695_s24, %s14278_s28 }
 0xfc0   : > { %p11273_p8 = scmp.lt.u32.totalorder %s11271_s0, %s11267_s29  ;;  %p11275_p13 = scmp.lt.u32.totalorder %s11267_s29, %s13695_s24 }
 0xfc1   : > { %p11269_p4 = pnand %p11268_p3, %p14279_p1 }
 0xfc2   : > { %p11274_p11 = por %p11273_p8, %p11272_p7 }
 0xfc3   : > { %p11270_p12 = pneg %p11269_p4 }
 0xfc4   : > { %p11276_p6 = por %p11275_p13, %p11274_p11 }
 0xfc6   : > { %p11277_p9 = pnand %p11276_p6, %p11270_p12 }
 0xfc8   : > { %11280 = shalt.err (!%p11277_p9)
}
 0xfc9   : > { %10584 = dma.vmem_to_hbm [thread:$0]  (%p14279_p1), %s13697_s11, 16, %s13695_s24, %s8501_s27  }
 0xfca PF: > { %s14280_s20 = sld [smem:[#allocation25_spill]]  ;;  %s14281_s8 = sld [smem:[#allocation22_spill]] }
 0xfcb   : > { %s14282_s15 = sld [smem:[#allocation29_spill]] }
 0xfd0   : > { %p10621_p5 = scmp.ge.s32.totalorder %s14280_s20, 2  ;;  %s8525_s22 = sand.u32 1, %s14281_s8  }
 0xfd1   : > { %p14283_p0 = scmp.ne.s32.totalorder %s14282_s15, 0  ;;  %s8526_s23 = scalar_lea.sflag [#allocation7], %s8525_s22 }
 0xfd3   : > { %p10606_p10 = pnand %p10621_p5, %p14283_p0 }
 0xfd5   : > { %11314 = dma.done.wait (!%p10606_p10), %s8526_s23, 16  }
 0xfd6   : > { %11316 = vsyncadd (!%p10606_p10), %s8526_s23, 4294967280  ;;  %s14284_s24 = sld [smem:[#allocation26_spill]]  ;;  %s14285_s21 = sld [smem:[#allocation23_spill]] }
 0xfd7   : > { %s14286_s22 = sld [smem:[#allocation24_spill]]  ;;  %s14287_s23 = sld [smem:[#allocation27_spill]] }
 0xfdc   : > { %p30_p2 = scmp.ge.s32.totalorder %s14284_s24, 4  }
 0xfde   :  { %32 = sbr.rel (!%p30_p2) target bundleno = 14 (0xe), region = 152 }
 0xfe5   :  { %8530 = vsyncpa [#allocation6], 1 }
 0xfe6   :  { %8532 = vsyncpa [#allocation6 + $0x1], 1 }
 0xfe7   :  { %8533 = vsyncpa [#allocation9], 1 }
 0xfe8   :  { %8534 = vsyncpa [#allocation12], 1 }
 0xfe9   :  { %8535 = vsyncpa [#allocation15], 1 }
 0xfea   :  { %8536 = vsyncpa [#allocation7], 1 }
 0xfeb   :  { %8538 = vsyncpa [#allocation7 + $0x1], 1 }

</bundles_post_ra>
